<compile_context>
chip_gen: v7x
topology: tpu7x:2x2x1
jax: 0.10.0
libtpu: 0.0.40
codegen_flags: <defaults>
</compile_context>

<pallas_src>
import numpy as np
import jax
import jax.numpy as jnp
from jax.experimental import pallas as pl
from jax.experimental.pallas import tpu as pltpu

CFG = dict(n_layers=2, n_steps=8, n_features=4, d_model=32, d_ffn=32,
           n_heads=2, d_k=16, d_v=16)
EPS = 1e-5      # torch.nn.LayerNorm default eps (review feedback)
PACK_W = 128    # lane-dense packed output width (>= 4*F + 2*H*L = 48)


# ----------------------------- parameter construction -----------------------------

def sinusoid_table(n_pos, d):
    pos = np.arange(n_pos, dtype=np.float64)[:, None]
    j = np.arange(d, dtype=np.float64)[None, :]
    angle = pos / np.power(10000.0, 2.0 * (j // 2) / d)
    tab = np.zeros((n_pos, d), dtype=np.float64)
    tab[:, 0::2] = np.sin(angle[:, 0::2])
    tab[:, 1::2] = np.cos(angle[:, 1::2])
    return jnp.asarray(tab, jnp.float32)


def init_params(key, cfg):
    """Flat, insertion-ordered dict: name -> 2-D f32 array."""
    F = cfg['n_features']; L = cfg['n_steps']; D = cfg['d_model']
    H = cfg['n_heads']; dk = cfg['d_k']; dv = cfg['d_v']; dffn = cfg['d_ffn']
    kit = iter(jax.random.split(key, 256))
    p = {}

    def uni(shape, fan_in):
        s = 1.0 / np.sqrt(fan_in)
        return jax.random.uniform(next(kit), shape, jnp.float32, -s, s)

    for bi in (1, 2):
        for li in range(cfg['n_layers']):
            pre = f'b{bi}_l{li}_'
            p[pre + 'wq'] = uni((D, H * dk), D)
            p[pre + 'wk'] = uni((D, H * dk), D)
            p[pre + 'wv'] = uni((D, H * dv), D)
            p[pre + 'fc'] = uni((H * dv, D), H * dv)
            p[pre + 'ln1_g'] = jnp.ones((1, D), jnp.float32)
            p[pre + 'ln1_b'] = jnp.zeros((1, D), jnp.float32)
            p[pre + 'ff1_w'] = uni((D, dffn), D)
            p[pre + 'ff1_b'] = uni((1, dffn), D)
            p[pre + 'ff2_w'] = uni((dffn, D), dffn)
            p[pre + 'ff2_b'] = uni((1, D), dffn)
            p[pre + 'ln2_g'] = jnp.ones((1, D), jnp.float32)
            p[pre + 'ln2_b'] = jnp.zeros((1, D), jnp.float32)

    for name in ('emb1', 'emb2'):            # nn.Linear(2F, D) on cat([x_or_xprime, mask])
        p[name + '_wa'] = uni((F, D), 2 * F)
        p[name + '_wb'] = uni((F, D), 2 * F)
        p[name + '_b'] = uni((1, D), 2 * F)
    p['red_z_w'] = uni((D, F), D);     p['red_z_b'] = uni((1, F), D)
    p['red_beta_w'] = uni((D, F), D);  p['red_beta_b'] = uni((1, F), D)
    p['red_gamma_w'] = uni((F, F), F); p['red_gamma_b'] = uni((1, F), F)
    p['wcomb_wa'] = uni((F, F), F + L)   # weight_combine: Linear(F + L, F) -> mask part
    p['wcomb_wb'] = uni((L, F), F + L)   #                                  -> attention part
    p['wcomb_b'] = uni((1, F), F + L)
    p['pos'] = sinusoid_table(L, D)      # PositionalEncoding table (L, D)
    return p


def build_param_slab(params, tb):
    """Pack every parameter into one (R, 32) f32 slab, each entry 8-row aligned, so the
    kernel receives a single parameter input (one DMA) and slices it with static offsets.
    The positional table is pre-tiled to the (tb*L, D) batch-block layout."""
    ncols = max(int(np.asarray(v).shape[-1]) for v in params.values())
    entries, blocks, off = {}, [], 0
    for name, val in params.items():
        arr = np.asarray(val, np.float32)
        if name == 'pos':
            arr = np.tile(arr, (tb, 1))
        r, c = arr.shape
        pr = ((r + 7) // 8) * 8
        blk = np.zeros((pr, ncols), np.float32)
        blk[:r, :c] = arr
        entries[name] = (off, r, c)
        blocks.append(blk)
        off += pr
    return jnp.asarray(np.concatenate(blocks, axis=0)), entries


# ----------------------------- shared forward math -----------------------------
# Used both inside the Pallas kernel (slab getter, approx reciprocal) and by the pure-JAX
# reference (dict getter, exact softmax/sigmoid) so the semantics match by construction.

def _mm(a, b):
    # bf16 operands, f32 accumulation -> native MXU rate on every TPU generation.
    return jnp.dot(a.astype(jnp.bfloat16), b.astype(jnp.bfloat16),
                   preferred_element_type=jnp.float32)


def _mm_nt(a, b):
    # a @ b.T (contract last dims) in f32 — used only for the tiny (L, L) score matmuls.
    return jax.lax.dot_general(a, b, (((1,), (1,)), ((), ())),
                               preferred_element_type=jnp.float32)


def _layer_norm(x, g, b):
    mu = jnp.mean(x, axis=-1, keepdims=True)
    var = jnp.mean((x - mu) ** 2, axis=-1, keepdims=True)
    return (x - mu) * jax.lax.rsqrt(var + EPS) * g + b


def _encoder_layer_block(h, g, pre, cfg, nb, approx):
    """Post-norm transformer encoder layer on a batch block.  h: (nb*L, D) with nb samples
    folded into the sublane dim.  Attention runs per (sample, head) on tiny (L, L) tiles;
    QKV / fc / FFN / LayerNorm run fused over the whole block."""
    L = cfg['n_steps']; H = cfg['n_heads']; dk = cfg['d_k']; dv = cfg['d_v']
    inv_temp = 1.0 / float(np.sqrt(dk))  # ScaledDotProductAttention temperature = d_k ** 0.5

    q = _mm(h, g(pre + 'wq'))            # (nb*L, H*dk)
    k = _mm(h, g(pre + 'wk'))
    v = _mm(h, g(pre + 'wv'))

    attn = [[None] * nb for _ in range(H)]   # attn[hi][b]: (L, L)
    hout = [[None] * nb for _ in range(H)]   # hout[hi][b]: (L, dv)
    for b in range(nb):
        qs = q[b * L:(b + 1) * L, :]
        ks = k[b * L:(b + 1) * L, :]
        vs = v[b * L:(b + 1) * L, :]
        for hi in range(H):
            qh = qs[:, hi * dk:(hi + 1) * dk] * inv_temp
            kh = ks[:, hi * dk:(hi + 1) * dk]
            vh = vs[:, hi * dv:(hi + 1) * dv]
            s = _mm_nt(qh, kh)                                  # (L, L)
            s = s - jnp.max(s, axis=-1, keepdims=True)
            e = jnp.exp(s)
            den = jnp.sum(e, axis=-1, keepdims=True)
            inv = pl.reciprocal(den, approx=True) if approx else 1.0 / den
            a = e * inv                                         # softmax
            attn[hi][b] = a
            hout[hi][b] = _mm(a, vh)                            # (L, dv)

    # concat-of-heads @ fc  ==  sum_h head_h @ fc[h*dv:(h+1)*dv, :]; fused across the block.
    fc = g(pre + 'fc')
    mha = _mm(jnp.concatenate(hout[0], axis=0), fc[:dv, :])
    for hi in range(1, H):
        mha = mha + _mm(jnp.concatenate(hout[hi], axis=0), fc[hi * dv:(hi + 1) * dv, :])

    h1 = _layer_norm(mha + h, g(pre + 'ln1_g'), g(pre + 'ln1_b'))     # attn + residual + LN
    f = jnp.maximum(_mm(h1, g(pre + 'ff1_w')) + g(pre + 'ff1_b'), 0.0)
    f = _mm(f, g(pre + 'ff2_w')) + g(pre + 'ff2_b')
    h2 = _layer_norm(f + h1, g(pre + 'ln2_g'), g(pre + 'ln2_b'))      # FFN + residual + LN

    attn_all = [jnp.concatenate(attn[hi], axis=0) for hi in range(H)]  # H x (nb*L, L)
    return h2, attn_all


def _saits_forward_block(x, m, g, cfg, nb, approx):
    """x, m: (nb*L, F).  Returns xt1/xt2/xt3/comb as (nb*L, F) and the per-head attention
    maps of the last layer of each block as lists of H (nb*L, L) arrays."""
    H = cfg['n_heads']; nl = cfg['n_layers']
    pos = g('pos')                                              # (nb*L, D)

    # ---- first DMSA block ----
    h = _mm(x, g('emb1_wa')) + _mm(m, g('emb1_wb')) + g('emb1_b') + pos
    a1 = None
    for li in range(nl):
        h, a1 = _encoder_layer_block(h, g, f'b1_l{li}_', cfg, nb, approx)
    xt1 = _mm(h, g('red_z_w')) + g('red_z_b')                   # (nb*L, F)

    # ---- second DMSA block ----
    xp = m * x + (1.0 - m) * xt1
    h = _mm(xp, g('emb2_wa')) + _mm(m, g('emb2_wb')) + g('emb2_b') + pos
    a2 = None
    for li in range(nl):
        h, a2 = _encoder_layer_block(h, g, f'b2_l{li}_', cfg, nb, approx)
    beta = jnp.maximum(_mm(h, g('red_beta_w')) + g('red_beta_b'), 0.0)
    xt2 = _mm(beta, g('red_gamma_w')) + g('red_gamma_b')        # (nb*L, F)

    # ---- attention-weight combining ----
    # torch's transpose(1,3) -> mean(dim=3) -> transpose(1,2) of (B,H,L,L) reduces to a plain
    # head-mean of the (L, L) attention (the two transposes cancel on the L axes).
    cw = a2[0]
    for hi in range(1, H):
        cw = cw + a2[hi]
    cw = cw * (1.0 / H)                                         # (nb*L, L)
    z = _mm(m, g('wcomb_wa')) + _mm(cw, g('wcomb_wb')) + g('wcomb_b')
    if approx:
        comb = pl.reciprocal(1.0 + jnp.exp(-z), approx=True)    # sigmoid via EUP reciprocal
    else:
        comb = jax.nn.sigmoid(z)
    xt3 = (1.0 - comb) * xt2 + comb * xt1
    return xt1, xt2, xt3, comb, a1, a2


# ----------------------------- Pallas kernel + wrapper -----------------------------

def _make_kernel(cfg, nb, entries):
    L = cfg['n_steps']; F = cfg['n_features']; H = cfg['n_heads']
    used = 4 * F + 2 * H * L   # 48 packed lanes; rest is padding to 128

    def kernel(x_ref, m_ref, slab_ref, out_ref):
        def g(name):
            off, r, c = entries[name]
            return slab_ref[off:off + r, 0:c]        # static slices of the parameter slab

        x = x_ref[...]                               # (nb*L, F)
        m = m_ref[...]
        xt1, xt2, xt3, comb, a1, a2 = _saits_forward_block(x, m, g, cfg, nb, approx=True)

        # Single lane-dense (nb*L, 128) output block -> one dense writeback DMA per step.
        out_ref[:, 0 * F:1 * F] = xt1
        out_ref[:, 1 * F:2 * F] = xt2
        out_ref[:, 2 * F:3 * F] = xt3
        out_ref[:, 3 * F:4 * F] = comb
        for hi in range(H):
            out_ref[:, 4 * F + hi * L:4 * F + (hi + 1) * L] = a1[hi]
            out_ref[:, 4 * F + H * L + hi * L:4 * F + H * L + (hi + 1) * L] = a2[hi]
        out_ref[:, used:PACK_W] = jnp.zeros((nb * L, PACK_W - used), jnp.float32)

    return kernel


def backbone_saits_pallas(X, M, params, cfg, tb=4):
    B, L, F = X.shape
    H = cfg['n_heads']
    assert B % tb == 0, (B, tb)
    nblk = B // tb
    slab, entries = build_param_slab(params, tb)
    kernel = _make_kernel(cfg, tb, entries)

    # Fold batch into the sublane dim (free XLA reshape): the kernel sees 2-D (tb*L, F) blocks.
    X2 = X.reshape(B * L, F).astype(jnp.float32)
    M2 = M.reshape(B * L, F).astype(jnp.float32)

    packed = pl.pallas_call(
        kernel,
        out_shape=jax.ShapeDtypeStruct((B * L, PACK_W), jnp.float32),
        grid_spec=pltpu.PrefetchScalarGridSpec(
            num_scalar_prefetch=0,
            grid=(nblk,),
            in_specs=[pl.BlockSpec((tb * L, F), lambda i: (i, 0)),
                      pl.BlockSpec((tb * L, F), lambda i: (i, 0)),
                      pl.BlockSpec(slab.shape, lambda i: (0, 0))],
            out_specs=pl.BlockSpec((tb * L, PACK_W), lambda i: (i, 0)),
        ),
        compiler_params=pltpu.CompilerParams(dimension_semantics=("parallel",)),
    )(X2, M2, slab)

    # Unpack the lane-dense slab back to the module's output shapes (free in XLA).
    xt1 = packed[:, 0 * F:1 * F].reshape(B, L, F)
    xt2 = packed[:, 1 * F:2 * F].reshape(B, L, F)
    xt3 = packed[:, 2 * F:3 * F].reshape(B, L, F)
    comb = packed[:, 3 * F:4 * F].reshape(B, L, F)
    a1 = packed[:, 4 * F:4 * F + H * L].reshape(B, L, H, L).transpose(0, 2, 1, 3)
    a2 = packed[:, 4 * F + H * L:4 * F + 2 * H * L].reshape(B, L, H, L).transpose(0, 2, 1, 3)
    return xt1, xt2, xt3, a1, a2, comb


def backbone_saits_ref(X, M, params, cfg):
    """Pure-JAX reference (vmap over the batch, exact softmax / sigmoid)."""
    def g(name):
        return params[name]

    def one(x, m):
        xt1, xt2, xt3, comb, a1, a2 = _saits_forward_block(x, m, g, cfg, nb=1, approx=False)
        return xt1, xt2, xt3, jnp.stack(a1, axis=0), jnp.stack(a2, axis=0), comb

    return jax.vmap(one)(X, M)


# ----------------------------- main -----------------------------

if __name__ == "__main__":
    cfg = CFG
    B, TB = 8, 4
    L, F = cfg['n_steps'], cfg['n_features']
    key = jax.random.PRNGKey(0)
    kx, km, kp = jax.random.split(key, 3)
    X = jax.random.normal(kx, (B, L, F), jnp.float32)
    M = (jax.random.uniform(km, (B, L, F)) > 0.3).astype(jnp.float32)
    params = init_params(kp, cfg)

    # TODO(synk): attn_mask / diagonal-attention-mask path (masked_fill with -1e9) not
    # implemented; attn_mask is None here (the module's default).
    outs = jax.block_until_ready(backbone_saits_pallas(X, M, params, cfg, tb=TB))
    refs = jax.block_until_ready(backbone_saits_ref(X, M, params, cfg))

    for o, r in zip(outs, refs):
        assert o.shape == r.shape, (o.shape, r.shape)
        np.testing.assert_allclose(np.asarray(o), np.asarray(r), atol=2e-2, rtol=2e-2)

    print("KERNEL_OK")
</pallas_src>

<mosaic_0001>
module attributes {stable_mosaic.version = 11 : i64} {
  func.func @kernel(%arg0: i32, %arg1: memref<32x4xf32, #tpu.memory_space<vmem>>, %arg2: memref<32x4xf32, #tpu.memory_space<vmem>>, %arg3: memref<1160x32xf32, #tpu.memory_space<vmem>>, %arg4: memref<32x128xf32, #tpu.memory_space<vmem>>) attributes {dimension_semantics = [#tpu.dimension_semantics<parallel>], iteration_bounds = array<i64: 2>, scalar_prefetch = 0 : i64, scratch_operands = 0 : i64, tpu.core_type = #tpu.core_type<tc>, window_params = [{transform_indices = @transform_0, window_bounds = array<i64: 32, 4>}, {transform_indices = @transform_1, window_bounds = array<i64: 32, 4>}, {pipeline_mode = #tpu.pipeline_mode<synchronous>, transform_indices = @transform_2, window_bounds = array<i64: 1160, 32>}, {transform_indices = @transform_3, window_bounds = array<i64: 32, 128>}]} {
    %c0 = arith.constant 0 : index
    %c0_0 = arith.constant 0 : index
    %0 = vector.load %arg1[%c0, %c0_0] : memref<32x4xf32, #tpu.memory_space<vmem>>, vector<32x4xf32>
    %c0_1 = arith.constant 0 : index
    %c0_2 = arith.constant 0 : index
    %1 = vector.load %arg2[%c0_1, %c0_2] : memref<32x4xf32, #tpu.memory_space<vmem>>, vector<32x4xf32>
    %c1128 = arith.constant 1128 : index
    %c0_3 = arith.constant 0 : index
    %2 = vector.load %arg3[%c1128, %c0_3] : memref<1160x32xf32, #tpu.memory_space<vmem>>, vector<32x32xf32>
    %c960 = arith.constant 960 : index
    %c0_4 = arith.constant 0 : index
    %3 = vector.load %arg3[%c960, %c0_4] : memref<1160x32xf32, #tpu.memory_space<vmem>>, vector<4x32xf32>
    %4 = arith.truncf %0 : vector<32x4xf32> to vector<32x4xbf16>
    %5 = arith.truncf %3 : vector<4x32xf32> to vector<4x32xbf16>
    %cst = arith.constant dense<0.000000e+00> : vector<32x32xf32>
    %6 = tpu.matmul %4, %5, %cst {dimension_numbers = #tpu.dot_dimension_numbers<[1], [0], [0], [1], [0, 0, 1, 1], [], []>} : vector<32x4xbf16>, vector<4x32xbf16>, vector<32x32xf32> -> vector<32x32xf32>
    %c968 = arith.constant 968 : index
    %c0_5 = arith.constant 0 : index
    %7 = vector.load %arg3[%c968, %c0_5] : memref<1160x32xf32, #tpu.memory_space<vmem>>, vector<4x32xf32>
    %8 = arith.truncf %1 : vector<32x4xf32> to vector<32x4xbf16>
    %9 = arith.truncf %7 : vector<4x32xf32> to vector<4x32xbf16>
    %cst_6 = arith.constant dense<0.000000e+00> : vector<32x32xf32>
    %10 = tpu.matmul %8, %9, %cst_6 {dimension_numbers = #tpu.dot_dimension_numbers<[1], [0], [0], [1], [0, 0, 1, 1], [], []>} : vector<32x4xbf16>, vector<4x32xbf16>, vector<32x32xf32> -> vector<32x32xf32>
    %11 = arith.addf %6, %10 : vector<32x32xf32>
    %c976 = arith.constant 976 : index
    %c0_7 = arith.constant 0 : index
    %12 = vector.load %arg3[%c976, %c0_7] : memref<1160x32xf32, #tpu.memory_space<vmem>>, vector<1x32xf32>
    %13 = vector.broadcast %12 : vector<1x32xf32> to vector<32x32xf32>
    %14 = arith.addf %11, %13 : vector<32x32xf32>
    %15 = arith.addf %14, %2 : vector<32x32xf32>
    %c0_8 = arith.constant 0 : index
    %c0_9 = arith.constant 0 : index
    %16 = vector.load %arg3[%c0_8, %c0_9] : memref<1160x32xf32, #tpu.memory_space<vmem>>, vector<32x32xf32>
    %17 = arith.truncf %15 : vector<32x32xf32> to vector<32x32xbf16>
    %18 = arith.truncf %16 : vector<32x32xf32> to vector<32x32xbf16>
    %cst_10 = arith.constant dense<0.000000e+00> : vector<32x32xf32>
    %19 = tpu.matmul %17, %18, %cst_10 {dimension_numbers = #tpu.dot_dimension_numbers<[1], [0], [0], [1], [0, 0, 1, 1], [], []>} : vector<32x32xbf16>, vector<32x32xbf16>, vector<32x32xf32> -> vector<32x32xf32>
    %c32 = arith.constant 32 : index
    %c0_11 = arith.constant 0 : index
    %20 = vector.load %arg3[%c32, %c0_11] : memref<1160x32xf32, #tpu.memory_space<vmem>>, vector<32x32xf32>
    %21 = arith.truncf %15 : vector<32x32xf32> to vector<32x32xbf16>
    %22 = arith.truncf %20 : vector<32x32xf32> to vector<32x32xbf16>
    %cst_12 = arith.constant dense<0.000000e+00> : vector<32x32xf32>
    %23 = tpu.matmul %21, %22, %cst_12 {dimension_numbers = #tpu.dot_dimension_numbers<[1], [0], [0], [1], [0, 0, 1, 1], [], []>} : vector<32x32xbf16>, vector<32x32xbf16>, vector<32x32xf32> -> vector<32x32xf32>
    %c64 = arith.constant 64 : index
    %c0_13 = arith.constant 0 : index
    %24 = vector.load %arg3[%c64, %c0_13] : memref<1160x32xf32, #tpu.memory_space<vmem>>, vector<32x32xf32>
    %25 = arith.truncf %15 : vector<32x32xf32> to vector<32x32xbf16>
    %26 = arith.truncf %24 : vector<32x32xf32> to vector<32x32xbf16>
    %cst_14 = arith.constant dense<0.000000e+00> : vector<32x32xf32>
    %27 = tpu.matmul %25, %26, %cst_14 {dimension_numbers = #tpu.dot_dimension_numbers<[1], [0], [0], [1], [0, 0, 1, 1], [], []>} : vector<32x32xbf16>, vector<32x32xbf16>, vector<32x32xf32> -> vector<32x32xf32>
    %28 = vector.extract_strided_slice %19 {offsets = [0, 0], sizes = [8, 32], strides = [1, 1]} : vector<32x32xf32> to vector<8x32xf32>
    %29 = vector.extract_strided_slice %23 {offsets = [0, 0], sizes = [8, 32], strides = [1, 1]} : vector<32x32xf32> to vector<8x32xf32>
    %30 = vector.extract_strided_slice %27 {offsets = [0, 0], sizes = [8, 32], strides = [1, 1]} : vector<32x32xf32> to vector<8x32xf32>
    %31 = vector.extract_strided_slice %28 {offsets = [0, 0], sizes = [8, 16], strides = [1, 1]} : vector<8x32xf32> to vector<8x16xf32>
    %cst_15 = arith.constant 2.500000e-01 : f32
    %32 = vector.broadcast %cst_15 : f32 to vector<8x16xf32>
    %33 = arith.mulf %31, %32 : vector<8x16xf32>
    %34 = vector.extract_strided_slice %29 {offsets = [0, 0], sizes = [8, 16], strides = [1, 1]} : vector<8x32xf32> to vector<8x16xf32>
    %35 = vector.extract_strided_slice %30 {offsets = [0, 0], sizes = [8, 16], strides = [1, 1]} : vector<8x32xf32> to vector<8x16xf32>
    %cst_16 = arith.constant dense<0.000000e+00> : vector<8x8xf32>
    %36 = tpu.matmul %33, %34, %cst_16 {dimension_numbers = #tpu.dot_dimension_numbers<[1], [1], [0], [0], [0, 0, 1, 0], [], []>} : vector<8x16xf32>, vector<8x16xf32>, vector<8x8xf32> -> vector<8x8xf32>
    %cst_17 = arith.constant dense<0xFF800000> : vector<8xf32>
    %37 = vector.multi_reduction <maximumf>, %36, %cst_17 [1] : vector<8x8xf32> to vector<8xf32>
    %38 = vector.shape_cast %37 : vector<8xf32> to vector<8x1xf32>
    %39 = vector.broadcast %38 : vector<8x1xf32> to vector<8x8xf32>
    %40 = arith.subf %36, %39 : vector<8x8xf32>
    %41 = math.exp %40 : vector<8x8xf32>
    %cst_18 = arith.constant dense<0.000000e+00> : vector<8xf32>
    %42 = vector.multi_reduction <add>, %41, %cst_18 [1] : vector<8x8xf32> to vector<8xf32>
    %43 = vector.shape_cast %42 : vector<8xf32> to vector<8x1xf32>
    %44 = tpu.reciprocal %43 {approx = true} : vector<8x1xf32> -> vector<8x1xf32>
    %45 = vector.broadcast %44 : vector<8x1xf32> to vector<8x8xf32>
    %46 = arith.mulf %41, %45 : vector<8x8xf32>
    %47 = arith.truncf %46 : vector<8x8xf32> to vector<8x8xbf16>
    %48 = arith.truncf %35 : vector<8x16xf32> to vector<8x16xbf16>
    %cst_19 = arith.constant dense<0.000000e+00> : vector<8x16xf32>
    %49 = tpu.matmul %47, %48, %cst_19 {dimension_numbers = #tpu.dot_dimension_numbers<[1], [0], [0], [1], [0, 0, 1, 1], [], []>} : vector<8x8xbf16>, vector<8x16xbf16>, vector<8x16xf32> -> vector<8x16xf32>
    %50 = vector.extract_strided_slice %28 {offsets = [0, 16], sizes = [8, 16], strides = [1, 1]} : vector<8x32xf32> to vector<8x16xf32>
    %cst_20 = arith.constant 2.500000e-01 : f32
    %51 = vector.broadcast %cst_20 : f32 to vector<8x16xf32>
    %52 = arith.mulf %50, %51 : vector<8x16xf32>
    %53 = vector.extract_strided_slice %29 {offsets = [0, 16], sizes = [8, 16], strides = [1, 1]} : vector<8x32xf32> to vector<8x16xf32>
    %54 = vector.extract_strided_slice %30 {offsets = [0, 16], sizes = [8, 16], strides = [1, 1]} : vector<8x32xf32> to vector<8x16xf32>
    %cst_21 = arith.constant dense<0.000000e+00> : vector<8x8xf32>
    %55 = tpu.matmul %52, %53, %cst_21 {dimension_numbers = #tpu.dot_dimension_numbers<[1], [1], [0], [0], [0, 0, 1, 0], [], []>} : vector<8x16xf32>, vector<8x16xf32>, vector<8x8xf32> -> vector<8x8xf32>
    %cst_22 = arith.constant dense<0xFF800000> : vector<8xf32>
    %56 = vector.multi_reduction <maximumf>, %55, %cst_22 [1] : vector<8x8xf32> to vector<8xf32>
    %57 = vector.shape_cast %56 : vector<8xf32> to vector<8x1xf32>
    %58 = vector.broadcast %57 : vector<8x1xf32> to vector<8x8xf32>
    %59 = arith.subf %55, %58 : vector<8x8xf32>
    %60 = math.exp %59 : vector<8x8xf32>
    %cst_23 = arith.constant dense<0.000000e+00> : vector<8xf32>
    %61 = vector.multi_reduction <add>, %60, %cst_23 [1] : vector<8x8xf32> to vector<8xf32>
    %62 = vector.shape_cast %61 : vector<8xf32> to vector<8x1xf32>
    %63 = tpu.reciprocal %62 {approx = true} : vector<8x1xf32> -> vector<8x1xf32>
    %64 = vector.broadcast %63 : vector<8x1xf32> to vector<8x8xf32>
    %65 = arith.mulf %60, %64 : vector<8x8xf32>
    %66 = arith.truncf %65 : vector<8x8xf32> to vector<8x8xbf16>
    %67 = arith.truncf %54 : vector<8x16xf32> to vector<8x16xbf16>
    %cst_24 = arith.constant dense<0.000000e+00> : vector<8x16xf32>
    %68 = tpu.matmul %66, %67, %cst_24 {dimension_numbers = #tpu.dot_dimension_numbers<[1], [0], [0], [1], [0, 0, 1, 1], [], []>} : vector<8x8xbf16>, vector<8x16xbf16>, vector<8x16xf32> -> vector<8x16xf32>
    %69 = vector.extract_strided_slice %19 {offsets = [8, 0], sizes = [8, 32], strides = [1, 1]} : vector<32x32xf32> to vector<8x32xf32>
    %70 = vector.extract_strided_slice %23 {offsets = [8, 0], sizes = [8, 32], strides = [1, 1]} : vector<32x32xf32> to vector<8x32xf32>
    %71 = vector.extract_strided_slice %27 {offsets = [8, 0], sizes = [8, 32], strides = [1, 1]} : vector<32x32xf32> to vector<8x32xf32>
    %72 = vector.extract_strided_slice %69 {offsets = [0, 0], sizes = [8, 16], strides = [1, 1]} : vector<8x32xf32> to vector<8x16xf32>
    %cst_25 = arith.constant 2.500000e-01 : f32
    %73 = vector.broadcast %cst_25 : f32 to vector<8x16xf32>
    %74 = arith.mulf %72, %73 : vector<8x16xf32>
    %75 = vector.extract_strided_slice %70 {offsets = [0, 0], sizes = [8, 16], strides = [1, 1]} : vector<8x32xf32> to vector<8x16xf32>
    %76 = vector.extract_strided_slice %71 {offsets = [0, 0], sizes = [8, 16], strides = [1, 1]} : vector<8x32xf32> to vector<8x16xf32>
    %cst_26 = arith.constant dense<0.000000e+00> : vector<8x8xf32>
    %77 = tpu.matmul %74, %75, %cst_26 {dimension_numbers = #tpu.dot_dimension_numbers<[1], [1], [0], [0], [0, 0, 1, 0], [], []>} : vector<8x16xf32>, vector<8x16xf32>, vector<8x8xf32> -> vector<8x8xf32>
    %cst_27 = arith.constant dense<0xFF800000> : vector<8xf32>
    %78 = vector.multi_reduction <maximumf>, %77, %cst_27 [1] : vector<8x8xf32> to vector<8xf32>
    %79 = vector.shape_cast %78 : vector<8xf32> to vector<8x1xf32>
    %80 = vector.broadcast %79 : vector<8x1xf32> to vector<8x8xf32>
    %81 = arith.subf %77, %80 : vector<8x8xf32>
    %82 = math.exp %81 : vector<8x8xf32>
    %cst_28 = arith.constant dense<0.000000e+00> : vector<8xf32>
    %83 = vector.multi_reduction <add>, %82, %cst_28 [1] : vector<8x8xf32> to vector<8xf32>
    %84 = vector.shape_cast %83 : vector<8xf32> to vector<8x1xf32>
    %85 = tpu.reciprocal %84 {approx = true} : vector<8x1xf32> -> vector<8x1xf32>
    %86 = vector.broadcast %85 : vector<8x1xf32> to vector<8x8xf32>
    %87 = arith.mulf %82, %86 : vector<8x8xf32>
    %88 = arith.truncf %87 : vector<8x8xf32> to vector<8x8xbf16>
    %89 = arith.truncf %76 : vector<8x16xf32> to vector<8x16xbf16>
    %cst_29 = arith.constant dense<0.000000e+00> : vector<8x16xf32>
    %90 = tpu.matmul %88, %89, %cst_29 {dimension_numbers = #tpu.dot_dimension_numbers<[1], [0], [0], [1], [0, 0, 1, 1], [], []>} : vector<8x8xbf16>, vector<8x16xbf16>, vector<8x16xf32> -> vector<8x16xf32>
    %91 = vector.extract_strided_slice %69 {offsets = [0, 16], sizes = [8, 16], strides = [1, 1]} : vector<8x32xf32> to vector<8x16xf32>
    %cst_30 = arith.constant 2.500000e-01 : f32
    %92 = vector.broadcast %cst_30 : f32 to vector<8x16xf32>
    %93 = arith.mulf %91, %92 : vector<8x16xf32>
    %94 = vector.extract_strided_slice %70 {offsets = [0, 16], sizes = [8, 16], strides = [1, 1]} : vector<8x32xf32> to vector<8x16xf32>
    %95 = vector.extract_strided_slice %71 {offsets = [0, 16], sizes = [8, 16], strides = [1, 1]} : vector<8x32xf32> to vector<8x16xf32>
    %cst_31 = arith.constant dense<0.000000e+00> : vector<8x8xf32>
    %96 = tpu.matmul %93, %94, %cst_31 {dimension_numbers = #tpu.dot_dimension_numbers<[1], [1], [0], [0], [0, 0, 1, 0], [], []>} : vector<8x16xf32>, vector<8x16xf32>, vector<8x8xf32> -> vector<8x8xf32>
    %cst_32 = arith.constant dense<0xFF800000> : vector<8xf32>
    %97 = vector.multi_reduction <maximumf>, %96, %cst_32 [1] : vector<8x8xf32> to vector<8xf32>
    %98 = vector.shape_cast %97 : vector<8xf32> to vector<8x1xf32>
    %99 = vector.broadcast %98 : vector<8x1xf32> to vector<8x8xf32>
    %100 = arith.subf %96, %99 : vector<8x8xf32>
    %101 = math.exp %100 : vector<8x8xf32>
    %cst_33 = arith.constant dense<0.000000e+00> : vector<8xf32>
    %102 = vector.multi_reduction <add>, %101, %cst_33 [1] : vector<8x8xf32> to vector<8xf32>
    %103 = vector.shape_cast %102 : vector<8xf32> to vector<8x1xf32>
    %104 = tpu.reciprocal %103 {approx = true} : vector<8x1xf32> -> vector<8x1xf32>
    %105 = vector.broadcast %104 : vector<8x1xf32> to vector<8x8xf32>
    %106 = arith.mulf %101, %105 : vector<8x8xf32>
    %107 = arith.truncf %106 : vector<8x8xf32> to vector<8x8xbf16>
    %108 = arith.truncf %95 : vector<8x16xf32> to vector<8x16xbf16>
    %cst_34 = arith.constant dense<0.000000e+00> : vector<8x16xf32>
    %109 = tpu.matmul %107, %108, %cst_34 {dimension_numbers = #tpu.dot_dimension_numbers<[1], [0], [0], [1], [0, 0, 1, 1], [], []>} : vector<8x8xbf16>, vector<8x16xbf16>, vector<8x16xf32> -> vector<8x16xf32>
    %110 = vector.extract_strided_slice %19 {offsets = [16, 0], sizes = [8, 32], strides = [1, 1]} : vector<32x32xf32> to vector<8x32xf32>
    %111 = vector.extract_strided_slice %23 {offsets = [16, 0], sizes = [8, 32], strides = [1, 1]} : vector<32x32xf32> to vector<8x32xf32>
    %112 = vector.extract_strided_slice %27 {offsets = [16, 0], sizes = [8, 32], strides = [1, 1]} : vector<32x32xf32> to vector<8x32xf32>
    %113 = vector.extract_strided_slice %110 {offsets = [0, 0], sizes = [8, 16], strides = [1, 1]} : vector<8x32xf32> to vector<8x16xf32>
    %cst_35 = arith.constant 2.500000e-01 : f32
    %114 = vector.broadcast %cst_35 : f32 to vector<8x16xf32>
    %115 = arith.mulf %113, %114 : vector<8x16xf32>
    %116 = vector.extract_strided_slice %111 {offsets = [0, 0], sizes = [8, 16], strides = [1, 1]} : vector<8x32xf32> to vector<8x16xf32>
    %117 = vector.extract_strided_slice %112 {offsets = [0, 0], sizes = [8, 16], strides = [1, 1]} : vector<8x32xf32> to vector<8x16xf32>
    %cst_36 = arith.constant dense<0.000000e+00> : vector<8x8xf32>
    %118 = tpu.matmul %115, %116, %cst_36 {dimension_numbers = #tpu.dot_dimension_numbers<[1], [1], [0], [0], [0, 0, 1, 0], [], []>} : vector<8x16xf32>, vector<8x16xf32>, vector<8x8xf32> -> vector<8x8xf32>
    %cst_37 = arith.constant dense<0xFF800000> : vector<8xf32>
    %119 = vector.multi_reduction <maximumf>, %118, %cst_37 [1] : vector<8x8xf32> to vector<8xf32>
    %120 = vector.shape_cast %119 : vector<8xf32> to vector<8x1xf32>
    %121 = vector.broadcast %120 : vector<8x1xf32> to vector<8x8xf32>
    %122 = arith.subf %118, %121 : vector<8x8xf32>
    %123 = math.exp %122 : vector<8x8xf32>
    %cst_38 = arith.constant dense<0.000000e+00> : vector<8xf32>
    %124 = vector.multi_reduction <add>, %123, %cst_38 [1] : vector<8x8xf32> to vector<8xf32>
    %125 = vector.shape_cast %124 : vector<8xf32> to vector<8x1xf32>
    %126 = tpu.reciprocal %125 {approx = true} : vector<8x1xf32> -> vector<8x1xf32>
    %127 = vector.broadcast %126 : vector<8x1xf32> to vector<8x8xf32>
    %128 = arith.mulf %123, %127 : vector<8x8xf32>
    %129 = arith.truncf %128 : vector<8x8xf32> to vector<8x8xbf16>
    %130 = arith.truncf %117 : vector<8x16xf32> to vector<8x16xbf16>
    %cst_39 = arith.constant dense<0.000000e+00> : vector<8x16xf32>
    %131 = tpu.matmul %129, %130, %cst_39 {dimension_numbers = #tpu.dot_dimension_numbers<[1], [0], [0], [1], [0, 0, 1, 1], [], []>} : vector<8x8xbf16>, vector<8x16xbf16>, vector<8x16xf32> -> vector<8x16xf32>
    %132 = vector.extract_strided_slice %110 {offsets = [0, 16], sizes = [8, 16], strides = [1, 1]} : vector<8x32xf32> to vector<8x16xf32>
    %cst_40 = arith.constant 2.500000e-01 : f32
    %133 = vector.broadcast %cst_40 : f32 to vector<8x16xf32>
    %134 = arith.mulf %132, %133 : vector<8x16xf32>
    %135 = vector.extract_strided_slice %111 {offsets = [0, 16], sizes = [8, 16], strides = [1, 1]} : vector<8x32xf32> to vector<8x16xf32>
    %136 = vector.extract_strided_slice %112 {offsets = [0, 16], sizes = [8, 16], strides = [1, 1]} : vector<8x32xf32> to vector<8x16xf32>
    %cst_41 = arith.constant dense<0.000000e+00> : vector<8x8xf32>
    %137 = tpu.matmul %134, %135, %cst_41 {dimension_numbers = #tpu.dot_dimension_numbers<[1], [1], [0], [0], [0, 0, 1, 0], [], []>} : vector<8x16xf32>, vector<8x16xf32>, vector<8x8xf32> -> vector<8x8xf32>
    %cst_42 = arith.constant dense<0xFF800000> : vector<8xf32>
    %138 = vector.multi_reduction <maximumf>, %137, %cst_42 [1] : vector<8x8xf32> to vector<8xf32>
    %139 = vector.shape_cast %138 : vector<8xf32> to vector<8x1xf32>
    %140 = vector.broadcast %139 : vector<8x1xf32> to vector<8x8xf32>
    %141 = arith.subf %137, %140 : vector<8x8xf32>
    %142 = math.exp %141 : vector<8x8xf32>
    %cst_43 = arith.constant dense<0.000000e+00> : vector<8xf32>
    %143 = vector.multi_reduction <add>, %142, %cst_43 [1] : vector<8x8xf32> to vector<8xf32>
    %144 = vector.shape_cast %143 : vector<8xf32> to vector<8x1xf32>
    %145 = tpu.reciprocal %144 {approx = true} : vector<8x1xf32> -> vector<8x1xf32>
    %146 = vector.broadcast %145 : vector<8x1xf32> to vector<8x8xf32>
    %147 = arith.mulf %142, %146 : vector<8x8xf32>
    %148 = arith.truncf %147 : vector<8x8xf32> to vector<8x8xbf16>
    %149 = arith.truncf %136 : vector<8x16xf32> to vector<8x16xbf16>
    %cst_44 = arith.constant dense<0.000000e+00> : vector<8x16xf32>
    %150 = tpu.matmul %148, %149, %cst_44 {dimension_numbers = #tpu.dot_dimension_numbers<[1], [0], [0], [1], [0, 0, 1, 1], [], []>} : vector<8x8xbf16>, vector<8x16xbf16>, vector<8x16xf32> -> vector<8x16xf32>
    %151 = vector.extract_strided_slice %19 {offsets = [24, 0], sizes = [8, 32], strides = [1, 1]} : vector<32x32xf32> to vector<8x32xf32>
    %152 = vector.extract_strided_slice %23 {offsets = [24, 0], sizes = [8, 32], strides = [1, 1]} : vector<32x32xf32> to vector<8x32xf32>
    %153 = vector.extract_strided_slice %27 {offsets = [24, 0], sizes = [8, 32], strides = [1, 1]} : vector<32x32xf32> to vector<8x32xf32>
    %154 = vector.extract_strided_slice %151 {offsets = [0, 0], sizes = [8, 16], strides = [1, 1]} : vector<8x32xf32> to vector<8x16xf32>
    %cst_45 = arith.constant 2.500000e-01 : f32
    %155 = vector.broadcast %cst_45 : f32 to vector<8x16xf32>
    %156 = arith.mulf %154, %155 : vector<8x16xf32>
    %157 = vector.extract_strided_slice %152 {offsets = [0, 0], sizes = [8, 16], strides = [1, 1]} : vector<8x32xf32> to vector<8x16xf32>
    %158 = vector.extract_strided_slice %153 {offsets = [0, 0], sizes = [8, 16], strides = [1, 1]} : vector<8x32xf32> to vector<8x16xf32>
    %cst_46 = arith.constant dense<0.000000e+00> : vector<8x8xf32>
    %159 = tpu.matmul %156, %157, %cst_46 {dimension_numbers = #tpu.dot_dimension_numbers<[1], [1], [0], [0], [0, 0, 1, 0], [], []>} : vector<8x16xf32>, vector<8x16xf32>, vector<8x8xf32> -> vector<8x8xf32>
    %cst_47 = arith.constant dense<0xFF800000> : vector<8xf32>
    %160 = vector.multi_reduction <maximumf>, %159, %cst_47 [1] : vector<8x8xf32> to vector<8xf32>
    %161 = vector.shape_cast %160 : vector<8xf32> to vector<8x1xf32>
    %162 = vector.broadcast %161 : vector<8x1xf32> to vector<8x8xf32>
    %163 = arith.subf %159, %162 : vector<8x8xf32>
    %164 = math.exp %163 : vector<8x8xf32>
    %cst_48 = arith.constant dense<0.000000e+00> : vector<8xf32>
    %165 = vector.multi_reduction <add>, %164, %cst_48 [1] : vector<8x8xf32> to vector<8xf32>
    %166 = vector.shape_cast %165 : vector<8xf32> to vector<8x1xf32>
    %167 = tpu.reciprocal %166 {approx = true} : vector<8x1xf32> -> vector<8x1xf32>
    %168 = vector.broadcast %167 : vector<8x1xf32> to vector<8x8xf32>
    %169 = arith.mulf %164, %168 : vector<8x8xf32>
    %170 = arith.truncf %169 : vector<8x8xf32> to vector<8x8xbf16>
    %171 = arith.truncf %158 : vector<8x16xf32> to vector<8x16xbf16>
    %cst_49 = arith.constant dense<0.000000e+00> : vector<8x16xf32>
    %172 = tpu.matmul %170, %171, %cst_49 {dimension_numbers = #tpu.dot_dimension_numbers<[1], [0], [0], [1], [0, 0, 1, 1], [], []>} : vector<8x8xbf16>, vector<8x16xbf16>, vector<8x16xf32> -> vector<8x16xf32>
    %173 = vector.extract_strided_slice %151 {offsets = [0, 16], sizes = [8, 16], strides = [1, 1]} : vector<8x32xf32> to vector<8x16xf32>
    %cst_50 = arith.constant 2.500000e-01 : f32
    %174 = vector.broadcast %cst_50 : f32 to vector<8x16xf32>
    %175 = arith.mulf %173, %174 : vector<8x16xf32>
    %176 = vector.extract_strided_slice %152 {offsets = [0, 16], sizes = [8, 16], strides = [1, 1]} : vector<8x32xf32> to vector<8x16xf32>
    %177 = vector.extract_strided_slice %153 {offsets = [0, 16], sizes = [8, 16], strides = [1, 1]} : vector<8x32xf32> to vector<8x16xf32>
    %cst_51 = arith.constant dense<0.000000e+00> : vector<8x8xf32>
    %178 = tpu.matmul %175, %176, %cst_51 {dimension_numbers = #tpu.dot_dimension_numbers<[1], [1], [0], [0], [0, 0, 1, 0], [], []>} : vector<8x16xf32>, vector<8x16xf32>, vector<8x8xf32> -> vector<8x8xf32>
    %cst_52 = arith.constant dense<0xFF800000> : vector<8xf32>
    %179 = vector.multi_reduction <maximumf>, %178, %cst_52 [1] : vector<8x8xf32> to vector<8xf32>
    %180 = vector.shape_cast %179 : vector<8xf32> to vector<8x1xf32>
    %181 = vector.broadcast %180 : vector<8x1xf32> to vector<8x8xf32>
    %182 = arith.subf %178, %181 : vector<8x8xf32>
    %183 = math.exp %182 : vector<8x8xf32>
    %cst_53 = arith.constant dense<0.000000e+00> : vector<8xf32>
    %184 = vector.multi_reduction <add>, %183, %cst_53 [1] : vector<8x8xf32> to vector<8xf32>
    %185 = vector.shape_cast %184 : vector<8xf32> to vector<8x1xf32>
    %186 = tpu.reciprocal %185 {approx = true} : vector<8x1xf32> -> vector<8x1xf32>
    %187 = vector.broadcast %186 : vector<8x1xf32> to vector<8x8xf32>
    %188 = arith.mulf %183, %187 : vector<8x8xf32>
    %189 = arith.truncf %188 : vector<8x8xf32> to vector<8x8xbf16>
    %190 = arith.truncf %177 : vector<8x16xf32> to vector<8x16xbf16>
    %cst_54 = arith.constant dense<0.000000e+00> : vector<8x16xf32>
    %191 = tpu.matmul %189, %190, %cst_54 {dimension_numbers = #tpu.dot_dimension_numbers<[1], [0], [0], [1], [0, 0, 1, 1], [], []>} : vector<8x8xbf16>, vector<8x16xbf16>, vector<8x16xf32> -> vector<8x16xf32>
    %c96 = arith.constant 96 : index
    %c0_55 = arith.constant 0 : index
    %192 = vector.load %arg3[%c96, %c0_55] : memref<1160x32xf32, #tpu.memory_space<vmem>>, vector<32x32xf32>
    %193 = tpu.concatenate %49, %90, %131, %172 in 0 : vector<8x16xf32>, vector<8x16xf32>, vector<8x16xf32>, vector<8x16xf32> -> vector<32x16xf32>
    %194 = vector.extract_strided_slice %192 {offsets = [0, 0], sizes = [16, 32], strides = [1, 1]} : vector<32x32xf32> to vector<16x32xf32>
    %195 = arith.truncf %193 : vector<32x16xf32> to vector<32x16xbf16>
    %196 = arith.truncf %194 : vector<16x32xf32> to vector<16x32xbf16>
    %cst_56 = arith.constant dense<0.000000e+00> : vector<32x32xf32>
    %197 = tpu.matmul %195, %196, %cst_56 {dimension_numbers = #tpu.dot_dimension_numbers<[1], [0], [0], [1], [0, 0, 1, 1], [], []>} : vector<32x16xbf16>, vector<16x32xbf16>, vector<32x32xf32> -> vector<32x32xf32>
    %198 = tpu.concatenate %68, %109, %150, %191 in 0 : vector<8x16xf32>, vector<8x16xf32>, vector<8x16xf32>, vector<8x16xf32> -> vector<32x16xf32>
    %199 = vector.extract_strided_slice %192 {offsets = [16, 0], sizes = [16, 32], strides = [1, 1]} : vector<32x32xf32> to vector<16x32xf32>
    %200 = arith.truncf %198 : vector<32x16xf32> to vector<32x16xbf16>
    %201 = arith.truncf %199 : vector<16x32xf32> to vector<16x32xbf16>
    %cst_57 = arith.constant dense<0.000000e+00> : vector<32x32xf32>
    %202 = tpu.matmul %200, %201, %cst_57 {dimension_numbers = #tpu.dot_dimension_numbers<[1], [0], [0], [1], [0, 0, 1, 1], [], []>} : vector<32x16xbf16>, vector<16x32xbf16>, vector<32x32xf32> -> vector<32x32xf32>
    %203 = arith.addf %197, %202 : vector<32x32xf32>
    %204 = arith.addf %203, %15 : vector<32x32xf32>
    %c128 = arith.constant 128 : index
    %c0_58 = arith.constant 0 : index
    %205 = vector.load %arg3[%c128, %c0_58] : memref<1160x32xf32, #tpu.memory_space<vmem>>, vector<1x32xf32>
    %c136 = arith.constant 136 : index
    %c0_59 = arith.constant 0 : index
    %206 = vector.load %arg3[%c136, %c0_59] : memref<1160x32xf32, #tpu.memory_space<vmem>>, vector<1x32xf32>
    %cst_60 = arith.constant dense<0.000000e+00> : vector<32xf32>
    %207 = vector.multi_reduction <add>, %204, %cst_60 [1] : vector<32x32xf32> to vector<32xf32>
    %208 = vector.shape_cast %207 : vector<32xf32> to vector<32x1xf32>
    %cst_61 = arith.constant 3.200000e+01 : f32
    %209 = vector.broadcast %cst_61 : f32 to vector<32x1xf32>
    %210 = arith.divf %208, %209 : vector<32x1xf32>
    %211 = vector.broadcast %210 : vector<32x1xf32> to vector<32x32xf32>
    %212 = arith.subf %204, %211 : vector<32x32xf32>
    %213 = arith.mulf %212, %212 : vector<32x32xf32>
    %cst_62 = arith.constant dense<0.000000e+00> : vector<32xf32>
    %214 = vector.multi_reduction <add>, %213, %cst_62 [1] : vector<32x32xf32> to vector<32xf32>
    %215 = vector.shape_cast %214 : vector<32xf32> to vector<32x1xf32>
    %cst_63 = arith.constant 3.200000e+01 : f32
    %216 = vector.broadcast %cst_63 : f32 to vector<32x1xf32>
    %217 = arith.divf %215, %216 : vector<32x1xf32>
    %218 = vector.broadcast %210 : vector<32x1xf32> to vector<32x32xf32>
    %219 = arith.subf %204, %218 : vector<32x32xf32>
    %cst_64 = arith.constant 9.99999974E-6 : f32
    %220 = vector.broadcast %cst_64 : f32 to vector<32x1xf32>
    %221 = arith.addf %217, %220 : vector<32x1xf32>
    %222 = math.rsqrt %221 : vector<32x1xf32>
    %223 = vector.broadcast %222 : vector<32x1xf32> to vector<32x32xf32>
    %224 = arith.mulf %219, %223 : vector<32x32xf32>
    %225 = vector.broadcast %205 : vector<1x32xf32> to vector<32x32xf32>
    %226 = arith.mulf %224, %225 : vector<32x32xf32>
    %227 = vector.broadcast %206 : vector<1x32xf32> to vector<32x32xf32>
    %228 = arith.addf %226, %227 : vector<32x32xf32>
    %c144 = arith.constant 144 : index
    %c0_65 = arith.constant 0 : index
    %229 = vector.load %arg3[%c144, %c0_65] : memref<1160x32xf32, #tpu.memory_space<vmem>>, vector<32x32xf32>
    %230 = arith.truncf %228 : vector<32x32xf32> to vector<32x32xbf16>
    %231 = arith.truncf %229 : vector<32x32xf32> to vector<32x32xbf16>
    %cst_66 = arith.constant dense<0.000000e+00> : vector<32x32xf32>
    %232 = tpu.matmul %230, %231, %cst_66 {dimension_numbers = #tpu.dot_dimension_numbers<[1], [0], [0], [1], [0, 0, 1, 1], [], []>} : vector<32x32xbf16>, vector<32x32xbf16>, vector<32x32xf32> -> vector<32x32xf32>
    %c176 = arith.constant 176 : index
    %c0_67 = arith.constant 0 : index
    %233 = vector.load %arg3[%c176, %c0_67] : memref<1160x32xf32, #tpu.memory_space<vmem>>, vector<1x32xf32>
    %234 = vector.broadcast %233 : vector<1x32xf32> to vector<32x32xf32>
    %235 = arith.addf %232, %234 : vector<32x32xf32>
    %cst_68 = arith.constant 0.000000e+00 : f32
    %236 = vector.broadcast %cst_68 : f32 to vector<32x32xf32>
    %237 = arith.maximumf %235, %236 : vector<32x32xf32>
    %c184 = arith.constant 184 : index
    %c0_69 = arith.constant 0 : index
    %238 = vector.load %arg3[%c184, %c0_69] : memref<1160x32xf32, #tpu.memory_space<vmem>>, vector<32x32xf32>
    %239 = arith.truncf %237 : vector<32x32xf32> to vector<32x32xbf16>
    %240 = arith.truncf %238 : vector<32x32xf32> to vector<32x32xbf16>
    %cst_70 = arith.constant dense<0.000000e+00> : vector<32x32xf32>
    %241 = tpu.matmul %239, %240, %cst_70 {dimension_numbers = #tpu.dot_dimension_numbers<[1], [0], [0], [1], [0, 0, 1, 1], [], []>} : vector<32x32xbf16>, vector<32x32xbf16>, vector<32x32xf32> -> vector<32x32xf32>
    %c216 = arith.constant 216 : index
    %c0_71 = arith.constant 0 : index
    %242 = vector.load %arg3[%c216, %c0_71] : memref<1160x32xf32, #tpu.memory_space<vmem>>, vector<1x32xf32>
    %243 = vector.broadcast %242 : vector<1x32xf32> to vector<32x32xf32>
    %244 = arith.addf %241, %243 : vector<32x32xf32>
    %245 = arith.addf %244, %228 : vector<32x32xf32>
    %c224 = arith.constant 224 : index
    %c0_72 = arith.constant 0 : index
    %246 = vector.load %arg3[%c224, %c0_72] : memref<1160x32xf32, #tpu.memory_space<vmem>>, vector<1x32xf32>
    %c232 = arith.constant 232 : index
    %c0_73 = arith.constant 0 : index
    %247 = vector.load %arg3[%c232, %c0_73] : memref<1160x32xf32, #tpu.memory_space<vmem>>, vector<1x32xf32>
    %cst_74 = arith.constant dense<0.000000e+00> : vector<32xf32>
    %248 = vector.multi_reduction <add>, %245, %cst_74 [1] : vector<32x32xf32> to vector<32xf32>
    %249 = vector.shape_cast %248 : vector<32xf32> to vector<32x1xf32>
    %cst_75 = arith.constant 3.200000e+01 : f32
    %250 = vector.broadcast %cst_75 : f32 to vector<32x1xf32>
    %251 = arith.divf %249, %250 : vector<32x1xf32>
    %252 = vector.broadcast %251 : vector<32x1xf32> to vector<32x32xf32>
    %253 = arith.subf %245, %252 : vector<32x32xf32>
    %254 = arith.mulf %253, %253 : vector<32x32xf32>
    %cst_76 = arith.constant dense<0.000000e+00> : vector<32xf32>
    %255 = vector.multi_reduction <add>, %254, %cst_76 [1] : vector<32x32xf32> to vector<32xf32>
    %256 = vector.shape_cast %255 : vector<32xf32> to vector<32x1xf32>
    %cst_77 = arith.constant 3.200000e+01 : f32
    %257 = vector.broadcast %cst_77 : f32 to vector<32x1xf32>
    %258 = arith.divf %256, %257 : vector<32x1xf32>
    %259 = vector.broadcast %251 : vector<32x1xf32> to vector<32x32xf32>
    %260 = arith.subf %245, %259 : vector<32x32xf32>
    %cst_78 = arith.constant 9.99999974E-6 : f32
    %261 = vector.broadcast %cst_78 : f32 to vector<32x1xf32>
    %262 = arith.addf %258, %261 : vector<32x1xf32>
    %263 = math.rsqrt %262 : vector<32x1xf32>
    %264 = vector.broadcast %263 : vector<32x1xf32> to vector<32x32xf32>
    %265 = arith.mulf %260, %264 : vector<32x32xf32>
    %266 = vector.broadcast %246 : vector<1x32xf32> to vector<32x32xf32>
    %267 = arith.mulf %265, %266 : vector<32x32xf32>
    %268 = vector.broadcast %247 : vector<1x32xf32> to vector<32x32xf32>
    %269 = arith.addf %267, %268 : vector<32x32xf32>
    %c240 = arith.constant 240 : index
    %c0_79 = arith.constant 0 : index
    %270 = vector.load %arg3[%c240, %c0_79] : memref<1160x32xf32, #tpu.memory_space<vmem>>, vector<32x32xf32>
    %271 = arith.truncf %269 : vector<32x32xf32> to vector<32x32xbf16>
    %272 = arith.truncf %270 : vector<32x32xf32> to vector<32x32xbf16>
    %cst_80 = arith.constant dense<0.000000e+00> : vector<32x32xf32>
    %273 = tpu.matmul %271, %272, %cst_80 {dimension_numbers = #tpu.dot_dimension_numbers<[1], [0], [0], [1], [0, 0, 1, 1], [], []>} : vector<32x32xbf16>, vector<32x32xbf16>, vector<32x32xf32> -> vector<32x32xf32>
    %c272 = arith.constant 272 : index
    %c0_81 = arith.constant 0 : index
    %274 = vector.load %arg3[%c272, %c0_81] : memref<1160x32xf32, #tpu.memory_space<vmem>>, vector<32x32xf32>
    %275 = arith.truncf %269 : vector<32x32xf32> to vector<32x32xbf16>
    %276 = arith.truncf %274 : vector<32x32xf32> to vector<32x32xbf16>
    %cst_82 = arith.constant dense<0.000000e+00> : vector<32x32xf32>
    %277 = tpu.matmul %275, %276, %cst_82 {dimension_numbers = #tpu.dot_dimension_numbers<[1], [0], [0], [1], [0, 0, 1, 1], [], []>} : vector<32x32xbf16>, vector<32x32xbf16>, vector<32x32xf32> -> vector<32x32xf32>
    %c304 = arith.constant 304 : index
    %c0_83 = arith.constant 0 : index
    %278 = vector.load %arg3[%c304, %c0_83] : memref<1160x32xf32, #tpu.memory_space<vmem>>, vector<32x32xf32>
    %279 = arith.truncf %269 : vector<32x32xf32> to vector<32x32xbf16>
    %280 = arith.truncf %278 : vector<32x32xf32> to vector<32x32xbf16>
    %cst_84 = arith.constant dense<0.000000e+00> : vector<32x32xf32>
    %281 = tpu.matmul %279, %280, %cst_84 {dimension_numbers = #tpu.dot_dimension_numbers<[1], [0], [0], [1], [0, 0, 1, 1], [], []>} : vector<32x32xbf16>, vector<32x32xbf16>, vector<32x32xf32> -> vector<32x32xf32>
    %282 = vector.extract_strided_slice %273 {offsets = [0, 0], sizes = [8, 32], strides = [1, 1]} : vector<32x32xf32> to vector<8x32xf32>
    %283 = vector.extract_strided_slice %277 {offsets = [0, 0], sizes = [8, 32], strides = [1, 1]} : vector<32x32xf32> to vector<8x32xf32>
    %284 = vector.extract_strided_slice %281 {offsets = [0, 0], sizes = [8, 32], strides = [1, 1]} : vector<32x32xf32> to vector<8x32xf32>
    %285 = vector.extract_strided_slice %282 {offsets = [0, 0], sizes = [8, 16], strides = [1, 1]} : vector<8x32xf32> to vector<8x16xf32>
    %cst_85 = arith.constant 2.500000e-01 : f32
    %286 = vector.broadcast %cst_85 : f32 to vector<8x16xf32>
    %287 = arith.mulf %285, %286 : vector<8x16xf32>
    %288 = vector.extract_strided_slice %283 {offsets = [0, 0], sizes = [8, 16], strides = [1, 1]} : vector<8x32xf32> to vector<8x16xf32>
    %289 = vector.extract_strided_slice %284 {offsets = [0, 0], sizes = [8, 16], strides = [1, 1]} : vector<8x32xf32> to vector<8x16xf32>
    %cst_86 = arith.constant dense<0.000000e+00> : vector<8x8xf32>
    %290 = tpu.matmul %287, %288, %cst_86 {dimension_numbers = #tpu.dot_dimension_numbers<[1], [1], [0], [0], [0, 0, 1, 0], [], []>} : vector<8x16xf32>, vector<8x16xf32>, vector<8x8xf32> -> vector<8x8xf32>
    %cst_87 = arith.constant dense<0xFF800000> : vector<8xf32>
    %291 = vector.multi_reduction <maximumf>, %290, %cst_87 [1] : vector<8x8xf32> to vector<8xf32>
    %292 = vector.shape_cast %291 : vector<8xf32> to vector<8x1xf32>
    %293 = vector.broadcast %292 : vector<8x1xf32> to vector<8x8xf32>
    %294 = arith.subf %290, %293 : vector<8x8xf32>
    %295 = math.exp %294 : vector<8x8xf32>
    %cst_88 = arith.constant dense<0.000000e+00> : vector<8xf32>
    %296 = vector.multi_reduction <add>, %295, %cst_88 [1] : vector<8x8xf32> to vector<8xf32>
    %297 = vector.shape_cast %296 : vector<8xf32> to vector<8x1xf32>
    %298 = tpu.reciprocal %297 {approx = true} : vector<8x1xf32> -> vector<8x1xf32>
    %299 = vector.broadcast %298 : vector<8x1xf32> to vector<8x8xf32>
    %300 = arith.mulf %295, %299 : vector<8x8xf32>
    %301 = arith.truncf %300 : vector<8x8xf32> to vector<8x8xbf16>
    %302 = arith.truncf %289 : vector<8x16xf32> to vector<8x16xbf16>
    %cst_89 = arith.constant dense<0.000000e+00> : vector<8x16xf32>
    %303 = tpu.matmul %301, %302, %cst_89 {dimension_numbers = #tpu.dot_dimension_numbers<[1], [0], [0], [1], [0, 0, 1, 1], [], []>} : vector<8x8xbf16>, vector<8x16xbf16>, vector<8x16xf32> -> vector<8x16xf32>
    %304 = vector.extract_strided_slice %282 {offsets = [0, 16], sizes = [8, 16], strides = [1, 1]} : vector<8x32xf32> to vector<8x16xf32>
    %cst_90 = arith.constant 2.500000e-01 : f32
    %305 = vector.broadcast %cst_90 : f32 to vector<8x16xf32>
    %306 = arith.mulf %304, %305 : vector<8x16xf32>
    %307 = vector.extract_strided_slice %283 {offsets = [0, 16], sizes = [8, 16], strides = [1, 1]} : vector<8x32xf32> to vector<8x16xf32>
    %308 = vector.extract_strided_slice %284 {offsets = [0, 16], sizes = [8, 16], strides = [1, 1]} : vector<8x32xf32> to vector<8x16xf32>
    %cst_91 = arith.constant dense<0.000000e+00> : vector<8x8xf32>
    %309 = tpu.matmul %306, %307, %cst_91 {dimension_numbers = #tpu.dot_dimension_numbers<[1], [1], [0], [0], [0, 0, 1, 0], [], []>} : vector<8x16xf32>, vector<8x16xf32>, vector<8x8xf32> -> vector<8x8xf32>
    %cst_92 = arith.constant dense<0xFF800000> : vector<8xf32>
    %310 = vector.multi_reduction <maximumf>, %309, %cst_92 [1] : vector<8x8xf32> to vector<8xf32>
    %311 = vector.shape_cast %310 : vector<8xf32> to vector<8x1xf32>
    %312 = vector.broadcast %311 : vector<8x1xf32> to vector<8x8xf32>
    %313 = arith.subf %309, %312 : vector<8x8xf32>
    %314 = math.exp %313 : vector<8x8xf32>
    %cst_93 = arith.constant dense<0.000000e+00> : vector<8xf32>
    %315 = vector.multi_reduction <add>, %314, %cst_93 [1] : vector<8x8xf32> to vector<8xf32>
    %316 = vector.shape_cast %315 : vector<8xf32> to vector<8x1xf32>
    %317 = tpu.reciprocal %316 {approx = true} : vector<8x1xf32> -> vector<8x1xf32>
    %318 = vector.broadcast %317 : vector<8x1xf32> to vector<8x8xf32>
    %319 = arith.mulf %314, %318 : vector<8x8xf32>
    %320 = arith.truncf %319 : vector<8x8xf32> to vector<8x8xbf16>
    %321 = arith.truncf %308 : vector<8x16xf32> to vector<8x16xbf16>
    %cst_94 = arith.constant dense<0.000000e+00> : vector<8x16xf32>
    %322 = tpu.matmul %320, %321, %cst_94 {dimension_numbers = #tpu.dot_dimension_numbers<[1], [0], [0], [1], [0, 0, 1, 1], [], []>} : vector<8x8xbf16>, vector<8x16xbf16>, vector<8x16xf32> -> vector<8x16xf32>
    %323 = vector.extract_strided_slice %273 {offsets = [8, 0], sizes = [8, 32], strides = [1, 1]} : vector<32x32xf32> to vector<8x32xf32>
    %324 = vector.extract_strided_slice %277 {offsets = [8, 0], sizes = [8, 32], strides = [1, 1]} : vector<32x32xf32> to vector<8x32xf32>
    %325 = vector.extract_strided_slice %281 {offsets = [8, 0], sizes = [8, 32], strides = [1, 1]} : vector<32x32xf32> to vector<8x32xf32>
    %326 = vector.extract_strided_slice %323 {offsets = [0, 0], sizes = [8, 16], strides = [1, 1]} : vector<8x32xf32> to vector<8x16xf32>
    %cst_95 = arith.constant 2.500000e-01 : f32
    %327 = vector.broadcast %cst_95 : f32 to vector<8x16xf32>
    %328 = arith.mulf %326, %327 : vector<8x16xf32>
    %329 = vector.extract_strided_slice %324 {offsets = [0, 0], sizes = [8, 16], strides = [1, 1]} : vector<8x32xf32> to vector<8x16xf32>
    %330 = vector.extract_strided_slice %325 {offsets = [0, 0], sizes = [8, 16], strides = [1, 1]} : vector<8x32xf32> to vector<8x16xf32>
    %cst_96 = arith.constant dense<0.000000e+00> : vector<8x8xf32>
    %331 = tpu.matmul %328, %329, %cst_96 {dimension_numbers = #tpu.dot_dimension_numbers<[1], [1], [0], [0], [0, 0, 1, 0], [], []>} : vector<8x16xf32>, vector<8x16xf32>, vector<8x8xf32> -> vector<8x8xf32>
    %cst_97 = arith.constant dense<0xFF800000> : vector<8xf32>
    %332 = vector.multi_reduction <maximumf>, %331, %cst_97 [1] : vector<8x8xf32> to vector<8xf32>
    %333 = vector.shape_cast %332 : vector<8xf32> to vector<8x1xf32>
    %334 = vector.broadcast %333 : vector<8x1xf32> to vector<8x8xf32>
    %335 = arith.subf %331, %334 : vector<8x8xf32>
    %336 = math.exp %335 : vector<8x8xf32>
    %cst_98 = arith.constant dense<0.000000e+00> : vector<8xf32>
    %337 = vector.multi_reduction <add>, %336, %cst_98 [1] : vector<8x8xf32> to vector<8xf32>
    %338 = vector.shape_cast %337 : vector<8xf32> to vector<8x1xf32>
    %339 = tpu.reciprocal %338 {approx = true} : vector<8x1xf32> -> vector<8x1xf32>
    %340 = vector.broadcast %339 : vector<8x1xf32> to vector<8x8xf32>
    %341 = arith.mulf %336, %340 : vector<8x8xf32>
    %342 = arith.truncf %341 : vector<8x8xf32> to vector<8x8xbf16>
    %343 = arith.truncf %330 : vector<8x16xf32> to vector<8x16xbf16>
    %cst_99 = arith.constant dense<0.000000e+00> : vector<8x16xf32>
    %344 = tpu.matmul %342, %343, %cst_99 {dimension_numbers = #tpu.dot_dimension_numbers<[1], [0], [0], [1], [0, 0, 1, 1], [], []>} : vector<8x8xbf16>, vector<8x16xbf16>, vector<8x16xf32> -> vector<8x16xf32>
    %345 = vector.extract_strided_slice %323 {offsets = [0, 16], sizes = [8, 16], strides = [1, 1]} : vector<8x32xf32> to vector<8x16xf32>
    %cst_100 = arith.constant 2.500000e-01 : f32
    %346 = vector.broadcast %cst_100 : f32 to vector<8x16xf32>
    %347 = arith.mulf %345, %346 : vector<8x16xf32>
    %348 = vector.extract_strided_slice %324 {offsets = [0, 16], sizes = [8, 16], strides = [1, 1]} : vector<8x32xf32> to vector<8x16xf32>
    %349 = vector.extract_strided_slice %325 {offsets = [0, 16], sizes = [8, 16], strides = [1, 1]} : vector<8x32xf32> to vector<8x16xf32>
    %cst_101 = arith.constant dense<0.000000e+00> : vector<8x8xf32>
    %350 = tpu.matmul %347, %348, %cst_101 {dimension_numbers = #tpu.dot_dimension_numbers<[1], [1], [0], [0], [0, 0, 1, 0], [], []>} : vector<8x16xf32>, vector<8x16xf32>, vector<8x8xf32> -> vector<8x8xf32>
    %cst_102 = arith.constant dense<0xFF800000> : vector<8xf32>
    %351 = vector.multi_reduction <maximumf>, %350, %cst_102 [1] : vector<8x8xf32> to vector<8xf32>
    %352 = vector.shape_cast %351 : vector<8xf32> to vector<8x1xf32>
    %353 = vector.broadcast %352 : vector<8x1xf32> to vector<8x8xf32>
    %354 = arith.subf %350, %353 : vector<8x8xf32>
    %355 = math.exp %354 : vector<8x8xf32>
    %cst_103 = arith.constant dense<0.000000e+00> : vector<8xf32>
    %356 = vector.multi_reduction <add>, %355, %cst_103 [1] : vector<8x8xf32> to vector<8xf32>
    %357 = vector.shape_cast %356 : vector<8xf32> to vector<8x1xf32>
    %358 = tpu.reciprocal %357 {approx = true} : vector<8x1xf32> -> vector<8x1xf32>
    %359 = vector.broadcast %358 : vector<8x1xf32> to vector<8x8xf32>
    %360 = arith.mulf %355, %359 : vector<8x8xf32>
    %361 = arith.truncf %360 : vector<8x8xf32> to vector<8x8xbf16>
    %362 = arith.truncf %349 : vector<8x16xf32> to vector<8x16xbf16>
    %cst_104 = arith.constant dense<0.000000e+00> : vector<8x16xf32>
    %363 = tpu.matmul %361, %362, %cst_104 {dimension_numbers = #tpu.dot_dimension_numbers<[1], [0], [0], [1], [0, 0, 1, 1], [], []>} : vector<8x8xbf16>, vector<8x16xbf16>, vector<8x16xf32> -> vector<8x16xf32>
    %364 = vector.extract_strided_slice %273 {offsets = [16, 0], sizes = [8, 32], strides = [1, 1]} : vector<32x32xf32> to vector<8x32xf32>
    %365 = vector.extract_strided_slice %277 {offsets = [16, 0], sizes = [8, 32], strides = [1, 1]} : vector<32x32xf32> to vector<8x32xf32>
    %366 = vector.extract_strided_slice %281 {offsets = [16, 0], sizes = [8, 32], strides = [1, 1]} : vector<32x32xf32> to vector<8x32xf32>
    %367 = vector.extract_strided_slice %364 {offsets = [0, 0], sizes = [8, 16], strides = [1, 1]} : vector<8x32xf32> to vector<8x16xf32>
    %cst_105 = arith.constant 2.500000e-01 : f32
    %368 = vector.broadcast %cst_105 : f32 to vector<8x16xf32>
    %369 = arith.mulf %367, %368 : vector<8x16xf32>
    %370 = vector.extract_strided_slice %365 {offsets = [0, 0], sizes = [8, 16], strides = [1, 1]} : vector<8x32xf32> to vector<8x16xf32>
    %371 = vector.extract_strided_slice %366 {offsets = [0, 0], sizes = [8, 16], strides = [1, 1]} : vector<8x32xf32> to vector<8x16xf32>
    %cst_106 = arith.constant dense<0.000000e+00> : vector<8x8xf32>
    %372 = tpu.matmul %369, %370, %cst_106 {dimension_numbers = #tpu.dot_dimension_numbers<[1], [1], [0], [0], [0, 0, 1, 0], [], []>} : vector<8x16xf32>, vector<8x16xf32>, vector<8x8xf32> -> vector<8x8xf32>
    %cst_107 = arith.constant dense<0xFF800000> : vector<8xf32>
    %373 = vector.multi_reduction <maximumf>, %372, %cst_107 [1] : vector<8x8xf32> to vector<8xf32>
    %374 = vector.shape_cast %373 : vector<8xf32> to vector<8x1xf32>
    %375 = vector.broadcast %374 : vector<8x1xf32> to vector<8x8xf32>
    %376 = arith.subf %372, %375 : vector<8x8xf32>
    %377 = math.exp %376 : vector<8x8xf32>
    %cst_108 = arith.constant dense<0.000000e+00> : vector<8xf32>
    %378 = vector.multi_reduction <add>, %377, %cst_108 [1] : vector<8x8xf32> to vector<8xf32>
    %379 = vector.shape_cast %378 : vector<8xf32> to vector<8x1xf32>
    %380 = tpu.reciprocal %379 {approx = true} : vector<8x1xf32> -> vector<8x1xf32>
    %381 = vector.broadcast %380 : vector<8x1xf32> to vector<8x8xf32>
    %382 = arith.mulf %377, %381 : vector<8x8xf32>
    %383 = arith.truncf %382 : vector<8x8xf32> to vector<8x8xbf16>
    %384 = arith.truncf %371 : vector<8x16xf32> to vector<8x16xbf16>
    %cst_109 = arith.constant dense<0.000000e+00> : vector<8x16xf32>
    %385 = tpu.matmul %383, %384, %cst_109 {dimension_numbers = #tpu.dot_dimension_numbers<[1], [0], [0], [1], [0, 0, 1, 1], [], []>} : vector<8x8xbf16>, vector<8x16xbf16>, vector<8x16xf32> -> vector<8x16xf32>
    %386 = vector.extract_strided_slice %364 {offsets = [0, 16], sizes = [8, 16], strides = [1, 1]} : vector<8x32xf32> to vector<8x16xf32>
    %cst_110 = arith.constant 2.500000e-01 : f32
    %387 = vector.broadcast %cst_110 : f32 to vector<8x16xf32>
    %388 = arith.mulf %386, %387 : vector<8x16xf32>
    %389 = vector.extract_strided_slice %365 {offsets = [0, 16], sizes = [8, 16], strides = [1, 1]} : vector<8x32xf32> to vector<8x16xf32>
    %390 = vector.extract_strided_slice %366 {offsets = [0, 16], sizes = [8, 16], strides = [1, 1]} : vector<8x32xf32> to vector<8x16xf32>
    %cst_111 = arith.constant dense<0.000000e+00> : vector<8x8xf32>
    %391 = tpu.matmul %388, %389, %cst_111 {dimension_numbers = #tpu.dot_dimension_numbers<[1], [1], [0], [0], [0, 0, 1, 0], [], []>} : vector<8x16xf32>, vector<8x16xf32>, vector<8x8xf32> -> vector<8x8xf32>
    %cst_112 = arith.constant dense<0xFF800000> : vector<8xf32>
    %392 = vector.multi_reduction <maximumf>, %391, %cst_112 [1] : vector<8x8xf32> to vector<8xf32>
    %393 = vector.shape_cast %392 : vector<8xf32> to vector<8x1xf32>
    %394 = vector.broadcast %393 : vector<8x1xf32> to vector<8x8xf32>
    %395 = arith.subf %391, %394 : vector<8x8xf32>
    %396 = math.exp %395 : vector<8x8xf32>
    %cst_113 = arith.constant dense<0.000000e+00> : vector<8xf32>
    %397 = vector.multi_reduction <add>, %396, %cst_113 [1] : vector<8x8xf32> to vector<8xf32>
    %398 = vector.shape_cast %397 : vector<8xf32> to vector<8x1xf32>
    %399 = tpu.reciprocal %398 {approx = true} : vector<8x1xf32> -> vector<8x1xf32>
    %400 = vector.broadcast %399 : vector<8x1xf32> to vector<8x8xf32>
    %401 = arith.mulf %396, %400 : vector<8x8xf32>
    %402 = arith.truncf %401 : vector<8x8xf32> to vector<8x8xbf16>
    %403 = arith.truncf %390 : vector<8x16xf32> to vector<8x16xbf16>
    %cst_114 = arith.constant dense<0.000000e+00> : vector<8x16xf32>
    %404 = tpu.matmul %402, %403, %cst_114 {dimension_numbers = #tpu.dot_dimension_numbers<[1], [0], [0], [1], [0, 0, 1, 1], [], []>} : vector<8x8xbf16>, vector<8x16xbf16>, vector<8x16xf32> -> vector<8x16xf32>
    %405 = vector.extract_strided_slice %273 {offsets = [24, 0], sizes = [8, 32], strides = [1, 1]} : vector<32x32xf32> to vector<8x32xf32>
    %406 = vector.extract_strided_slice %277 {offsets = [24, 0], sizes = [8, 32], strides = [1, 1]} : vector<32x32xf32> to vector<8x32xf32>
    %407 = vector.extract_strided_slice %281 {offsets = [24, 0], sizes = [8, 32], strides = [1, 1]} : vector<32x32xf32> to vector<8x32xf32>
    %408 = vector.extract_strided_slice %405 {offsets = [0, 0], sizes = [8, 16], strides = [1, 1]} : vector<8x32xf32> to vector<8x16xf32>
    %cst_115 = arith.constant 2.500000e-01 : f32
    %409 = vector.broadcast %cst_115 : f32 to vector<8x16xf32>
    %410 = arith.mulf %408, %409 : vector<8x16xf32>
    %411 = vector.extract_strided_slice %406 {offsets = [0, 0], sizes = [8, 16], strides = [1, 1]} : vector<8x32xf32> to vector<8x16xf32>
    %412 = vector.extract_strided_slice %407 {offsets = [0, 0], sizes = [8, 16], strides = [1, 1]} : vector<8x32xf32> to vector<8x16xf32>
    %cst_116 = arith.constant dense<0.000000e+00> : vector<8x8xf32>
    %413 = tpu.matmul %410, %411, %cst_116 {dimension_numbers = #tpu.dot_dimension_numbers<[1], [1], [0], [0], [0, 0, 1, 0], [], []>} : vector<8x16xf32>, vector<8x16xf32>, vector<8x8xf32> -> vector<8x8xf32>
    %cst_117 = arith.constant dense<0xFF800000> : vector<8xf32>
    %414 = vector.multi_reduction <maximumf>, %413, %cst_117 [1] : vector<8x8xf32> to vector<8xf32>
    %415 = vector.shape_cast %414 : vector<8xf32> to vector<8x1xf32>
    %416 = vector.broadcast %415 : vector<8x1xf32> to vector<8x8xf32>
    %417 = arith.subf %413, %416 : vector<8x8xf32>
    %418 = math.exp %417 : vector<8x8xf32>
    %cst_118 = arith.constant dense<0.000000e+00> : vector<8xf32>
    %419 = vector.multi_reduction <add>, %418, %cst_118 [1] : vector<8x8xf32> to vector<8xf32>
    %420 = vector.shape_cast %419 : vector<8xf32> to vector<8x1xf32>
    %421 = tpu.reciprocal %420 {approx = true} : vector<8x1xf32> -> vector<8x1xf32>
    %422 = vector.broadcast %421 : vector<8x1xf32> to vector<8x8xf32>
    %423 = arith.mulf %418, %422 : vector<8x8xf32>
    %424 = arith.truncf %423 : vector<8x8xf32> to vector<8x8xbf16>
    %425 = arith.truncf %412 : vector<8x16xf32> to vector<8x16xbf16>
    %cst_119 = arith.constant dense<0.000000e+00> : vector<8x16xf32>
    %426 = tpu.matmul %424, %425, %cst_119 {dimension_numbers = #tpu.dot_dimension_numbers<[1], [0], [0], [1], [0, 0, 1, 1], [], []>} : vector<8x8xbf16>, vector<8x16xbf16>, vector<8x16xf32> -> vector<8x16xf32>
    %427 = vector.extract_strided_slice %405 {offsets = [0, 16], sizes = [8, 16], strides = [1, 1]} : vector<8x32xf32> to vector<8x16xf32>
    %cst_120 = arith.constant 2.500000e-01 : f32
    %428 = vector.broadcast %cst_120 : f32 to vector<8x16xf32>
    %429 = arith.mulf %427, %428 : vector<8x16xf32>
    %430 = vector.extract_strided_slice %406 {offsets = [0, 16], sizes = [8, 16], strides = [1, 1]} : vector<8x32xf32> to vector<8x16xf32>
    %431 = vector.extract_strided_slice %407 {offsets = [0, 16], sizes = [8, 16], strides = [1, 1]} : vector<8x32xf32> to vector<8x16xf32>
    %cst_121 = arith.constant dense<0.000000e+00> : vector<8x8xf32>
    %432 = tpu.matmul %429, %430, %cst_121 {dimension_numbers = #tpu.dot_dimension_numbers<[1], [1], [0], [0], [0, 0, 1, 0], [], []>} : vector<8x16xf32>, vector<8x16xf32>, vector<8x8xf32> -> vector<8x8xf32>
    %cst_122 = arith.constant dense<0xFF800000> : vector<8xf32>
    %433 = vector.multi_reduction <maximumf>, %432, %cst_122 [1] : vector<8x8xf32> to vector<8xf32>
    %434 = vector.shape_cast %433 : vector<8xf32> to vector<8x1xf32>
    %435 = vector.broadcast %434 : vector<8x1xf32> to vector<8x8xf32>
    %436 = arith.subf %432, %435 : vector<8x8xf32>
    %437 = math.exp %436 : vector<8x8xf32>
    %cst_123 = arith.constant dense<0.000000e+00> : vector<8xf32>
    %438 = vector.multi_reduction <add>, %437, %cst_123 [1] : vector<8x8xf32> to vector<8xf32>
    %439 = vector.shape_cast %438 : vector<8xf32> to vector<8x1xf32>
    %440 = tpu.reciprocal %439 {approx = true} : vector<8x1xf32> -> vector<8x1xf32>
    %441 = vector.broadcast %440 : vector<8x1xf32> to vector<8x8xf32>
    %442 = arith.mulf %437, %441 : vector<8x8xf32>
    %443 = arith.truncf %442 : vector<8x8xf32> to vector<8x8xbf16>
    %444 = arith.truncf %431 : vector<8x16xf32> to vector<8x16xbf16>
    %cst_124 = arith.constant dense<0.000000e+00> : vector<8x16xf32>
    %445 = tpu.matmul %443, %444, %cst_124 {dimension_numbers = #tpu.dot_dimension_numbers<[1], [0], [0], [1], [0, 0, 1, 1], [], []>} : vector<8x8xbf16>, vector<8x16xbf16>, vector<8x16xf32> -> vector<8x16xf32>
    %c336 = arith.constant 336 : index
    %c0_125 = arith.constant 0 : index
    %446 = vector.load %arg3[%c336, %c0_125] : memref<1160x32xf32, #tpu.memory_space<vmem>>, vector<32x32xf32>
    %447 = tpu.concatenate %303, %344, %385, %426 in 0 : vector<8x16xf32>, vector<8x16xf32>, vector<8x16xf32>, vector<8x16xf32> -> vector<32x16xf32>
    %448 = vector.extract_strided_slice %446 {offsets = [0, 0], sizes = [16, 32], strides = [1, 1]} : vector<32x32xf32> to vector<16x32xf32>
    %449 = arith.truncf %447 : vector<32x16xf32> to vector<32x16xbf16>
    %450 = arith.truncf %448 : vector<16x32xf32> to vector<16x32xbf16>
    %cst_126 = arith.constant dense<0.000000e+00> : vector<32x32xf32>
    %451 = tpu.matmul %449, %450, %cst_126 {dimension_numbers = #tpu.dot_dimension_numbers<[1], [0], [0], [1], [0, 0, 1, 1], [], []>} : vector<32x16xbf16>, vector<16x32xbf16>, vector<32x32xf32> -> vector<32x32xf32>
    %452 = tpu.concatenate %322, %363, %404, %445 in 0 : vector<8x16xf32>, vector<8x16xf32>, vector<8x16xf32>, vector<8x16xf32> -> vector<32x16xf32>
    %453 = vector.extract_strided_slice %446 {offsets = [16, 0], sizes = [16, 32], strides = [1, 1]} : vector<32x32xf32> to vector<16x32xf32>
    %454 = arith.truncf %452 : vector<32x16xf32> to vector<32x16xbf16>
    %455 = arith.truncf %453 : vector<16x32xf32> to vector<16x32xbf16>
    %cst_127 = arith.constant dense<0.000000e+00> : vector<32x32xf32>
    %456 = tpu.matmul %454, %455, %cst_127 {dimension_numbers = #tpu.dot_dimension_numbers<[1], [0], [0], [1], [0, 0, 1, 1], [], []>} : vector<32x16xbf16>, vector<16x32xbf16>, vector<32x32xf32> -> vector<32x32xf32>
    %457 = arith.addf %451, %456 : vector<32x32xf32>
    %458 = arith.addf %457, %269 : vector<32x32xf32>
    %c368 = arith.constant 368 : index
    %c0_128 = arith.constant 0 : index
    %459 = vector.load %arg3[%c368, %c0_128] : memref<1160x32xf32, #tpu.memory_space<vmem>>, vector<1x32xf32>
    %c376 = arith.constant 376 : index
    %c0_129 = arith.constant 0 : index
    %460 = vector.load %arg3[%c376, %c0_129] : memref<1160x32xf32, #tpu.memory_space<vmem>>, vector<1x32xf32>
    %cst_130 = arith.constant dense<0.000000e+00> : vector<32xf32>
    %461 = vector.multi_reduction <add>, %458, %cst_130 [1] : vector<32x32xf32> to vector<32xf32>
    %462 = vector.shape_cast %461 : vector<32xf32> to vector<32x1xf32>
    %cst_131 = arith.constant 3.200000e+01 : f32
    %463 = vector.broadcast %cst_131 : f32 to vector<32x1xf32>
    %464 = arith.divf %462, %463 : vector<32x1xf32>
    %465 = vector.broadcast %464 : vector<32x1xf32> to vector<32x32xf32>
    %466 = arith.subf %458, %465 : vector<32x32xf32>
    %467 = arith.mulf %466, %466 : vector<32x32xf32>
    %cst_132 = arith.constant dense<0.000000e+00> : vector<32xf32>
    %468 = vector.multi_reduction <add>, %467, %cst_132 [1] : vector<32x32xf32> to vector<32xf32>
    %469 = vector.shape_cast %468 : vector<32xf32> to vector<32x1xf32>
    %cst_133 = arith.constant 3.200000e+01 : f32
    %470 = vector.broadcast %cst_133 : f32 to vector<32x1xf32>
    %471 = arith.divf %469, %470 : vector<32x1xf32>
    %472 = vector.broadcast %464 : vector<32x1xf32> to vector<32x32xf32>
    %473 = arith.subf %458, %472 : vector<32x32xf32>
    %cst_134 = arith.constant 9.99999974E-6 : f32
    %474 = vector.broadcast %cst_134 : f32 to vector<32x1xf32>
    %475 = arith.addf %471, %474 : vector<32x1xf32>
    %476 = math.rsqrt %475 : vector<32x1xf32>
    %477 = vector.broadcast %476 : vector<32x1xf32> to vector<32x32xf32>
    %478 = arith.mulf %473, %477 : vector<32x32xf32>
    %479 = vector.broadcast %459 : vector<1x32xf32> to vector<32x32xf32>
    %480 = arith.mulf %478, %479 : vector<32x32xf32>
    %481 = vector.broadcast %460 : vector<1x32xf32> to vector<32x32xf32>
    %482 = arith.addf %480, %481 : vector<32x32xf32>
    %c384 = arith.constant 384 : index
    %c0_135 = arith.constant 0 : index
    %483 = vector.load %arg3[%c384, %c0_135] : memref<1160x32xf32, #tpu.memory_space<vmem>>, vector<32x32xf32>
    %484 = arith.truncf %482 : vector<32x32xf32> to vector<32x32xbf16>
    %485 = arith.truncf %483 : vector<32x32xf32> to vector<32x32xbf16>
    %cst_136 = arith.constant dense<0.000000e+00> : vector<32x32xf32>
    %486 = tpu.matmul %484, %485, %cst_136 {dimension_numbers = #tpu.dot_dimension_numbers<[1], [0], [0], [1], [0, 0, 1, 1], [], []>} : vector<32x32xbf16>, vector<32x32xbf16>, vector<32x32xf32> -> vector<32x32xf32>
    %c416 = arith.constant 416 : index
    %c0_137 = arith.constant 0 : index
    %487 = vector.load %arg3[%c416, %c0_137] : memref<1160x32xf32, #tpu.memory_space<vmem>>, vector<1x32xf32>
    %488 = vector.broadcast %487 : vector<1x32xf32> to vector<32x32xf32>
    %489 = arith.addf %486, %488 : vector<32x32xf32>
    %cst_138 = arith.constant 0.000000e+00 : f32
    %490 = vector.broadcast %cst_138 : f32 to vector<32x32xf32>
    %491 = arith.maximumf %489, %490 : vector<32x32xf32>
    %c424 = arith.constant 424 : index
    %c0_139 = arith.constant 0 : index
    %492 = vector.load %arg3[%c424, %c0_139] : memref<1160x32xf32, #tpu.memory_space<vmem>>, vector<32x32xf32>
    %493 = arith.truncf %491 : vector<32x32xf32> to vector<32x32xbf16>
    %494 = arith.truncf %492 : vector<32x32xf32> to vector<32x32xbf16>
    %cst_140 = arith.constant dense<0.000000e+00> : vector<32x32xf32>
    %495 = tpu.matmul %493, %494, %cst_140 {dimension_numbers = #tpu.dot_dimension_numbers<[1], [0], [0], [1], [0, 0, 1, 1], [], []>} : vector<32x32xbf16>, vector<32x32xbf16>, vector<32x32xf32> -> vector<32x32xf32>
    %c456 = arith.constant 456 : index
    %c0_141 = arith.constant 0 : index
    %496 = vector.load %arg3[%c456, %c0_141] : memref<1160x32xf32, #tpu.memory_space<vmem>>, vector<1x32xf32>
    %497 = vector.broadcast %496 : vector<1x32xf32> to vector<32x32xf32>
    %498 = arith.addf %495, %497 : vector<32x32xf32>
    %499 = arith.addf %498, %482 : vector<32x32xf32>
    %c464 = arith.constant 464 : index
    %c0_142 = arith.constant 0 : index
    %500 = vector.load %arg3[%c464, %c0_142] : memref<1160x32xf32, #tpu.memory_space<vmem>>, vector<1x32xf32>
    %c472 = arith.constant 472 : index
    %c0_143 = arith.constant 0 : index
    %501 = vector.load %arg3[%c472, %c0_143] : memref<1160x32xf32, #tpu.memory_space<vmem>>, vector<1x32xf32>
    %cst_144 = arith.constant dense<0.000000e+00> : vector<32xf32>
    %502 = vector.multi_reduction <add>, %499, %cst_144 [1] : vector<32x32xf32> to vector<32xf32>
    %503 = vector.shape_cast %502 : vector<32xf32> to vector<32x1xf32>
    %cst_145 = arith.constant 3.200000e+01 : f32
    %504 = vector.broadcast %cst_145 : f32 to vector<32x1xf32>
    %505 = arith.divf %503, %504 : vector<32x1xf32>
    %506 = vector.broadcast %505 : vector<32x1xf32> to vector<32x32xf32>
    %507 = arith.subf %499, %506 : vector<32x32xf32>
    %508 = arith.mulf %507, %507 : vector<32x32xf32>
    %cst_146 = arith.constant dense<0.000000e+00> : vector<32xf32>
    %509 = vector.multi_reduction <add>, %508, %cst_146 [1] : vector<32x32xf32> to vector<32xf32>
    %510 = vector.shape_cast %509 : vector<32xf32> to vector<32x1xf32>
    %cst_147 = arith.constant 3.200000e+01 : f32
    %511 = vector.broadcast %cst_147 : f32 to vector<32x1xf32>
    %512 = arith.divf %510, %511 : vector<32x1xf32>
    %513 = vector.broadcast %505 : vector<32x1xf32> to vector<32x32xf32>
    %514 = arith.subf %499, %513 : vector<32x32xf32>
    %cst_148 = arith.constant 9.99999974E-6 : f32
    %515 = vector.broadcast %cst_148 : f32 to vector<32x1xf32>
    %516 = arith.addf %512, %515 : vector<32x1xf32>
    %517 = math.rsqrt %516 : vector<32x1xf32>
    %518 = vector.broadcast %517 : vector<32x1xf32> to vector<32x32xf32>
    %519 = arith.mulf %514, %518 : vector<32x32xf32>
    %520 = vector.broadcast %500 : vector<1x32xf32> to vector<32x32xf32>
    %521 = arith.mulf %519, %520 : vector<32x32xf32>
    %522 = vector.broadcast %501 : vector<1x32xf32> to vector<32x32xf32>
    %523 = arith.addf %521, %522 : vector<32x32xf32>
    %524 = tpu.concatenate %300, %341, %382, %423 in 0 : vector<8x8xf32>, vector<8x8xf32>, vector<8x8xf32>, vector<8x8xf32> -> vector<32x8xf32>
    %525 = tpu.concatenate %319, %360, %401, %442 in 0 : vector<8x8xf32>, vector<8x8xf32>, vector<8x8xf32>, vector<8x8xf32> -> vector<32x8xf32>
    %c1008 = arith.constant 1008 : index
    %c0_149 = arith.constant 0 : index
    %526 = vector.load %arg3[%c1008, %c0_149] : memref<1160x32xf32, #tpu.memory_space<vmem>>, vector<32x4xf32>
    %527 = arith.truncf %523 : vector<32x32xf32> to vector<32x32xbf16>
    %528 = arith.truncf %526 : vector<32x4xf32> to vector<32x4xbf16>
    %cst_150 = arith.constant dense<0.000000e+00> : vector<32x4xf32>
    %529 = tpu.matmul %527, %528, %cst_150 {dimension_numbers = #tpu.dot_dimension_numbers<[1], [0], [0], [1], [0, 0, 1, 1], [], []>} : vector<32x32xbf16>, vector<32x4xbf16>, vector<32x4xf32> -> vector<32x4xf32>
    %c1040 = arith.constant 1040 : index
    %c0_151 = arith.constant 0 : index
    %530 = vector.load %arg3[%c1040, %c0_151] : memref<1160x32xf32, #tpu.memory_space<vmem>>, vector<1x4xf32>
    %531 = vector.broadcast %530 : vector<1x4xf32> to vector<32x4xf32>
    %532 = arith.addf %529, %531 : vector<32x4xf32>
    %533 = arith.mulf %1, %0 : vector<32x4xf32>
    %cst_152 = arith.constant 1.000000e+00 : f32
    %534 = vector.broadcast %cst_152 : f32 to vector<32x4xf32>
    %535 = arith.subf %534, %1 : vector<32x4xf32>
    %536 = arith.mulf %535, %532 : vector<32x4xf32>
    %537 = arith.addf %533, %536 : vector<32x4xf32>
    %c984 = arith.constant 984 : index
    %c0_153 = arith.constant 0 : index
    %538 = vector.load %arg3[%c984, %c0_153] : memref<1160x32xf32, #tpu.memory_space<vmem>>, vector<4x32xf32>
    %539 = arith.truncf %537 : vector<32x4xf32> to vector<32x4xbf16>
    %540 = arith.truncf %538 : vector<4x32xf32> to vector<4x32xbf16>
    %cst_154 = arith.constant dense<0.000000e+00> : vector<32x32xf32>
    %541 = tpu.matmul %539, %540, %cst_154 {dimension_numbers = #tpu.dot_dimension_numbers<[1], [0], [0], [1], [0, 0, 1, 1], [], []>} : vector<32x4xbf16>, vector<4x32xbf16>, vector<32x32xf32> -> vector<32x32xf32>
    %c992 = arith.constant 992 : index
    %c0_155 = arith.constant 0 : index
    %542 = vector.load %arg3[%c992, %c0_155] : memref<1160x32xf32, #tpu.memory_space<vmem>>, vector<4x32xf32>
    %543 = arith.truncf %1 : vector<32x4xf32> to vector<32x4xbf16>
    %544 = arith.truncf %542 : vector<4x32xf32> to vector<4x32xbf16>
    %cst_156 = arith.constant dense<0.000000e+00> : vector<32x32xf32>
    %545 = tpu.matmul %543, %544, %cst_156 {dimension_numbers = #tpu.dot_dimension_numbers<[1], [0], [0], [1], [0, 0, 1, 1], [], []>} : vector<32x4xbf16>, vector<4x32xbf16>, vector<32x32xf32> -> vector<32x32xf32>
    %546 = arith.addf %541, %545 : vector<32x32xf32>
    %c1000 = arith.constant 1000 : index
    %c0_157 = arith.constant 0 : index
    %547 = vector.load %arg3[%c1000, %c0_157] : memref<1160x32xf32, #tpu.memory_space<vmem>>, vector<1x32xf32>
    %548 = vector.broadcast %547 : vector<1x32xf32> to vector<32x32xf32>
    %549 = arith.addf %546, %548 : vector<32x32xf32>
    %550 = arith.addf %549, %2 : vector<32x32xf32>
    %c480 = arith.constant 480 : index
    %c0_158 = arith.constant 0 : index
    %551 = vector.load %arg3[%c480, %c0_158] : memref<1160x32xf32, #tpu.memory_space<vmem>>, vector<32x32xf32>
    %552 = arith.truncf %550 : vector<32x32xf32> to vector<32x32xbf16>
    %553 = arith.truncf %551 : vector<32x32xf32> to vector<32x32xbf16>
    %cst_159 = arith.constant dense<0.000000e+00> : vector<32x32xf32>
    %554 = tpu.matmul %552, %553, %cst_159 {dimension_numbers = #tpu.dot_dimension_numbers<[1], [0], [0], [1], [0, 0, 1, 1], [], []>} : vector<32x32xbf16>, vector<32x32xbf16>, vector<32x32xf32> -> vector<32x32xf32>
    %c512 = arith.constant 512 : index
    %c0_160 = arith.constant 0 : index
    %555 = vector.load %arg3[%c512, %c0_160] : memref<1160x32xf32, #tpu.memory_space<vmem>>, vector<32x32xf32>
    %556 = arith.truncf %550 : vector<32x32xf32> to vector<32x32xbf16>
    %557 = arith.truncf %555 : vector<32x32xf32> to vector<32x32xbf16>
    %cst_161 = arith.constant dense<0.000000e+00> : vector<32x32xf32>
    %558 = tpu.matmul %556, %557, %cst_161 {dimension_numbers = #tpu.dot_dimension_numbers<[1], [0], [0], [1], [0, 0, 1, 1], [], []>} : vector<32x32xbf16>, vector<32x32xbf16>, vector<32x32xf32> -> vector<32x32xf32>
    %c544 = arith.constant 544 : index
    %c0_162 = arith.constant 0 : index
    %559 = vector.load %arg3[%c544, %c0_162] : memref<1160x32xf32, #tpu.memory_space<vmem>>, vector<32x32xf32>
    %560 = arith.truncf %550 : vector<32x32xf32> to vector<32x32xbf16>
    %561 = arith.truncf %559 : vector<32x32xf32> to vector<32x32xbf16>
    %cst_163 = arith.constant dense<0.000000e+00> : vector<32x32xf32>
    %562 = tpu.matmul %560, %561, %cst_163 {dimension_numbers = #tpu.dot_dimension_numbers<[1], [0], [0], [1], [0, 0, 1, 1], [], []>} : vector<32x32xbf16>, vector<32x32xbf16>, vector<32x32xf32> -> vector<32x32xf32>
    %563 = vector.extract_strided_slice %554 {offsets = [0, 0], sizes = [8, 32], strides = [1, 1]} : vector<32x32xf32> to vector<8x32xf32>
    %564 = vector.extract_strided_slice %558 {offsets = [0, 0], sizes = [8, 32], strides = [1, 1]} : vector<32x32xf32> to vector<8x32xf32>
    %565 = vector.extract_strided_slice %562 {offsets = [0, 0], sizes = [8, 32], strides = [1, 1]} : vector<32x32xf32> to vector<8x32xf32>
    %566 = vector.extract_strided_slice %563 {offsets = [0, 0], sizes = [8, 16], strides = [1, 1]} : vector<8x32xf32> to vector<8x16xf32>
    %cst_164 = arith.constant 2.500000e-01 : f32
    %567 = vector.broadcast %cst_164 : f32 to vector<8x16xf32>
    %568 = arith.mulf %566, %567 : vector<8x16xf32>
    %569 = vector.extract_strided_slice %564 {offsets = [0, 0], sizes = [8, 16], strides = [1, 1]} : vector<8x32xf32> to vector<8x16xf32>
    %570 = vector.extract_strided_slice %565 {offsets = [0, 0], sizes = [8, 16], strides = [1, 1]} : vector<8x32xf32> to vector<8x16xf32>
    %cst_165 = arith.constant dense<0.000000e+00> : vector<8x8xf32>
    %571 = tpu.matmul %568, %569, %cst_165 {dimension_numbers = #tpu.dot_dimension_numbers<[1], [1], [0], [0], [0, 0, 1, 0], [], []>} : vector<8x16xf32>, vector<8x16xf32>, vector<8x8xf32> -> vector<8x8xf32>
    %cst_166 = arith.constant dense<0xFF800000> : vector<8xf32>
    %572 = vector.multi_reduction <maximumf>, %571, %cst_166 [1] : vector<8x8xf32> to vector<8xf32>
    %573 = vector.shape_cast %572 : vector<8xf32> to vector<8x1xf32>
    %574 = vector.broadcast %573 : vector<8x1xf32> to vector<8x8xf32>
    %575 = arith.subf %571, %574 : vector<8x8xf32>
    %576 = math.exp %575 : vector<8x8xf32>
    %cst_167 = arith.constant dense<0.000000e+00> : vector<8xf32>
    %577 = vector.multi_reduction <add>, %576, %cst_167 [1] : vector<8x8xf32> to vector<8xf32>
    %578 = vector.shape_cast %577 : vector<8xf32> to vector<8x1xf32>
    %579 = tpu.reciprocal %578 {approx = true} : vector<8x1xf32> -> vector<8x1xf32>
    %580 = vector.broadcast %579 : vector<8x1xf32> to vector<8x8xf32>
    %581 = arith.mulf %576, %580 : vector<8x8xf32>
    %582 = arith.truncf %581 : vector<8x8xf32> to vector<8x8xbf16>
    %583 = arith.truncf %570 : vector<8x16xf32> to vector<8x16xbf16>
    %cst_168 = arith.constant dense<0.000000e+00> : vector<8x16xf32>
    %584 = tpu.matmul %582, %583, %cst_168 {dimension_numbers = #tpu.dot_dimension_numbers<[1], [0], [0], [1], [0, 0, 1, 1], [], []>} : vector<8x8xbf16>, vector<8x16xbf16>, vector<8x16xf32> -> vector<8x16xf32>
    %585 = vector.extract_strided_slice %563 {offsets = [0, 16], sizes = [8, 16], strides = [1, 1]} : vector<8x32xf32> to vector<8x16xf32>
    %cst_169 = arith.constant 2.500000e-01 : f32
    %586 = vector.broadcast %cst_169 : f32 to vector<8x16xf32>
    %587 = arith.mulf %585, %586 : vector<8x16xf32>
    %588 = vector.extract_strided_slice %564 {offsets = [0, 16], sizes = [8, 16], strides = [1, 1]} : vector<8x32xf32> to vector<8x16xf32>
    %589 = vector.extract_strided_slice %565 {offsets = [0, 16], sizes = [8, 16], strides = [1, 1]} : vector<8x32xf32> to vector<8x16xf32>
    %cst_170 = arith.constant dense<0.000000e+00> : vector<8x8xf32>
    %590 = tpu.matmul %587, %588, %cst_170 {dimension_numbers = #tpu.dot_dimension_numbers<[1], [1], [0], [0], [0, 0, 1, 0], [], []>} : vector<8x16xf32>, vector<8x16xf32>, vector<8x8xf32> -> vector<8x8xf32>
    %cst_171 = arith.constant dense<0xFF800000> : vector<8xf32>
    %591 = vector.multi_reduction <maximumf>, %590, %cst_171 [1] : vector<8x8xf32> to vector<8xf32>
    %592 = vector.shape_cast %591 : vector<8xf32> to vector<8x1xf32>
    %593 = vector.broadcast %592 : vector<8x1xf32> to vector<8x8xf32>
    %594 = arith.subf %590, %593 : vector<8x8xf32>
    %595 = math.exp %594 : vector<8x8xf32>
    %cst_172 = arith.constant dense<0.000000e+00> : vector<8xf32>
    %596 = vector.multi_reduction <add>, %595, %cst_172 [1] : vector<8x8xf32> to vector<8xf32>
    %597 = vector.shape_cast %596 : vector<8xf32> to vector<8x1xf32>
    %598 = tpu.reciprocal %597 {approx = true} : vector<8x1xf32> -> vector<8x1xf32>
    %599 = vector.broadcast %598 : vector<8x1xf32> to vector<8x8xf32>
    %600 = arith.mulf %595, %599 : vector<8x8xf32>
    %601 = arith.truncf %600 : vector<8x8xf32> to vector<8x8xbf16>
    %602 = arith.truncf %589 : vector<8x16xf32> to vector<8x16xbf16>
    %cst_173 = arith.constant dense<0.000000e+00> : vector<8x16xf32>
    %603 = tpu.matmul %601, %602, %cst_173 {dimension_numbers = #tpu.dot_dimension_numbers<[1], [0], [0], [1], [0, 0, 1, 1], [], []>} : vector<8x8xbf16>, vector<8x16xbf16>, vector<8x16xf32> -> vector<8x16xf32>
    %604 = vector.extract_strided_slice %554 {offsets = [8, 0], sizes = [8, 32], strides = [1, 1]} : vector<32x32xf32> to vector<8x32xf32>
    %605 = vector.extract_strided_slice %558 {offsets = [8, 0], sizes = [8, 32], strides = [1, 1]} : vector<32x32xf32> to vector<8x32xf32>
    %606 = vector.extract_strided_slice %562 {offsets = [8, 0], sizes = [8, 32], strides = [1, 1]} : vector<32x32xf32> to vector<8x32xf32>
    %607 = vector.extract_strided_slice %604 {offsets = [0, 0], sizes = [8, 16], strides = [1, 1]} : vector<8x32xf32> to vector<8x16xf32>
    %cst_174 = arith.constant 2.500000e-01 : f32
    %608 = vector.broadcast %cst_174 : f32 to vector<8x16xf32>
    %609 = arith.mulf %607, %608 : vector<8x16xf32>
    %610 = vector.extract_strided_slice %605 {offsets = [0, 0], sizes = [8, 16], strides = [1, 1]} : vector<8x32xf32> to vector<8x16xf32>
    %611 = vector.extract_strided_slice %606 {offsets = [0, 0], sizes = [8, 16], strides = [1, 1]} : vector<8x32xf32> to vector<8x16xf32>
    %cst_175 = arith.constant dense<0.000000e+00> : vector<8x8xf32>
    %612 = tpu.matmul %609, %610, %cst_175 {dimension_numbers = #tpu.dot_dimension_numbers<[1], [1], [0], [0], [0, 0, 1, 0], [], []>} : vector<8x16xf32>, vector<8x16xf32>, vector<8x8xf32> -> vector<8x8xf32>
    %cst_176 = arith.constant dense<0xFF800000> : vector<8xf32>
    %613 = vector.multi_reduction <maximumf>, %612, %cst_176 [1] : vector<8x8xf32> to vector<8xf32>
    %614 = vector.shape_cast %613 : vector<8xf32> to vector<8x1xf32>
    %615 = vector.broadcast %614 : vector<8x1xf32> to vector<8x8xf32>
    %616 = arith.subf %612, %615 : vector<8x8xf32>
    %617 = math.exp %616 : vector<8x8xf32>
    %cst_177 = arith.constant dense<0.000000e+00> : vector<8xf32>
    %618 = vector.multi_reduction <add>, %617, %cst_177 [1] : vector<8x8xf32> to vector<8xf32>
    %619 = vector.shape_cast %618 : vector<8xf32> to vector<8x1xf32>
    %620 = tpu.reciprocal %619 {approx = true} : vector<8x1xf32> -> vector<8x1xf32>
    %621 = vector.broadcast %620 : vector<8x1xf32> to vector<8x8xf32>
    %622 = arith.mulf %617, %621 : vector<8x8xf32>
    %623 = arith.truncf %622 : vector<8x8xf32> to vector<8x8xbf16>
    %624 = arith.truncf %611 : vector<8x16xf32> to vector<8x16xbf16>
    %cst_178 = arith.constant dense<0.000000e+00> : vector<8x16xf32>
    %625 = tpu.matmul %623, %624, %cst_178 {dimension_numbers = #tpu.dot_dimension_numbers<[1], [0], [0], [1], [0, 0, 1, 1], [], []>} : vector<8x8xbf16>, vector<8x16xbf16>, vector<8x16xf32> -> vector<8x16xf32>
    %626 = vector.extract_strided_slice %604 {offsets = [0, 16], sizes = [8, 16], strides = [1, 1]} : vector<8x32xf32> to vector<8x16xf32>
    %cst_179 = arith.constant 2.500000e-01 : f32
    %627 = vector.broadcast %cst_179 : f32 to vector<8x16xf32>
    %628 = arith.mulf %626, %627 : vector<8x16xf32>
    %629 = vector.extract_strided_slice %605 {offsets = [0, 16], sizes = [8, 16], strides = [1, 1]} : vector<8x32xf32> to vector<8x16xf32>
    %630 = vector.extract_strided_slice %606 {offsets = [0, 16], sizes = [8, 16], strides = [1, 1]} : vector<8x32xf32> to vector<8x16xf32>
    %cst_180 = arith.constant dense<0.000000e+00> : vector<8x8xf32>
    %631 = tpu.matmul %628, %629, %cst_180 {dimension_numbers = #tpu.dot_dimension_numbers<[1], [1], [0], [0], [0, 0, 1, 0], [], []>} : vector<8x16xf32>, vector<8x16xf32>, vector<8x8xf32> -> vector<8x8xf32>
    %cst_181 = arith.constant dense<0xFF800000> : vector<8xf32>
    %632 = vector.multi_reduction <maximumf>, %631, %cst_181 [1] : vector<8x8xf32> to vector<8xf32>
    %633 = vector.shape_cast %632 : vector<8xf32> to vector<8x1xf32>
    %634 = vector.broadcast %633 : vector<8x1xf32> to vector<8x8xf32>
    %635 = arith.subf %631, %634 : vector<8x8xf32>
    %636 = math.exp %635 : vector<8x8xf32>
    %cst_182 = arith.constant dense<0.000000e+00> : vector<8xf32>
    %637 = vector.multi_reduction <add>, %636, %cst_182 [1] : vector<8x8xf32> to vector<8xf32>
    %638 = vector.shape_cast %637 : vector<8xf32> to vector<8x1xf32>
    %639 = tpu.reciprocal %638 {approx = true} : vector<8x1xf32> -> vector<8x1xf32>
    %640 = vector.broadcast %639 : vector<8x1xf32> to vector<8x8xf32>
    %641 = arith.mulf %636, %640 : vector<8x8xf32>
    %642 = arith.truncf %641 : vector<8x8xf32> to vector<8x8xbf16>
    %643 = arith.truncf %630 : vector<8x16xf32> to vector<8x16xbf16>
    %cst_183 = arith.constant dense<0.000000e+00> : vector<8x16xf32>
    %644 = tpu.matmul %642, %643, %cst_183 {dimension_numbers = #tpu.dot_dimension_numbers<[1], [0], [0], [1], [0, 0, 1, 1], [], []>} : vector<8x8xbf16>, vector<8x16xbf16>, vector<8x16xf32> -> vector<8x16xf32>
    %645 = vector.extract_strided_slice %554 {offsets = [16, 0], sizes = [8, 32], strides = [1, 1]} : vector<32x32xf32> to vector<8x32xf32>
    %646 = vector.extract_strided_slice %558 {offsets = [16, 0], sizes = [8, 32], strides = [1, 1]} : vector<32x32xf32> to vector<8x32xf32>
    %647 = vector.extract_strided_slice %562 {offsets = [16, 0], sizes = [8, 32], strides = [1, 1]} : vector<32x32xf32> to vector<8x32xf32>
    %648 = vector.extract_strided_slice %645 {offsets = [0, 0], sizes = [8, 16], strides = [1, 1]} : vector<8x32xf32> to vector<8x16xf32>
    %cst_184 = arith.constant 2.500000e-01 : f32
    %649 = vector.broadcast %cst_184 : f32 to vector<8x16xf32>
    %650 = arith.mulf %648, %649 : vector<8x16xf32>
    %651 = vector.extract_strided_slice %646 {offsets = [0, 0], sizes = [8, 16], strides = [1, 1]} : vector<8x32xf32> to vector<8x16xf32>
    %652 = vector.extract_strided_slice %647 {offsets = [0, 0], sizes = [8, 16], strides = [1, 1]} : vector<8x32xf32> to vector<8x16xf32>
    %cst_185 = arith.constant dense<0.000000e+00> : vector<8x8xf32>
    %653 = tpu.matmul %650, %651, %cst_185 {dimension_numbers = #tpu.dot_dimension_numbers<[1], [1], [0], [0], [0, 0, 1, 0], [], []>} : vector<8x16xf32>, vector<8x16xf32>, vector<8x8xf32> -> vector<8x8xf32>
    %cst_186 = arith.constant dense<0xFF800000> : vector<8xf32>
    %654 = vector.multi_reduction <maximumf>, %653, %cst_186 [1] : vector<8x8xf32> to vector<8xf32>
    %655 = vector.shape_cast %654 : vector<8xf32> to vector<8x1xf32>
    %656 = vector.broadcast %655 : vector<8x1xf32> to vector<8x8xf32>
    %657 = arith.subf %653, %656 : vector<8x8xf32>
    %658 = math.exp %657 : vector<8x8xf32>
    %cst_187 = arith.constant dense<0.000000e+00> : vector<8xf32>
    %659 = vector.multi_reduction <add>, %658, %cst_187 [1] : vector<8x8xf32> to vector<8xf32>
    %660 = vector.shape_cast %659 : vector<8xf32> to vector<8x1xf32>
    %661 = tpu.reciprocal %660 {approx = true} : vector<8x1xf32> -> vector<8x1xf32>
    %662 = vector.broadcast %661 : vector<8x1xf32> to vector<8x8xf32>
    %663 = arith.mulf %658, %662 : vector<8x8xf32>
    %664 = arith.truncf %663 : vector<8x8xf32> to vector<8x8xbf16>
    %665 = arith.truncf %652 : vector<8x16xf32> to vector<8x16xbf16>
    %cst_188 = arith.constant dense<0.000000e+00> : vector<8x16xf32>
    %666 = tpu.matmul %664, %665, %cst_188 {dimension_numbers = #tpu.dot_dimension_numbers<[1], [0], [0], [1], [0, 0, 1, 1], [], []>} : vector<8x8xbf16>, vector<8x16xbf16>, vector<8x16xf32> -> vector<8x16xf32>
    %667 = vector.extract_strided_slice %645 {offsets = [0, 16], sizes = [8, 16], strides = [1, 1]} : vector<8x32xf32> to vector<8x16xf32>
    %cst_189 = arith.constant 2.500000e-01 : f32
    %668 = vector.broadcast %cst_189 : f32 to vector<8x16xf32>
    %669 = arith.mulf %667, %668 : vector<8x16xf32>
    %670 = vector.extract_strided_slice %646 {offsets = [0, 16], sizes = [8, 16], strides = [1, 1]} : vector<8x32xf32> to vector<8x16xf32>
    %671 = vector.extract_strided_slice %647 {offsets = [0, 16], sizes = [8, 16], strides = [1, 1]} : vector<8x32xf32> to vector<8x16xf32>
    %cst_190 = arith.constant dense<0.000000e+00> : vector<8x8xf32>
    %672 = tpu.matmul %669, %670, %cst_190 {dimension_numbers = #tpu.dot_dimension_numbers<[1], [1], [0], [0], [0, 0, 1, 0], [], []>} : vector<8x16xf32>, vector<8x16xf32>, vector<8x8xf32> -> vector<8x8xf32>
    %cst_191 = arith.constant dense<0xFF800000> : vector<8xf32>
    %673 = vector.multi_reduction <maximumf>, %672, %cst_191 [1] : vector<8x8xf32> to vector<8xf32>
    %674 = vector.shape_cast %673 : vector<8xf32> to vector<8x1xf32>
    %675 = vector.broadcast %674 : vector<8x1xf32> to vector<8x8xf32>
    %676 = arith.subf %672, %675 : vector<8x8xf32>
    %677 = math.exp %676 : vector<8x8xf32>
    %cst_192 = arith.constant dense<0.000000e+00> : vector<8xf32>
    %678 = vector.multi_reduction <add>, %677, %cst_192 [1] : vector<8x8xf32> to vector<8xf32>
    %679 = vector.shape_cast %678 : vector<8xf32> to vector<8x1xf32>
    %680 = tpu.reciprocal %679 {approx = true} : vector<8x1xf32> -> vector<8x1xf32>
    %681 = vector.broadcast %680 : vector<8x1xf32> to vector<8x8xf32>
    %682 = arith.mulf %677, %681 : vector<8x8xf32>
    %683 = arith.truncf %682 : vector<8x8xf32> to vector<8x8xbf16>
    %684 = arith.truncf %671 : vector<8x16xf32> to vector<8x16xbf16>
    %cst_193 = arith.constant dense<0.000000e+00> : vector<8x16xf32>
    %685 = tpu.matmul %683, %684, %cst_193 {dimension_numbers = #tpu.dot_dimension_numbers<[1], [0], [0], [1], [0, 0, 1, 1], [], []>} : vector<8x8xbf16>, vector<8x16xbf16>, vector<8x16xf32> -> vector<8x16xf32>
    %686 = vector.extract_strided_slice %554 {offsets = [24, 0], sizes = [8, 32], strides = [1, 1]} : vector<32x32xf32> to vector<8x32xf32>
    %687 = vector.extract_strided_slice %558 {offsets = [24, 0], sizes = [8, 32], strides = [1, 1]} : vector<32x32xf32> to vector<8x32xf32>
    %688 = vector.extract_strided_slice %562 {offsets = [24, 0], sizes = [8, 32], strides = [1, 1]} : vector<32x32xf32> to vector<8x32xf32>
    %689 = vector.extract_strided_slice %686 {offsets = [0, 0], sizes = [8, 16], strides = [1, 1]} : vector<8x32xf32> to vector<8x16xf32>
    %cst_194 = arith.constant 2.500000e-01 : f32
    %690 = vector.broadcast %cst_194 : f32 to vector<8x16xf32>
    %691 = arith.mulf %689, %690 : vector<8x16xf32>
    %692 = vector.extract_strided_slice %687 {offsets = [0, 0], sizes = [8, 16], strides = [1, 1]} : vector<8x32xf32> to vector<8x16xf32>
    %693 = vector.extract_strided_slice %688 {offsets = [0, 0], sizes = [8, 16], strides = [1, 1]} : vector<8x32xf32> to vector<8x16xf32>
    %cst_195 = arith.constant dense<0.000000e+00> : vector<8x8xf32>
    %694 = tpu.matmul %691, %692, %cst_195 {dimension_numbers = #tpu.dot_dimension_numbers<[1], [1], [0], [0], [0, 0, 1, 0], [], []>} : vector<8x16xf32>, vector<8x16xf32>, vector<8x8xf32> -> vector<8x8xf32>
    %cst_196 = arith.constant dense<0xFF800000> : vector<8xf32>
    %695 = vector.multi_reduction <maximumf>, %694, %cst_196 [1] : vector<8x8xf32> to vector<8xf32>
    %696 = vector.shape_cast %695 : vector<8xf32> to vector<8x1xf32>
    %697 = vector.broadcast %696 : vector<8x1xf32> to vector<8x8xf32>
    %698 = arith.subf %694, %697 : vector<8x8xf32>
    %699 = math.exp %698 : vector<8x8xf32>
    %cst_197 = arith.constant dense<0.000000e+00> : vector<8xf32>
    %700 = vector.multi_reduction <add>, %699, %cst_197 [1] : vector<8x8xf32> to vector<8xf32>
    %701 = vector.shape_cast %700 : vector<8xf32> to vector<8x1xf32>
    %702 = tpu.reciprocal %701 {approx = true} : vector<8x1xf32> -> vector<8x1xf32>
    %703 = vector.broadcast %702 : vector<8x1xf32> to vector<8x8xf32>
    %704 = arith.mulf %699, %703 : vector<8x8xf32>
    %705 = arith.truncf %704 : vector<8x8xf32> to vector<8x8xbf16>
    %706 = arith.truncf %693 : vector<8x16xf32> to vector<8x16xbf16>
    %cst_198 = arith.constant dense<0.000000e+00> : vector<8x16xf32>
    %707 = tpu.matmul %705, %706, %cst_198 {dimension_numbers = #tpu.dot_dimension_numbers<[1], [0], [0], [1], [0, 0, 1, 1], [], []>} : vector<8x8xbf16>, vector<8x16xbf16>, vector<8x16xf32> -> vector<8x16xf32>
    %708 = vector.extract_strided_slice %686 {offsets = [0, 16], sizes = [8, 16], strides = [1, 1]} : vector<8x32xf32> to vector<8x16xf32>
    %cst_199 = arith.constant 2.500000e-01 : f32
    %709 = vector.broadcast %cst_199 : f32 to vector<8x16xf32>
    %710 = arith.mulf %708, %709 : vector<8x16xf32>
    %711 = vector.extract_strided_slice %687 {offsets = [0, 16], sizes = [8, 16], strides = [1, 1]} : vector<8x32xf32> to vector<8x16xf32>
    %712 = vector.extract_strided_slice %688 {offsets = [0, 16], sizes = [8, 16], strides = [1, 1]} : vector<8x32xf32> to vector<8x16xf32>
    %cst_200 = arith.constant dense<0.000000e+00> : vector<8x8xf32>
    %713 = tpu.matmul %710, %711, %cst_200 {dimension_numbers = #tpu.dot_dimension_numbers<[1], [1], [0], [0], [0, 0, 1, 0], [], []>} : vector<8x16xf32>, vector<8x16xf32>, vector<8x8xf32> -> vector<8x8xf32>
    %cst_201 = arith.constant dense<0xFF800000> : vector<8xf32>
    %714 = vector.multi_reduction <maximumf>, %713, %cst_201 [1] : vector<8x8xf32> to vector<8xf32>
    %715 = vector.shape_cast %714 : vector<8xf32> to vector<8x1xf32>
    %716 = vector.broadcast %715 : vector<8x1xf32> to vector<8x8xf32>
    %717 = arith.subf %713, %716 : vector<8x8xf32>
    %718 = math.exp %717 : vector<8x8xf32>
    %cst_202 = arith.constant dense<0.000000e+00> : vector<8xf32>
    %719 = vector.multi_reduction <add>, %718, %cst_202 [1] : vector<8x8xf32> to vector<8xf32>
    %720 = vector.shape_cast %719 : vector<8xf32> to vector<8x1xf32>
    %721 = tpu.reciprocal %720 {approx = true} : vector<8x1xf32> -> vector<8x1xf32>
    %722 = vector.broadcast %721 : vector<8x1xf32> to vector<8x8xf32>
    %723 = arith.mulf %718, %722 : vector<8x8xf32>
    %724 = arith.truncf %723 : vector<8x8xf32> to vector<8x8xbf16>
    %725 = arith.truncf %712 : vector<8x16xf32> to vector<8x16xbf16>
    %cst_203 = arith.constant dense<0.000000e+00> : vector<8x16xf32>
    %726 = tpu.matmul %724, %725, %cst_203 {dimension_numbers = #tpu.dot_dimension_numbers<[1], [0], [0], [1], [0, 0, 1, 1], [], []>} : vector<8x8xbf16>, vector<8x16xbf16>, vector<8x16xf32> -> vector<8x16xf32>
    %c576 = arith.constant 576 : index
    %c0_204 = arith.constant 0 : index
    %727 = vector.load %arg3[%c576, %c0_204] : memref<1160x32xf32, #tpu.memory_space<vmem>>, vector<32x32xf32>
    %728 = tpu.concatenate %584, %625, %666, %707 in 0 : vector<8x16xf32>, vector<8x16xf32>, vector<8x16xf32>, vector<8x16xf32> -> vector<32x16xf32>
    %729 = vector.extract_strided_slice %727 {offsets = [0, 0], sizes = [16, 32], strides = [1, 1]} : vector<32x32xf32> to vector<16x32xf32>
    %730 = arith.truncf %728 : vector<32x16xf32> to vector<32x16xbf16>
    %731 = arith.truncf %729 : vector<16x32xf32> to vector<16x32xbf16>
    %cst_205 = arith.constant dense<0.000000e+00> : vector<32x32xf32>
    %732 = tpu.matmul %730, %731, %cst_205 {dimension_numbers = #tpu.dot_dimension_numbers<[1], [0], [0], [1], [0, 0, 1, 1], [], []>} : vector<32x16xbf16>, vector<16x32xbf16>, vector<32x32xf32> -> vector<32x32xf32>
    %733 = tpu.concatenate %603, %644, %685, %726 in 0 : vector<8x16xf32>, vector<8x16xf32>, vector<8x16xf32>, vector<8x16xf32> -> vector<32x16xf32>
    %734 = vector.extract_strided_slice %727 {offsets = [16, 0], sizes = [16, 32], strides = [1, 1]} : vector<32x32xf32> to vector<16x32xf32>
    %735 = arith.truncf %733 : vector<32x16xf32> to vector<32x16xbf16>
    %736 = arith.truncf %734 : vector<16x32xf32> to vector<16x32xbf16>
    %cst_206 = arith.constant dense<0.000000e+00> : vector<32x32xf32>
    %737 = tpu.matmul %735, %736, %cst_206 {dimension_numbers = #tpu.dot_dimension_numbers<[1], [0], [0], [1], [0, 0, 1, 1], [], []>} : vector<32x16xbf16>, vector<16x32xbf16>, vector<32x32xf32> -> vector<32x32xf32>
    %738 = arith.addf %732, %737 : vector<32x32xf32>
    %739 = arith.addf %738, %550 : vector<32x32xf32>
    %c608 = arith.constant 608 : index
    %c0_207 = arith.constant 0 : index
    %740 = vector.load %arg3[%c608, %c0_207] : memref<1160x32xf32, #tpu.memory_space<vmem>>, vector<1x32xf32>
    %c616 = arith.constant 616 : index
    %c0_208 = arith.constant 0 : index
    %741 = vector.load %arg3[%c616, %c0_208] : memref<1160x32xf32, #tpu.memory_space<vmem>>, vector<1x32xf32>
    %cst_209 = arith.constant dense<0.000000e+00> : vector<32xf32>
    %742 = vector.multi_reduction <add>, %739, %cst_209 [1] : vector<32x32xf32> to vector<32xf32>
    %743 = vector.shape_cast %742 : vector<32xf32> to vector<32x1xf32>
    %cst_210 = arith.constant 3.200000e+01 : f32
    %744 = vector.broadcast %cst_210 : f32 to vector<32x1xf32>
    %745 = arith.divf %743, %744 : vector<32x1xf32>
    %746 = vector.broadcast %745 : vector<32x1xf32> to vector<32x32xf32>
    %747 = arith.subf %739, %746 : vector<32x32xf32>
    %748 = arith.mulf %747, %747 : vector<32x32xf32>
    %cst_211 = arith.constant dense<0.000000e+00> : vector<32xf32>
    %749 = vector.multi_reduction <add>, %748, %cst_211 [1] : vector<32x32xf32> to vector<32xf32>
    %750 = vector.shape_cast %749 : vector<32xf32> to vector<32x1xf32>
    %cst_212 = arith.constant 3.200000e+01 : f32
    %751 = vector.broadcast %cst_212 : f32 to vector<32x1xf32>
    %752 = arith.divf %750, %751 : vector<32x1xf32>
    %753 = vector.broadcast %745 : vector<32x1xf32> to vector<32x32xf32>
    %754 = arith.subf %739, %753 : vector<32x32xf32>
    %cst_213 = arith.constant 9.99999974E-6 : f32
    %755 = vector.broadcast %cst_213 : f32 to vector<32x1xf32>
    %756 = arith.addf %752, %755 : vector<32x1xf32>
    %757 = math.rsqrt %756 : vector<32x1xf32>
    %758 = vector.broadcast %757 : vector<32x1xf32> to vector<32x32xf32>
    %759 = arith.mulf %754, %758 : vector<32x32xf32>
    %760 = vector.broadcast %740 : vector<1x32xf32> to vector<32x32xf32>
    %761 = arith.mulf %759, %760 : vector<32x32xf32>
    %762 = vector.broadcast %741 : vector<1x32xf32> to vector<32x32xf32>
    %763 = arith.addf %761, %762 : vector<32x32xf32>
    %c624 = arith.constant 624 : index
    %c0_214 = arith.constant 0 : index
    %764 = vector.load %arg3[%c624, %c0_214] : memref<1160x32xf32, #tpu.memory_space<vmem>>, vector<32x32xf32>
    %765 = arith.truncf %763 : vector<32x32xf32> to vector<32x32xbf16>
    %766 = arith.truncf %764 : vector<32x32xf32> to vector<32x32xbf16>
    %cst_215 = arith.constant dense<0.000000e+00> : vector<32x32xf32>
    %767 = tpu.matmul %765, %766, %cst_215 {dimension_numbers = #tpu.dot_dimension_numbers<[1], [0], [0], [1], [0, 0, 1, 1], [], []>} : vector<32x32xbf16>, vector<32x32xbf16>, vector<32x32xf32> -> vector<32x32xf32>
    %c656 = arith.constant 656 : index
    %c0_216 = arith.constant 0 : index
    %768 = vector.load %arg3[%c656, %c0_216] : memref<1160x32xf32, #tpu.memory_space<vmem>>, vector<1x32xf32>
    %769 = vector.broadcast %768 : vector<1x32xf32> to vector<32x32xf32>
    %770 = arith.addf %767, %769 : vector<32x32xf32>
    %cst_217 = arith.constant 0.000000e+00 : f32
    %771 = vector.broadcast %cst_217 : f32 to vector<32x32xf32>
    %772 = arith.maximumf %770, %771 : vector<32x32xf32>
    %c664 = arith.constant 664 : index
    %c0_218 = arith.constant 0 : index
    %773 = vector.load %arg3[%c664, %c0_218] : memref<1160x32xf32, #tpu.memory_space<vmem>>, vector<32x32xf32>
    %774 = arith.truncf %772 : vector<32x32xf32> to vector<32x32xbf16>
    %775 = arith.truncf %773 : vector<32x32xf32> to vector<32x32xbf16>
    %cst_219 = arith.constant dense<0.000000e+00> : vector<32x32xf32>
    %776 = tpu.matmul %774, %775, %cst_219 {dimension_numbers = #tpu.dot_dimension_numbers<[1], [0], [0], [1], [0, 0, 1, 1], [], []>} : vector<32x32xbf16>, vector<32x32xbf16>, vector<32x32xf32> -> vector<32x32xf32>
    %c696 = arith.constant 696 : index
    %c0_220 = arith.constant 0 : index
    %777 = vector.load %arg3[%c696, %c0_220] : memref<1160x32xf32, #tpu.memory_space<vmem>>, vector<1x32xf32>
    %778 = vector.broadcast %777 : vector<1x32xf32> to vector<32x32xf32>
    %779 = arith.addf %776, %778 : vector<32x32xf32>
    %780 = arith.addf %779, %763 : vector<32x32xf32>
    %c704 = arith.constant 704 : index
    %c0_221 = arith.constant 0 : index
    %781 = vector.load %arg3[%c704, %c0_221] : memref<1160x32xf32, #tpu.memory_space<vmem>>, vector<1x32xf32>
    %c712 = arith.constant 712 : index
    %c0_222 = arith.constant 0 : index
    %782 = vector.load %arg3[%c712, %c0_222] : memref<1160x32xf32, #tpu.memory_space<vmem>>, vector<1x32xf32>
    %cst_223 = arith.constant dense<0.000000e+00> : vector<32xf32>
    %783 = vector.multi_reduction <add>, %780, %cst_223 [1] : vector<32x32xf32> to vector<32xf32>
    %784 = vector.shape_cast %783 : vector<32xf32> to vector<32x1xf32>
    %cst_224 = arith.constant 3.200000e+01 : f32
    %785 = vector.broadcast %cst_224 : f32 to vector<32x1xf32>
    %786 = arith.divf %784, %785 : vector<32x1xf32>
    %787 = vector.broadcast %786 : vector<32x1xf32> to vector<32x32xf32>
    %788 = arith.subf %780, %787 : vector<32x32xf32>
    %789 = arith.mulf %788, %788 : vector<32x32xf32>
    %cst_225 = arith.constant dense<0.000000e+00> : vector<32xf32>
    %790 = vector.multi_reduction <add>, %789, %cst_225 [1] : vector<32x32xf32> to vector<32xf32>
    %791 = vector.shape_cast %790 : vector<32xf32> to vector<32x1xf32>
    %cst_226 = arith.constant 3.200000e+01 : f32
    %792 = vector.broadcast %cst_226 : f32 to vector<32x1xf32>
    %793 = arith.divf %791, %792 : vector<32x1xf32>
    %794 = vector.broadcast %786 : vector<32x1xf32> to vector<32x32xf32>
    %795 = arith.subf %780, %794 : vector<32x32xf32>
    %cst_227 = arith.constant 9.99999974E-6 : f32
    %796 = vector.broadcast %cst_227 : f32 to vector<32x1xf32>
    %797 = arith.addf %793, %796 : vector<32x1xf32>
    %798 = math.rsqrt %797 : vector<32x1xf32>
    %799 = vector.broadcast %798 : vector<32x1xf32> to vector<32x32xf32>
    %800 = arith.mulf %795, %799 : vector<32x32xf32>
    %801 = vector.broadcast %781 : vector<1x32xf32> to vector<32x32xf32>
    %802 = arith.mulf %800, %801 : vector<32x32xf32>
    %803 = vector.broadcast %782 : vector<1x32xf32> to vector<32x32xf32>
    %804 = arith.addf %802, %803 : vector<32x32xf32>
    %c720 = arith.constant 720 : index
    %c0_228 = arith.constant 0 : index
    %805 = vector.load %arg3[%c720, %c0_228] : memref<1160x32xf32, #tpu.memory_space<vmem>>, vector<32x32xf32>
    %806 = arith.truncf %804 : vector<32x32xf32> to vector<32x32xbf16>
    %807 = arith.truncf %805 : vector<32x32xf32> to vector<32x32xbf16>
    %cst_229 = arith.constant dense<0.000000e+00> : vector<32x32xf32>
    %808 = tpu.matmul %806, %807, %cst_229 {dimension_numbers = #tpu.dot_dimension_numbers<[1], [0], [0], [1], [0, 0, 1, 1], [], []>} : vector<32x32xbf16>, vector<32x32xbf16>, vector<32x32xf32> -> vector<32x32xf32>
    %c752 = arith.constant 752 : index
    %c0_230 = arith.constant 0 : index
    %809 = vector.load %arg3[%c752, %c0_230] : memref<1160x32xf32, #tpu.memory_space<vmem>>, vector<32x32xf32>
    %810 = arith.truncf %804 : vector<32x32xf32> to vector<32x32xbf16>
    %811 = arith.truncf %809 : vector<32x32xf32> to vector<32x32xbf16>
    %cst_231 = arith.constant dense<0.000000e+00> : vector<32x32xf32>
    %812 = tpu.matmul %810, %811, %cst_231 {dimension_numbers = #tpu.dot_dimension_numbers<[1], [0], [0], [1], [0, 0, 1, 1], [], []>} : vector<32x32xbf16>, vector<32x32xbf16>, vector<32x32xf32> -> vector<32x32xf32>
    %c784 = arith.constant 784 : index
    %c0_232 = arith.constant 0 : index
    %813 = vector.load %arg3[%c784, %c0_232] : memref<1160x32xf32, #tpu.memory_space<vmem>>, vector<32x32xf32>
    %814 = arith.truncf %804 : vector<32x32xf32> to vector<32x32xbf16>
    %815 = arith.truncf %813 : vector<32x32xf32> to vector<32x32xbf16>
    %cst_233 = arith.constant dense<0.000000e+00> : vector<32x32xf32>
    %816 = tpu.matmul %814, %815, %cst_233 {dimension_numbers = #tpu.dot_dimension_numbers<[1], [0], [0], [1], [0, 0, 1, 1], [], []>} : vector<32x32xbf16>, vector<32x32xbf16>, vector<32x32xf32> -> vector<32x32xf32>
    %817 = vector.extract_strided_slice %808 {offsets = [0, 0], sizes = [8, 32], strides = [1, 1]} : vector<32x32xf32> to vector<8x32xf32>
    %818 = vector.extract_strided_slice %812 {offsets = [0, 0], sizes = [8, 32], strides = [1, 1]} : vector<32x32xf32> to vector<8x32xf32>
    %819 = vector.extract_strided_slice %816 {offsets = [0, 0], sizes = [8, 32], strides = [1, 1]} : vector<32x32xf32> to vector<8x32xf32>
    %820 = vector.extract_strided_slice %817 {offsets = [0, 0], sizes = [8, 16], strides = [1, 1]} : vector<8x32xf32> to vector<8x16xf32>
    %cst_234 = arith.constant 2.500000e-01 : f32
    %821 = vector.broadcast %cst_234 : f32 to vector<8x16xf32>
    %822 = arith.mulf %820, %821 : vector<8x16xf32>
    %823 = vector.extract_strided_slice %818 {offsets = [0, 0], sizes = [8, 16], strides = [1, 1]} : vector<8x32xf32> to vector<8x16xf32>
    %824 = vector.extract_strided_slice %819 {offsets = [0, 0], sizes = [8, 16], strides = [1, 1]} : vector<8x32xf32> to vector<8x16xf32>
    %cst_235 = arith.constant dense<0.000000e+00> : vector<8x8xf32>
    %825 = tpu.matmul %822, %823, %cst_235 {dimension_numbers = #tpu.dot_dimension_numbers<[1], [1], [0], [0], [0, 0, 1, 0], [], []>} : vector<8x16xf32>, vector<8x16xf32>, vector<8x8xf32> -> vector<8x8xf32>
    %cst_236 = arith.constant dense<0xFF800000> : vector<8xf32>
    %826 = vector.multi_reduction <maximumf>, %825, %cst_236 [1] : vector<8x8xf32> to vector<8xf32>
    %827 = vector.shape_cast %826 : vector<8xf32> to vector<8x1xf32>
    %828 = vector.broadcast %827 : vector<8x1xf32> to vector<8x8xf32>
    %829 = arith.subf %825, %828 : vector<8x8xf32>
    %830 = math.exp %829 : vector<8x8xf32>
    %cst_237 = arith.constant dense<0.000000e+00> : vector<8xf32>
    %831 = vector.multi_reduction <add>, %830, %cst_237 [1] : vector<8x8xf32> to vector<8xf32>
    %832 = vector.shape_cast %831 : vector<8xf32> to vector<8x1xf32>
    %833 = tpu.reciprocal %832 {approx = true} : vector<8x1xf32> -> vector<8x1xf32>
    %834 = vector.broadcast %833 : vector<8x1xf32> to vector<8x8xf32>
    %835 = arith.mulf %830, %834 : vector<8x8xf32>
    %836 = arith.truncf %835 : vector<8x8xf32> to vector<8x8xbf16>
    %837 = arith.truncf %824 : vector<8x16xf32> to vector<8x16xbf16>
    %cst_238 = arith.constant dense<0.000000e+00> : vector<8x16xf32>
    %838 = tpu.matmul %836, %837, %cst_238 {dimension_numbers = #tpu.dot_dimension_numbers<[1], [0], [0], [1], [0, 0, 1, 1], [], []>} : vector<8x8xbf16>, vector<8x16xbf16>, vector<8x16xf32> -> vector<8x16xf32>
    %839 = vector.extract_strided_slice %817 {offsets = [0, 16], sizes = [8, 16], strides = [1, 1]} : vector<8x32xf32> to vector<8x16xf32>
    %cst_239 = arith.constant 2.500000e-01 : f32
    %840 = vector.broadcast %cst_239 : f32 to vector<8x16xf32>
    %841 = arith.mulf %839, %840 : vector<8x16xf32>
    %842 = vector.extract_strided_slice %818 {offsets = [0, 16], sizes = [8, 16], strides = [1, 1]} : vector<8x32xf32> to vector<8x16xf32>
    %843 = vector.extract_strided_slice %819 {offsets = [0, 16], sizes = [8, 16], strides = [1, 1]} : vector<8x32xf32> to vector<8x16xf32>
    %cst_240 = arith.constant dense<0.000000e+00> : vector<8x8xf32>
    %844 = tpu.matmul %841, %842, %cst_240 {dimension_numbers = #tpu.dot_dimension_numbers<[1], [1], [0], [0], [0, 0, 1, 0], [], []>} : vector<8x16xf32>, vector<8x16xf32>, vector<8x8xf32> -> vector<8x8xf32>
    %cst_241 = arith.constant dense<0xFF800000> : vector<8xf32>
    %845 = vector.multi_reduction <maximumf>, %844, %cst_241 [1] : vector<8x8xf32> to vector<8xf32>
    %846 = vector.shape_cast %845 : vector<8xf32> to vector<8x1xf32>
    %847 = vector.broadcast %846 : vector<8x1xf32> to vector<8x8xf32>
    %848 = arith.subf %844, %847 : vector<8x8xf32>
    %849 = math.exp %848 : vector<8x8xf32>
    %cst_242 = arith.constant dense<0.000000e+00> : vector<8xf32>
    %850 = vector.multi_reduction <add>, %849, %cst_242 [1] : vector<8x8xf32> to vector<8xf32>
    %851 = vector.shape_cast %850 : vector<8xf32> to vector<8x1xf32>
    %852 = tpu.reciprocal %851 {approx = true} : vector<8x1xf32> -> vector<8x1xf32>
    %853 = vector.broadcast %852 : vector<8x1xf32> to vector<8x8xf32>
    %854 = arith.mulf %849, %853 : vector<8x8xf32>
    %855 = arith.truncf %854 : vector<8x8xf32> to vector<8x8xbf16>
    %856 = arith.truncf %843 : vector<8x16xf32> to vector<8x16xbf16>
    %cst_243 = arith.constant dense<0.000000e+00> : vector<8x16xf32>
    %857 = tpu.matmul %855, %856, %cst_243 {dimension_numbers = #tpu.dot_dimension_numbers<[1], [0], [0], [1], [0, 0, 1, 1], [], []>} : vector<8x8xbf16>, vector<8x16xbf16>, vector<8x16xf32> -> vector<8x16xf32>
    %858 = vector.extract_strided_slice %808 {offsets = [8, 0], sizes = [8, 32], strides = [1, 1]} : vector<32x32xf32> to vector<8x32xf32>
    %859 = vector.extract_strided_slice %812 {offsets = [8, 0], sizes = [8, 32], strides = [1, 1]} : vector<32x32xf32> to vector<8x32xf32>
    %860 = vector.extract_strided_slice %816 {offsets = [8, 0], sizes = [8, 32], strides = [1, 1]} : vector<32x32xf32> to vector<8x32xf32>
    %861 = vector.extract_strided_slice %858 {offsets = [0, 0], sizes = [8, 16], strides = [1, 1]} : vector<8x32xf32> to vector<8x16xf32>
    %cst_244 = arith.constant 2.500000e-01 : f32
    %862 = vector.broadcast %cst_244 : f32 to vector<8x16xf32>
    %863 = arith.mulf %861, %862 : vector<8x16xf32>
    %864 = vector.extract_strided_slice %859 {offsets = [0, 0], sizes = [8, 16], strides = [1, 1]} : vector<8x32xf32> to vector<8x16xf32>
    %865 = vector.extract_strided_slice %860 {offsets = [0, 0], sizes = [8, 16], strides = [1, 1]} : vector<8x32xf32> to vector<8x16xf32>
    %cst_245 = arith.constant dense<0.000000e+00> : vector<8x8xf32>
    %866 = tpu.matmul %863, %864, %cst_245 {dimension_numbers = #tpu.dot_dimension_numbers<[1], [1], [0], [0], [0, 0, 1, 0], [], []>} : vector<8x16xf32>, vector<8x16xf32>, vector<8x8xf32> -> vector<8x8xf32>
    %cst_246 = arith.constant dense<0xFF800000> : vector<8xf32>
    %867 = vector.multi_reduction <maximumf>, %866, %cst_246 [1] : vector<8x8xf32> to vector<8xf32>
    %868 = vector.shape_cast %867 : vector<8xf32> to vector<8x1xf32>
    %869 = vector.broadcast %868 : vector<8x1xf32> to vector<8x8xf32>
    %870 = arith.subf %866, %869 : vector<8x8xf32>
    %871 = math.exp %870 : vector<8x8xf32>
    %cst_247 = arith.constant dense<0.000000e+00> : vector<8xf32>
    %872 = vector.multi_reduction <add>, %871, %cst_247 [1] : vector<8x8xf32> to vector<8xf32>
    %873 = vector.shape_cast %872 : vector<8xf32> to vector<8x1xf32>
    %874 = tpu.reciprocal %873 {approx = true} : vector<8x1xf32> -> vector<8x1xf32>
    %875 = vector.broadcast %874 : vector<8x1xf32> to vector<8x8xf32>
    %876 = arith.mulf %871, %875 : vector<8x8xf32>
    %877 = arith.truncf %876 : vector<8x8xf32> to vector<8x8xbf16>
    %878 = arith.truncf %865 : vector<8x16xf32> to vector<8x16xbf16>
    %cst_248 = arith.constant dense<0.000000e+00> : vector<8x16xf32>
    %879 = tpu.matmul %877, %878, %cst_248 {dimension_numbers = #tpu.dot_dimension_numbers<[1], [0], [0], [1], [0, 0, 1, 1], [], []>} : vector<8x8xbf16>, vector<8x16xbf16>, vector<8x16xf32> -> vector<8x16xf32>
    %880 = vector.extract_strided_slice %858 {offsets = [0, 16], sizes = [8, 16], strides = [1, 1]} : vector<8x32xf32> to vector<8x16xf32>
    %cst_249 = arith.constant 2.500000e-01 : f32
    %881 = vector.broadcast %cst_249 : f32 to vector<8x16xf32>
    %882 = arith.mulf %880, %881 : vector<8x16xf32>
    %883 = vector.extract_strided_slice %859 {offsets = [0, 16], sizes = [8, 16], strides = [1, 1]} : vector<8x32xf32> to vector<8x16xf32>
    %884 = vector.extract_strided_slice %860 {offsets = [0, 16], sizes = [8, 16], strides = [1, 1]} : vector<8x32xf32> to vector<8x16xf32>
    %cst_250 = arith.constant dense<0.000000e+00> : vector<8x8xf32>
    %885 = tpu.matmul %882, %883, %cst_250 {dimension_numbers = #tpu.dot_dimension_numbers<[1], [1], [0], [0], [0, 0, 1, 0], [], []>} : vector<8x16xf32>, vector<8x16xf32>, vector<8x8xf32> -> vector<8x8xf32>
    %cst_251 = arith.constant dense<0xFF800000> : vector<8xf32>
    %886 = vector.multi_reduction <maximumf>, %885, %cst_251 [1] : vector<8x8xf32> to vector<8xf32>
    %887 = vector.shape_cast %886 : vector<8xf32> to vector<8x1xf32>
    %888 = vector.broadcast %887 : vector<8x1xf32> to vector<8x8xf32>
    %889 = arith.subf %885, %888 : vector<8x8xf32>
    %890 = math.exp %889 : vector<8x8xf32>
    %cst_252 = arith.constant dense<0.000000e+00> : vector<8xf32>
    %891 = vector.multi_reduction <add>, %890, %cst_252 [1] : vector<8x8xf32> to vector<8xf32>
    %892 = vector.shape_cast %891 : vector<8xf32> to vector<8x1xf32>
    %893 = tpu.reciprocal %892 {approx = true} : vector<8x1xf32> -> vector<8x1xf32>
    %894 = vector.broadcast %893 : vector<8x1xf32> to vector<8x8xf32>
    %895 = arith.mulf %890, %894 : vector<8x8xf32>
    %896 = arith.truncf %895 : vector<8x8xf32> to vector<8x8xbf16>
    %897 = arith.truncf %884 : vector<8x16xf32> to vector<8x16xbf16>
    %cst_253 = arith.constant dense<0.000000e+00> : vector<8x16xf32>
    %898 = tpu.matmul %896, %897, %cst_253 {dimension_numbers = #tpu.dot_dimension_numbers<[1], [0], [0], [1], [0, 0, 1, 1], [], []>} : vector<8x8xbf16>, vector<8x16xbf16>, vector<8x16xf32> -> vector<8x16xf32>
    %899 = vector.extract_strided_slice %808 {offsets = [16, 0], sizes = [8, 32], strides = [1, 1]} : vector<32x32xf32> to vector<8x32xf32>
    %900 = vector.extract_strided_slice %812 {offsets = [16, 0], sizes = [8, 32], strides = [1, 1]} : vector<32x32xf32> to vector<8x32xf32>
    %901 = vector.extract_strided_slice %816 {offsets = [16, 0], sizes = [8, 32], strides = [1, 1]} : vector<32x32xf32> to vector<8x32xf32>
    %902 = vector.extract_strided_slice %899 {offsets = [0, 0], sizes = [8, 16], strides = [1, 1]} : vector<8x32xf32> to vector<8x16xf32>
    %cst_254 = arith.constant 2.500000e-01 : f32
    %903 = vector.broadcast %cst_254 : f32 to vector<8x16xf32>
    %904 = arith.mulf %902, %903 : vector<8x16xf32>
    %905 = vector.extract_strided_slice %900 {offsets = [0, 0], sizes = [8, 16], strides = [1, 1]} : vector<8x32xf32> to vector<8x16xf32>
    %906 = vector.extract_strided_slice %901 {offsets = [0, 0], sizes = [8, 16], strides = [1, 1]} : vector<8x32xf32> to vector<8x16xf32>
    %cst_255 = arith.constant dense<0.000000e+00> : vector<8x8xf32>
    %907 = tpu.matmul %904, %905, %cst_255 {dimension_numbers = #tpu.dot_dimension_numbers<[1], [1], [0], [0], [0, 0, 1, 0], [], []>} : vector<8x16xf32>, vector<8x16xf32>, vector<8x8xf32> -> vector<8x8xf32>
    %cst_256 = arith.constant dense<0xFF800000> : vector<8xf32>
    %908 = vector.multi_reduction <maximumf>, %907, %cst_256 [1] : vector<8x8xf32> to vector<8xf32>
    %909 = vector.shape_cast %908 : vector<8xf32> to vector<8x1xf32>
    %910 = vector.broadcast %909 : vector<8x1xf32> to vector<8x8xf32>
    %911 = arith.subf %907, %910 : vector<8x8xf32>
    %912 = math.exp %911 : vector<8x8xf32>
    %cst_257 = arith.constant dense<0.000000e+00> : vector<8xf32>
    %913 = vector.multi_reduction <add>, %912, %cst_257 [1] : vector<8x8xf32> to vector<8xf32>
    %914 = vector.shape_cast %913 : vector<8xf32> to vector<8x1xf32>
    %915 = tpu.reciprocal %914 {approx = true} : vector<8x1xf32> -> vector<8x1xf32>
    %916 = vector.broadcast %915 : vector<8x1xf32> to vector<8x8xf32>
    %917 = arith.mulf %912, %916 : vector<8x8xf32>
    %918 = arith.truncf %917 : vector<8x8xf32> to vector<8x8xbf16>
    %919 = arith.truncf %906 : vector<8x16xf32> to vector<8x16xbf16>
    %cst_258 = arith.constant dense<0.000000e+00> : vector<8x16xf32>
    %920 = tpu.matmul %918, %919, %cst_258 {dimension_numbers = #tpu.dot_dimension_numbers<[1], [0], [0], [1], [0, 0, 1, 1], [], []>} : vector<8x8xbf16>, vector<8x16xbf16>, vector<8x16xf32> -> vector<8x16xf32>
    %921 = vector.extract_strided_slice %899 {offsets = [0, 16], sizes = [8, 16], strides = [1, 1]} : vector<8x32xf32> to vector<8x16xf32>
    %cst_259 = arith.constant 2.500000e-01 : f32
    %922 = vector.broadcast %cst_259 : f32 to vector<8x16xf32>
    %923 = arith.mulf %921, %922 : vector<8x16xf32>
    %924 = vector.extract_strided_slice %900 {offsets = [0, 16], sizes = [8, 16], strides = [1, 1]} : vector<8x32xf32> to vector<8x16xf32>
    %925 = vector.extract_strided_slice %901 {offsets = [0, 16], sizes = [8, 16], strides = [1, 1]} : vector<8x32xf32> to vector<8x16xf32>
    %cst_260 = arith.constant dense<0.000000e+00> : vector<8x8xf32>
    %926 = tpu.matmul %923, %924, %cst_260 {dimension_numbers = #tpu.dot_dimension_numbers<[1], [1], [0], [0], [0, 0, 1, 0], [], []>} : vector<8x16xf32>, vector<8x16xf32>, vector<8x8xf32> -> vector<8x8xf32>
    %cst_261 = arith.constant dense<0xFF800000> : vector<8xf32>
    %927 = vector.multi_reduction <maximumf>, %926, %cst_261 [1] : vector<8x8xf32> to vector<8xf32>
    %928 = vector.shape_cast %927 : vector<8xf32> to vector<8x1xf32>
    %929 = vector.broadcast %928 : vector<8x1xf32> to vector<8x8xf32>
    %930 = arith.subf %926, %929 : vector<8x8xf32>
    %931 = math.exp %930 : vector<8x8xf32>
    %cst_262 = arith.constant dense<0.000000e+00> : vector<8xf32>
    %932 = vector.multi_reduction <add>, %931, %cst_262 [1] : vector<8x8xf32> to vector<8xf32>
    %933 = vector.shape_cast %932 : vector<8xf32> to vector<8x1xf32>
    %934 = tpu.reciprocal %933 {approx = true} : vector<8x1xf32> -> vector<8x1xf32>
    %935 = vector.broadcast %934 : vector<8x1xf32> to vector<8x8xf32>
    %936 = arith.mulf %931, %935 : vector<8x8xf32>
    %937 = arith.truncf %936 : vector<8x8xf32> to vector<8x8xbf16>
    %938 = arith.truncf %925 : vector<8x16xf32> to vector<8x16xbf16>
    %cst_263 = arith.constant dense<0.000000e+00> : vector<8x16xf32>
    %939 = tpu.matmul %937, %938, %cst_263 {dimension_numbers = #tpu.dot_dimension_numbers<[1], [0], [0], [1], [0, 0, 1, 1], [], []>} : vector<8x8xbf16>, vector<8x16xbf16>, vector<8x16xf32> -> vector<8x16xf32>
    %940 = vector.extract_strided_slice %808 {offsets = [24, 0], sizes = [8, 32], strides = [1, 1]} : vector<32x32xf32> to vector<8x32xf32>
    %941 = vector.extract_strided_slice %812 {offsets = [24, 0], sizes = [8, 32], strides = [1, 1]} : vector<32x32xf32> to vector<8x32xf32>
    %942 = vector.extract_strided_slice %816 {offsets = [24, 0], sizes = [8, 32], strides = [1, 1]} : vector<32x32xf32> to vector<8x32xf32>
    %943 = vector.extract_strided_slice %940 {offsets = [0, 0], sizes = [8, 16], strides = [1, 1]} : vector<8x32xf32> to vector<8x16xf32>
    %cst_264 = arith.constant 2.500000e-01 : f32
    %944 = vector.broadcast %cst_264 : f32 to vector<8x16xf32>
    %945 = arith.mulf %943, %944 : vector<8x16xf32>
    %946 = vector.extract_strided_slice %941 {offsets = [0, 0], sizes = [8, 16], strides = [1, 1]} : vector<8x32xf32> to vector<8x16xf32>
    %947 = vector.extract_strided_slice %942 {offsets = [0, 0], sizes = [8, 16], strides = [1, 1]} : vector<8x32xf32> to vector<8x16xf32>
    %cst_265 = arith.constant dense<0.000000e+00> : vector<8x8xf32>
    %948 = tpu.matmul %945, %946, %cst_265 {dimension_numbers = #tpu.dot_dimension_numbers<[1], [1], [0], [0], [0, 0, 1, 0], [], []>} : vector<8x16xf32>, vector<8x16xf32>, vector<8x8xf32> -> vector<8x8xf32>
    %cst_266 = arith.constant dense<0xFF800000> : vector<8xf32>
    %949 = vector.multi_reduction <maximumf>, %948, %cst_266 [1] : vector<8x8xf32> to vector<8xf32>
    %950 = vector.shape_cast %949 : vector<8xf32> to vector<8x1xf32>
    %951 = vector.broadcast %950 : vector<8x1xf32> to vector<8x8xf32>
    %952 = arith.subf %948, %951 : vector<8x8xf32>
    %953 = math.exp %952 : vector<8x8xf32>
    %cst_267 = arith.constant dense<0.000000e+00> : vector<8xf32>
    %954 = vector.multi_reduction <add>, %953, %cst_267 [1] : vector<8x8xf32> to vector<8xf32>
    %955 = vector.shape_cast %954 : vector<8xf32> to vector<8x1xf32>
    %956 = tpu.reciprocal %955 {approx = true} : vector<8x1xf32> -> vector<8x1xf32>
    %957 = vector.broadcast %956 : vector<8x1xf32> to vector<8x8xf32>
    %958 = arith.mulf %953, %957 : vector<8x8xf32>
    %959 = arith.truncf %958 : vector<8x8xf32> to vector<8x8xbf16>
    %960 = arith.truncf %947 : vector<8x16xf32> to vector<8x16xbf16>
    %cst_268 = arith.constant dense<0.000000e+00> : vector<8x16xf32>
    %961 = tpu.matmul %959, %960, %cst_268 {dimension_numbers = #tpu.dot_dimension_numbers<[1], [0], [0], [1], [0, 0, 1, 1], [], []>} : vector<8x8xbf16>, vector<8x16xbf16>, vector<8x16xf32> -> vector<8x16xf32>
    %962 = vector.extract_strided_slice %940 {offsets = [0, 16], sizes = [8, 16], strides = [1, 1]} : vector<8x32xf32> to vector<8x16xf32>
    %cst_269 = arith.constant 2.500000e-01 : f32
    %963 = vector.broadcast %cst_269 : f32 to vector<8x16xf32>
    %964 = arith.mulf %962, %963 : vector<8x16xf32>
    %965 = vector.extract_strided_slice %941 {offsets = [0, 16], sizes = [8, 16], strides = [1, 1]} : vector<8x32xf32> to vector<8x16xf32>
    %966 = vector.extract_strided_slice %942 {offsets = [0, 16], sizes = [8, 16], strides = [1, 1]} : vector<8x32xf32> to vector<8x16xf32>
    %cst_270 = arith.constant dense<0.000000e+00> : vector<8x8xf32>
    %967 = tpu.matmul %964, %965, %cst_270 {dimension_numbers = #tpu.dot_dimension_numbers<[1], [1], [0], [0], [0, 0, 1, 0], [], []>} : vector<8x16xf32>, vector<8x16xf32>, vector<8x8xf32> -> vector<8x8xf32>
    %cst_271 = arith.constant dense<0xFF800000> : vector<8xf32>
    %968 = vector.multi_reduction <maximumf>, %967, %cst_271 [1] : vector<8x8xf32> to vector<8xf32>
    %969 = vector.shape_cast %968 : vector<8xf32> to vector<8x1xf32>
    %970 = vector.broadcast %969 : vector<8x1xf32> to vector<8x8xf32>
    %971 = arith.subf %967, %970 : vector<8x8xf32>
    %972 = math.exp %971 : vector<8x8xf32>
    %cst_272 = arith.constant dense<0.000000e+00> : vector<8xf32>
    %973 = vector.multi_reduction <add>, %972, %cst_272 [1] : vector<8x8xf32> to vector<8xf32>
    %974 = vector.shape_cast %973 : vector<8xf32> to vector<8x1xf32>
    %975 = tpu.reciprocal %974 {approx = true} : vector<8x1xf32> -> vector<8x1xf32>
    %976 = vector.broadcast %975 : vector<8x1xf32> to vector<8x8xf32>
    %977 = arith.mulf %972, %976 : vector<8x8xf32>
    %978 = arith.truncf %977 : vector<8x8xf32> to vector<8x8xbf16>
    %979 = arith.truncf %966 : vector<8x16xf32> to vector<8x16xbf16>
    %cst_273 = arith.constant dense<0.000000e+00> : vector<8x16xf32>
    %980 = tpu.matmul %978, %979, %cst_273 {dimension_numbers = #tpu.dot_dimension_numbers<[1], [0], [0], [1], [0, 0, 1, 1], [], []>} : vector<8x8xbf16>, vector<8x16xbf16>, vector<8x16xf32> -> vector<8x16xf32>
    %c816 = arith.constant 816 : index
    %c0_274 = arith.constant 0 : index
    %981 = vector.load %arg3[%c816, %c0_274] : memref<1160x32xf32, #tpu.memory_space<vmem>>, vector<32x32xf32>
    %982 = tpu.concatenate %838, %879, %920, %961 in 0 : vector<8x16xf32>, vector<8x16xf32>, vector<8x16xf32>, vector<8x16xf32> -> vector<32x16xf32>
    %983 = vector.extract_strided_slice %981 {offsets = [0, 0], sizes = [16, 32], strides = [1, 1]} : vector<32x32xf32> to vector<16x32xf32>
    %984 = arith.truncf %982 : vector<32x16xf32> to vector<32x16xbf16>
    %985 = arith.truncf %983 : vector<16x32xf32> to vector<16x32xbf16>
    %cst_275 = arith.constant dense<0.000000e+00> : vector<32x32xf32>
    %986 = tpu.matmul %984, %985, %cst_275 {dimension_numbers = #tpu.dot_dimension_numbers<[1], [0], [0], [1], [0, 0, 1, 1], [], []>} : vector<32x16xbf16>, vector<16x32xbf16>, vector<32x32xf32> -> vector<32x32xf32>
    %987 = tpu.concatenate %857, %898, %939, %980 in 0 : vector<8x16xf32>, vector<8x16xf32>, vector<8x16xf32>, vector<8x16xf32> -> vector<32x16xf32>
    %988 = vector.extract_strided_slice %981 {offsets = [16, 0], sizes = [16, 32], strides = [1, 1]} : vector<32x32xf32> to vector<16x32xf32>
    %989 = arith.truncf %987 : vector<32x16xf32> to vector<32x16xbf16>
    %990 = arith.truncf %988 : vector<16x32xf32> to vector<16x32xbf16>
    %cst_276 = arith.constant dense<0.000000e+00> : vector<32x32xf32>
    %991 = tpu.matmul %989, %990, %cst_276 {dimension_numbers = #tpu.dot_dimension_numbers<[1], [0], [0], [1], [0, 0, 1, 1], [], []>} : vector<32x16xbf16>, vector<16x32xbf16>, vector<32x32xf32> -> vector<32x32xf32>
    %992 = arith.addf %986, %991 : vector<32x32xf32>
    %993 = arith.addf %992, %804 : vector<32x32xf32>
    %c848 = arith.constant 848 : index
    %c0_277 = arith.constant 0 : index
    %994 = vector.load %arg3[%c848, %c0_277] : memref<1160x32xf32, #tpu.memory_space<vmem>>, vector<1x32xf32>
    %c856 = arith.constant 856 : index
    %c0_278 = arith.constant 0 : index
    %995 = vector.load %arg3[%c856, %c0_278] : memref<1160x32xf32, #tpu.memory_space<vmem>>, vector<1x32xf32>
    %cst_279 = arith.constant dense<0.000000e+00> : vector<32xf32>
    %996 = vector.multi_reduction <add>, %993, %cst_279 [1] : vector<32x32xf32> to vector<32xf32>
    %997 = vector.shape_cast %996 : vector<32xf32> to vector<32x1xf32>
    %cst_280 = arith.constant 3.200000e+01 : f32
    %998 = vector.broadcast %cst_280 : f32 to vector<32x1xf32>
    %999 = arith.divf %997, %998 : vector<32x1xf32>
    %1000 = vector.broadcast %999 : vector<32x1xf32> to vector<32x32xf32>
    %1001 = arith.subf %993, %1000 : vector<32x32xf32>
    %1002 = arith.mulf %1001, %1001 : vector<32x32xf32>
    %cst_281 = arith.constant dense<0.000000e+00> : vector<32xf32>
    %1003 = vector.multi_reduction <add>, %1002, %cst_281 [1] : vector<32x32xf32> to vector<32xf32>
    %1004 = vector.shape_cast %1003 : vector<32xf32> to vector<32x1xf32>
    %cst_282 = arith.constant 3.200000e+01 : f32
    %1005 = vector.broadcast %cst_282 : f32 to vector<32x1xf32>
    %1006 = arith.divf %1004, %1005 : vector<32x1xf32>
    %1007 = vector.broadcast %999 : vector<32x1xf32> to vector<32x32xf32>
    %1008 = arith.subf %993, %1007 : vector<32x32xf32>
    %cst_283 = arith.constant 9.99999974E-6 : f32
    %1009 = vector.broadcast %cst_283 : f32 to vector<32x1xf32>
    %1010 = arith.addf %1006, %1009 : vector<32x1xf32>
    %1011 = math.rsqrt %1010 : vector<32x1xf32>
    %1012 = vector.broadcast %1011 : vector<32x1xf32> to vector<32x32xf32>
    %1013 = arith.mulf %1008, %1012 : vector<32x32xf32>
    %1014 = vector.broadcast %994 : vector<1x32xf32> to vector<32x32xf32>
    %1015 = arith.mulf %1013, %1014 : vector<32x32xf32>
    %1016 = vector.broadcast %995 : vector<1x32xf32> to vector<32x32xf32>
    %1017 = arith.addf %1015, %1016 : vector<32x32xf32>
    %c864 = arith.constant 864 : index
    %c0_284 = arith.constant 0 : index
    %1018 = vector.load %arg3[%c864, %c0_284] : memref<1160x32xf32, #tpu.memory_space<vmem>>, vector<32x32xf32>
    %1019 = arith.truncf %1017 : vector<32x32xf32> to vector<32x32xbf16>
    %1020 = arith.truncf %1018 : vector<32x32xf32> to vector<32x32xbf16>
    %cst_285 = arith.constant dense<0.000000e+00> : vector<32x32xf32>
    %1021 = tpu.matmul %1019, %1020, %cst_285 {dimension_numbers = #tpu.dot_dimension_numbers<[1], [0], [0], [1], [0, 0, 1, 1], [], []>} : vector<32x32xbf16>, vector<32x32xbf16>, vector<32x32xf32> -> vector<32x32xf32>
    %c896 = arith.constant 896 : index
    %c0_286 = arith.constant 0 : index
    %1022 = vector.load %arg3[%c896, %c0_286] : memref<1160x32xf32, #tpu.memory_space<vmem>>, vector<1x32xf32>
    %1023 = vector.broadcast %1022 : vector<1x32xf32> to vector<32x32xf32>
    %1024 = arith.addf %1021, %1023 : vector<32x32xf32>
    %cst_287 = arith.constant 0.000000e+00 : f32
    %1025 = vector.broadcast %cst_287 : f32 to vector<32x32xf32>
    %1026 = arith.maximumf %1024, %1025 : vector<32x32xf32>
    %c904 = arith.constant 904 : index
    %c0_288 = arith.constant 0 : index
    %1027 = vector.load %arg3[%c904, %c0_288] : memref<1160x32xf32, #tpu.memory_space<vmem>>, vector<32x32xf32>
    %1028 = arith.truncf %1026 : vector<32x32xf32> to vector<32x32xbf16>
    %1029 = arith.truncf %1027 : vector<32x32xf32> to vector<32x32xbf16>
    %cst_289 = arith.constant dense<0.000000e+00> : vector<32x32xf32>
    %1030 = tpu.matmul %1028, %1029, %cst_289 {dimension_numbers = #tpu.dot_dimension_numbers<[1], [0], [0], [1], [0, 0, 1, 1], [], []>} : vector<32x32xbf16>, vector<32x32xbf16>, vector<32x32xf32> -> vector<32x32xf32>
    %c936 = arith.constant 936 : index
    %c0_290 = arith.constant 0 : index
    %1031 = vector.load %arg3[%c936, %c0_290] : memref<1160x32xf32, #tpu.memory_space<vmem>>, vector<1x32xf32>
    %1032 = vector.broadcast %1031 : vector<1x32xf32> to vector<32x32xf32>
    %1033 = arith.addf %1030, %1032 : vector<32x32xf32>
    %1034 = arith.addf %1033, %1017 : vector<32x32xf32>
    %c944 = arith.constant 944 : index
    %c0_291 = arith.constant 0 : index
    %1035 = vector.load %arg3[%c944, %c0_291] : memref<1160x32xf32, #tpu.memory_space<vmem>>, vector<1x32xf32>
    %c952 = arith.constant 952 : index
    %c0_292 = arith.constant 0 : index
    %1036 = vector.load %arg3[%c952, %c0_292] : memref<1160x32xf32, #tpu.memory_space<vmem>>, vector<1x32xf32>
    %cst_293 = arith.constant dense<0.000000e+00> : vector<32xf32>
    %1037 = vector.multi_reduction <add>, %1034, %cst_293 [1] : vector<32x32xf32> to vector<32xf32>
    %1038 = vector.shape_cast %1037 : vector<32xf32> to vector<32x1xf32>
    %cst_294 = arith.constant 3.200000e+01 : f32
    %1039 = vector.broadcast %cst_294 : f32 to vector<32x1xf32>
    %1040 = arith.divf %1038, %1039 : vector<32x1xf32>
    %1041 = vector.broadcast %1040 : vector<32x1xf32> to vector<32x32xf32>
    %1042 = arith.subf %1034, %1041 : vector<32x32xf32>
    %1043 = arith.mulf %1042, %1042 : vector<32x32xf32>
    %cst_295 = arith.constant dense<0.000000e+00> : vector<32xf32>
    %1044 = vector.multi_reduction <add>, %1043, %cst_295 [1] : vector<32x32xf32> to vector<32xf32>
    %1045 = vector.shape_cast %1044 : vector<32xf32> to vector<32x1xf32>
    %cst_296 = arith.constant 3.200000e+01 : f32
    %1046 = vector.broadcast %cst_296 : f32 to vector<32x1xf32>
    %1047 = arith.divf %1045, %1046 : vector<32x1xf32>
    %1048 = vector.broadcast %1040 : vector<32x1xf32> to vector<32x32xf32>
    %1049 = arith.subf %1034, %1048 : vector<32x32xf32>
    %cst_297 = arith.constant 9.99999974E-6 : f32
    %1050 = vector.broadcast %cst_297 : f32 to vector<32x1xf32>
    %1051 = arith.addf %1047, %1050 : vector<32x1xf32>
    %1052 = math.rsqrt %1051 : vector<32x1xf32>
    %1053 = vector.broadcast %1052 : vector<32x1xf32> to vector<32x32xf32>
    %1054 = arith.mulf %1049, %1053 : vector<32x32xf32>
    %1055 = vector.broadcast %1035 : vector<1x32xf32> to vector<32x32xf32>
    %1056 = arith.mulf %1054, %1055 : vector<32x32xf32>
    %1057 = vector.broadcast %1036 : vector<1x32xf32> to vector<32x32xf32>
    %1058 = arith.addf %1056, %1057 : vector<32x32xf32>
    %1059 = tpu.concatenate %835, %876, %917, %958 in 0 : vector<8x8xf32>, vector<8x8xf32>, vector<8x8xf32>, vector<8x8xf32> -> vector<32x8xf32>
    %1060 = tpu.concatenate %854, %895, %936, %977 in 0 : vector<8x8xf32>, vector<8x8xf32>, vector<8x8xf32>, vector<8x8xf32> -> vector<32x8xf32>
    %c1048 = arith.constant 1048 : index
    %c0_298 = arith.constant 0 : index
    %1061 = vector.load %arg3[%c1048, %c0_298] : memref<1160x32xf32, #tpu.memory_space<vmem>>, vector<32x4xf32>
    %1062 = arith.truncf %1058 : vector<32x32xf32> to vector<32x32xbf16>
    %1063 = arith.truncf %1061 : vector<32x4xf32> to vector<32x4xbf16>
    %cst_299 = arith.constant dense<0.000000e+00> : vector<32x4xf32>
    %1064 = tpu.matmul %1062, %1063, %cst_299 {dimension_numbers = #tpu.dot_dimension_numbers<[1], [0], [0], [1], [0, 0, 1, 1], [], []>} : vector<32x32xbf16>, vector<32x4xbf16>, vector<32x4xf32> -> vector<32x4xf32>
    %c1080 = arith.constant 1080 : index
    %c0_300 = arith.constant 0 : index
    %1065 = vector.load %arg3[%c1080, %c0_300] : memref<1160x32xf32, #tpu.memory_space<vmem>>, vector<1x4xf32>
    %1066 = vector.broadcast %1065 : vector<1x4xf32> to vector<32x4xf32>
    %1067 = arith.addf %1064, %1066 : vector<32x4xf32>
    %cst_301 = arith.constant 0.000000e+00 : f32
    %1068 = vector.broadcast %cst_301 : f32 to vector<32x4xf32>
    %1069 = arith.maximumf %1067, %1068 : vector<32x4xf32>
    %c1088 = arith.constant 1088 : index
    %c0_302 = arith.constant 0 : index
    %1070 = vector.load %arg3[%c1088, %c0_302] : memref<1160x32xf32, #tpu.memory_space<vmem>>, vector<4x4xf32>
    %1071 = arith.truncf %1069 : vector<32x4xf32> to vector<32x4xbf16>
    %1072 = arith.truncf %1070 : vector<4x4xf32> to vector<4x4xbf16>
    %cst_303 = arith.constant dense<0.000000e+00> : vector<32x4xf32>
    %1073 = tpu.matmul %1071, %1072, %cst_303 {dimension_numbers = #tpu.dot_dimension_numbers<[1], [0], [0], [1], [0, 0, 1, 1], [], []>} : vector<32x4xbf16>, vector<4x4xbf16>, vector<32x4xf32> -> vector<32x4xf32>
    %c1096 = arith.constant 1096 : index
    %c0_304 = arith.constant 0 : index
    %1074 = vector.load %arg3[%c1096, %c0_304] : memref<1160x32xf32, #tpu.memory_space<vmem>>, vector<1x4xf32>
    %1075 = vector.broadcast %1074 : vector<1x4xf32> to vector<32x4xf32>
    %1076 = arith.addf %1073, %1075 : vector<32x4xf32>
    %1077 = arith.addf %1059, %1060 : vector<32x8xf32>
    %cst_305 = arith.constant 5.000000e-01 : f32
    %1078 = vector.broadcast %cst_305 : f32 to vector<32x8xf32>
    %1079 = arith.mulf %1077, %1078 : vector<32x8xf32>
    %c1104 = arith.constant 1104 : index
    %c0_306 = arith.constant 0 : index
    %1080 = vector.load %arg3[%c1104, %c0_306] : memref<1160x32xf32, #tpu.memory_space<vmem>>, vector<4x4xf32>
    %1081 = arith.truncf %1 : vector<32x4xf32> to vector<32x4xbf16>
    %1082 = arith.truncf %1080 : vector<4x4xf32> to vector<4x4xbf16>
    %cst_307 = arith.constant dense<0.000000e+00> : vector<32x4xf32>
    %1083 = tpu.matmul %1081, %1082, %cst_307 {dimension_numbers = #tpu.dot_dimension_numbers<[1], [0], [0], [1], [0, 0, 1, 1], [], []>} : vector<32x4xbf16>, vector<4x4xbf16>, vector<32x4xf32> -> vector<32x4xf32>
    %c1112 = arith.constant 1112 : index
    %c0_308 = arith.constant 0 : index
    %1084 = vector.load %arg3[%c1112, %c0_308] : memref<1160x32xf32, #tpu.memory_space<vmem>>, vector<8x4xf32>
    %1085 = arith.truncf %1079 : vector<32x8xf32> to vector<32x8xbf16>
    %1086 = arith.truncf %1084 : vector<8x4xf32> to vector<8x4xbf16>
    %cst_309 = arith.constant dense<0.000000e+00> : vector<32x4xf32>
    %1087 = tpu.matmul %1085, %1086, %cst_309 {dimension_numbers = #tpu.dot_dimension_numbers<[1], [0], [0], [1], [0, 0, 1, 1], [], []>} : vector<32x8xbf16>, vector<8x4xbf16>, vector<32x4xf32> -> vector<32x4xf32>
    %1088 = arith.addf %1083, %1087 : vector<32x4xf32>
    %c1120 = arith.constant 1120 : index
    %c0_310 = arith.constant 0 : index
    %1089 = vector.load %arg3[%c1120, %c0_310] : memref<1160x32xf32, #tpu.memory_space<vmem>>, vector<1x4xf32>
    %1090 = vector.broadcast %1089 : vector<1x4xf32> to vector<32x4xf32>
    %1091 = arith.addf %1088, %1090 : vector<32x4xf32>
    %cst_311 = arith.constant 0.000000e+00 : f32
    %1092 = vector.broadcast %cst_311 : f32 to vector<32x4xf32>
    %1093 = arith.subf %1092, %1091 : vector<32x4xf32>
    %1094 = math.exp %1093 : vector<32x4xf32>
    %cst_312 = arith.constant 1.000000e+00 : f32
    %1095 = vector.broadcast %cst_312 : f32 to vector<32x4xf32>
    %1096 = arith.addf %1095, %1094 : vector<32x4xf32>
    %1097 = tpu.reciprocal %1096 {approx = true} : vector<32x4xf32> -> vector<32x4xf32>
    %cst_313 = arith.constant 1.000000e+00 : f32
    %1098 = vector.broadcast %cst_313 : f32 to vector<32x4xf32>
    %1099 = arith.subf %1098, %1097 : vector<32x4xf32>
    %1100 = arith.mulf %1099, %1076 : vector<32x4xf32>
    %1101 = arith.mulf %1097, %532 : vector<32x4xf32>
    %1102 = arith.addf %1100, %1101 : vector<32x4xf32>
    %c0_314 = arith.constant 0 : index
    %c0_315 = arith.constant 0 : index
    %1103 = vector.load %arg4[%c0_314, %c0_315] : memref<32x128xf32, #tpu.memory_space<vmem>>, vector<32x4xf32>
    tpu.vector_store %arg4[%c0_314, %c0_315], %532 {strides = array<i32>} : memref<32x128xf32, #tpu.memory_space<vmem>>, vector<32x4xf32>,
    %c0_316 = arith.constant 0 : index
    %c4 = arith.constant 4 : index
    %1104 = vector.load %arg4[%c0_316, %c4] : memref<32x128xf32, #tpu.memory_space<vmem>>, vector<32x4xf32>
    tpu.vector_store %arg4[%c0_316, %c4], %1076 {strides = array<i32>} : memref<32x128xf32, #tpu.memory_space<vmem>>, vector<32x4xf32>,
    %c0_317 = arith.constant 0 : index
    %c8 = arith.constant 8 : index
    %1105 = vector.load %arg4[%c0_317, %c8] : memref<32x128xf32, #tpu.memory_space<vmem>>, vector<32x4xf32>
    tpu.vector_store %arg4[%c0_317, %c8], %1102 {strides = array<i32>} : memref<32x128xf32, #tpu.memory_space<vmem>>, vector<32x4xf32>,
    %c0_318 = arith.constant 0 : index
    %c12 = arith.constant 12 : index
    %1106 = vector.load %arg4[%c0_318, %c12] : memref<32x128xf32, #tpu.memory_space<vmem>>, vector<32x4xf32>
    tpu.vector_store %arg4[%c0_318, %c12], %1097 {strides = array<i32>} : memref<32x128xf32, #tpu.memory_space<vmem>>, vector<32x4xf32>,
    %c0_319 = arith.constant 0 : index
    %c16 = arith.constant 16 : index
    %1107 = vector.load %arg4[%c0_319, %c16] : memref<32x128xf32, #tpu.memory_space<vmem>>, vector<32x8xf32>
    tpu.vector_store %arg4[%c0_319, %c16], %524 {strides = array<i32>} : memref<32x128xf32, #tpu.memory_space<vmem>>, vector<32x8xf32>,
    %c0_320 = arith.constant 0 : index
    %c32_321 = arith.constant 32 : index
    %1108 = vector.load %arg4[%c0_320, %c32_321] : memref<32x128xf32, #tpu.memory_space<vmem>>, vector<32x8xf32>
    tpu.vector_store %arg4[%c0_320, %c32_321], %1059 {strides = array<i32>} : memref<32x128xf32, #tpu.memory_space<vmem>>, vector<32x8xf32>,
    %c0_322 = arith.constant 0 : index
    %c24 = arith.constant 24 : index
    %1109 = vector.load %arg4[%c0_322, %c24] : memref<32x128xf32, #tpu.memory_space<vmem>>, vector<32x8xf32>
    tpu.vector_store %arg4[%c0_322, %c24], %525 {strides = array<i32>} : memref<32x128xf32, #tpu.memory_space<vmem>>, vector<32x8xf32>,
    %c0_323 = arith.constant 0 : index
    %c40 = arith.constant 40 : index
    %1110 = vector.load %arg4[%c0_323, %c40] : memref<32x128xf32, #tpu.memory_space<vmem>>, vector<32x8xf32>
    tpu.vector_store %arg4[%c0_323, %c40], %1060 {strides = array<i32>} : memref<32x128xf32, #tpu.memory_space<vmem>>, vector<32x8xf32>,
    %cst_324 = arith.constant 0.000000e+00 : f32
    %1111 = vector.broadcast %cst_324 : f32 to vector<32x80xf32>
    %c0_325 = arith.constant 0 : index
    %c48 = arith.constant 48 : index
    %1112 = vector.load %arg4[%c0_325, %c48] : memref<32x128xf32, #tpu.memory_space<vmem>>, vector<32x80xf32>
    tpu.vector_store %arg4[%c0_325, %c48], %1111 {strides = array<i32>} : memref<32x128xf32, #tpu.memory_space<vmem>>, vector<32x80xf32>,
    return
  }
  func.func @transform_0(%arg0: i32) -> (i32, i32) {
    %c0_i32 = arith.constant 0 : i32
    %c0_i32_0 = arith.constant 0 : i32
    return %arg0, %c0_i32 : i32, i32
  }
  func.func @transform_1(%arg0: i32) -> (i32, i32) {
    %c0_i32 = arith.constant 0 : i32
    %c0_i32_0 = arith.constant 0 : i32
    return %arg0, %c0_i32 : i32, i32
  }
  func.func @transform_2(%arg0: i32) -> (i32, i32) {
    %c0_i32 = arith.constant 0 : i32
    %c0_i32_0 = arith.constant 0 : i32
    %c0_i32_1 = arith.constant 0 : i32
    return %c0_i32, %c0_i32_0 : i32, i32
  }
  func.func @transform_3(%arg0: i32) -> (i32, i32) {
    %c0_i32 = arith.constant 0 : i32
    %c0_i32_0 = arith.constant 0 : i32
    return %arg0, %c0_i32 : i32, i32
  }
}

</mosaic_0001>

<bundles_post_ra>
// kernel: tpu_custom_call.1
= control target key start
LH: loop header
LB: loop body
LE: loop exit
PB: predicated region body
PF: predicated region fallthrough
CT: control target
= control target key end

     0   :  { %8 = vsyncpa [#allocation3], 0  ;;  %s10958_s0 = inlined_call_operand.vmem [shape: f32[64,4], index: 0, kind: input, shape index: {}]   ;;  %s10959_s1 = inlined_call_operand.vmem [shape: f32[64,4], index: 1, kind: input, shape index: {}]   ;;  %s10960_s2 = inlined_call_operand.vmem [shape: f32[1160,32], index: 2, kind: input, shape index: {}]   ;;  %s10961_s3 = inlined_call_operand.hbm [shape: f32[64,128], index: 3, kind: output, shape index: {}]  }
   0x1   :  { %10 = vsyncpa [#allocation3 + $0x1], 0  ;;  %s9335_s12 = smov 0   ;;  %s9337_s13 = smov 0  }
   0x2   :  { %s9339_s14 = smov 0   ;;  %s9341_s15 = smov 0  }
   0x3 LB: > { %s9356_s16 = sadd.s32 4294967295, %s9301_s15   ;;  %s7840_s17 = sadd.s32 4294967294, %s9301_s15   ;;  %s9301_s15 = sphi %s9341_s15, %s10967_s15   ;;  %s9297_s14 = sphi %s9339_s14, %s10966_s14   ;;  %s9293_s13 = sphi %s9337_s13, %s10965_s13   ;;  %s9289_s12 = sphi %s9335_s12, %s10964_s12  }
   0x4   : > { %s9360_s18 = sadd.s32 1, %s9301_s15   ;;  %s96_s19 = sadd.s32 1, %s9297_s14 }
   0x5   : > { %s93_s20 = ssub.s32 %s9301_s15, %s9360_s18  ;;  %p106_p0 = scmp.ne.s32.totalorder %s9297_s14, %s9293_s13 }
   0x6   : > { %p94_p1 = scmp.eq.s32.totalorder %s93_s20, 0  ;;  %p107_p2 = scmp.eq.s32.totalorder %s9356_s16, 1 }
   0x7   : > { %p112_p3 = scmp.ne.s32.totalorder %s9293_s13, %s9289_s12  ;;  %p113_p4 = scmp.eq.s32.totalorder %s7840_s17, 1 }
   0x8   : > { %s9371_s21 = scalar_select %p94_p1, %s9297_s14, %s96_s19  }
   0x9   : > { %p9373_p5 = por %p107_p2, %p106_p0  ;;  %p9377_p6 = por %p113_p4, %p112_p3 }
   0xa   : > { %p7843_p7 = scmp.ge.s32.totalorder %s9301_s15, 1  ;;  %p152_p8 = scmp.lt.s32.totalorder %s9301_s15, 3 }
   0xc   : > { %p153_p9 = pnand %p7843_p7, %p152_p8 }
   0xd   : > { %v211_v0 = vld [vmem:[%s10960_s2 + $0x3c8] sm:$0xf] (!%p153_p9)  ;;  %vm222_vm0 = vcmask (!%p153_p9), 1041408   ;;  %v207_v1 = vld [vmem:[%s10960_s2 + $0x3c0] sm:$0xf] (!%p153_p9)  ;;  %s7845_s28 = sshll.u32 (!%p153_p9), %s9356_s16, 2 }
   0xe   : > { %156 = sbr.rel (%p153_p9) target bundleno = 17310 (0x439e), region = 32  ;;  %v214_v2 = vpack.c.bf16 (!%p153_p9), %v211_v0, %v211_v0  ;;  %v210_v3 = vpack.c.bf16 (!%p153_p9), %v207_v1, %v207_v1  ;;  %p182_p10 = scmp.lt.s32.totalorder (!%p153_p9), %s7845_s28, 7  ;;  %vm215_vm1 = vcmask (!%p153_p9), 31744   ;;  %v346_v18 = vld [vmem:[%s10960_s2] sm:$0xff] (!%p153_p9)  ;;  %v347_v19 = vld [vmem:[%s10960_s2 + $0x8] sm:$0xff] (!%p153_p9)  ;;  %v348_v24 = vld [vmem:[%s10960_s2 + $0x10] sm:$0xff] (!%p153_p9) }
   0xf   : > { %v465_v20 = vld [vmem:[%s10960_s2 + $0x40] sm:$0xff] (!%p153_p9)  ;;  %v352_v21 = vpack.c.bf16 (!%p153_p9), %v347_v19, %v346_v18  ;;  %v466_v22 = vld [vmem:[%s10960_s2 + $0x48] sm:$0xff] (!%p153_p9)  ;;  %v349_v25 = vld [vmem:[%s10960_s2 + $0x18] sm:$0xff] (!%p153_p9)  ;;  %vm354_vm2 = vcmask (!%p153_p9), 261120   ;;  %v9303_v63 = vmov (!%p153_p9), 0.0   ;;  %vm9304_vm3 = vmmov (!%p153_p9), 0  }
  0x10   : > { %8962 = vmatprep.subr.msk.bf16.mxu1 (!%p153_p9), %vm222_vm0, %v214_v2  ;;  %8963 = vmatprep.subr.msk.bf16.mxu0 (!%p153_p9), %vm222_vm0, %v210_v3  ;;  %v224_v4 = vsel (!%p153_p9), %vm222_vm0, %v214_v2, 0  ;;  %v282_v5 = vsel (!%p153_p9), %vm222_vm0, %v210_v3, 0  ;;  %v469_v23 = vpack.c.bf16 (!%p153_p9), %v466_v22, %v465_v20  ;;  %v353_v26 = vpack.c.bf16 (!%p153_p9), %v349_v25, %v348_v24  ;;  %v467_v27 = vld [vmem:[%s10960_s2 + $0x50] sm:$0xff] (!%p153_p9)  ;;  %v468_v28 = vld [vmem:[%s10960_s2 + $0x58] sm:$0xff] (!%p153_p9)  ;;  %v410_v30 = vld [vmem:[%s10960_s2 + $0x20] sm:$0xff] (!%p153_p9)  ;;  %s9305_s11 = smov (!%p153_p9), 112  }
  0x11   : > { %8317 = vmatpush3.bf16.msra.mxu1 (!%p153_p9), %v224_v4  ;;  %8323 = vmatpush3.bf16.msra.mxu0 (!%p153_p9), %v282_v5  ;;  %v470_v29 = vpack.c.bf16 (!%p153_p9), %v468_v28, %v467_v27  ;;  %v411_v31 = vld [vmem:[%s10960_s2 + $0x28] sm:$0xff] (!%p153_p9)  ;;  %v7853_v37 = vld [vmem:[%s10960_s2 + $0x3d0] ss:$0 sm:$0xff] (!%p153_p9)  ;;  %v206_v46 = vld [vmem:[%s10960_s2 + $0x480] sm:$0xff] (!%p153_p9)  ;;  %vm615_vm4 = vcmask (!%p153_p9), 1043456   ;;  %vm521_vm5 = vcmask (!%p153_p9), 130048  }
  0x12   : > { %8328 = vmatprep.subr.bf16.mxu1 (!%p153_p9), %v352_v21  ;;  %8344 = vmatprep.subr.bf16.mxu0 (!%p153_p9), %v469_v23  ;;  %v414_v32 = vpack.c.bf16 (!%p153_p9), %v411_v31, %v410_v30  ;;  %v203_v49 = vld [vmem:[%s10960_s2 + $0x468] sm:$0xff] (!%p153_p9)  ;;  %v204_v51 = vld [vmem:[%s10960_s2 + $0x470] sm:$0xff] (!%p153_p9)  ;;  %v205_v52 = vld [vmem:[%s10960_s2 + $0x478] sm:$0xff] (!%p153_p9)  ;;  %vm598_vm6 = vcmask (!%p153_p9), 64512   ;;  %s178_s24 = sand.u32 (!%p153_p9), 1, %s9293_s13   ;;  %s9306_s4 = smov (!%p153_p9), 16  }
  0x13   : > { %v412_v57 = vld [vmem:[%s10960_s2 + $0x30] sm:$0xff] (!%p153_p9)  ;;  %v413_v58 = vld [vmem:[%s10960_s2 + $0x38] sm:$0xff] (!%p153_p9)  ;;  %s7844_s25 = sshll.u32 (!%p153_p9), %s178_s24, 5  ;;  %s9307_s6 = smov (!%p153_p9), 32   ;;  %vm7616_vm7 = vcmask (!%p153_p9), 64544   ;;  %vm7637_vm8 = vcmask (!%p153_p9), 97344  }
  0x14   : > { %v415_v62 = vpack.c.bf16 (!%p153_p9), %v413_v58, %v412_v57  ;;  %s9308_s7 = smov (!%p153_p9), 24   ;;  %vm7658_vm9 = vcmask (!%p153_p9), 130144   ;;  %vm7679_vm10 = vcmask (!%p153_p9), 195712   ;;  %vm7700_vm11 = vcmask (!%p153_p9), 326912   ;;  %s8054_s30 = sshll.u32 (!%p153_p9), %s9356_s16, 9 }
  0x15   : > { %s10969_s28 = smov (!%p182_p10, %s7845_s28), 7  ;;  %vm7721_vm12 = vcmask 261312   ;;  %vm7742_vm13 = vcmask 392512   ;;  %vm7747_vm14 = vcmask 1047936   ;;  %s10900_s9 = scalar_lea.hbm %s10961_s3, %s8054_s30 }
  0x16   : > { %s7846_s29 = sshll.u32 %s10969_s28, 3  ;;  %s10094_s28 = scalar_lea.vmem [#allocation2], %s7844_s25 }
  0x17   : > { %s9397_s5 = scalar_lea.vmem %s10959_s1, %s7846_s29  ;;  %s9402_s8 = scalar_lea.vmem %s10958_s0, %s7846_s29 }
  0x18   : > { %v199_v6 = vld [vmem:[%s9397_s5] sm:$0xff]  ;;  %v200_v7 = vld [vmem:[%s9397_s5 + $0x8] sm:$0xff]  ;;  %v201_v11 = vld [vmem:[%s9397_s5 + $0x10] sm:$0xff]  ;;  %s9309_s25 = smov 12   ;;  %s9312_s29 = smov 40  }
  0x19   : > { %v195_v8 = vld [vmem:[%s9402_s8] sm:$0xff]  ;;  %v9407_v9 = vpack.c.bf16 %v200_v7, %v199_v6  ;;  %v196_v10 = vld [vmem:[%s9402_s8 + $0x8] sm:$0xff]  ;;  %v202_v12 = vld [vmem:[%s9397_s5 + $0x18] sm:$0xff]  ;;  %s10916_s16 = scalar_lea.sflag [#allocation3], %s178_s24  ;;  %s9313_s10 = smov [#allocation2]  }
  0x1a   : > { %v208_v13 = vpack.c.bf16 %v196_v10, %v195_v8  ;;  %v9412_v14 = vpack.c.bf16 %v202_v12, %v201_v11  ;;  %v197_v15 = vld [vmem:[%s9402_s8 + $0x10] sm:$0xff]  ;;  %v198_v16 = vld [vmem:[%s9402_s8 + $0x18] sm:$0xff]  ;;  %s9243_s17 = sshll.u32 %s9313_s10, 4  ;;  %s9244_s17 = int_to_ptr.vmem [resolvable:$false] %s9243_s17 }
  0x1b   : > { %8318 = vmatprep.mubr.msk.bf16.mxu1 %vm215_vm1, %v9407_v9  ;;  %v209_v17 = vpack.c.bf16 %v198_v16, %v197_v15  ;;  %s9245_s19 = scalar_lea.vmem %s9244_s17, 1024 }
  0x1c   : > { %8324 = vmatprep.mubr.msk.bf16.mxu0 %vm215_vm1, %v208_v13  ;;  %8319 = vmatmul.mubr.msk.bf16.vlgmr.msra.gmra.mrb[0].mxu1 %vm215_vm1, %v9412_v14 }
  0x1d   : > { %8325 = vmatmul.mubr.msk.bf16.vlgmr.msra.gmra.mrb[0].mxu0 %vm215_vm1, %v209_v17  ;;  %8329 = vmatpush3.bf16.msra.mxu1 %v352_v21 }
  0x1e   : > { %8345 = vmatpush3.bf16.msra.mxu0 %v469_v23  ;;  %8330 = vmatprep.subr.bf16.mxu1 %v353_v26 }
  0x1f   : > { %8346 = vmatprep.subr.bf16.mxu0 %v470_v29 }
  0x21   : > { %8331 = vmatpush3.bf16.msra.mxu1 %v353_v26 }
  0x22   : > { %8347 = vmatpush3.bf16.msra.mxu0 %v470_v29  ;;  %8336 = vmatprep.subr.bf16.mxu1 %v414_v32 }
  0x23   : > { %8357 = vmatprep.subr.bf16.mxu0 %v9303_v63 }
  0xef   : > { %v8320_v33 = vpop.f32.mrb[0].mxu1 }
  0xf0   : > { %v8326_v34 = vpop.f32.mrb[0].mxu0  ;;  %v260_v35 = vpop.f32.mrb[1].mxu1 }
  0xf1   : > { %v327_v36 = vadd.f32 %v8326_v34, %v8320_v33  ;;  %v318_v38 = vpop.f32.mrb[1].mxu0  ;;  %v8321_v39 = vpop.f32.mrb[2].mxu1 }
  0xf2   : > { %v319_v40 = vadd.f32 %v318_v38, %v260_v35  ;;  %v8327_v41 = vpop.f32.mrb[2].mxu0  ;;  %v263_v42 = vpop.f32.mrb[3].mxu1 }
  0xf3   : > { %v330_v43 = vadd.f32 %v8327_v41, %v8321_v39  ;;  %v321_v44 = vpop.f32.mrb[3].mxu0  ;;  %v340_v48 = vadd.f32 %v7853_v37, %v327_v36 }
  0xf4   : > { %v338_v45 = vadd.f32 %v7853_v37, %v319_v40  ;;  %v322_v47 = vadd.f32 %v321_v44, %v263_v42 }
  0xf5   : > { %v341_v50 = vadd.f32 %v7853_v37, %v330_v43  ;;  %v9479_v59 = vadd.f32 %v340_v48, %v205_v52 }
  0xf6   : > { %v339_v53 = vadd.f32 %v7853_v37, %v322_v47  ;;  %v9469_v55 = vadd.f32 %v338_v45, %v203_v49 }
  0xf7   : > { %v9467_v54 = vadd.f32 %v341_v50, %v206_v46 }
  0xf8   : > { %v9471_v56 = vadd.f32 %v339_v53, %v204_v51 }
  0xf9   : > { %v351_v61 = vpack.c.bf16 %v9467_v54, %v9479_v59 }
  0xfa   : > { %v350_v60 = vpack.c.bf16 %v9471_v56, %v9469_v55 }
  0xfc   : > { %8332 = vmatprep.mubr.msk.bf16.mxu1 %vm354_vm2, %v350_v60  ;;  %8348 = vmatprep.mubr.msk.bf16.mxu0 %vm354_vm2, %v350_v60 }
  0xfd   : > { %8333 = vmatmul.mubr.msk.bf16.vlgmr.msra.gmra.mrb[4].mxu1 %vm354_vm2, %v351_v61  ;;  %8349 = vmatmul.mubr.msk.bf16.vlgmr.msra.gmra.mrb[4].mxu0 %vm354_vm2, %v351_v61 }
  0xfe   : > { %8337 = vmatpush3.bf16.msra.mxu1 %v414_v32  ;;  %8340 = vmatprep.mubr.msk.bf16.mxu1 %vm354_vm2, %v350_v60 }
  0xff   : > { %8338 = vmatprep.subr.bf16.mxu1 %v415_v62  ;;  %8359 = vmatprep.mubr.msk.bf16.mxu0 %vm9304_vm3, %v9303_v63 }
 0x102   : > { %8339 = vmatpush3.bf16.msra.mxu1 %v415_v62 }
 0x103   : > { %8352 = vmatprep.subr.mxu1 %v9303_v63 }
 0x105   : > { %8341 = vmatmul.mubr.msk.bf16.vlgmr.msra.gmra.mrb[8].mxu1 %vm354_vm2, %v351_v61 }
 0x106   : > { %8354 = vmatprep.mubr.msk.f32.mxu1 %vm9304_vm3, %v9303_v63 }
 0x1d0   : > { %v9497_v0 = vpop.f32.mrb[4].mxu1  ;;  %v9499_v1 = vpop.f32.mrb[4].mxu0 }
 0x1d1   : > { %v395_v2 = vpop.f32.mrb[5].mxu1  ;;  %v505_v3 = vpop.f32.mrb[5].mxu0 }
 0x1d2   : > { %v611_v4 = vpack.c.bf16 %v505_v3, %v505_v3  ;;  %v9501_v5 = vpop.f32.mrb[6].mxu1  ;;  %v9503_v6 = vpop.f32.mrb[6].mxu0  ;;  %v520_v15 = vmul.f32 0.25, %v395_v2 }
 0x1d3   : > { %v398_v7 = vpop.f32.mrb[7].mxu1  ;;  %v9505_v8 = vpop.f32.mrb[7].mxu0 }
 0x1d4   : > { %v617_v10 = vsel %vm615_vm4, %v611_v4, 0  ;;  %v798_v35 = vmul.f32 0.25, %v398_v7  ;;  %v887_v48 = vpack.c.bf16 %v9505_v8, %v9505_v8 }
 0x1d5   : > { %8358 = vmatpush3.bf16.msra.mxu0 %v617_v10  ;;  %v1073_v10 = vmul.f32 0.25, %v9497_v0 }
 0x1d6   : > { %8374 = vmatprep.subr.mxu0 %v9303_v63  ;;  %v892_v49 = vsel %vm615_vm4, %v887_v48, 0 }
 0x1d8   : > { %v9509_v11 = vpop.f32.mrb[8].mxu1 }
 0x1d9   : > { %v450_v12 = vpop.f32.mrb[9].mxu1 }
 0x1da   : > { %661 = vrot.lane.b32.xlu0 %v450_v12, %s9305_s11  ;;  %v9512_v13 = vpop.f32.mrb[10].mxu1  ;;  %8353 = vmatpush3.xpose.msk.msra.mxu1 %vm521_vm5, %v450_v12 }
 0x1db   : > { %v453_v16 = vpop.f32.mrb[11].mxu1  ;;  %8363 = vmatprep.subr.mxu1 %v9303_v63 }
 0x1dd   : > { %8355 = vmatmul.mubr.msk.f32.vlgmr.msra.gmra.mrb[12].mxu1 %vm521_vm5, %v520_v15 }
 0x1de   : > { %659 = vrot.lane.b32.xlu0 %v520_v15, %s9305_s11  ;;  %8365 = vmatprep.mubr.msk.f32.mxu1 %vm9304_vm3, %v9303_v63 }
 0x24c   : > { %v662_v17 = vpop.permute.xlu0 %661 }
 0x24d   : > { %8364 = vmatpush3.xpose.msk.msra.mxu1 %vm521_vm5, %v662_v17 }
 0x24e   : > { %8368 = vmatprep.subr.bf16.mxu1 %v9303_v63 }
 0x250   : > { %v660_v18 = vpop.permute.xlu0 %659 }
 0x251   : > { %8366 = vmatmul.mubr.msk.f32.vlgmr.msra.gmra.mrb[14].mxu1 %vm521_vm5, %v660_v18 }
 0x252   : > { %8370 = vmatprep.mubr.msk.bf16.mxu1 %vm9304_vm3, %v9303_v63 }
 0x2b0   : > { %v594_v19 = vpop.f32.mrb[12].mxu1 }
 0x2b1   : > { %v8356_v20 = vpop.f32.mrb[13].mxu1  ;;  %v599_v24 = vsel %vm598_vm6, %v594_v19, -inf }
 0x324   : > { %v733_v21 = vpop.f32.mrb[14].mxu1 }
 0x325   : > { %v8367_v22 = vpop.f32.mrb[15].mxu1  ;;  %v737_v23 = vsel %vm598_vm6, %v733_v21, -inf }
 0x326   : > { %738 = vmax.xlane.f32.xlu1 %v737_v23 }
 0x32a   : > { %600 = vmax.xlane.f32.xlu1 %v599_v24 }
 0x3b3   : > { %v739_v25 = vpop.xlane.xlu1 %738 }
 0x3b4   : > { %v740_v26 = vsub.f32 %v733_v21, %v739_v25 }
 0x3b6   : > { %v741_v27 = vmul.f32 1.442695, %v740_v26 }
 0x3b7   : > { %v601_v28 = vpop.xlane.xlu1 %600 }
 0x3b8   : > { %9019 = vpow2.f32 %v741_v27  ;;  %v602_v29 = vsub.f32 %v594_v19, %v601_v28 }
 0x3ba   : > { %v603_v30 = vmul.f32 1.442695, %v602_v29 }
 0x3bc   : > { %9021 = vpow2.f32 %v603_v30 }
 0x3c2   : > { %v9020_v31 = vpop.eup %9019 }
 0x3c3   : > { %v743_v32 = vsel %vm598_vm6, %v9020_v31, 0.0 }
 0x3c4   : > { %744 = vadd.xlane.f32.xlu0 %v743_v32 }
 0x3c6   : > { %v9022_v33 = vpop.eup %9021 }
 0x3c7   : > { %v605_v34 = vsel %vm598_vm6, %v9022_v33, 0.0 }
 0x3c8   : > { %606 = vadd.xlane.f32.xlu1 %v605_v34 }
 0x3d9   : > { %750 = vrot.lane.b32.xlu1 %v611_v4, %s9305_s11 }
 0x3dd   : > { %936 = vrot.lane.b32.xlu1 %v453_v16, %s9305_s11 }
 0x3e1   : > { %934 = vrot.lane.b32.xlu1 %v798_v35, %s9305_s11 }
 0x451   : > { %v745_v36 = vpop.xlane.xlu0 %744 }
 0x452   : > { %9023 = vrcp.f32 %v745_v36 }
 0x455   : > { %v607_v37 = vpop.xlane.xlu1 %606 }
 0x456   : > { %9025 = vrcp.f32 %v607_v37 }
 0x459   : > { %v751_v38 = vpop.permute.xlu1 %750 }
 0x45a   : > { %v756_v39 = vsel %vm615_vm4, %v751_v38, 0 }
 0x45b   : > { %8369 = vmatpush3.bf16.msra.mxu1 %v756_v39 }
 0x45c   : > { %v9024_v40 = vpop.eup %9023  ;;  %8385 = vmatprep.subr.mxu1 %v9303_v63 }
 0x45d   : > { %v747_v41 = vmul.f32 %v9024_v40, %v9020_v31  ;;  %v937_v45 = vpop.permute.xlu1 %936 }
 0x45f   : > { %v748_v42 = vpack.c.bf16 %v747_v41, %v747_v41 }
 0x460   : > { %v9026_v43 = vpop.eup %9025 }
 0x461   : > { %8371 = vmatmul.mubr.msk.bf16.vlgmr.msra.gmra.mrb[16].mxu1 %vm598_vm6, %v748_v42  ;;  %v609_v44 = vmul.f32 %v9026_v43, %v9022_v33  ;;  %v935_v47 = vpop.permute.xlu1 %934  ;;  %v1162_v33 = vpack.c.bf16 %v9499_v1, %v9499_v1 }
 0x462   : > { %8387 = vmatprep.mubr.msk.f32.mxu1 %vm9304_vm3, %v9303_v63 }
 0x463   : > { %v610_v46 = vpack.c.bf16 %v609_v44, %v609_v44 }
 0x464   : > { %8386 = vmatpush3.xpose.msk.msra.mxu1 %vm521_vm5, %v937_v45 }
 0x465   : > { %8360 = vmatmul.mubr.msk.bf16.vlgmr.msra.gmra.mrb[8].mxu0 %vm598_vm6, %v610_v46  ;;  %8390 = vmatprep.subr.bf16.mxu1 %v9303_v63 }
 0x466   : > { %8375 = vmatpush3.xpose.msk.msra.mxu0 %vm521_vm5, %v453_v16  ;;  %8376 = vmatprep.mubr.msk.f32.mxu0 %vm9304_vm3, %v9303_v63 }
 0x467   : > { %8379 = vmatprep.subr.bf16.mxu0 %v9303_v63 }
 0x469   : > { %8388 = vmatmul.mubr.msk.f32.vlgmr.msra.gmra.mrb[20].mxu1 %vm521_vm5, %v935_v47 }
 0x46a   : > { %8392 = vmatprep.mubr.msk.bf16.mxu1 %vm9304_vm3, %v9303_v63 }
 0x46d   : > { %8377 = vmatmul.mubr.msk.f32.vlgmr.msra.gmra.mrb[12].mxu0 %vm521_vm5, %v798_v35 }
 0x46e   : > { %8380 = vmatpush3.bf16.msra.mxu0 %v892_v49  ;;  %8381 = vmatprep.mubr.msk.bf16.mxu0 %vm9304_vm3, %v9303_v63 }
 0x46f   : > { %8396 = vmatprep.subr.mxu0 %v9303_v63 }
 0x534   : > { %v9554_v50 = vpop.f32.mrb[16].mxu1 }
 0x535   : > { %v8372_v51 = vpop.f32.mrb[17].mxu1 }
 0x536   : > { %v795_v52 = vpop.f32.mrb[18].mxu1 }
 0x537   : > { %v8373_v53 = vpop.f32.mrb[19].mxu1 }
 0x538   : > { %v9556_v57 = vpop.f32.mrb[8].mxu0 }
 0x539   : > { %v8361_v58 = vpop.f32.mrb[9].mxu0 }
 0x53a   : > { %v656_v60 = vpop.f32.mrb[10].mxu0 }
 0x53b   : > { %v8362_v61 = vpop.f32.mrb[11].mxu0 }
 0x53c   : > { %v1008_v62 = vpop.f32.mrb[20].mxu1 }
 0x53d   : > { %v8389_v2 = vpop.f32.mrb[21].mxu1  ;;  %v1012_v3 = vsel %vm598_vm6, %v1008_v62, -inf }
 0x53e   : > { %1013 = vmax.xlane.f32.xlu1 %v1012_v3 }
 0x540   : > { %v871_v4 = vpop.f32.mrb[12].mxu0 }
 0x541   : > { %v8378_v7 = vpop.f32.mrb[13].mxu0  ;;  %v875_v8 = vsel %vm598_vm6, %v871_v4, -inf }
 0x542   : > { %876 = vmax.xlane.f32.xlu0 %v875_v8  ;;  %v1348_v8 = vmul.f32 0.25, %v9501_v5 }
 0x54f   : > { %1209 = vrot.lane.b32.xlu1 %v1073_v10, %s9305_s11 }
 0x5cb   : > { %v1014_v12 = vpop.xlane.xlu1 %1013 }
 0x5cc   : > { %v1015_v15 = vsub.f32 %v1008_v62, %v1014_v12 }
 0x5ce   : > { %v1016_v18 = vmul.f32 1.442695, %v1015_v15 }
 0x5cf   : > { %v877_v16 = vpop.xlane.xlu0 %876  ;;  %v1210_v1 = vpop.permute.xlu1 %1209 }
 0x5d0   : > { %v878_v17 = vsub.f32 %v871_v4, %v877_v16 }
 0x5d2   : > { %v879_v19 = vmul.f32 1.442695, %v878_v17 }
 0x5d4   : > { %9027 = vpow2.f32 %v879_v19 }
 0x5d5   : > { %9029 = vpow2.f32 %v1016_v18 }
 0x5de   : > { %v9028_v20 = vpop.eup %9027 }
 0x5df   : > { %v881_v21 = vsel %vm598_vm6, %v9028_v20, 0.0  ;;  %v9030_v22 = vpop.eup %9029 }
 0x5e0   : > { %882 = vadd.xlane.f32.xlu0 %v881_v21  ;;  %v1018_v23 = vsel %vm598_vm6, %v9030_v22, 0.0 }
 0x5e4   : > { %1019 = vadd.xlane.f32.xlu0 %v1018_v23 }
 0x5fa   : > { %1025 = vrot.lane.b32.xlu0 %v887_v48, %s9305_s11 }
 0x5fe   : > { %1211 = vrot.lane.b32.xlu0 %v9509_v11, %s9305_s11 }
 0x66d   : > { %v883_v0 = vpop.xlane.xlu0 %882 }
 0x66e   : > { %9031 = vrcp.f32 %v883_v0 }
 0x671   : > { %v1020_v24 = vpop.xlane.xlu0 %1019 }
 0x672   : > { %9033 = vrcp.f32 %v1020_v24 }
 0x675   : > { %v1026_v25 = vpop.permute.xlu0 %1025 }
 0x676   : > { %v1031_v26 = vsel %vm615_vm4, %v1026_v25, 0 }
 0x677   : > { %8391 = vmatpush3.bf16.msra.mxu1 %v1031_v26 }
 0x678   : > { %v9032_v27 = vpop.eup %9031  ;;  %8407 = vmatprep.subr.mxu1 %v9303_v63 }
 0x679   : > { %v885_v28 = vmul.f32 %v9032_v27, %v9028_v20  ;;  %v1212_v34 = vpop.permute.xlu0 %1211 }
 0x67b   : > { %v886_v29 = vpack.c.bf16 %v885_v28, %v885_v28 }
 0x67c   : > { %v9034_v30 = vpop.eup %9033 }
 0x67d   : > { %8382 = vmatmul.mubr.msk.bf16.vlgmr.msra.gmra.mrb[16].mxu0 %vm598_vm6, %v886_v29  ;;  %v1022_v31 = vmul.f32 %v9034_v30, %v9030_v22  ;;  %v1437_v22 = vpack.c.bf16 %v9503_v6, %v9503_v6 }
 0x67e   : > { %8397 = vmatpush3.xpose.msk.msra.mxu0 %vm521_vm5, %v9509_v11  ;;  %8398 = vmatprep.mubr.msk.f32.mxu0 %vm9304_vm3, %v9303_v63  ;;  %v1167_v11 = vsel %vm615_vm4, %v1162_v33, 0 }
 0x67f   : > { %v1023_v32 = vpack.c.bf16 %v1022_v31, %v1022_v31  ;;  %8401 = vmatprep.subr.bf16.mxu0 %v9303_v63 }
 0x681   : > { %8393 = vmatmul.mubr.msk.bf16.vlgmr.msra.gmra.mrb[24].mxu1 %vm598_vm6, %v1023_v32 }
 0x682   : > { %8408 = vmatpush3.xpose.msk.msra.mxu1 %vm521_vm5, %v1212_v34  ;;  %8409 = vmatprep.mubr.msk.f32.mxu1 %vm9304_vm3, %v9303_v63 }
 0x683   : > { %8412 = vmatprep.subr.bf16.mxu1 %v9303_v63 }
 0x685   : > { %8399 = vmatmul.mubr.msk.f32.vlgmr.msra.gmra.mrb[14].mxu0 %vm521_vm5, %v1073_v10 }
 0x686   : > { %8402 = vmatpush3.bf16.msra.mxu0 %v1167_v11  ;;  %8403 = vmatprep.mubr.msk.bf16.mxu0 %vm9304_vm3, %v9303_v63 }
 0x687   : > { %8418 = vmatprep.subr.mxu0 %v9303_v63 }
 0x689   : > { %8410 = vmatmul.mubr.msk.f32.vlgmr.msra.gmra.mrb[22].mxu1 %vm521_vm5, %v1210_v1 }
 0x68a   : > { %8414 = vmatprep.mubr.msk.bf16.mxu1 %vm9304_vm3, %v9303_v63 }
 0x750   : > { %v9590_v35 = vpop.f32.mrb[16].mxu0 }
 0x751   : > { %v1627_v36 = vpack.c.bf16 %v9590_v35, %v9556_v57  ;;  %v8383_v37 = vpop.f32.mrb[17].mxu0 }
 0x752   : > { %v931_v38 = vpop.f32.mrb[18].mxu0 }
 0x753   : > { %v8384_v39 = vpop.f32.mrb[19].mxu0 }
 0x754   : > { %v9594_v40 = vpop.f32.mrb[24].mxu1 }
 0x755   : > { %v1630_v41 = vpack.c.bf16 %v9594_v40, %v9554_v50  ;;  %v8394_v42 = vpop.f32.mrb[25].mxu1 }
 0x756   : > { %v1070_v43 = vpop.f32.mrb[26].mxu1 }
 0x757   : > { %v8395_v44 = vpop.f32.mrb[27].mxu1 }
 0x758   : > { %v1146_v45 = vpop.f32.mrb[14].mxu0 }
 0x759   : > { %v8400_v46 = vpop.f32.mrb[15].mxu0  ;;  %v1150_v47 = vsel %vm598_vm6, %v1146_v45, -inf }
 0x75a   : > { %1151 = vmax.xlane.f32.xlu1 %v1150_v47 }
 0x75c   : > { %v1283_v48 = vpop.f32.mrb[22].mxu1 }
 0x75d   : > { %v8411_v49 = vpop.f32.mrb[23].mxu1  ;;  %v1287_v51 = vsel %vm598_vm6, %v1283_v48, -inf }
 0x75e   : > { %1288 = vmax.xlane.f32.xlu0 %v1287_v51 }
 0x76b   : > { %1486 = vrot.lane.b32.xlu1 %v9512_v13, %s9305_s11 }
 0x7e7   : > { %v1152_v52 = vpop.xlane.xlu1 %1151 }
 0x7e8   : > { %v1153_v53 = vsub.f32 %v1146_v45, %v1152_v52  ;;  %v1625_v52 = vld [vmem:[%s10960_s2 + $0x70] sm:$0xff] }
 0x7ea   : > { %v1154_v58 = vmul.f32 1.442695, %v1153_v53  ;;  %v1626_v53 = vld [vmem:[%s10960_s2 + $0x78] sm:$0xff] }
 0x7eb   : > { %v1289_v60 = vpop.xlane.xlu0 %1288  ;;  %v1487_v23 = vpop.permute.xlu1 %1486 }
 0x7ec   : > { %9035 = vpow2.f32 %v1154_v58  ;;  %v1290_v61 = vsub.f32 %v1283_v48, %v1289_v60  ;;  %v1632_v58 = vpack.c.bf16 %v1626_v53, %v1625_v52 }
 0x7ee   : > { %v1291_v62 = vmul.f32 1.442695, %v1290_v61 }
 0x7f0   : > { %9037 = vpow2.f32 %v1291_v62 }
 0x7f6   : > { %v9036_v2 = vpop.eup %9035 }
 0x7f7   : > { %v1156_v3 = vsel %vm598_vm6, %v9036_v2, 0.0 }
 0x7f8   : > { %1157 = vadd.xlane.f32.xlu0 %v1156_v3 }
 0x7fa   : > { %v9038_v4 = vpop.eup %9037 }
 0x7fb   : > { %v1293_v7 = vsel %vm598_vm6, %v9038_v4, 0.0 }
 0x7fc   : > { %1294 = vadd.xlane.f32.xlu0 %v1293_v7 }
 0x812   : > { %1300 = vrot.lane.b32.xlu0 %v1162_v33, %s9305_s11 }
 0x816   : > { %1484 = vrot.lane.b32.xlu0 %v1348_v8, %s9305_s11 }
 0x885   : > { %v1158_v10 = vpop.xlane.xlu0 %1157 }
 0x886   : > { %9039 = vrcp.f32 %v1158_v10  ;;  %v1623_v10 = vld [vmem:[%s10960_s2 + $0x60] sm:$0xff] }
 0x889   : > { %v1295_v12 = vpop.xlane.xlu0 %1294 }
 0x88a   : > { %9041 = vrcp.f32 %v1295_v12  ;;  %v1624_v12 = vld [vmem:[%s10960_s2 + $0x68] sm:$0xff] }
 0x88d   : > { %v1301_v15 = vpop.permute.xlu0 %1300 }
 0x88e   : > { %v1306_v16 = vsel %vm615_vm4, %v1301_v15, 0  ;;  %v1629_v15 = vpack.c.bf16 %v1624_v12, %v1623_v10 }
 0x88f   : > { %8413 = vmatpush3.bf16.msra.mxu1 %v1306_v16 }
 0x890   : > { %v9040_v17 = vpop.eup %9039  ;;  %8429 = vmatprep.subr.mxu1 %v9303_v63 }
 0x891   : > { %v1160_v18 = vmul.f32 %v9040_v17, %v9036_v2  ;;  %v1485_v0 = vpop.permute.xlu0 %1484 }
 0x893   : > { %v1161_v19 = vpack.c.bf16 %v1160_v18, %v1160_v18 }
 0x894   : > { %v9042_v20 = vpop.eup %9041 }
 0x895   : > { %8404 = vmatmul.mubr.msk.bf16.vlgmr.msra.gmra.mrb[20].mxu0 %vm598_vm6, %v1161_v19  ;;  %v1297_v21 = vmul.f32 %v9042_v20, %v9038_v4 }
 0x896   : > { %8419 = vmatpush3.xpose.msk.msra.mxu0 %vm521_vm5, %v9512_v13  ;;  %8420 = vmatprep.mubr.msk.f32.mxu0 %vm9304_vm3, %v9303_v63  ;;  %v1442_v13 = vsel %vm615_vm4, %v1437_v22, 0 }
 0x897   : > { %v1298_v5 = vpack.c.bf16 %v1297_v21, %v1297_v21  ;;  %8423 = vmatprep.subr.bf16.mxu0 %v9303_v63 }
 0x899   : > { %8415 = vmatmul.mubr.msk.bf16.vlgmr.msra.gmra.mrb[28].mxu1 %vm598_vm6, %v1298_v5 }
 0x89a   : > { %8430 = vmatpush3.xpose.msk.msra.mxu1 %vm521_vm5, %v1487_v23  ;;  %8431 = vmatprep.mubr.msk.f32.mxu1 %vm9304_vm3, %v9303_v63 }
 0x89b   : > { %8434 = vmatprep.subr.bf16.mxu1 %v9303_v63 }
 0x89d   : > { %8421 = vmatmul.mubr.msk.f32.vlgmr.msra.gmra.mrb[24].mxu0 %vm521_vm5, %v1348_v8 }
 0x89e   : > { %8424 = vmatpush3.bf16.msra.mxu0 %v1442_v13  ;;  %8425 = vmatprep.mubr.msk.bf16.mxu0 %vm9304_vm3, %v9303_v63 }
 0x89f   : > { %8440 = vmatprep.subr.bf16.mxu0 %v1632_v58 }
 0x8a1   : > { %8432 = vmatmul.mubr.msk.f32.vlgmr.msra.gmra.mrb[32].mxu1 %vm521_vm5, %v1485_v0 }
 0x8a2   : > { %8436 = vmatprep.mubr.msk.bf16.mxu1 %vm9304_vm3, %v9303_v63 }
 0x968   : > { %v9629_v6 = vpop.f32.mrb[20].mxu0 }
 0x969   : > { %v8405_v24 = vpop.f32.mrb[21].mxu0 }
 0x96a   : > { %v1206_v25 = vpop.f32.mrb[22].mxu0 }
 0x96b   : > { %v8406_v26 = vpop.f32.mrb[23].mxu0 }
 0x96c   : > { %v1342_v27 = vpop.f32.mrb[28].mxu1 }
 0x96d   : > { %v8416_v28 = vpop.f32.mrb[29].mxu1 }
 0x96e   : > { %v1345_v29 = vpop.f32.mrb[30].mxu1 }
 0x96f   : > { %v8417_v30 = vpop.f32.mrb[31].mxu1 }
 0x970   : > { %v1421_v31 = vpop.f32.mrb[24].mxu0 }
 0x971   : > { %v8422_v32 = vpop.f32.mrb[25].mxu0  ;;  %v1425_v33 = vsel %vm598_vm6, %v1421_v31, -inf }
 0x972   : > { %1426 = vmax.xlane.f32.xlu1 %v1425_v33 }
 0x974   : > { %v1558_v34 = vpop.f32.mrb[32].mxu1 }
 0x975   : > { %v8433_v11 = vpop.f32.mrb[33].mxu1  ;;  %v1562_v1 = vsel %vm598_vm6, %v1558_v34, -inf }
 0x976   : > { %1563 = vmax.xlane.f32.xlu0 %v1562_v1 }
 0x983   : > { %1575 = vrot.lane.b32.xlu1 %v1437_v22, %s9305_s11 }
 0x9ff   : > { %v1427_v37 = vpop.xlane.xlu1 %1426 }
 0xa00   : > { %v1428_v38 = vsub.f32 %v1421_v31, %v1427_v37 }
 0xa02   : > { %v1429_v45 = vmul.f32 1.442695, %v1428_v38 }
 0xa03   : > { %v1576_v39 = vpop.permute.xlu1 %1575  ;;  %v1564_v42 = vpop.xlane.xlu0 %1563 }
 0xa04   : > { %v1581_v43 = vsel %vm615_vm4, %v1576_v39, 0  ;;  %v1565_v44 = vsub.f32 %v1558_v34, %v1564_v42 }
 0xa05   : > { %8435 = vmatpush3.bf16.msra.mxu1 %v1581_v43 }
 0xa06   : > { %v1566_v46 = vmul.f32 1.442695, %v1565_v44 }
 0xa08   : > { %9043 = vpow2.f32 %v1566_v46  ;;  %v1818_v46 = vld [vmem:[%s10960_s2 + $0x90] sm:$0xff] }
 0xa09   : > { %9045 = vpow2.f32 %v1429_v45 }
 0xa12   : > { %v9044_v47 = vpop.eup %9043 }
 0xa13   : > { %v1568_v48 = vsel %vm598_vm6, %v9044_v47, 0.0  ;;  %v9046_v49 = vpop.eup %9045 }
 0xa14   : > { %1569 = vadd.xlane.f32.xlu0 %v1568_v48  ;;  %v1431_v51 = vsel %vm598_vm6, %v9046_v49, 0.0 }
 0xa18   : > { %1432 = vadd.xlane.f32.xlu0 %v1431_v51  ;;  %v1821_v51 = vld [vmem:[%s10960_s2 + $0xa8] sm:$0xff] }
 0xaa1   : > { %v1570_v60 = vpop.xlane.xlu0 %1569 }
 0xaa2   : > { %9047 = vrcp.f32 %v1570_v60 }
 0xaa5   : > { %v1433_v61 = vpop.xlane.xlu0 %1432 }
 0xaa6   : > { %9049 = vrcp.f32 %v1433_v61 }
 0xaac   : > { %v9048_v62 = vpop.eup %9047 }
 0xaad   : > { %v1572_v2 = vmul.f32 %v9048_v62, %v9044_v47  ;;  %v1819_v47 = vld [vmem:[%s10960_s2 + $0x98] sm:$0xff] }
 0xaae   : > { %v1824_v48 = vpack.c.bf16 %v1819_v47, %v1818_v46 }
 0xaaf   : > { %v1573_v3 = vpack.c.bf16 %v1572_v2, %v1572_v2 }
 0xab0   : > { %v9050_v4 = vpop.eup %9049  ;;  %8452 = vmatprep.subr.bf16.mxu1 %v1824_v48 }
 0xab1   : > { %8437 = vmatmul.mubr.msk.bf16.vlgmr.msra.gmra.mrb[36].mxu1 %vm598_vm6, %v1573_v3  ;;  %v1435_v7 = vmul.f32 %v9050_v4, %v9046_v49  ;;  %v1820_v49 = vld [vmem:[%s10960_s2 + $0xa0] sm:$0xff] }
 0xab2   : > { %v1825_v52 = vpack.c.bf16 %v1821_v51, %v1820_v49  ;;  %8453 = vmatpush3.bf16.msra.mxu1 %v1824_v48 }
 0xab3   : > { %v1436_v8 = vpack.c.bf16 %v1435_v7, %v1435_v7 }
 0xab4   : > { %8454 = vmatprep.subr.bf16.mxu1 %v1825_v52 }
 0xab5   : > { %8426 = vmatmul.mubr.msk.bf16.vlgmr.msra.gmra.mrb[28].mxu0 %vm598_vm6, %v1436_v8 }
 0xab6   : > { %8442 = vmatprep.mubr.msk.bf16.mxu0 %vm521_vm5, %v1630_v41  ;;  %8441 = vmatpush3.bf16.msra.mxu0 %v1632_v58 }
 0xab7   : > { %8446 = vmatprep.subr.bf16.mxu0 %v1629_v15  ;;  %8455 = vmatpush3.bf16.msra.mxu1 %v1825_v52 }
 0xb84   : > { %v1617_v16 = vpop.f32.mrb[36].mxu1 }
 0xb85   : > { %v1631_v17 = vpack.c.bf16 %v1617_v16, %v1342_v27  ;;  %v8438_v18 = vpop.f32.mrb[37].mxu1 }
 0xb86   : > { %v1620_v19 = vpop.f32.mrb[38].mxu1 }
 0xb87   : > { %v8439_v20 = vpop.f32.mrb[39].mxu1  ;;  %8443 = vmatmul.mubr.msk.bf16.vlgmr.msra.gmra.mrb[32].mxu0 %vm521_vm5, %v1631_v17  ;;  %v7888_v19 = vld [vmem:[%s10960_s2 + $0x80] ss:$0 sm:$0xff] }
 0xb88   : > { %v1478_v50 = vpop.f32.mrb[28].mxu0  ;;  %8448 = vmatprep.mubr.msk.bf16.mxu0 %vm521_vm5, %v1627_v36  ;;  %8447 = vmatpush3.bf16.msra.mxu0 %v1629_v15 }
 0xb89   : > { %v1628_v40 = vpack.c.bf16 %v1478_v50, %v9629_v6  ;;  %v8427_v41 = vpop.f32.mrb[29].mxu0 }
 0xb8a   : > { %v1481_v21 = vpop.f32.mrb[30].mxu0 }
 0xb8b   : > { %v8428_v5 = vpop.f32.mrb[31].mxu0 }
 0xb8c   : > { %v7889_v5 = vld [vmem:[%s10960_s2 + $0x88] ss:$0 sm:$0xff] }
 0xb93   : > { %8449 = vmatmul.mubr.msk.bf16.vlgmr.msra.gmra.mrb[32].mxu0 %vm521_vm5, %v1628_v40 }
 0xc66   : > { %v8450_v22 = vpop.f32.mrb[32].mxu0 }
 0xc67   : > { %v1745_v23 = vadd.f32 %v8450_v22, %v9479_v59  ;;  %v1728_v13 = vpop.f32.mrb[33].mxu0 }
 0xc68   : > { %v8451_v0 = vpop.f32.mrb[34].mxu0  ;;  %v1743_v24 = vadd.f32 %v1728_v13, %v9469_v55 }
 0xc69   : > { %v1731_v25 = vpop.f32.mrb[35].mxu0  ;;  %v1755_v57 = vsel %vm354_vm2, %v1745_v23, 0.0  ;;  %v1746_v6 = vadd.f32 %v8451_v0, %v9467_v54 }
 0xc6a   : > { %1756 = vadd.xlane.f32.xlu0 %v1755_v57  ;;  %v1744_v35 = vadd.f32 %v1731_v25, %v9471_v56  ;;  %v1749_v36 = vsel %vm354_vm2, %v1743_v24, 0.0 }
 0xc6b   : > { %v1758_v59 = vsel %vm354_vm2, %v1746_v6, 0.0 }
 0xc6c   : > { %v1752_v26 = vsel %vm354_vm2, %v1744_v35, 0.0 }
 0xc6e   : > { %1750 = vadd.xlane.f32.xlu0 %v1749_v36 }
 0xc72   : > { %1753 = vadd.xlane.f32.xlu0 %v1752_v26  ;;  %v1891_v26 = vld [vmem:[%s10960_s2 + $0xc0] sm:$0xff] }
 0xc76   : > { %1759 = vadd.xlane.f32.xlu0 %v1758_v59 }
 0xcf7   : > { %v1757_v27 = vpop.xlane.xlu0 %1756 }
 0xcf8   : > { %v1764_v28 = vmul.f32 0.03125, %v1757_v27  ;;  %v1892_v27 = vld [vmem:[%s10960_s2 + $0xc8] sm:$0xff] }
 0xcfa   : > { %v1768_v55 = vsub.f32 %v1745_v23, %v1764_v28  ;;  %v1893_v28 = vld [vmem:[%s10960_s2 + $0xd0] sm:$0xff] }
 0xcfb   : > { %v1751_v29 = vpop.xlane.xlu0 %1750 }
 0xcfc   : > { %v1762_v30 = vmul.f32 0.03125, %v1751_v29  ;;  %v1772_v31 = vmul.f32 %v1768_v55, %v1768_v55  ;;  %v7890_v29 = vld [vmem:[%s10960_s2 + $0xb0] ss:$0 sm:$0xff] }
 0xcfe   : > { %v1766_v32 = vsub.f32 %v1743_v24, %v1762_v30  ;;  %v1780_v56 = vsel %vm354_vm2, %v1772_v31, 0.0 }
 0xcff   : > { %1781 = vadd.xlane.f32.xlu0 %v1780_v56  ;;  %v1754_v33 = vpop.xlane.xlu0 %1753 }
 0xd00   : > { %v1763_v34 = vmul.f32 0.03125, %v1754_v33  ;;  %v1770_v11 = vmul.f32 %v1766_v32, %v1766_v32 }
 0xd02   : > { %v1767_v54 = vsub.f32 %v1744_v35, %v1763_v34  ;;  %v1774_v1 = vsel %vm354_vm2, %v1770_v11, 0.0 }
 0xd03   : > { %1775 = vadd.xlane.f32.xlu1 %v1774_v1  ;;  %v1760_v37 = vpop.xlane.xlu0 %1759 }
 0xd04   : > { %v1765_v38 = vmul.f32 0.03125, %v1760_v37  ;;  %v1771_v39 = vmul.f32 %v1767_v54, %v1767_v54 }
 0xd06   : > { %v1769_v42 = vsub.f32 %v1746_v6, %v1765_v38  ;;  %v1777_v43 = vsel %vm354_vm2, %v1771_v39, 0.0  ;;  %v1890_v6 = vld [vmem:[%s10960_s2 + $0xb8] sm:$0xff] }
 0xd07   : > { %1778 = vadd.xlane.f32.xlu0 %v1777_v43  ;;  %v1896_v59 = vpack.c.bf16 %v1891_v26, %v1890_v6  ;;  %v2096_v26 = vld [vmem:[%s10960_s2 + $0x118] sm:$0xff] }
 0xd08   : > { %v1773_v44 = vmul.f32 %v1769_v42, %v1769_v42 }
 0xd09   : > { %8460 = vmatprep.subr.bf16.mxu1 %v1896_v59 }
 0xd0a   : > { %v1783_v45 = vsel %vm354_vm2, %v1773_v44, 0.0  ;;  %v7893_v44 = vld [vmem:[%s10960_s2 + $0xd8] ss:$0 sm:$0xff] }
 0xd0b   : > { %1784 = vadd.xlane.f32.xlu0 %v1783_v45 }
 0xd8c   : > { %v1782_v53 = vpop.xlane.xlu0 %1781 }
 0xd8d   : > { %v1788_v58 = vmul.f32 0.03125, %v1782_v53 }
 0xd8f   : > { %v1792_v62 = vadd.f32 1e-05, %v1788_v58 }
 0xd90   : > { %v1776_v60 = vpop.xlane.xlu1 %1775 }
 0xd91   : > { %v1786_v61 = vmul.f32 0.03125, %v1776_v60 }
 0xd93   : > { %v1790_v2 = vadd.f32 1e-05, %v1786_v61 }
 0xd94   : > { %v1779_v3 = vpop.xlane.xlu0 %1778 }
 0xd95   : > { %9051 = vrsqrt.f32 %v1790_v2  ;;  %v1787_v4 = vmul.f32 0.03125, %v1779_v3 }
 0xd96   : > { %9053 = vrsqrt.f32 %v1792_v62 }
 0xd97   : > { %v1791_v7 = vadd.f32 1e-05, %v1787_v4 }
 0xd98   : > { %v1785_v8 = vpop.xlane.xlu0 %1784 }
 0xd99   : > { %9055 = vrsqrt.f32 %v1791_v7  ;;  %v1789_v10 = vmul.f32 0.03125, %v1785_v8 }
 0xd9b   : > { %v1793_v12 = vadd.f32 1e-05, %v1789_v10 }
 0xd9d   : > { %9057 = vrsqrt.f32 %v1793_v12 }
 0xd9f   : > { %v9052_v15 = vpop.eup %9051 }
 0xda0   : > { %v1798_v16 = vmul.f32 %v9052_v15, %v1766_v32  ;;  %v9054_v17 = vpop.eup %9053 }
 0xda1   : > { %v1800_v20 = vmul.f32 %v9054_v17, %v1768_v55  ;;  %v1897_v55 = vpack.c.bf16 %v1893_v28, %v1892_v27  ;;  %v2034_v27 = vld [vmem:[%s10960_s2 + $0x100] sm:$0xff]  ;;  %v2035_v28 = vld [vmem:[%s10960_s2 + $0x108] sm:$0xff] }
 0xda2   : > { %v1806_v40 = vmul.f32 %v7888_v19, %v1798_v16 }
 0xda3   : > { %v9056_v18 = vpop.eup %9055  ;;  %v1808_v0 = vmul.f32 %v7888_v19, %v1800_v20 }
 0xda4   : > { %v1799_v50 = vmul.f32 %v9056_v18, %v1767_v54  ;;  %v1814_v23 = vadd.f32 %v7889_v5, %v1806_v40 }
 0xda5   : > { %v1816_v57 = vadd.f32 %v7889_v5, %v1808_v0 }
 0xda6   : > { %v1807_v41 = vmul.f32 %v7888_v19, %v1799_v50 }
 0xda7   : > { %v9058_v21 = vpop.eup %9057 }
 0xda8   : > { %v1801_v22 = vmul.f32 %v9058_v21, %v1769_v42  ;;  %v1815_v13 = vadd.f32 %v7889_v5, %v1807_v41 }
 0xdaa   : > { %v1822_v24 = vpack.c.bf16 %v1815_v13, %v1814_v23  ;;  %v1809_v25 = vmul.f32 %v7888_v19, %v1801_v22 }
 0xdac   : > { %8456 = vmatprep.mubr.msk.bf16.mxu1 %vm354_vm2, %v1822_v24  ;;  %v1817_v35 = vadd.f32 %v7889_v5, %v1809_v25 }
 0xdae   : > { %v1823_v36 = vpack.c.bf16 %v1817_v35, %v1816_v57 }
 0xdb0   : > { %8457 = vmatmul.mubr.msk.bf16.vlgmr.msra.gmra.mrb[40].mxu1 %vm354_vm2, %v1823_v36  ;;  %v2095_v36 = vld [vmem:[%s10960_s2 + $0x110] sm:$0xff] }
 0xdb1   : > { %8461 = vmatpush3.bf16.msra.mxu1 %v1896_v59  ;;  %v2099_v59 = vpack.c.bf16 %v2096_v26, %v2095_v36 }
 0xdb2   : > { %8462 = vmatprep.subr.bf16.mxu1 %v1897_v55 }
 0xdb5   : > { %8463 = vmatpush3.bf16.msra.mxu1 %v1897_v55  ;;  %v2039_v55 = vpack.c.bf16 %v2035_v28, %v2034_v27 }
 0xdb6   : > { %8476 = vmatprep.subr.bf16.mxu1 %v2099_v59 }
 0xe83   : > { %v8458_v30 = vpop.f32.mrb[40].mxu1 }
 0xe84   : > { %v1880_v31 = vadd.f32 %v8458_v30, %v7890_v29  ;;  %v1871_v32 = vpop.f32.mrb[41].mxu1  ;;  %v2098_v30 = vld [vmem:[%s10960_s2 + $0x128] sm:$0xff] }
 0xe85   : > { %v1872_v56 = vadd.f32 %v7890_v29, %v1871_v32  ;;  %v8459_v33 = vpop.f32.mrb[42].mxu1  ;;  %v2150_v32 = vld [vmem:[%s10960_s2 + $0x130] sm:$0xff] }
 0xe86   : > { %v1883_v34 = vadd.f32 %v8459_v33, %v7890_v29  ;;  %v1874_v11 = vpop.f32.mrb[43].mxu1  ;;  %v1888_v1 = vmax.f32 %v1880_v31, 0.0 }
 0xe87   : > { %v1875_v54 = vadd.f32 %v7890_v29, %v1874_v11  ;;  %v1886_v38 = vmax.f32 %v1872_v56, 0.0  ;;  %v2097_v29 = vld [vmem:[%s10960_s2 + $0x120] sm:$0xff]  ;;  %v2151_v56 = vld [vmem:[%s10960_s2 + $0x138] sm:$0xff] }
 0xe88   : > { %v1889_v37 = vmax.f32 %v1883_v34, 0.0  ;;  %v2100_v31 = vpack.c.bf16 %v2098_v30, %v2097_v29  ;;  %v2154_v33 = vpack.c.bf16 %v2151_v56, %v2150_v32 }
 0xe89   : > { %v1887_v39 = vmax.f32 %v1875_v54, 0.0 }
 0xe8a   : > { %v1895_v42 = vpack.c.bf16 %v1889_v37, %v1888_v1 }
 0xe8b   : > { %v1894_v43 = vpack.c.bf16 %v1887_v39, %v1886_v38 }
 0xe8d   : > { %8464 = vmatprep.mubr.msk.bf16.mxu1 %vm354_vm2, %v1894_v43 }
 0xe8e   : > { %8465 = vmatmul.mubr.msk.bf16.vlgmr.msra.gmra.mrb[44].mxu1 %vm354_vm2, %v1895_v42 }
 0xe8f   : > { %8477 = vmatpush3.bf16.msra.mxu1 %v2099_v59 }
 0xe90   : > { %8478 = vmatprep.subr.bf16.mxu1 %v2100_v31 }
 0xe93   : > { %8479 = vmatpush3.bf16.msra.mxu1 %v2100_v31 }
 0xe94   : > { %8492 = vmatprep.subr.mxu1 %v9303_v63 }
 0xf61   : > { %v8466_v45 = vpop.f32.mrb[44].mxu1 }
 0xf62   : > { %v1952_v46 = vadd.f32 %v8466_v45, %v7893_v44  ;;  %v1943_v47 = vpop.f32.mrb[45].mxu1 }
 0xf63   : > { %v1944_v48 = vadd.f32 %v7893_v44, %v1943_v47  ;;  %v8467_v49 = vpop.f32.mrb[46].mxu1 }
 0xf64   : > { %v1946_v51 = vpop.f32.mrb[47].mxu1  ;;  %v1960_v52 = vadd.f32 %v1952_v46, %v1816_v57  ;;  %v1955_v61 = vadd.f32 %v8467_v49, %v7893_v44  ;;  %v2032_v57 = vld [vmem:[%s10960_s2 + $0xf0] sm:$0xff] }
 0xf65   : > { %v1947_v53 = vadd.f32 %v7893_v44, %v1946_v51  ;;  %v1958_v60 = vadd.f32 %v1944_v48, %v1814_v23 }
 0xf66   : > { %v1970_v58 = vsel %vm354_vm2, %v1960_v52, 0.0  ;;  %v1961_v4 = vadd.f32 %v1955_v61, %v1817_v35  ;;  %v2033_v35 = vld [vmem:[%s10960_s2 + $0xf8] sm:$0xff] }
 0xf67   : > { %1971 = vadd.xlane.f32.xlu0 %v1970_v58  ;;  %v1964_v62 = vsel %vm354_vm2, %v1958_v60, 0.0  ;;  %v1959_v2 = vadd.f32 %v1947_v53, %v1815_v13  ;;  %v2038_v6 = vpack.c.bf16 %v2033_v35, %v2032_v57 }
 0xf68   : > { %v1973_v7 = vsel %vm354_vm2, %v1961_v4, 0.0 }
 0xf69   : > { %v1967_v3 = vsel %vm354_vm2, %v1959_v2, 0.0  ;;  %8468 = vmatprep.subr.bf16.mxu0 %v2038_v6 }
 0xf6a   : > { %8469 = vmatpush3.bf16.msra.mxu0 %v2038_v6 }
 0xf6b   : > { %1965 = vadd.xlane.f32.xlu0 %v1964_v62  ;;  %8470 = vmatprep.subr.bf16.mxu0 %v2039_v55 }
 0xf6e   : > { %8471 = vmatpush3.bf16.msra.mxu0 %v2039_v55 }
 0xf6f   : > { %1968 = vadd.xlane.f32.xlu0 %v1967_v3  ;;  %8484 = vmatprep.subr.bf16.mxu0 %v2154_v33 }
 0xf73   : > { %1974 = vadd.xlane.f32.xlu0 %v1973_v7 }
 0xff4   : > { %v1972_v8 = vpop.xlane.xlu0 %1971 }
 0xff5   : > { %v1978_v10 = vmul.f32 0.03125, %v1972_v8 }
 0xff7   : > { %v9718_v12 = vsub.f32 %v1960_v52, %v1978_v10  ;;  %v7896_v52 = vld [vmem:[%s10960_s2 + $0xe0] ss:$0 sm:$0xff] }
 0xff8   : > { %v1966_v15 = vpop.xlane.xlu0 %1965 }
 0xff9   : > { %v1976_v16 = vmul.f32 0.03125, %v1966_v15  ;;  %v1986_v17 = vmul.f32 %v9718_v12, %v9718_v12 }
 0xffb   : > { %v1980_v18 = vsub.f32 %v1958_v60, %v1976_v16  ;;  %v1994_v19 = vsel %vm354_vm2, %v1986_v17, 0.0  ;;  %v2153_v16 = vld [vmem:[%s10960_s2 + $0x148] sm:$0xff] }
 0xffc   : > { %1995 = vadd.xlane.f32.xlu1 %v1994_v19  ;;  %v1969_v20 = vpop.xlane.xlu0 %1968 }
 0xffd   : > { %v1977_v50 = vmul.f32 0.03125, %v1969_v20  ;;  %v1984_v40 = vmul.f32 %v1980_v18, %v1980_v18 }
 0xfff   : > { %v1981_v41 = vsub.f32 %v1959_v2, %v1977_v50  ;;  %v1988_v21 = vsel %vm354_vm2, %v1984_v40, 0.0  ;;  %v7897_v2 = vld [vmem:[%s10960_s2 + $0xe8] ss:$0 sm:$0xff] }
0x1000   : > { %1989 = vadd.xlane.f32.xlu0 %v1988_v21  ;;  %v1975_v5 = vpop.xlane.xlu0 %1974 }
0x1001   : > { %v1979_v22 = vmul.f32 0.03125, %v1975_v5  ;;  %v1985_v23 = vmul.f32 %v1981_v41, %v1981_v41 }
0x1003   : > { %v1983_v13 = vsub.f32 %v1961_v4, %v1979_v22  ;;  %v1991_v0 = vsel %vm354_vm2, %v1985_v23, 0.0 }
0x1004   : > { %1992 = vadd.xlane.f32.xlu0 %v1991_v0 }
0x1005   : > { %v1987_v24 = vmul.f32 %v1983_v13, %v1983_v13 }
0x1007   : > { %v1997_v25 = vsel %vm354_vm2, %v1987_v24, 0.0 }
0x1008   : > { %1998 = vadd.xlane.f32.xlu0 %v1997_v25 }
0x1089   : > { %v1996_v34 = vpop.xlane.xlu1 %1995 }
0x108a   : > { %v2002_v11 = vmul.f32 0.03125, %v1996_v34 }
0x108c   : > { %v2006_v37 = vadd.f32 1e-05, %v2002_v11 }
0x108d   : > { %v1990_v54 = vpop.xlane.xlu0 %1989 }
0x108e   : > { %v2000_v1 = vmul.f32 0.03125, %v1990_v54 }
0x1090   : > { %v2004_v38 = vadd.f32 1e-05, %v2000_v1 }
0x1091   : > { %v1993_v39 = vpop.xlane.xlu0 %1992 }
0x1092   : > { %9059 = vrsqrt.f32 %v2004_v38  ;;  %v2001_v42 = vmul.f32 0.03125, %v1993_v39 }
0x1093   : > { %9061 = vrsqrt.f32 %v2006_v37 }
0x1094   : > { %v2005_v43 = vadd.f32 1e-05, %v2001_v42 }
0x1095   : > { %v1999_v44 = vpop.xlane.xlu0 %1998 }
0x1096   : > { %9063 = vrsqrt.f32 %v2005_v43  ;;  %v2003_v45 = vmul.f32 0.03125, %v1999_v44 }
0x1098   : > { %v2007_v46 = vadd.f32 1e-05, %v2003_v45 }
0x109a   : > { %9065 = vrsqrt.f32 %v2007_v46 }
0x109c   : > { %v9060_v47 = vpop.eup %9059 }
0x109d   : > { %v2012_v48 = vmul.f32 %v9060_v47, %v1980_v18  ;;  %v9062_v49 = vpop.eup %9061 }
0x109e   : > { %v2014_v53 = vmul.f32 %v9062_v49, %v9718_v12  ;;  %v2152_v12 = vld [vmem:[%s10960_s2 + $0x140] sm:$0xff] }
0x109f   : > { %v2020_v60 = vmul.f32 %v7896_v52, %v2012_v48  ;;  %v2155_v20 = vpack.c.bf16 %v2153_v16, %v2152_v12 }
0x10a0   : > { %v9064_v51 = vpop.eup %9063  ;;  %v2022_v8 = vmul.f32 %v7896_v52, %v2014_v53 }
0x10a1   : > { %v2013_v58 = vmul.f32 %v9064_v51, %v1981_v41  ;;  %v9764_v4 = vadd.f32 %v7897_v2, %v2020_v60 }
0x10a2   : > { %v9778_v17 = vadd.f32 %v7897_v2, %v2022_v8 }
0x10a3   : > { %v2021_v61 = vmul.f32 %v7896_v52, %v2013_v58 }
0x10a4   : > { %v9066_v62 = vpop.eup %9065 }
0x10a5   : > { %v2015_v3 = vmul.f32 %v9066_v62, %v1983_v13  ;;  %v9766_v7 = vadd.f32 %v7897_v2, %v2021_v61 }
0x10a7   : > { %v2036_v10 = vpack.c.bf16 %v9766_v7, %v9764_v4  ;;  %v2023_v15 = vmul.f32 %v7896_v52, %v2015_v3 }
0x10a9   : > { %8472 = vmatprep.mubr.msk.bf16.mxu0 %vm354_vm2, %v2036_v10  ;;  %8480 = vmatprep.mubr.msk.bf16.mxu1 %vm354_vm2, %v2036_v10  ;;  %v9780_v18 = vadd.f32 %v7897_v2, %v2023_v15 }
0x10ab   : > { %v2037_v19 = vpack.c.bf16 %v9780_v18, %v9778_v17 }
0x10ad   : > { %8473 = vmatmul.mubr.msk.bf16.vlgmr.msra.gmra.mrb[36].mxu0 %vm354_vm2, %v2037_v19  ;;  %8481 = vmatmul.mubr.msk.bf16.vlgmr.msra.gmra.mrb[48].mxu1 %vm354_vm2, %v2037_v19 }
0x10ae   : > { %8485 = vmatpush3.bf16.msra.mxu0 %v2154_v33  ;;  %8488 = vmatprep.mubr.msk.bf16.mxu0 %vm354_vm2, %v2036_v10 }
0x10af   : > { %8486 = vmatprep.subr.bf16.mxu0 %v2155_v20  ;;  %8494 = vmatprep.mubr.msk.f32.mxu1 %vm9304_vm3, %v9303_v63 }
0x10b2   : > { %8487 = vmatpush3.bf16.msra.mxu0 %v2155_v20 }
0x10b3   : > { %8497 = vmatprep.subr.bf16.mxu0 %v9303_v63 }
0x10b5   : > { %8489 = vmatmul.mubr.msk.bf16.vlgmr.msra.gmra.mrb[40].mxu0 %vm354_vm2, %v2037_v19 }
0x10b6   : > { %8499 = vmatprep.mubr.msk.bf16.mxu0 %vm9304_vm3, %v9303_v63 }
0x1180   : > { %v9793_v50 = vpop.f32.mrb[36].mxu0  ;;  %v9795_v40 = vpop.f32.mrb[48].mxu1 }
0x1181   : > { %v2080_v41 = vpop.f32.mrb[37].mxu0  ;;  %v2135_v21 = vpop.f32.mrb[49].mxu1 }
0x1182   : > { %v2205_v5 = vmul.f32 0.25, %v2080_v41  ;;  %2343 = vrot.lane.b32.xlu1 %v2135_v21, %s9305_s11  ;;  %v9798_v22 = vpop.f32.mrb[38].mxu0  ;;  %v9800_v23 = vpop.f32.mrb[50].mxu1  ;;  %8493 = vmatpush3.xpose.msk.msra.mxu1 %vm521_vm5, %v2135_v21 }
0x1183   : > { %v2083_v13 = vpop.f32.mrb[39].mxu0  ;;  %v2138_v0 = vpop.f32.mrb[51].mxu1  ;;  %8503 = vmatprep.subr.mxu1 %v9303_v63 }
0x1184   : > { %2341 = vrot.lane.b32.xlu0 %v2205_v5, %s9305_s11  ;;  %v2480_v42 = vmul.f32 0.25, %v2083_v13 }
0x1185   : > { %8495 = vmatmul.mubr.msk.f32.vlgmr.msra.gmra.mrb[34].mxu1 %vm521_vm5, %v2205_v5 }
0x1186   : > { %8505 = vmatprep.mubr.msk.f32.mxu1 %vm9304_vm3, %v9303_v63 }
0x1188   : > { %v9808_v24 = vpop.f32.mrb[40].mxu0 }
0x1189   : > { %v2190_v25 = vpop.f32.mrb[41].mxu0 }
0x118a   : > { %v2294_v57 = vpack.c.bf16 %v2190_v25, %v2190_v25  ;;  %v9810_v35 = vpop.f32.mrb[42].mxu0 }
0x118b   : > { %v2193_v36 = vpop.f32.mrb[43].mxu0 }
0x118c   : > { %v2299_v6 = vsel %vm615_vm4, %v2294_v57, 0  ;;  %v2569_v47 = vpack.c.bf16 %v2193_v36, %v2193_v36 }
0x118d   : > { %8498 = vmatpush3.bf16.msra.mxu0 %v2299_v6 }
0x118e   : > { %8514 = vmatprep.subr.mxu0 %v9303_v63  ;;  %v2574_v48 = vsel %vm615_vm4, %v2569_v47, 0 }
0x11f4   : > { %v2344_v26 = vpop.permute.xlu1 %2343 }
0x11f5   : > { %8504 = vmatpush3.xpose.msk.msra.mxu1 %vm521_vm5, %v2344_v26 }
0x11f6   : > { %v2342_v59 = vpop.permute.xlu0 %2341  ;;  %8508 = vmatprep.subr.bf16.mxu1 %v9303_v63 }
0x11f8   : > { %8506 = vmatmul.mubr.msk.f32.vlgmr.msra.gmra.mrb[52].mxu1 %vm521_vm5, %v2342_v59  ;;  %v2755_v59 = vmul.f32 0.25, %v9793_v50 }
0x11f9   : > { %8510 = vmatprep.mubr.msk.bf16.mxu1 %vm9304_vm3, %v9303_v63 }
0x1258   : > { %v2278_v27 = vpop.f32.mrb[34].mxu1 }
0x1259   : > { %v8496_v28 = vpop.f32.mrb[35].mxu1  ;;  %v2282_v55 = vsel %vm598_vm6, %v2278_v27, -inf }
0x125a   : > { %2283 = vmax.xlane.f32.xlu0 %v2282_v55 }
0x12cb   : > { %v2415_v29 = vpop.f32.mrb[52].mxu1 }
0x12cc   : > { %v8507_v30 = vpop.f32.mrb[53].mxu1  ;;  %v2419_v31 = vsel %vm598_vm6, %v2415_v29, -inf }
0x12cd   : > { %2420 = vmax.xlane.f32.xlu1 %v2419_v31 }
0x12e7   : > { %v2284_v32 = vpop.xlane.xlu0 %2283 }
0x12e8   : > { %v2285_v56 = vsub.f32 %v2278_v27, %v2284_v32 }
0x12ea   : > { %v2286_v33 = vmul.f32 1.442695, %v2285_v56 }
0x12ec   : > { %9067 = vpow2.f32 %v2286_v33  ;;  %v2844_v33 = vpack.c.bf16 %v9808_v24, %v9808_v24 }
0x12f6   : > { %v9068_v34 = vpop.eup %9067 }
0x12f7   : > { %v2288_v11 = vsel %vm598_vm6, %v9068_v34, 0.0 }
0x12f8   : > { %2289 = vadd.xlane.f32.xlu0 %v2288_v11 }
0x130e   : > { %2618 = vrot.lane.b32.xlu0 %v2138_v0, %s9305_s11 }
0x135a   : > { %v2421_v54 = vpop.xlane.xlu1 %2420 }
0x135b   : > { %v2422_v1 = vsub.f32 %v2415_v29, %v2421_v54 }
0x135d   : > { %v2423_v37 = vmul.f32 1.442695, %v2422_v1 }
0x135f   : > { %9069 = vpow2.f32 %v2423_v37 }
0x1369   : > { %v9070_v38 = vpop.eup %9069 }
0x136a   : > { %v2425_v39 = vsel %vm598_vm6, %v9070_v38, 0.0 }
0x136b   : > { %2426 = vadd.xlane.f32.xlu1 %v2425_v39 }
0x137c   : > { %2432 = vrot.lane.b32.xlu1 %v2294_v57, %s9305_s11 }
0x1380   : > { %2616 = vrot.lane.b32.xlu1 %v2480_v42, %s9305_s11 }
0x1385   : > { %v2290_v43 = vpop.xlane.xlu0 %2289 }
0x1386   : > { %9071 = vrcp.f32 %v2290_v43 }
0x1389   : > { %v2619_v61 = vpop.permute.xlu0 %2618 }
0x1390   : > { %v9072_v44 = vpop.eup %9071 }
0x1391   : > { %v9826_v45 = vmul.f32 %v9072_v44, %v9068_v34  ;;  %v2849_v34 = vsel %vm615_vm4, %v2844_v33, 0 }
0x1393   : > { %v2293_v46 = vpack.c.bf16 %v9826_v45, %v9826_v45 }
0x1395   : > { %8500 = vmatmul.mubr.msk.bf16.vlgmr.msra.gmra.mrb[44].mxu0 %vm598_vm6, %v2293_v46 }
0x1396   : > { %8515 = vmatpush3.xpose.msk.msra.mxu0 %vm521_vm5, %v2138_v0  ;;  %8516 = vmatprep.mubr.msk.f32.mxu0 %vm9304_vm3, %v9303_v63 }
0x1397   : > { %8519 = vmatprep.subr.bf16.mxu0 %v9303_v63 }
0x139d   : > { %8517 = vmatmul.mubr.msk.f32.vlgmr.msra.gmra.mrb[26].mxu0 %vm521_vm5, %v2480_v42 }
0x139e   : > { %8520 = vmatpush3.bf16.msra.mxu0 %v2574_v48  ;;  %8521 = vmatprep.mubr.msk.bf16.mxu0 %vm9304_vm3, %v9303_v63 }
0x139f   : > { %8536 = vmatprep.subr.mxu0 %v9303_v63 }
0x13f8   : > { %v2427_v49 = vpop.xlane.xlu1 %2426 }
0x13f9   : > { %9073 = vrcp.f32 %v2427_v49 }
0x13fc   : > { %v2433_v51 = vpop.permute.xlu1 %2432 }
0x13fd   : > { %v2438_v52 = vsel %vm615_vm4, %v2433_v51, 0 }
0x13fe   : > { %8509 = vmatpush3.bf16.msra.mxu1 %v2438_v52  ;;  %v3030_v52 = vmul.f32 0.25, %v9798_v22 }
0x13ff   : > { %8525 = vmatprep.subr.mxu1 %v9303_v63 }
0x1400   : > { %v2617_v62 = vpop.permute.xlu1 %2616 }
0x1403   : > { %v9074_v53 = vpop.eup %9073 }
0x1404   : > { %v9842_v58 = vmul.f32 %v9074_v53, %v9070_v38 }
0x1406   : > { %v2430_v60 = vpack.c.bf16 %v9842_v58, %v9842_v58 }
0x1408   : > { %8511 = vmatmul.mubr.msk.bf16.vlgmr.msra.gmra.mrb[56].mxu1 %vm598_vm6, %v2430_v60 }
0x1409   : > { %8526 = vmatpush3.xpose.msk.msra.mxu1 %vm521_vm5, %v2619_v61  ;;  %8527 = vmatprep.mubr.msk.f32.mxu1 %vm9304_vm3, %v9303_v63 }
0x140a   : > { %8530 = vmatprep.subr.bf16.mxu1 %v9303_v63 }
0x1410   : > { %8528 = vmatmul.mubr.msk.f32.vlgmr.msra.gmra.mrb[54].mxu1 %vm521_vm5, %v2617_v62 }
0x1411   : > { %8532 = vmatprep.mubr.msk.bf16.mxu1 %vm9304_vm3, %v9303_v63 }
0x1468   : > { %v9854_v2 = vpop.f32.mrb[44].mxu0 }
0x1469   : > { %v8501_v3 = vpop.f32.mrb[45].mxu0 }
0x146a   : > { %v2338_v8 = vpop.f32.mrb[46].mxu0 }
0x146b   : > { %v8502_v10 = vpop.f32.mrb[47].mxu0 }
0x1470   : > { %v2553_v15 = vpop.f32.mrb[26].mxu0 }
0x1471   : > { %v8518_v12 = vpop.f32.mrb[27].mxu0  ;;  %v2557_v16 = vsel %vm598_vm6, %v2553_v15, -inf }
0x1472   : > { %2558 = vmax.xlane.f32.xlu0 %v2557_v16 }
0x14db   : > { %v9857_v19 = vpop.f32.mrb[56].mxu1 }
0x14dc   : > { %v8512_v20 = vpop.f32.mrb[57].mxu1 }
0x14dd   : > { %v2477_v41 = vpop.f32.mrb[58].mxu1 }
0x14de   : > { %v8513_v21 = vpop.f32.mrb[59].mxu1 }
0x14e3   : > { %v2690_v5 = vpop.f32.mrb[54].mxu1 }
0x14e4   : > { %v8529_v13 = vpop.f32.mrb[55].mxu1  ;;  %v2694_v0 = vsel %vm598_vm6, %v2690_v5, -inf }
0x14e5   : > { %2695 = vmax.xlane.f32.xlu1 %v2694_v0 }
0x14ff   : > { %v2559_v25 = vpop.xlane.xlu0 %2558 }
0x1500   : > { %v2560_v57 = vsub.f32 %v2553_v15, %v2559_v25 }
0x1502   : > { %v2561_v36 = vmul.f32 1.442695, %v2560_v57 }
0x1504   : > { %9075 = vpow2.f32 %v2561_v36 }
0x150e   : > { %v9076_v6 = vpop.eup %9075 }
0x150f   : > { %v2563_v26 = vsel %vm598_vm6, %v9076_v6, 0.0 }
0x1510   : > { %2564 = vadd.xlane.f32.xlu1 %v2563_v26 }
0x1521   : > { %2893 = vrot.lane.b32.xlu1 %v9795_v40, %s9305_s11 }
0x1525   : > { %2891 = vrot.lane.b32.xlu1 %v2755_v59, %s9305_s11 }
0x1572   : > { %v2696_v27 = vpop.xlane.xlu1 %2695 }
0x1573   : > { %v2697_v28 = vsub.f32 %v2690_v5, %v2696_v27 }
0x1575   : > { %v2698_v55 = vmul.f32 1.442695, %v2697_v28 }
0x1577   : > { %9077 = vpow2.f32 %v2698_v55 }
0x1581   : > { %v9078_v29 = vpop.eup %9077 }
0x1582   : > { %v2700_v30 = vsel %vm598_vm6, %v9078_v29, 0.0 }
0x1583   : > { %2701 = vadd.xlane.f32.xlu0 %v2700_v30 }
0x1599   : > { %2707 = vrot.lane.b32.xlu0 %v2569_v47, %s9305_s11 }
0x159d   : > { %v2565_v31 = vpop.xlane.xlu1 %2564 }
0x159e   : > { %9079 = vrcp.f32 %v2565_v31 }
0x15a1   : > { %v2894_v38 = vpop.permute.xlu1 %2893 }
0x15a5   : > { %v2892_v39 = vpop.permute.xlu1 %2891 }
0x15a8   : > { %v9080_v32 = vpop.eup %9079 }
0x15a9   : > { %v9867_v56 = vmul.f32 %v9080_v32, %v9076_v6 }
0x15ab   : > { %v2568_v50 = vpack.c.bf16 %v9867_v56, %v9867_v56 }
0x15ad   : > { %8522 = vmatmul.mubr.msk.bf16.vlgmr.msra.gmra.mrb[48].mxu0 %vm598_vm6, %v2568_v50  ;;  %v3119_v50 = vpack.c.bf16 %v9810_v35, %v9810_v35 }
0x15ae   : > { %8537 = vmatpush3.xpose.msk.msra.mxu0 %vm521_vm5, %v9795_v40  ;;  %8538 = vmatprep.mubr.msk.f32.mxu0 %vm9304_vm3, %v9303_v63 }
0x15af   : > { %8541 = vmatprep.subr.bf16.mxu0 %v9303_v63 }
0x15b5   : > { %8539 = vmatmul.mubr.msk.f32.vlgmr.msra.gmra.mrb[52].mxu0 %vm521_vm5, %v2755_v59 }
0x15b6   : > { %8542 = vmatpush3.bf16.msra.mxu0 %v2849_v34  ;;  %8543 = vmatprep.mubr.msk.bf16.mxu0 %vm9304_vm3, %v9303_v63 }
0x15b7   : > { %8558 = vmatprep.subr.mxu0 %v9303_v63 }
0x1610   : > { %v2702_v11 = vpop.xlane.xlu0 %2701 }
0x1611   : > { %9081 = vrcp.f32 %v2702_v11 }
0x1614   : > { %v2708_v40 = vpop.permute.xlu0 %2707 }
0x1615   : > { %v2713_v54 = vsel %vm615_vm4, %v2708_v40, 0 }
0x1616   : > { %8531 = vmatpush3.bf16.msra.mxu1 %v2713_v54 }
0x1617   : > { %8547 = vmatprep.subr.mxu1 %v9303_v63 }
0x161b   : > { %v9082_v1 = vpop.eup %9081 }
0x161c   : > { %v9886_v24 = vmul.f32 %v9082_v1, %v9078_v29 }
0x161e   : > { %v2705_v37 = vpack.c.bf16 %v9886_v24, %v9886_v24 }
0x1620   : > { %8533 = vmatmul.mubr.msk.bf16.vlgmr.msra.gmra.mrb[60].mxu1 %vm598_vm6, %v2705_v37 }
0x1621   : > { %8548 = vmatpush3.xpose.msk.msra.mxu1 %vm521_vm5, %v2894_v38  ;;  %8549 = vmatprep.mubr.msk.f32.mxu1 %vm9304_vm3, %v9303_v63 }
0x1622   : > { %8552 = vmatprep.subr.bf16.mxu1 %v9303_v63 }
0x1628   : > { %8550 = vmatmul.mubr.msk.f32.vlgmr.msra.gmra.mrb[64].mxu1 %vm521_vm5, %v2892_v39 }
0x1629   : > { %8554 = vmatprep.mubr.msk.bf16.mxu1 %vm9304_vm3, %v9303_v63 }
0x1680   : > { %v9898_v42 = vpop.f32.mrb[48].mxu0 }
0x1681   : > { %v3309_v43 = vpack.c.bf16 %v9898_v42, %v9854_v2  ;;  %v8523_v44 = vpop.f32.mrb[49].mxu0 }
0x1682   : > { %v2613_v46 = vpop.f32.mrb[50].mxu0 }
0x1683   : > { %v8524_v47 = vpop.f32.mrb[51].mxu0 }
0x1688   : > { %v2828_v48 = vpop.f32.mrb[52].mxu0 }
0x1689   : > { %v8540_v49 = vpop.f32.mrb[53].mxu0  ;;  %v2832_v51 = vsel %vm598_vm6, %v2828_v48, -inf }
0x168a   : > { %2833 = vmax.xlane.f32.xlu1 %v2832_v51 }
0x169b   : > { %2982 = vrot.lane.b32.xlu1 %v2844_v33, %s9305_s11  ;;  %v3124_v33 = vsel %vm615_vm4, %v3119_v50, 0 }
0x169f   : > { %3166 = vrot.lane.b32.xlu1 %v3030_v52, %s9305_s11 }
0x16f3   : > { %v9906_v53 = vpop.f32.mrb[60].mxu1 }
0x16f4   : > { %v3312_v60 = vpack.c.bf16 %v9906_v53, %v9857_v19  ;;  %v8534_v61 = vpop.f32.mrb[61].mxu1 }
0x16f5   : > { %v2752_v62 = vpop.f32.mrb[62].mxu1 }
0x16f6   : > { %v8535_v3 = vpop.f32.mrb[63].mxu1 }
0x16fb   : > { %v2965_v8 = vpop.f32.mrb[64].mxu1 }
0x16fc   : > { %v8551_v10 = vpop.f32.mrb[65].mxu1  ;;  %v2969_v15 = vsel %vm598_vm6, %v2965_v8, -inf }
0x16fd   : > { %2970 = vmax.xlane.f32.xlu0 %v2969_v15 }
0x1717   : > { %v2834_v12 = vpop.xlane.xlu1 %2833 }
0x1718   : > { %v2835_v22 = vsub.f32 %v2828_v48, %v2834_v12 }
0x171a   : > { %v2836_v5 = vmul.f32 1.442695, %v2835_v22 }
0x171b   : > { %v2983_v16 = vpop.permute.xlu1 %2982 }
0x171c   : > { %v2988_v20 = vsel %vm615_vm4, %v2983_v16, 0  ;;  %v3307_v16 = vld [vmem:[%s10960_s2 + $0x160] sm:$0xff] }
0x171d   : > { %8553 = vmatpush3.bf16.msra.mxu1 %v2988_v20  ;;  %v3308_v20 = vld [vmem:[%s10960_s2 + $0x168] sm:$0xff] }
0x171e   : > { %8569 = vmatprep.subr.mxu1 %v9303_v63  ;;  %v3314_v22 = vpack.c.bf16 %v3308_v20, %v3307_v16 }
0x171f   : > { %v3167_v32 = vpop.permute.xlu1 %3166 }
0x178a   : > { %v2971_v41 = vpop.xlane.xlu0 %2970 }
0x178b   : > { %v2972_v21 = vsub.f32 %v2965_v8, %v2971_v41 }
0x178d   : > { %v2973_v13 = vmul.f32 1.442695, %v2972_v21 }
0x178f   : > { %9083 = vpow2.f32 %v2973_v13 }
0x1790   : > { %9085 = vpow2.f32 %v2836_v5 }
0x1799   : > { %v9084_v0 = vpop.eup %9083 }
0x179a   : > { %v2975_v25 = vsel %vm598_vm6, %v9084_v0, 0.0  ;;  %v9086_v57 = vpop.eup %9085 }
0x179b   : > { %2976 = vadd.xlane.f32.xlu0 %v2975_v25  ;;  %v2838_v36 = vsel %vm598_vm6, %v9086_v57, 0.0 }
0x179f   : > { %2839 = vadd.xlane.f32.xlu0 %v2838_v36 }
0x17b5   : > { %3168 = vrot.lane.b32.xlu0 %v9800_v23, %s9305_s11 }
0x1828   : > { %v2977_v6 = vpop.xlane.xlu0 %2976 }
0x1829   : > { %9087 = vrcp.f32 %v2977_v6 }
0x182c   : > { %v2840_v26 = vpop.xlane.xlu0 %2839 }
0x182d   : > { %9089 = vrcp.f32 %v2840_v26 }
0x1830   : > { %v3169_v30 = vpop.permute.xlu0 %3168 }
0x1833   : > { %v9088_v59 = vpop.eup %9087 }
0x1834   : > { %v9917_v27 = vmul.f32 %v9088_v59, %v9084_v0  ;;  %v3305_v59 = vld [vmem:[%s10960_s2 + $0x150] sm:$0xff] }
0x1836   : > { %v2980_v28 = vpack.c.bf16 %v9917_v27, %v9917_v27 }
0x1837   : > { %v9090_v55 = vpop.eup %9089 }
0x1838   : > { %v9921_v29 = vmul.f32 %v9090_v55, %v9086_v57  ;;  %8555 = vmatmul.mubr.msk.bf16.vlgmr.msra.gmra.mrb[68].mxu1 %vm598_vm6, %v2980_v28  ;;  %v3306_v28 = vld [vmem:[%s10960_s2 + $0x158] sm:$0xff] }
0x1839   : > { %8570 = vmatpush3.xpose.msk.msra.mxu1 %vm521_vm5, %v3169_v30  ;;  %8571 = vmatprep.mubr.msk.f32.mxu1 %vm9304_vm3, %v9303_v63  ;;  %v3311_v55 = vpack.c.bf16 %v3306_v28, %v3305_v59 }
0x183a   : > { %v2843_v31 = vpack.c.bf16 %v9921_v29, %v9921_v29  ;;  %8574 = vmatprep.subr.bf16.mxu1 %v9303_v63 }
0x183c   : > { %8544 = vmatmul.mubr.msk.bf16.vlgmr.msra.gmra.mrb[56].mxu0 %vm598_vm6, %v2843_v31 }
0x183d   : > { %8559 = vmatpush3.xpose.msk.msra.mxu0 %vm521_vm5, %v9800_v23  ;;  %8560 = vmatprep.mubr.msk.f32.mxu0 %vm9304_vm3, %v9303_v63 }
0x183e   : > { %8563 = vmatprep.subr.bf16.mxu0 %v9303_v63 }
0x1840   : > { %8572 = vmatmul.mubr.msk.f32.vlgmr.msra.gmra.mrb[66].mxu1 %vm521_vm5, %v3167_v32 }
0x1841   : > { %8576 = vmatprep.mubr.msk.bf16.mxu1 %vm9304_vm3, %v9303_v63 }
0x1844   : > { %8561 = vmatmul.mubr.msk.f32.vlgmr.msra.gmra.mrb[54].mxu0 %vm521_vm5, %v3030_v52 }
0x1845   : > { %8564 = vmatpush3.bf16.msra.mxu0 %v3124_v33  ;;  %8565 = vmatprep.mubr.msk.bf16.mxu0 %vm9304_vm3, %v9303_v63 }
0x1846   : > { %8580 = vmatprep.subr.bf16.mxu0 %v3314_v22 }
0x190b   : > { %v3024_v23 = vpop.f32.mrb[68].mxu1 }
0x190c   : > { %v8556_v34 = vpop.f32.mrb[69].mxu1 }
0x190d   : > { %v3027_v11 = vpop.f32.mrb[70].mxu1 }
0x190e   : > { %v8557_v40 = vpop.f32.mrb[71].mxu1 }
0x190f   : > { %v9945_v54 = vpop.f32.mrb[56].mxu0 }
0x1910   : > { %v8545_v35 = vpop.f32.mrb[57].mxu0 }
0x1911   : > { %v2888_v1 = vpop.f32.mrb[58].mxu0 }
0x1912   : > { %v8546_v37 = vpop.f32.mrb[59].mxu0 }
0x1913   : > { %v3240_v38 = vpop.f32.mrb[66].mxu1 }
0x1914   : > { %v8573_v39 = vpop.f32.mrb[67].mxu1  ;;  %v3244_v44 = vsel %vm598_vm6, %v3240_v38, -inf }
0x1915   : > { %3245 = vmax.xlane.f32.xlu1 %v3244_v44 }
0x1917   : > { %v3103_v46 = vpop.f32.mrb[54].mxu0 }
0x1918   : > { %v8562_v47 = vpop.f32.mrb[55].mxu0  ;;  %v3107_v48 = vsel %vm598_vm6, %v3103_v46, -inf }
0x1919   : > { %3108 = vmax.xlane.f32.xlu0 %v3107_v48 }
0x19a2   : > { %v3246_v49 = vpop.xlane.xlu1 %3245 }
0x19a3   : > { %v3247_v51 = vsub.f32 %v3240_v38, %v3246_v49 }
0x19a5   : > { %v3248_v52 = vmul.f32 1.442695, %v3247_v51 }
0x19a6   : > { %v3109_v61 = vpop.xlane.xlu0 %3108 }
0x19a7   : > { %9091 = vpow2.f32 %v3248_v52  ;;  %v3110_v62 = vsub.f32 %v3103_v46, %v3109_v61 }
0x19a9   : > { %v3111_v3 = vmul.f32 1.442695, %v3110_v62 }
0x19ab   : > { %9093 = vpow2.f32 %v3111_v3 }
0x19b1   : > { %v9092_v8 = vpop.eup %9091 }
0x19b2   : > { %v3250_v10 = vsel %vm598_vm6, %v9092_v8, 0.0 }
0x19b3   : > { %3251 = vadd.xlane.f32.xlu0 %v3250_v10 }
0x19b5   : > { %v9094_v15 = vpop.eup %9093 }
0x19b6   : > { %v3113_v12 = vsel %vm598_vm6, %v9094_v15, 0.0 }
0x19b7   : > { %3114 = vadd.xlane.f32.xlu1 %v3113_v12 }
0x19c9   : > { %3257 = vrot.lane.b32.xlu0 %v3119_v50, %s9305_s11 }
0x1a40   : > { %v3252_v41 = vpop.xlane.xlu0 %3251 }
0x1a41   : > { %9095 = vrcp.f32 %v3252_v41  ;;  %v3499_v41 = vld [vmem:[%s10960_s2 + $0x180] sm:$0xff] }
0x1a44   : > { %v3115_v21 = vpop.xlane.xlu1 %3114  ;;  %v3258_v5 = vpop.permute.xlu0 %3257 }
0x1a45   : > { %9097 = vrcp.f32 %v3115_v21  ;;  %v3263_v13 = vsel %vm615_vm4, %v3258_v5, 0  ;;  %v3500_v21 = vld [vmem:[%s10960_s2 + $0x188] sm:$0xff] }
0x1a46   : > { %8575 = vmatpush3.bf16.msra.mxu1 %v3263_v13  ;;  %v3505_v5 = vpack.c.bf16 %v3500_v21, %v3499_v41  ;;  %v3501_v13 = vld [vmem:[%s10960_s2 + $0x190] sm:$0xff] }
0x1a48   : > { %8592 = vmatprep.subr.bf16.mxu1 %v3505_v5 }
0x1a4b   : > { %v9096_v0 = vpop.eup %9095 }
0x1a4c   : > { %v9959_v25 = vmul.f32 %v9096_v0, %v9092_v8  ;;  %v3502_v0 = vld [vmem:[%s10960_s2 + $0x198] sm:$0xff] }
0x1a4e   : > { %v3255_v57 = vpack.c.bf16 %v9959_v25, %v9959_v25 }
0x1a4f   : > { %v9098_v36 = vpop.eup %9097 }
0x1a50   : > { %v9963_v6 = vmul.f32 %v9098_v36, %v9094_v15  ;;  %8577 = vmatmul.mubr.msk.bf16.vlgmr.msra.gmra.mrb[72].mxu1 %vm598_vm6, %v3255_v57  ;;  %v3506_v57 = vpack.c.bf16 %v3502_v0, %v3501_v13 }
0x1a51   : > { %8593 = vmatpush3.bf16.msra.mxu1 %v3505_v5 }
0x1a52   : > { %v3118_v26 = vpack.c.bf16 %v9963_v6, %v9963_v6  ;;  %8594 = vmatprep.subr.bf16.mxu1 %v3506_v57 }
0x1a54   : > { %8566 = vmatmul.mubr.msk.bf16.vlgmr.msra.gmra.mrb[60].mxu0 %vm598_vm6, %v3118_v26 }
0x1a55   : > { %8582 = vmatprep.mubr.msk.bf16.mxu0 %vm521_vm5, %v3312_v60  ;;  %8581 = vmatpush3.bf16.msra.mxu0 %v3314_v22 }
0x1a56   : > { %8586 = vmatprep.subr.bf16.mxu0 %v3311_v55  ;;  %8595 = vmatpush3.bf16.msra.mxu1 %v3506_v57 }
0x1b23   : > { %v3299_v30 = vpop.f32.mrb[72].mxu1 }
0x1b24   : > { %v3313_v31 = vpack.c.bf16 %v3299_v30, %v3024_v23  ;;  %v8578_v32 = vpop.f32.mrb[73].mxu1 }
0x1b25   : > { %v3302_v50 = vpop.f32.mrb[74].mxu1 }
0x1b26   : > { %v8579_v33 = vpop.f32.mrb[75].mxu1  ;;  %8583 = vmatmul.mubr.msk.bf16.vlgmr.msra.gmra.mrb[64].mxu0 %vm521_vm5, %v3313_v31 }
0x1b27   : > { %v3160_v19 = vpop.f32.mrb[60].mxu0  ;;  %8588 = vmatprep.mubr.msk.bf16.mxu0 %vm521_vm5, %v3309_v43  ;;  %8587 = vmatpush3.bf16.msra.mxu0 %v3311_v55 }
0x1b28   : > { %v3310_v53 = vpack.c.bf16 %v3160_v19, %v9945_v54  ;;  %v8567_v60 = vpop.f32.mrb[61].mxu0 }
0x1b29   : > { %v3163_v34 = vpop.f32.mrb[62].mxu0 }
0x1b2a   : > { %v8568_v11 = vpop.f32.mrb[63].mxu0 }
0x1b2b   : > { %v7932_v11 = vld [vmem:[%s10960_s2 + $0x170] ss:$0 sm:$0xff] }
0x1b32   : > { %8589 = vmatmul.mubr.msk.bf16.vlgmr.msra.gmra.mrb[64].mxu0 %vm521_vm5, %v3310_v53 }
0x1c05   : > { %v8590_v23 = vpop.f32.mrb[64].mxu0 }
0x1c06   : > { %v3427_v40 = vadd.f32 %v8590_v23, %v9778_v17  ;;  %v3410_v35 = vpop.f32.mrb[65].mxu0 }
0x1c07   : > { %v8591_v1 = vpop.f32.mrb[66].mxu0  ;;  %v3425_v37 = vadd.f32 %v3410_v35, %v9764_v4 }
0x1c08   : > { %v3413_v38 = vpop.f32.mrb[67].mxu0  ;;  %v3437_v2 = vsel %vm354_vm2, %v3427_v40, 0.0  ;;  %v3428_v54 = vadd.f32 %v8591_v1, %v9780_v18 }
0x1c09   : > { %3438 = vadd.xlane.f32.xlu1 %v3437_v2  ;;  %v3426_v42 = vadd.f32 %v3413_v38, %v9766_v7  ;;  %v3431_v43 = vsel %vm354_vm2, %v3425_v37, 0.0  ;;  %v7933_v38 = vld [vmem:[%s10960_s2 + $0x178] ss:$0 sm:$0xff] }
0x1c0a   : > { %v3440_v17 = vsel %vm354_vm2, %v3428_v54, 0.0 }
0x1c0b   : > { %v3434_v39 = vsel %vm354_vm2, %v3426_v42, 0.0 }
0x1c0d   : > { %3432 = vadd.xlane.f32.xlu1 %v3431_v43 }
0x1c11   : > { %3435 = vadd.xlane.f32.xlu1 %v3434_v39 }
0x1c15   : > { %3441 = vadd.xlane.f32.xlu1 %v3440_v17 }
0x1c96   : > { %v3439_v44 = vpop.xlane.xlu1 %3438 }
0x1c97   : > { %v3445_v46 = vmul.f32 0.03125, %v3439_v44 }
0x1c99   : > { %v3449_v48 = vsub.f32 %v3427_v40, %v3445_v46 }
0x1c9a   : > { %v3433_v4 = vpop.xlane.xlu1 %3432 }
0x1c9b   : > { %v3443_v47 = vmul.f32 0.03125, %v3433_v4  ;;  %v3453_v3 = vmul.f32 %v3449_v48, %v3449_v48 }
0x1c9d   : > { %v3447_v49 = vsub.f32 %v3425_v37, %v3443_v47  ;;  %v3461_v12 = vsel %vm354_vm2, %v3453_v3, 0.0  ;;  %v7934_v3 = vld [vmem:[%s10960_s2 + $0x1a0] ss:$0 sm:$0xff] }
0x1c9e   : > { %v3436_v51 = vpop.xlane.xlu1 %3435 }
0x1c9f   : > { %v3444_v52 = vmul.f32 0.03125, %v3436_v51  ;;  %v3451_v7 = vmul.f32 %v3447_v49, %v3447_v49  ;;  %v3572_v51 = vld [vmem:[%s10960_s2 + $0x1b0] sm:$0xff] }
0x1ca1   : > { %v3448_v61 = vsub.f32 %v3426_v42, %v3444_v52  ;;  %v3455_v62 = vsel %vm354_vm2, %v3451_v7, 0.0  ;;  %v3573_v7 = vld [vmem:[%s10960_s2 + $0x1b8] sm:$0xff] }
0x1ca2   : > { %3456 = vadd.xlane.f32.xlu1 %v3455_v62  ;;  %v3442_v18 = vpop.xlane.xlu1 %3441 }
0x1ca3   : > { %v3446_v8 = vmul.f32 0.03125, %v3442_v18  ;;  %v3452_v10 = vmul.f32 %v3448_v61, %v3448_v61 }
0x1ca5   : > { %v3450_v15 = vsub.f32 %v3428_v54, %v3446_v8  ;;  %v3458_v16 = vsel %vm354_vm2, %v3452_v10, 0.0 }
0x1ca6   : > { %3462 = vadd.xlane.f32.xlu1 %v3461_v12  ;;  %3459 = vadd.xlane.f32.xlu0 %v3458_v16 }
0x1ca7   : > { %v3454_v20 = vmul.f32 %v3450_v15, %v3450_v15 }
0x1ca9   : > { %v3464_v22 = vsel %vm354_vm2, %v3454_v20, 0.0 }
0x1caa   : > { %3465 = vadd.xlane.f32.xlu1 %v3464_v22 }
0x1d2f   : > { %v3457_v36 = vpop.xlane.xlu1 %3456 }
0x1d30   : > { %v3467_v26 = vmul.f32 0.03125, %v3457_v36  ;;  %v7937_v36 = vld [vmem:[%s10960_s2 + $0x1c8] ss:$0 sm:$0xff] }
0x1d32   : > { %v3471_v59 = vadd.f32 1e-05, %v3467_v26 }
0x1d33   : > { %v3460_v28 = vpop.xlane.xlu0 %3459  ;;  %v3463_v55 = vpop.xlane.xlu1 %3462 }
0x1d34   : > { %9099 = vrsqrt.f32 %v3471_v59  ;;  %v3468_v30 = vmul.f32 0.03125, %v3460_v28  ;;  %v3469_v31 = vmul.f32 0.03125, %v3463_v55 }
0x1d36   : > { %v3472_v32 = vadd.f32 1e-05, %v3468_v30  ;;  %v3473_v50 = vadd.f32 1e-05, %v3469_v31 }
0x1d37   : > { %v3466_v33 = vpop.xlane.xlu1 %3465 }
0x1d38   : > { %9101 = vrsqrt.f32 %v3472_v32  ;;  %v3470_v19 = vmul.f32 0.03125, %v3466_v33 }
0x1d39   : > { %9103 = vrsqrt.f32 %v3473_v50 }
0x1d3a   : > { %v3474_v53 = vadd.f32 1e-05, %v3470_v19 }
0x1d3c   : > { %9105 = vrsqrt.f32 %v3474_v53 }
0x1d3e   : > { %v9100_v60 = vpop.eup %9099 }
0x1d3f   : > { %v3479_v34 = vmul.f32 %v9100_v60, %v3447_v49 }
0x1d41   : > { %v3487_v1 = vmul.f32 %v7932_v11, %v3479_v34 }
0x1d42   : > { %v9102_v23 = vpop.eup %9101 }
0x1d43   : > { %v9104_v40 = vpop.eup %9103  ;;  %v3480_v35 = vmul.f32 %v9102_v23, %v3448_v61  ;;  %v3495_v54 = vadd.f32 %v7933_v38, %v3487_v1  ;;  %v3574_v61 = vld [vmem:[%s10960_s2 + $0x1c0] sm:$0xff] }
0x1d44   : > { %v3481_v37 = vmul.f32 %v9104_v40, %v3449_v48  ;;  %v3571_v48 = vld [vmem:[%s10960_s2 + $0x1a8] sm:$0xff]  ;;  %v3578_v62 = vpack.c.bf16 %v3574_v61, %v3573_v7 }
0x1d45   : > { %v3488_v2 = vmul.f32 %v7932_v11, %v3480_v35  ;;  %v3577_v52 = vpack.c.bf16 %v3572_v51, %v3571_v48 }
0x1d46   : > { %v9106_v42 = vpop.eup %9105  ;;  %v3489_v17 = vmul.f32 %v7932_v11, %v3481_v37 }
0x1d47   : > { %v3482_v43 = vmul.f32 %v9106_v42, %v3450_v15  ;;  %v3496_v39 = vadd.f32 %v7933_v38, %v3488_v2  ;;  %8600 = vmatprep.subr.bf16.mxu1 %v3577_v52 }
0x1d48   : > { %v3497_v4 = vadd.f32 %v7933_v38, %v3489_v17 }
0x1d49   : > { %v3503_v44 = vpack.c.bf16 %v3496_v39, %v3495_v54  ;;  %v3490_v46 = vmul.f32 %v7932_v11, %v3482_v43 }
0x1d4b   : > { %8596 = vmatprep.mubr.msk.bf16.mxu1 %vm354_vm2, %v3503_v44  ;;  %v3498_v47 = vadd.f32 %v7933_v38, %v3490_v46 }
0x1d4d   : > { %v3504_v49 = vpack.c.bf16 %v3498_v47, %v3497_v4 }
0x1d4f   : > { %8597 = vmatmul.mubr.msk.bf16.vlgmr.msra.gmra.mrb[76].mxu1 %vm354_vm2, %v3504_v49 }
0x1d50   : > { %8601 = vmatpush3.bf16.msra.mxu1 %v3577_v52 }
0x1d51   : > { %8602 = vmatprep.subr.bf16.mxu1 %v3578_v62 }
0x1d54   : > { %8603 = vmatpush3.bf16.msra.mxu1 %v3578_v62  ;;  %v3713_v62 = vld [vmem:[%s10960_s2 + $0x3f0] sm:$0xff] }
0x1e22   : > { %v8598_v18 = vpop.f32.mrb[76].mxu1 }
0x1e23   : > { %v3561_v8 = vadd.f32 %v8598_v18, %v7934_v3  ;;  %v3552_v10 = vpop.f32.mrb[77].mxu1 }
0x1e24   : > { %v3553_v15 = vadd.f32 %v7934_v3, %v3552_v10  ;;  %v8599_v12 = vpop.f32.mrb[78].mxu1  ;;  %v3716_v10 = vld [vmem:[%s10960_s2 + $0x408] sm:$0xff] }
0x1e25   : > { %v3564_v16 = vadd.f32 %v8599_v12, %v7934_v3  ;;  %v3555_v20 = vpop.f32.mrb[79].mxu1  ;;  %v3569_v41 = vmax.f32 %v3561_v8, 0.0  ;;  %v3715_v8 = vld [vmem:[%s10960_s2 + $0x400] sm:$0xff] }
0x1e26   : > { %v3556_v22 = vadd.f32 %v7934_v3, %v3555_v20  ;;  %v3567_v5 = vmax.f32 %v3553_v15, 0.0  ;;  %v3714_v3 = vld [vmem:[%s10960_s2 + $0x3f8] sm:$0xff]  ;;  %v3720_v15 = vpack.c.bf16 %v3716_v10, %v3715_v8  ;;  %v3801_v12 = vld [vmem:[%s10960_s2 + $0x3e0] sm:$0xf]  ;;  %v9230_v8 = vld [vmem:[%s9397_s5 + $0x8] sm:$0xff] }
0x1e27   : > { %v3570_v21 = vmax.f32 %v3564_v16, 0.0  ;;  %v3719_v18 = vpack.c.bf16 %v3714_v3, %v3713_v62  ;;  %v3802_v16 = vpack.c.bf16 %v3801_v12, %v3801_v12  ;;  %v3786_v10 = vsub.f32 1.0, %v9230_v8  ;;  %v9231_v12 = vld [vmem:[%s9402_s8 + $0x18] sm:$0xff] }
0x1e28   : > { %v3568_v13 = vmax.f32 %v3556_v22, 0.0 }
0x1e29   : > { %v3576_v0 = vpack.c.bf16 %v3570_v21, %v3569_v41  ;;  %8608 = vmatprep.subr.bf16.mxu0 %v3719_v18  ;;  %8964 = vmatprep.subr.msk.bf16.mxu1 %vm222_vm0, %v3802_v16  ;;  %v3804_v20 = vsel %vm222_vm0, %v3802_v16, 0 }
0x1e2a   : > { %v3575_v57 = vpack.c.bf16 %v3568_v13, %v3567_v5  ;;  %8609 = vmatpush3.bf16.msra.mxu0 %v3719_v18 }
0x1e2b   : > { %8610 = vmatprep.subr.bf16.mxu0 %v3720_v15 }
0x1e2c   : > { %8604 = vmatprep.mubr.msk.bf16.mxu1 %vm354_vm2, %v3575_v57 }
0x1e2d   : > { %8605 = vmatmul.mubr.msk.bf16.vlgmr.msra.gmra.mrb[80].mxu1 %vm354_vm2, %v3576_v0 }
0x1e2e   : > { %8618 = vmatprep.mubr.msk.bf16.mxu1 %vm215_vm1, %v9407_v9  ;;  %8611 = vmatpush3.bf16.msra.mxu0 %v3720_v15 }
0x1e2f   : > { %8617 = vmatpush3.bf16.msra.mxu1 %v3804_v20 }
0x1e35   : > { %8619 = vmatmul.mubr.msk.bf16.vlgmr.msra.gmra.mrb[84].mxu1 %vm215_vm1, %v9412_v14 }
0x1f00   : > { %v8606_v26 = vpop.f32.mrb[80].mxu1 }
0x1f01   : > { %v3633_v59 = vadd.f32 %v8606_v26, %v7937_v36  ;;  %v3624_v28 = vpop.f32.mrb[81].mxu1 }
0x1f02   : > { %v3625_v55 = vadd.f32 %v7937_v36, %v3624_v28  ;;  %v8607_v30 = vpop.f32.mrb[82].mxu1 }
0x1f03   : > { %v3627_v31 = vpop.f32.mrb[83].mxu1  ;;  %v3641_v32 = vadd.f32 %v3633_v59, %v3497_v4  ;;  %v3636_v53 = vadd.f32 %v8607_v30, %v7937_v36 }
0x1f04   : > { %v3628_v50 = vadd.f32 %v7937_v36, %v3627_v31  ;;  %v3639_v19 = vadd.f32 %v3625_v55, %v3495_v54 }
0x1f05   : > { %v3651_v33 = vsel %vm354_vm2, %v3641_v32, 0.0  ;;  %v3642_v23 = vadd.f32 %v3636_v53, %v3498_v47 }
0x1f06   : > { %3652 = vadd.xlane.f32.xlu1 %v3651_v33  ;;  %v3645_v60 = vsel %vm354_vm2, %v3639_v19, 0.0  ;;  %v3640_v34 = vadd.f32 %v3628_v50, %v3496_v39  ;;  %v7940_v33 = vld [vmem:[%s10960_s2 + $0x1d0] ss:$0 sm:$0xff] }
0x1f07   : > { %v3654_v40 = vsel %vm354_vm2, %v3642_v23, 0.0 }
0x1f08   : > { %v3648_v11 = vsel %vm354_vm2, %v3640_v34, 0.0 }
0x1f0a   : > { %3646 = vadd.xlane.f32.xlu1 %v3645_v60 }
0x1f0e   : > { %3649 = vadd.xlane.f32.xlu1 %v3648_v11 }
0x1f12   : > { %3655 = vadd.xlane.f32.xlu1 %v3654_v40 }
0x1f93   : > { %v3653_v35 = vpop.xlane.xlu1 %3652 }
0x1f94   : > { %v3659_v1 = vmul.f32 0.03125, %v3653_v35 }
0x1f96   : > { %v3663_v37 = vsub.f32 %v3641_v32, %v3659_v1 }
0x1f97   : > { %v3647_v38 = vpop.xlane.xlu1 %3646 }
0x1f98   : > { %v3657_v2 = vmul.f32 0.03125, %v3647_v38  ;;  %v3667_v42 = vmul.f32 %v3663_v37, %v3663_v37 }
0x1f9a   : > { %v3661_v43 = vsub.f32 %v3639_v19, %v3657_v2  ;;  %v3675_v54 = vsel %vm354_vm2, %v3667_v42, 0.0 }
0x1f9b   : > { %3676 = vadd.xlane.f32.xlu0 %v3675_v54  ;;  %v3650_v17 = vpop.xlane.xlu1 %3649 }
0x1f9c   : > { %v3658_v39 = vmul.f32 0.03125, %v3650_v17  ;;  %v3665_v44 = vmul.f32 %v3661_v43, %v3661_v43  ;;  %v3797_v17 = vld [vmem:[%s10960_s2 + $0x3d8] sm:$0xf] }
0x1f9e   : > { %v3662_v46 = vsub.f32 %v3640_v34, %v3658_v39  ;;  %v3669_v4 = vsel %vm354_vm2, %v3665_v44, 0.0  ;;  %v3800_v39 = vpack.c.bf16 %v3797_v17, %v3797_v17  ;;  %v7949_v17 = vld [vmem:[%s10960_s2 + $0x3e8] ss:$0 sm:$0xff] }
0x1f9f   : > { %3670 = vadd.xlane.f32.xlu1 %v3669_v4  ;;  %v3656_v47 = vpop.xlane.xlu1 %3655 }
0x1fa0   : > { %v3660_v49 = vmul.f32 0.03125, %v3656_v47  ;;  %v3666_v48 = vmul.f32 %v3662_v46, %v3662_v46  ;;  %8965 = vmatprep.subr.msk.bf16.mxu1 %vm222_vm0, %v3800_v39  ;;  %v3862_v44 = vsel %vm222_vm0, %v3800_v39, 0  ;;  %v9227_v47 = vld [vmem:[%s9397_s5] sm:$0xff] }
0x1fa1   : > { %8623 = vmatpush3.bf16.msra.mxu1 %v3862_v44 }
0x1fa2   : > { %v3664_v51 = vsub.f32 %v3642_v23, %v3660_v49  ;;  %v3672_v52 = vsel %vm354_vm2, %v3666_v48, 0.0  ;;  %v7941_v23 = vld [vmem:[%s10960_s2 + $0x1d8] ss:$0 sm:$0xff]  ;;  %v3785_v49 = vsub.f32 1.0, %v9227_v47 }
0x1fa3   : > { %3673 = vadd.xlane.f32.xlu1 %v3672_v52 }
0x1fa4   : > { %v3668_v7 = vmul.f32 %v3664_v51, %v3664_v51 }
0x1fa6   : > { %v3678_v61 = vsel %vm354_vm2, %v3668_v7, 0.0 }
0x1fa7   : > { %3679 = vadd.xlane.f32.xlu1 %v3678_v61  ;;  %v9229_v61 = vld [vmem:[%s9397_s5 + $0x18] sm:$0xff] }
0x1fa8   : > { %v3788_v62 = vsub.f32 1.0, %v9229_v61  ;;  %v3784_v16 = vmul.f32 %v9231_v12, %v9229_v61  ;;  %v3991_v12 = vld [vmem:[%s10960_s2 + $0x210] sm:$0xff] }
0x2028   : > { %v3677_v22 = vpop.xlane.xlu0 %3676 }
0x2029   : > { %v3683_v41 = vmul.f32 0.03125, %v3677_v22  ;;  %v9232_v22 = vld [vmem:[%s9402_s8] sm:$0xff] }
0x202b   : > { %v3687_v13 = vadd.f32 1e-05, %v3683_v41  ;;  %v3781_v41 = vmul.f32 %v9232_v22, %v9227_v47 }
0x202c   : > { %v3671_v21 = vpop.xlane.xlu1 %3670 }
0x202d   : > { %v3681_v5 = vmul.f32 0.03125, %v3671_v21  ;;  %v9233_v21 = vld [vmem:[%s9402_s8 + $0x8] sm:$0xff] }
0x202f   : > { %v3685_v0 = vadd.f32 1e-05, %v3681_v5  ;;  %v3782_v5 = vmul.f32 %v9233_v21, %v9230_v8  ;;  %v9237_v8 = vld [vmem:[%s10960_s2 + $0x470] sm:$0xff] }
0x2030   : > { %v3674_v57 = vpop.xlane.xlu1 %3673 }
0x2031   : > { %9107 = vrsqrt.f32 %v3685_v0  ;;  %v3682_v36 = vmul.f32 0.03125, %v3674_v57  ;;  %v9234_v57 = vld [vmem:[%s9402_s8 + $0x10] sm:$0xff]  ;;  %s9311_s8 = smov 8  }
0x2032   : > { %9109 = vrsqrt.f32 %v3687_v13 }
0x2033   : > { %v3686_v26 = vadd.f32 1e-05, %v3682_v36 }
0x2034   : > { %v3680_v59 = vpop.xlane.xlu1 %3679 }
0x2035   : > { %9111 = vrsqrt.f32 %v3686_v26  ;;  %v3684_v28 = vmul.f32 0.03125, %v3680_v59 }
0x2037   : > { %v3688_v55 = vadd.f32 1e-05, %v3684_v28 }
0x2039   : > { %9113 = vrsqrt.f32 %v3688_v55 }
0x203b   : > { %v9108_v30 = vpop.eup %9107 }
0x203c   : > { %v3693_v31 = vmul.f32 %v9108_v30, %v3661_v43  ;;  %v9110_v32 = vpop.eup %9109 }
0x203d   : > { %v3695_v19 = vmul.f32 %v9110_v32, %v3663_v37 }
0x203e   : > { %v3701_v60 = vmul.f32 %v7940_v33, %v3693_v31 }
0x203f   : > { %v9112_v50 = vpop.eup %9111  ;;  %v3703_v38 = vmul.f32 %v7940_v33, %v3695_v19  ;;  %v3926_v19 = vld [vmem:[%s10960_s2 + $0x1e0] sm:$0xff] }
0x2040   : > { %v3694_v53 = vmul.f32 %v9112_v50, %v3662_v46  ;;  %v3709_v35 = vadd.f32 %v7941_v23, %v3701_v60  ;;  %v7942_v46 = vld [vmem:[%s10960_s2 + $0x410] ss:$0 sm:$0xff]  ;;  %v4044_v60 = vld [vmem:[%s10960_s2 + $0x220] sm:$0xff] }
0x2041   : > { %v3711_v37 = vadd.f32 %v7941_v23, %v3703_v38 }
0x2042   : > { %v3702_v34 = vmul.f32 %v7940_v33, %v3694_v53  ;;  %v3927_v53 = vld [vmem:[%s10960_s2 + $0x1e8] sm:$0xff] }
0x2043   : > { %v9114_v11 = vpop.eup %9113 }
0x2044   : > { %v3696_v40 = vmul.f32 %v9114_v11, %v3664_v51  ;;  %v3710_v1 = vadd.f32 %v7941_v23, %v3702_v34  ;;  %v9228_v51 = vld [vmem:[%s9397_s5 + $0x10] sm:$0xff]  ;;  %v3932_v34 = vpack.c.bf16 %v3927_v53, %v3926_v19  ;;  %v4045_v11 = vld [vmem:[%s10960_s2 + $0x228] sm:$0xff]  ;;  %s9310_s5 = smov 4  }
0x2045   : > { %v3787_v52 = vsub.f32 1.0, %v9228_v51  ;;  %v3783_v36 = vmul.f32 %v9234_v57, %v9228_v51 }
0x2046   : > { %v3717_v2 = vpack.c.bf16 %v3710_v1, %v3709_v35  ;;  %v3704_v42 = vmul.f32 %v7940_v33, %v3696_v40  ;;  %8628 = vmatprep.subr.bf16.mxu0 %v3932_v34  ;;  %v3928_v40 = vld [vmem:[%s10960_s2 + $0x1f0] sm:$0xff]  ;;  %v3929_v35 = vld [vmem:[%s10960_s2 + $0x1f8] sm:$0xff] }
0x2047   : > { %v4046_v1 = vld [vmem:[%s10960_s2 + $0x230] sm:$0xff]  ;;  %v3933_v38 = vpack.c.bf16 %v3929_v35, %v3928_v40 }
0x2048   : > { %8612 = vmatprep.mubr.msk.bf16.mxu0 %vm354_vm2, %v3717_v2  ;;  %v3712_v43 = vadd.f32 %v7941_v23, %v3704_v42  ;;  %v4048_v23 = vpack.c.bf16 %v4045_v11, %v4044_v60  ;;  %v4047_v2 = vld [vmem:[%s10960_s2 + $0x238] sm:$0xff] }
0x2049   : > { %v4049_v42 = vpack.c.bf16 %v4047_v2, %v4046_v1 }
0x204a   : > { %v3718_v54 = vpack.c.bf16 %v3712_v43, %v3711_v37  ;;  %8644 = vmatprep.subr.bf16.mxu1 %v4048_v23  ;;  %v3989_v37 = vld [vmem:[%s10960_s2 + $0x200] sm:$0xff]  ;;  %v3990_v43 = vld [vmem:[%s10960_s2 + $0x208] sm:$0xff] }
0x204c   : > { %8613 = vmatmul.mubr.msk.bf16.vlgmr.msra.gmra.mrb[68].mxu0 %vm354_vm2, %v3718_v54  ;;  %v3993_v54 = vpack.c.bf16 %v3990_v43, %v3989_v37 }
0x204d   : > { %8629 = vmatpush3.bf16.msra.mxu0 %v3932_v34 }
0x204e   : > { %8630 = vmatprep.subr.bf16.mxu0 %v3933_v38 }
0x2051   : > { %8631 = vmatpush3.bf16.msra.mxu0 %v3933_v38 }
0x2052   : > { %8636 = vmatprep.subr.bf16.mxu0 %v3993_v54 }
0x211f   : > { %v8614_v4 = vpop.f32.mrb[68].mxu0 }
0x2120   : > { %v10087_v48 = vadd.f32 %v8614_v4, %v7942_v46  ;;  %v3766_v7 = vpop.f32.mrb[69].mxu0 }
0x2121   : > { %v10091_v3 = vadd.f32 %v7942_v46, %v3766_v7  ;;  %v8615_v18 = vpop.f32.mrb[70].mxu0  ;;  %v9235_v7 = vld [vmem:[%s10960_s2 + $0x480] sm:$0xff] }
0x2122   : > { %7598 = vst.msk [vmem:[%s10094_s28 + $0x10] sm:$0xff] %vm215_vm1, %v10087_v48  ;;  %v10099_v15 = vadd.f32 %v8615_v18, %v7942_v46  ;;  %v3769_v20 = vpop.f32.mrb[71].mxu0  ;;  %v3791_v26 = vmul.f32 %v3787_v52, %v10087_v48 }
0x2123   : > { %v3789_v13 = vmul.f32 %v3785_v49, %v10091_v3  ;;  %7596 = vst.msk [vmem:[%s10094_s28] sm:$0xff] %vm215_vm1, %v10091_v3  ;;  %v10108_v0 = vadd.f32 %v7942_v46, %v3769_v20  ;;  %v9238_v20 = vld [vmem:[%s10960_s2 + $0x478] sm:$0xff] }
0x2124   : > { %v3792_v59 = vmul.f32 %v3788_v62, %v10099_v15  ;;  %7599 = vst.msk [vmem:[%s10094_s28 + $0x18] sm:$0xff] %vm215_vm1, %v10099_v15  ;;  %v3795_v32 = vadd.f32 %v3791_v26, %v3783_v36  ;;  %v9236_v62 = vld [vmem:[%s10960_s2 + $0x468] sm:$0xff] }
0x2125   : > { %v3790_v28 = vmul.f32 %v3786_v10, %v10108_v0  ;;  %7597 = vst.msk [vmem:[%s10094_s28 + $0x8] sm:$0xff] %vm215_vm1, %v10108_v0  ;;  %v3793_v30 = vadd.f32 %v3789_v13, %v3781_v41 }
0x2126   : > { %v3796_v55 = vadd.f32 %v3792_v59, %v3784_v16  ;;  %v3992_v16 = vld [vmem:[%s10960_s2 + $0x218] sm:$0xff] }
0x2127   : > { %v3794_v31 = vadd.f32 %v3790_v28, %v3782_v5  ;;  %v3994_v5 = vpack.c.bf16 %v3992_v16, %v3991_v12 }
0x2128   : > { %v3799_v33 = vpack.c.bf16 %v3796_v55, %v3795_v32 }
0x2129   : > { %v3798_v50 = vpack.c.bf16 %v3794_v31, %v3793_v30 }
0x212b   : > { %8624 = vmatprep.mubr.msk.bf16.mxu1 %vm215_vm1, %v3798_v50 }
0x212c   : > { %8625 = vmatmul.mubr.msk.bf16.vlgmr.msra.gmra.mrb[84].mxu1 %vm215_vm1, %v3799_v33 }
0x212d   : > { %8645 = vmatpush3.bf16.msra.mxu1 %v4048_v23 }
0x212e   : > { %8646 = vmatprep.subr.bf16.mxu1 %v4049_v42 }
0x2131   : > { %8647 = vmatpush3.bf16.msra.mxu1 %v4049_v42 }
0x2132   : > { %8663 = vmatprep.subr.mxu1 %v9303_v63 }
0x21ff   : > { %v8626_v39 = vpop.f32.mrb[84].mxu1 }
0x2200   : > { %v3898_v44 = vpop.f32.mrb[85].mxu1  ;;  %v3920_v47 = vadd.f32 %v8626_v39, %v7949_v17 }
0x2201   : > { %v3918_v46 = vadd.f32 %v7949_v17, %v3898_v44  ;;  %v8627_v4 = vpop.f32.mrb[86].mxu1 }
0x2202   : > { %v3921_v49 = vadd.f32 %v8627_v4, %v7949_v17  ;;  %v3901_v51 = vpop.f32.mrb[87].mxu1  ;;  %v10180_v22 = vadd.f32 %v9238_v20, %v3920_v47 }
0x2203   : > { %v3919_v52 = vadd.f32 %v7949_v17, %v3901_v51  ;;  %v10164_v18 = vadd.f32 %v9236_v62, %v3918_v46 }
0x2204   : > { %v10159_v61 = vadd.f32 %v9235_v7, %v3921_v49 }
0x2205   : > { %v10169_v10 = vadd.f32 %v9237_v8, %v3919_v52 }
0x2206   : > { %v3931_v21 = vpack.c.bf16 %v10159_v61, %v10180_v22 }
0x2207   : > { %v3930_v41 = vpack.c.bf16 %v10169_v10, %v10164_v18 }
0x2209   : > { %8632 = vmatprep.mubr.msk.bf16.mxu0 %vm354_vm2, %v3930_v41  ;;  %8648 = vmatprep.mubr.msk.bf16.mxu1 %vm354_vm2, %v3930_v41 }
0x220a   : > { %8633 = vmatmul.mubr.msk.bf16.vlgmr.msra.gmra.mrb[72].mxu0 %vm354_vm2, %v3931_v21  ;;  %8649 = vmatmul.mubr.msk.bf16.vlgmr.msra.gmra.mrb[88].mxu1 %vm354_vm2, %v3931_v21 }
0x220b   : > { %8637 = vmatpush3.bf16.msra.mxu0 %v3993_v54  ;;  %8640 = vmatprep.mubr.msk.bf16.mxu0 %vm354_vm2, %v3930_v41 }
0x220c   : > { %8638 = vmatprep.subr.bf16.mxu0 %v3994_v5  ;;  %8665 = vmatprep.mubr.msk.f32.mxu1 %vm9304_vm3, %v9303_v63 }
0x220f   : > { %8639 = vmatpush3.bf16.msra.mxu0 %v3994_v5 }
0x2210   : > { %8652 = vmatprep.subr.mxu0 %v9303_v63 }
0x2212   : > { %8641 = vmatmul.mubr.msk.bf16.vlgmr.msra.gmra.mrb[76].mxu0 %vm354_vm2, %v3931_v21 }
0x2213   : > { %8654 = vmatprep.mubr.msk.f32.mxu0 %vm9304_vm3, %v9303_v63 }
0x22dd   : > { %v10197_v13 = vpop.f32.mrb[72].mxu0  ;;  %v10199_v57 = vpop.f32.mrb[88].mxu1 }
0x22de   : > { %v3974_v36 = vpop.f32.mrb[73].mxu0  ;;  %v4084_v26 = vpop.f32.mrb[89].mxu1 }
0x22df   : > { %v4099_v59 = vmul.f32 0.25, %v3974_v36  ;;  %v10201_v28 = vpop.f32.mrb[74].mxu0  ;;  %v10203_v55 = vpop.f32.mrb[90].mxu1  ;;  %v4188_v50 = vpack.c.bf16 %v4084_v26, %v4084_v26 }
0x22e0   : > { %v3977_v30 = vpop.f32.mrb[75].mxu0  ;;  %v4087_v31 = vpop.f32.mrb[91].mxu1 }
0x22e1   : > { %4235 = vrot.lane.b32.xlu1 %v4099_v59, %s9305_s11  ;;  %v4193_v60 = vsel %vm615_vm4, %v4188_v50, 0  ;;  %v4374_v39 = vmul.f32 0.25, %v3977_v30  ;;  %v4463_v8 = vpack.c.bf16 %v4087_v31, %v4087_v31 }
0x22e3   : > { %v4468_v12 = vsel %vm615_vm4, %v4463_v8, 0 }
0x22e5   : > { %v10206_v32 = vpop.f32.mrb[76].mxu0 }
0x22e6   : > { %v4029_v33 = vpop.f32.mrb[77].mxu0 }
0x22e7   : > { %4237 = vrot.lane.b32.xlu0 %v4029_v33, %s9305_s11  ;;  %v10209_v19 = vpop.f32.mrb[78].mxu0  ;;  %8653 = vmatpush3.xpose.msk.msra.mxu0 %vm521_vm5, %v4029_v33 }
0x22e8   : > { %v4032_v53 = vpop.f32.mrb[79].mxu0  ;;  %8657 = vmatprep.subr.bf16.mxu0 %v9303_v63 }
0x22ea   : > { %8655 = vmatmul.mubr.msk.f32.vlgmr.msra.gmra.mrb[80].mxu0 %vm521_vm5, %v4099_v59 }
0x22eb   : > { %8658 = vmatpush3.bf16.msra.mxu0 %v4193_v60  ;;  %8659 = vmatprep.mubr.msk.bf16.mxu0 %vm9304_vm3, %v9303_v63 }
0x22ec   : > { %8674 = vmatprep.subr.mxu0 %v9303_v63 }
0x2353   : > { %v4236_v11 = vpop.permute.xlu1 %4235 }
0x2359   : > { %v4238_v34 = vpop.permute.xlu0 %4237 }
0x235a   : > { %8664 = vmatpush3.xpose.msk.msra.mxu1 %vm521_vm5, %v4238_v34 }
0x235b   : > { %8668 = vmatprep.subr.bf16.mxu1 %v9303_v63 }
0x235d   : > { %8666 = vmatmul.mubr.msk.f32.vlgmr.msra.gmra.mrb[92].mxu1 %vm521_vm5, %v4236_v11  ;;  %v4649_v11 = vmul.f32 0.25, %v10197_v13 }
0x235e   : > { %8670 = vmatprep.mubr.msk.bf16.mxu1 %vm9304_vm3, %v9303_v63 }
0x23bd   : > { %v4172_v23 = vpop.f32.mrb[80].mxu0 }
0x23be   : > { %v8656_v40 = vpop.f32.mrb[81].mxu0  ;;  %v4176_v35 = vsel %vm598_vm6, %v4172_v23, -inf }
0x23bf   : > { %4177 = vmax.xlane.f32.xlu0 %v4176_v35 }
0x2430   : > { %v4309_v1 = vpop.f32.mrb[92].mxu1 }
0x2431   : > { %v8667_v38 = vpop.f32.mrb[93].mxu1  ;;  %v4313_v2 = vsel %vm598_vm6, %v4309_v1, -inf }
0x2432   : > { %4314 = vmax.xlane.f32.xlu1 %v4313_v2 }
0x244c   : > { %v4178_v42 = vpop.xlane.xlu0 %4177 }
0x244d   : > { %v4179_v37 = vsub.f32 %v4172_v23, %v4178_v42 }
0x244f   : > { %v4180_v43 = vmul.f32 1.442695, %v4179_v37 }
0x2451   : > { %9115 = vpow2.f32 %v4180_v43 }
0x245b   : > { %v9116_v54 = vpop.eup %9115 }
0x245c   : > { %v4182_v17 = vsel %vm598_vm6, %v9116_v54, 0.0 }
0x245d   : > { %4183 = vadd.xlane.f32.xlu1 %v4182_v17 }
0x246e   : > { %4512 = vrot.lane.b32.xlu1 %v4032_v53, %s9305_s11 }
0x2472   : > { %4510 = vrot.lane.b32.xlu1 %v4374_v39, %s9305_s11 }
0x24bf   : > { %v4315_v44 = vpop.xlane.xlu1 %4314 }
0x24c0   : > { %v4316_v46 = vsub.f32 %v4309_v1, %v4315_v44 }
0x24c2   : > { %v4317_v4 = vmul.f32 1.442695, %v4316_v46 }
0x24c4   : > { %9117 = vpow2.f32 %v4317_v4 }
0x24ce   : > { %v9118_v47 = vpop.eup %9117 }
0x24cf   : > { %v4319_v49 = vsel %vm598_vm6, %v9118_v47, 0.0 }
0x24d0   : > { %4320 = vadd.xlane.f32.xlu0 %v4319_v49 }
0x24e6   : > { %4326 = vrot.lane.b32.xlu0 %v4188_v50, %s9305_s11 }
0x24ea   : > { %v4184_v51 = vpop.xlane.xlu1 %4183 }
0x24eb   : > { %9119 = vrcp.f32 %v4184_v51 }
0x24ee   : > { %v4513_v26 = vpop.permute.xlu1 %4512 }
0x24f2   : > { %v4511_v59 = vpop.permute.xlu1 %4510 }
0x24f5   : > { %v9120_v52 = vpop.eup %9119 }
0x24f6   : > { %v4186_v7 = vmul.f32 %v9120_v52, %v9116_v54 }
0x24f8   : > { %v4187_v62 = vpack.c.bf16 %v4186_v7, %v4186_v7 }
0x24fa   : > { %8660 = vmatmul.mubr.msk.bf16.vlgmr.msra.gmra.mrb[84].mxu0 %vm598_vm6, %v4187_v62 }
0x24fb   : > { %8675 = vmatpush3.xpose.msk.msra.mxu0 %vm521_vm5, %v4032_v53  ;;  %8676 = vmatprep.mubr.msk.f32.mxu0 %vm9304_vm3, %v9303_v63 }
0x24fc   : > { %8679 = vmatprep.subr.bf16.mxu0 %v9303_v63 }
0x2502   : > { %8677 = vmatmul.mubr.msk.f32.vlgmr.msra.gmra.mrb[82].mxu0 %vm521_vm5, %v4374_v39 }
0x2503   : > { %8680 = vmatpush3.bf16.msra.mxu0 %v4468_v12  ;;  %8681 = vmatprep.mubr.msk.bf16.mxu0 %vm9304_vm3, %v9303_v63 }
0x2504   : > { %8696 = vmatprep.subr.mxu0 %v9303_v63 }
0x255d   : > { %v4321_v16 = vpop.xlane.xlu0 %4320 }
0x255e   : > { %9121 = vrcp.f32 %v4321_v16 }
0x2561   : > { %v4327_v20 = vpop.permute.xlu0 %4326 }
0x2562   : > { %v4332_v41 = vsel %vm615_vm4, %v4327_v20, 0 }
0x2563   : > { %8669 = vmatpush3.bf16.msra.mxu1 %v4332_v41 }
0x2564   : > { %8685 = vmatprep.subr.mxu1 %v9303_v63 }
0x2568   : > { %v9122_v21 = vpop.eup %9121 }
0x2569   : > { %v4323_v5 = vmul.f32 %v9122_v21, %v9118_v47 }
0x256b   : > { %v4324_v36 = vpack.c.bf16 %v4323_v5, %v4323_v5 }
0x256d   : > { %8671 = vmatmul.mubr.msk.bf16.vlgmr.msra.gmra.mrb[96].mxu1 %vm598_vm6, %v4324_v36  ;;  %v4738_v36 = vpack.c.bf16 %v10199_v57, %v10199_v57 }
0x256e   : > { %8686 = vmatpush3.xpose.msk.msra.mxu1 %vm521_vm5, %v4513_v26  ;;  %8687 = vmatprep.mubr.msk.f32.mxu1 %vm9304_vm3, %v9303_v63 }
0x256f   : > { %8690 = vmatprep.subr.bf16.mxu1 %v9303_v63  ;;  %v4743_v26 = vsel %vm615_vm4, %v4738_v36, 0 }
0x2575   : > { %8688 = vmatmul.mubr.msk.f32.vlgmr.msra.gmra.mrb[94].mxu1 %vm521_vm5, %v4511_v59 }
0x2576   : > { %8692 = vmatprep.mubr.msk.bf16.mxu1 %vm9304_vm3, %v9303_v63 }
0x25cd   : > { %v10250_v30 = vpop.f32.mrb[84].mxu0 }
0x25ce   : > { %v8661_v31 = vpop.f32.mrb[85].mxu0 }
0x25cf   : > { %v4232_v50 = vpop.f32.mrb[86].mxu0 }
0x25d0   : > { %v8662_v33 = vpop.f32.mrb[87].mxu0 }
0x25d5   : > { %v4447_v53 = vpop.f32.mrb[82].mxu0 }
0x25d6   : > { %v8678_v60 = vpop.f32.mrb[83].mxu0  ;;  %v4451_v34 = vsel %vm598_vm6, %v4447_v53, -inf }
0x25d7   : > { %4452 = vmax.xlane.f32.xlu1 %v4451_v34 }
0x25e8   : > { %4601 = vrot.lane.b32.xlu1 %v4463_v8, %s9305_s11 }
0x25ec   : > { %4785 = vrot.lane.b32.xlu1 %v4649_v11, %s9305_s11 }
0x2640   : > { %v10256_v23 = vpop.f32.mrb[96].mxu1 }
0x2641   : > { %v8672_v40 = vpop.f32.mrb[97].mxu1 }
0x2642   : > { %v4371_v35 = vpop.f32.mrb[98].mxu1 }
0x2643   : > { %v8673_v1 = vpop.f32.mrb[99].mxu1 }
0x2648   : > { %v4584_v38 = vpop.f32.mrb[94].mxu1 }
0x2649   : > { %v8689_v2 = vpop.f32.mrb[95].mxu1  ;;  %v4588_v42 = vsel %vm598_vm6, %v4584_v38, -inf }
0x264a   : > { %4589 = vmax.xlane.f32.xlu0 %v4588_v42 }
0x2664   : > { %v4453_v37 = vpop.xlane.xlu1 %4452 }
0x2665   : > { %v4454_v13 = vsub.f32 %v4447_v53, %v4453_v37 }
0x2667   : > { %v4455_v44 = vmul.f32 1.442695, %v4454_v13 }
0x2668   : > { %v4602_v43 = vpop.permute.xlu1 %4601 }
0x2669   : > { %v4607_v54 = vsel %vm615_vm4, %v4602_v43, 0 }
0x266a   : > { %8691 = vmatpush3.bf16.msra.mxu1 %v4607_v54 }
0x266b   : > { %8707 = vmatprep.subr.mxu1 %v9303_v63 }
0x266c   : > { %v4786_v5 = vpop.permute.xlu1 %4785 }
0x26d7   : > { %v4590_v17 = vpop.xlane.xlu0 %4589 }
0x26d8   : > { %v4591_v39 = vsub.f32 %v4584_v38, %v4590_v17 }
0x26da   : > { %v4592_v46 = vmul.f32 1.442695, %v4591_v39 }
0x26dc   : > { %9123 = vpow2.f32 %v4592_v46 }
0x26dd   : > { %9125 = vpow2.f32 %v4455_v44 }
0x26e6   : > { %v9124_v4 = vpop.eup %9123 }
0x26e7   : > { %v4594_v47 = vsel %vm598_vm6, %v9124_v4, 0.0  ;;  %v9126_v49 = vpop.eup %9125 }
0x26e8   : > { %4595 = vadd.xlane.f32.xlu0 %v4594_v47  ;;  %v4457_v51 = vsel %vm598_vm6, %v9126_v49, 0.0 }
0x26ec   : > { %4458 = vadd.xlane.f32.xlu0 %v4457_v51 }
0x2702   : > { %4787 = vrot.lane.b32.xlu0 %v10206_v32, %s9305_s11 }
0x2775   : > { %v4596_v52 = vpop.xlane.xlu0 %4595 }
0x2776   : > { %9127 = vrcp.f32 %v4596_v52 }
0x2779   : > { %v4459_v7 = vpop.xlane.xlu0 %4458 }
0x277a   : > { %9129 = vrcp.f32 %v4459_v7 }
0x277d   : > { %v4788_v20 = vpop.permute.xlu0 %4787 }
0x2780   : > { %v9128_v62 = vpop.eup %9127 }
0x2781   : > { %v4598_v8 = vmul.f32 %v9128_v62, %v9124_v4 }
0x2783   : > { %v4599_v12 = vpack.c.bf16 %v4598_v8, %v4598_v8 }
0x2784   : > { %v9130_v16 = vpop.eup %9129 }
0x2785   : > { %8693 = vmatmul.mubr.msk.bf16.vlgmr.msra.gmra.mrb[100].mxu1 %vm598_vm6, %v4599_v12  ;;  %v4461_v41 = vmul.f32 %v9130_v16, %v9126_v49  ;;  %v4924_v49 = vmul.f32 0.25, %v10201_v28 }
0x2786   : > { %8708 = vmatpush3.xpose.msk.msra.mxu1 %vm521_vm5, %v4788_v20  ;;  %8709 = vmatprep.mubr.msk.f32.mxu1 %vm9304_vm3, %v9303_v63 }
0x2787   : > { %v4462_v21 = vpack.c.bf16 %v4461_v41, %v4461_v41  ;;  %8712 = vmatprep.subr.bf16.mxu1 %v9303_v63 }
0x2789   : > { %8682 = vmatmul.mubr.msk.bf16.vlgmr.msra.gmra.mrb[88].mxu0 %vm598_vm6, %v4462_v21 }
0x278a   : > { %8697 = vmatpush3.xpose.msk.msra.mxu0 %vm521_vm5, %v10206_v32  ;;  %8698 = vmatprep.mubr.msk.f32.mxu0 %vm9304_vm3, %v9303_v63 }
0x278b   : > { %8701 = vmatprep.subr.bf16.mxu0 %v9303_v63 }
0x278d   : > { %8710 = vmatmul.mubr.msk.f32.vlgmr.msra.gmra.mrb[104].mxu1 %vm521_vm5, %v4786_v5 }
0x278e   : > { %8714 = vmatprep.mubr.msk.bf16.mxu1 %vm9304_vm3, %v9303_v63 }
0x2791   : > { %8699 = vmatmul.mubr.msk.f32.vlgmr.msra.gmra.mrb[92].mxu0 %vm521_vm5, %v4649_v11 }
0x2792   : > { %8702 = vmatpush3.bf16.msra.mxu0 %v4743_v26  ;;  %8703 = vmatprep.mubr.msk.bf16.mxu0 %vm9304_vm3, %v9303_v63 }
0x2793   : > { %8718 = vmatprep.subr.mxu0 %v9303_v63 }
0x2858   : > { %v10286_v32 = vpop.f32.mrb[100].mxu1 }
0x2859   : > { %v5206_v57 = vpack.c.bf16 %v10286_v32, %v10256_v23  ;;  %v8694_v59 = vpop.f32.mrb[101].mxu1 }
0x285a   : > { %v4646_v31 = vpop.f32.mrb[102].mxu1 }
0x285b   : > { %v8695_v50 = vpop.f32.mrb[103].mxu1 }
0x285c   : > { %v10290_v33 = vpop.f32.mrb[88].mxu0 }
0x285d   : > { %v5203_v53 = vpack.c.bf16 %v10290_v33, %v10250_v30  ;;  %v8683_v60 = vpop.f32.mrb[89].mxu0 }
0x285e   : > { %v4507_v34 = vpop.f32.mrb[90].mxu0 }
0x285f   : > { %v8684_v11 = vpop.f32.mrb[91].mxu0 }
0x2860   : > { %v4859_v40 = vpop.f32.mrb[104].mxu1 }
0x2861   : > { %v8711_v35 = vpop.f32.mrb[105].mxu1  ;;  %v4863_v1 = vsel %vm598_vm6, %v4859_v40, -inf }
0x2862   : > { %4864 = vmax.xlane.f32.xlu1 %v4863_v1 }
0x2864   : > { %v4722_v38 = vpop.f32.mrb[92].mxu0 }
0x2865   : > { %v8700_v2 = vpop.f32.mrb[93].mxu0  ;;  %v4726_v42 = vsel %vm598_vm6, %v4722_v38, -inf }
0x2866   : > { %4727 = vmax.xlane.f32.xlu0 %v4726_v42 }
0x28ef   : > { %v4865_v37 = vpop.xlane.xlu1 %4864 }
0x28f0   : > { %v4866_v43 = vsub.f32 %v4859_v40, %v4865_v37 }
0x28f2   : > { %v4867_v54 = vmul.f32 1.442695, %v4866_v43 }
0x28f3   : > { %v4728_v13 = vpop.xlane.xlu0 %4727 }
0x28f4   : > { %9131 = vpow2.f32 %v4867_v54  ;;  %v4729_v17 = vsub.f32 %v4722_v38, %v4728_v13 }
0x28f6   : > { %v4730_v39 = vmul.f32 1.442695, %v4729_v17 }
0x28f8   : > { %9133 = vpow2.f32 %v4730_v39 }
0x28fe   : > { %v9132_v44 = vpop.eup %9131 }
0x28ff   : > { %v4869_v46 = vsel %vm598_vm6, %v9132_v44, 0.0 }
0x2900   : > { %4870 = vadd.xlane.f32.xlu0 %v4869_v46 }
0x2902   : > { %v9134_v4 = vpop.eup %9133 }
0x2903   : > { %v4732_v47 = vsel %vm598_vm6, %v9134_v4, 0.0 }
0x2904   : > { %4733 = vadd.xlane.f32.xlu1 %v4732_v47 }
0x2915   : > { %5062 = vrot.lane.b32.xlu1 %v10209_v19, %s9305_s11 }
0x2916   : > { %4876 = vrot.lane.b32.xlu0 %v4738_v36, %s9305_s11  ;;  %v5013_v36 = vpack.c.bf16 %v10203_v55, %v10203_v55 }
0x2918   : > { %v5018_v26 = vsel %vm615_vm4, %v5013_v36, 0 }
0x2919   : > { %5060 = vrot.lane.b32.xlu1 %v4924_v49, %s9305_s11 }
0x298d   : > { %v4871_v51 = vpop.xlane.xlu0 %4870 }
0x298e   : > { %9135 = vrcp.f32 %v4871_v51 }
0x2991   : > { %v4734_v52 = vpop.xlane.xlu1 %4733  ;;  %v4877_v7 = vpop.permute.xlu0 %4876 }
0x2992   : > { %9137 = vrcp.f32 %v4734_v52  ;;  %v4882_v62 = vsel %vm615_vm4, %v4877_v7, 0  ;;  %v5201_v52 = vld [vmem:[%s10960_s2 + $0x250] sm:$0xff]  ;;  %v5202_v7 = vld [vmem:[%s10960_s2 + $0x258] sm:$0xff] }
0x2993   : > { %8713 = vmatpush3.bf16.msra.mxu1 %v4882_v62  ;;  %v5208_v62 = vpack.c.bf16 %v5202_v7, %v5201_v52 }
0x2994   : > { %8729 = vmatprep.subr.mxu1 %v9303_v63 }
0x2995   : > { %v5063_v21 = vpop.permute.xlu1 %5062 }
0x2998   : > { %v9136_v8 = vpop.eup %9135 }
0x2999   : > { %v4873_v12 = vmul.f32 %v9136_v8, %v9132_v44  ;;  %v5061_v5 = vpop.permute.xlu1 %5060 }
0x299b   : > { %v4874_v16 = vpack.c.bf16 %v4873_v12, %v4873_v12 }
0x299c   : > { %v9138_v20 = vpop.eup %9137 }
0x299d   : > { %v4736_v41 = vmul.f32 %v9138_v20, %v9134_v4  ;;  %8715 = vmatmul.mubr.msk.bf16.vlgmr.msra.gmra.mrb[108].mxu1 %vm598_vm6, %v4874_v16 }
0x299e   : > { %8730 = vmatpush3.xpose.msk.msra.mxu1 %vm521_vm5, %v5063_v21  ;;  %8731 = vmatprep.mubr.msk.f32.mxu1 %vm9304_vm3, %v9303_v63 }
0x299f   : > { %v4737_v28 = vpack.c.bf16 %v4736_v41, %v4736_v41  ;;  %8734 = vmatprep.subr.bf16.mxu1 %v9303_v63 }
0x29a1   : > { %8704 = vmatmul.mubr.msk.bf16.vlgmr.msra.gmra.mrb[96].mxu0 %vm598_vm6, %v4737_v28 }
0x29a2   : > { %8719 = vmatpush3.xpose.msk.msra.mxu0 %vm521_vm5, %v10209_v19  ;;  %8720 = vmatprep.mubr.msk.f32.mxu0 %vm9304_vm3, %v9303_v63 }
0x29a3   : > { %8723 = vmatprep.subr.bf16.mxu0 %v9303_v63 }
0x29a5   : > { %8732 = vmatmul.mubr.msk.f32.vlgmr.msra.gmra.mrb[106].mxu1 %vm521_vm5, %v5061_v5 }
0x29a6   : > { %8736 = vmatprep.mubr.msk.bf16.mxu1 %vm9304_vm3, %v9303_v63 }
0x29a9   : > { %8721 = vmatmul.mubr.msk.f32.vlgmr.msra.gmra.mrb[94].mxu0 %vm521_vm5, %v4924_v49 }
0x29aa   : > { %8724 = vmatpush3.bf16.msra.mxu0 %v5018_v26  ;;  %8725 = vmatprep.mubr.msk.bf16.mxu0 %vm9304_vm3, %v9303_v63  ;;  %v5200_v26 = vld [vmem:[%s10960_s2 + $0x248] sm:$0xff] }
0x29ab   : > { %8740 = vmatprep.subr.bf16.mxu0 %v5208_v62 }
0x2a70   : > { %v4918_v19 = vpop.f32.mrb[108].mxu1 }
0x2a71   : > { %v8716_v59 = vpop.f32.mrb[109].mxu1 }
0x2a72   : > { %v4921_v31 = vpop.f32.mrb[110].mxu1 }
0x2a73   : > { %v8717_v50 = vpop.f32.mrb[111].mxu1 }
0x2a74   : > { %v10325_v60 = vpop.f32.mrb[96].mxu0 }
0x2a75   : > { %v8705_v55 = vpop.f32.mrb[97].mxu0 }
0x2a76   : > { %v4782_v34 = vpop.f32.mrb[98].mxu0 }
0x2a77   : > { %v8706_v11 = vpop.f32.mrb[99].mxu0 }
0x2a78   : > { %v5134_v40 = vpop.f32.mrb[106].mxu1 }
0x2a79   : > { %v8733_v35 = vpop.f32.mrb[107].mxu1  ;;  %v5138_v1 = vsel %vm598_vm6, %v5134_v40, -inf }
0x2a7a   : > { %5139 = vmax.xlane.f32.xlu0 %v5138_v1 }
0x2a7c   : > { %v4997_v38 = vpop.f32.mrb[94].mxu0 }
0x2a7d   : > { %v8722_v2 = vpop.f32.mrb[95].mxu0  ;;  %v5001_v42 = vsel %vm598_vm6, %v4997_v38, -inf }
0x2a7e   : > { %5002 = vmax.xlane.f32.xlu1 %v5001_v42 }
0x2a8f   : > { %5151 = vrot.lane.b32.xlu1 %v5013_v36, %s9305_s11  ;;  %v5199_v36 = vld [vmem:[%s10960_s2 + $0x240] sm:$0xff] }
0x2a90   : > { %v5205_v59 = vpack.c.bf16 %v5200_v26, %v5199_v36  ;;  %v5396_v36 = vld [vmem:[%s10960_s2 + $0x288] sm:$0xff] }
0x2b07   : > { %v5140_v37 = vpop.xlane.xlu0 %5139 }
0x2b08   : > { %v5141_v43 = vsub.f32 %v5134_v40, %v5140_v37 }
0x2b0a   : > { %v5142_v54 = vmul.f32 1.442695, %v5141_v43 }
0x2b0b   : > { %v5003_v13 = vpop.xlane.xlu1 %5002 }
0x2b0c   : > { %9139 = vpow2.f32 %v5142_v54  ;;  %v5004_v17 = vsub.f32 %v4997_v38, %v5003_v13 }
0x2b0e   : > { %v5005_v39 = vmul.f32 1.442695, %v5004_v17 }
0x2b0f   : > { %v5152_v44 = vpop.permute.xlu1 %5151 }
0x2b10   : > { %9141 = vpow2.f32 %v5005_v39  ;;  %v5157_v46 = vsel %vm615_vm4, %v5152_v44, 0 }
0x2b11   : > { %8735 = vmatpush3.bf16.msra.mxu1 %v5157_v46 }
0x2b16   : > { %v9140_v4 = vpop.eup %9139 }
0x2b17   : > { %v5144_v47 = vsel %vm598_vm6, %v9140_v4, 0.0 }
0x2b18   : > { %5145 = vadd.xlane.f32.xlu0 %v5144_v47 }
0x2b1a   : > { %v9142_v49 = vpop.eup %9141 }
0x2b1b   : > { %v5007_v51 = vsel %vm598_vm6, %v9142_v49, 0.0 }
0x2b1c   : > { %5008 = vadd.xlane.f32.xlu0 %v5007_v51 }
0x2ba5   : > { %v5146_v8 = vpop.xlane.xlu0 %5145 }
0x2ba6   : > { %9143 = vrcp.f32 %v5146_v8 }
0x2ba9   : > { %v5009_v12 = vpop.xlane.xlu0 %5008 }
0x2baa   : > { %9145 = vrcp.f32 %v5009_v12 }
0x2bb0   : > { %v9144_v16 = vpop.eup %9143 }
0x2bb1   : > { %v5148_v20 = vmul.f32 %v9144_v16, %v9140_v4 }
0x2bb3   : > { %v5149_v41 = vpack.c.bf16 %v5148_v20, %v5148_v20 }
0x2bb4   : > { %v9146_v21 = vpop.eup %9145 }
0x2bb5   : > { %v5011_v28 = vmul.f32 %v9146_v21, %v9142_v49  ;;  %8737 = vmatmul.mubr.msk.bf16.vlgmr.msra.gmra.mrb[112].mxu1 %vm598_vm6, %v5149_v41  ;;  %v5393_v41 = vld [vmem:[%s10960_s2 + $0x270] sm:$0xff]  ;;  %v5394_v21 = vld [vmem:[%s10960_s2 + $0x278] sm:$0xff] }
0x2bb7   : > { %v5012_v5 = vpack.c.bf16 %v5011_v28, %v5011_v28  ;;  %v5399_v28 = vpack.c.bf16 %v5394_v21, %v5393_v41 }
0x2bb9   : > { %8726 = vmatmul.mubr.msk.bf16.vlgmr.msra.gmra.mrb[100].mxu0 %vm598_vm6, %v5012_v5  ;;  %8752 = vmatprep.subr.bf16.mxu1 %v5399_v28  ;;  %v5395_v5 = vld [vmem:[%s10960_s2 + $0x280] sm:$0xff] }
0x2bba   : > { %8742 = vmatprep.mubr.msk.bf16.mxu0 %vm521_vm5, %v5206_v57  ;;  %8741 = vmatpush3.bf16.msra.mxu0 %v5208_v62  ;;  %v5400_v26 = vpack.c.bf16 %v5396_v36, %v5395_v5 }
0x2bbb   : > { %8746 = vmatprep.subr.bf16.mxu0 %v5205_v59  ;;  %8753 = vmatpush3.bf16.msra.mxu1 %v5399_v28 }
0x2bbc   : > { %8754 = vmatprep.subr.bf16.mxu1 %v5400_v26 }
0x2bbf   : > { %8755 = vmatpush3.bf16.msra.mxu1 %v5400_v26 }
0x2c88   : > { %v5193_v31 = vpop.f32.mrb[112].mxu1 }
0x2c89   : > { %v5207_v50 = vpack.c.bf16 %v5193_v31, %v4918_v19  ;;  %v8738_v55 = vpop.f32.mrb[113].mxu1 }
0x2c8a   : > { %v5196_v34 = vpop.f32.mrb[114].mxu1 }
0x2c8b   : > { %v8739_v11 = vpop.f32.mrb[115].mxu1  ;;  %8743 = vmatmul.mubr.msk.bf16.vlgmr.msra.gmra.mrb[104].mxu0 %vm521_vm5, %v5207_v50 }
0x2c8c   : > { %v5054_v23 = vpop.f32.mrb[100].mxu0  ;;  %8748 = vmatprep.mubr.msk.bf16.mxu0 %vm521_vm5, %v5203_v53  ;;  %8747 = vmatpush3.bf16.msra.mxu0 %v5205_v59 }
0x2c8d   : > { %v5204_v32 = vpack.c.bf16 %v5054_v23, %v10325_v60  ;;  %v8727_v57 = vpop.f32.mrb[101].mxu0 }
0x2c8e   : > { %v5057_v40 = vpop.f32.mrb[102].mxu0 }
0x2c8f   : > { %v8728_v35 = vpop.f32.mrb[103].mxu0 }
0x2c97   : > { %8749 = vmatmul.mubr.msk.bf16.vlgmr.msra.gmra.mrb[104].mxu0 %vm521_vm5, %v5204_v32 }
0x2d6a   : > { %v8750_v19 = vpop.f32.mrb[104].mxu0 }
0x2d6b   : > { %v5321_v1 = vadd.f32 %v8750_v19, %v10180_v22  ;;  %v5304_v38 = vpop.f32.mrb[105].mxu0 }
0x2d6c   : > { %v8751_v2 = vpop.f32.mrb[106].mxu0  ;;  %v5319_v42 = vadd.f32 %v5304_v38, %v10164_v18 }
0x2d6d   : > { %v5307_v37 = vpop.f32.mrb[107].mxu0  ;;  %v5331_v30 = vsel %vm354_vm2, %v5321_v1, 0.0  ;;  %v5322_v60 = vadd.f32 %v8751_v2, %v10159_v61 }
0x2d6e   : > { %5332 = vadd.xlane.f32.xlu0 %v5331_v30  ;;  %v5320_v33 = vadd.f32 %v5307_v37, %v10169_v10  ;;  %v5325_v53 = vsel %vm354_vm2, %v5319_v42, 0.0  ;;  %v7984_v37 = vld [vmem:[%s10960_s2 + $0x260] ss:$0 sm:$0xff] }
0x2d6f   : > { %v5334_v22 = vsel %vm354_vm2, %v5322_v60, 0.0 }
0x2d70   : > { %v5328_v43 = vsel %vm354_vm2, %v5320_v33, 0.0 }
0x2d72   : > { %5326 = vadd.xlane.f32.xlu0 %v5325_v53 }
0x2d76   : > { %5329 = vadd.xlane.f32.xlu0 %v5328_v43 }
0x2d7a   : > { %5335 = vadd.xlane.f32.xlu0 %v5334_v22  ;;  %v7985_v22 = vld [vmem:[%s10960_s2 + $0x268] ss:$0 sm:$0xff] }
0x2dfb   : > { %v5333_v54 = vpop.xlane.xlu0 %5332 }
0x2dfc   : > { %v5339_v13 = vmul.f32 0.03125, %v5333_v54 }
0x2dfe   : > { %v5343_v18 = vsub.f32 %v5321_v1, %v5339_v13 }
0x2dff   : > { %v5327_v17 = vpop.xlane.xlu0 %5326 }
0x2e00   : > { %v5337_v39 = vmul.f32 0.03125, %v5327_v17  ;;  %v5347_v44 = vmul.f32 %v5343_v18, %v5343_v18 }
0x2e02   : > { %v5341_v46 = vsub.f32 %v5319_v42, %v5337_v39  ;;  %v5355_v10 = vsel %vm354_vm2, %v5347_v44, 0.0 }
0x2e03   : > { %5356 = vadd.xlane.f32.xlu0 %v5355_v10  ;;  %v5330_v4 = vpop.xlane.xlu0 %5329 }
0x2e04   : > { %v5338_v47 = vmul.f32 0.03125, %v5330_v4  ;;  %v5345_v49 = vmul.f32 %v5341_v46, %v5341_v46 }
0x2e06   : > { %v5342_v61 = vsub.f32 %v5320_v33, %v5338_v47  ;;  %v5349_v51 = vsel %vm354_vm2, %v5345_v49, 0.0  ;;  %v5466_v49 = vld [vmem:[%s10960_s2 + $0x2a0] sm:$0xff] }
0x2e07   : > { %5350 = vadd.xlane.f32.xlu1 %v5349_v51  ;;  %v5336_v52 = vpop.xlane.xlu0 %5335  ;;  %v5467_v51 = vld [vmem:[%s10960_s2 + $0x2a8] sm:$0xff] }
0x2e08   : > { %v5340_v7 = vmul.f32 0.03125, %v5336_v52  ;;  %v5346_v62 = vmul.f32 %v5342_v61, %v5342_v61  ;;  %v5468_v52 = vld [vmem:[%s10960_s2 + $0x2b0] sm:$0xff] }
0x2e0a   : > { %v5344_v8 = vsub.f32 %v5322_v60, %v5340_v7  ;;  %v5352_v12 = vsel %vm354_vm2, %v5346_v62, 0.0  ;;  %v5472_v7 = vpack.c.bf16 %v5468_v52, %v5467_v51  ;;  %v7986_v62 = vld [vmem:[%s10960_s2 + $0x290] ss:$0 sm:$0xff] }
0x2e0b   : > { %5353 = vadd.xlane.f32.xlu0 %v5352_v12 }
0x2e0c   : > { %v5348_v16 = vmul.f32 %v5344_v8, %v5344_v8 }
0x2e0e   : > { %v5358_v20 = vsel %vm354_vm2, %v5348_v16, 0.0 }
0x2e0f   : > { %5359 = vadd.xlane.f32.xlu0 %v5358_v20 }
0x2e90   : > { %v5357_v59 = vpop.xlane.xlu0 %5356 }
0x2e91   : > { %v5363_v31 = vmul.f32 0.03125, %v5357_v59 }
0x2e93   : > { %v5367_v34 = vadd.f32 1e-05, %v5363_v31 }
0x2e94   : > { %v5351_v50 = vpop.xlane.xlu1 %5350 }
0x2e95   : > { %v5361_v55 = vmul.f32 0.03125, %v5351_v50 }
0x2e97   : > { %v5365_v11 = vadd.f32 1e-05, %v5361_v55 }
0x2e98   : > { %v5354_v23 = vpop.xlane.xlu0 %5353 }
0x2e99   : > { %9147 = vrsqrt.f32 %v5365_v11  ;;  %v5362_v32 = vmul.f32 0.03125, %v5354_v23 }
0x2e9a   : > { %9149 = vrsqrt.f32 %v5367_v34  ;;  %v7989_v34 = vld [vmem:[%s10960_s2 + $0x2b8] ss:$0 sm:$0xff] }
0x2e9b   : > { %v5366_v57 = vadd.f32 1e-05, %v5362_v32 }
0x2e9c   : > { %v5360_v40 = vpop.xlane.xlu0 %5359 }
0x2e9d   : > { %9151 = vrsqrt.f32 %v5366_v57  ;;  %v5364_v35 = vmul.f32 0.03125, %v5360_v40 }
0x2e9f   : > { %v5368_v19 = vadd.f32 1e-05, %v5364_v35 }
0x2ea1   : > { %9153 = vrsqrt.f32 %v5368_v19 }
0x2ea3   : > { %v9148_v1 = vpop.eup %9147 }
0x2ea4   : > { %v5373_v38 = vmul.f32 %v9148_v1, %v5341_v46  ;;  %v9150_v2 = vpop.eup %9149 }
0x2ea5   : > { %v5375_v30 = vmul.f32 %v9150_v2, %v5343_v18  ;;  %v5465_v18 = vld [vmem:[%s10960_s2 + $0x298] sm:$0xff] }
0x2ea6   : > { %v5381_v53 = vmul.f32 %v7984_v37, %v5373_v38 }
0x2ea7   : > { %v9152_v42 = vpop.eup %9151  ;;  %v5383_v54 = vmul.f32 %v7984_v37, %v5375_v30 }
0x2ea8   : > { %v5374_v33 = vmul.f32 %v9152_v42, %v5342_v61  ;;  %v5389_v17 = vadd.f32 %v7985_v22, %v5381_v53  ;;  %v5471_v61 = vpack.c.bf16 %v5466_v49, %v5465_v18 }
0x2ea9   : > { %v5391_v10 = vadd.f32 %v7985_v22, %v5383_v54 }
0x2eaa   : > { %v5382_v60 = vmul.f32 %v7984_v37, %v5374_v33  ;;  %8760 = vmatprep.subr.bf16.mxu1 %v5471_v61 }
0x2eab   : > { %v9154_v43 = vpop.eup %9153 }
0x2eac   : > { %v5376_v13 = vmul.f32 %v9154_v43, %v5344_v8  ;;  %v5390_v39 = vadd.f32 %v7985_v22, %v5382_v60 }
0x2eae   : > { %v5384_v44 = vmul.f32 %v7984_v37, %v5376_v13  ;;  %v5397_v46 = vpack.c.bf16 %v5390_v39, %v5389_v17 }
0x2eb0   : > { %8756 = vmatprep.mubr.msk.bf16.mxu1 %vm354_vm2, %v5397_v46  ;;  %v5392_v4 = vadd.f32 %v7985_v22, %v5384_v44 }
0x2eb2   : > { %v5398_v47 = vpack.c.bf16 %v5392_v4, %v5391_v10 }
0x2eb4   : > { %8757 = vmatmul.mubr.msk.bf16.vlgmr.msra.gmra.mrb[116].mxu1 %vm354_vm2, %v5398_v47 }
0x2eb5   : > { %8761 = vmatpush3.bf16.msra.mxu1 %v5471_v61 }
0x2eb6   : > { %8762 = vmatprep.subr.bf16.mxu1 %v5472_v7 }
0x2eb9   : > { %8763 = vmatpush3.bf16.msra.mxu1 %v5472_v7 }
0x2f87   : > { %v8758_v8 = vpop.f32.mrb[116].mxu1 }
0x2f88   : > { %v5455_v12 = vadd.f32 %v8758_v8, %v7986_v62  ;;  %v5446_v16 = vpop.f32.mrb[117].mxu1 }
0x2f89   : > { %v5447_v20 = vadd.f32 %v7986_v62, %v5446_v16  ;;  %v8759_v41 = vpop.f32.mrb[118].mxu1  ;;  %v5607_v16 = vld [vmem:[%s10960_s2 + $0x2d0] sm:$0xff] }
0x2f8a   : > { %v5458_v21 = vadd.f32 %v8759_v41, %v7986_v62  ;;  %v5449_v28 = vpop.f32.mrb[119].mxu1  ;;  %v5463_v36 = vmax.f32 %v5455_v12, 0.0  ;;  %v5670_v41 = vld [vmem:[%s10960_s2 + $0x2f0] sm:$0xff] }
0x2f8b   : > { %v5450_v5 = vadd.f32 %v7986_v62, %v5449_v28  ;;  %v5461_v59 = vmax.f32 %v5447_v20, 0.0  ;;  %v5608_v20 = vld [vmem:[%s10960_s2 + $0x2d8] sm:$0xff] }
0x2f8c   : > { %v5464_v26 = vmax.f32 %v5458_v21, 0.0  ;;  %v5613_v21 = vpack.c.bf16 %v5608_v20, %v5607_v16  ;;  %v5671_v28 = vld [vmem:[%s10960_s2 + $0x2f8] sm:$0xff] }
0x2f8d   : > { %v5462_v31 = vmax.f32 %v5450_v5, 0.0  ;;  %v5674_v5 = vpack.c.bf16 %v5671_v28, %v5670_v41 }
0x2f8e   : > { %v5470_v50 = vpack.c.bf16 %v5464_v26, %v5463_v36  ;;  %8768 = vmatprep.subr.bf16.mxu0 %v5613_v21  ;;  %v5609_v36 = vld [vmem:[%s10960_s2 + $0x2e0] sm:$0xff]  ;;  %v5610_v26 = vld [vmem:[%s10960_s2 + $0x2e8] sm:$0xff] }
0x2f8f   : > { %v5469_v55 = vpack.c.bf16 %v5462_v31, %v5461_v59  ;;  %8776 = vmatprep.subr.bf16.mxu1 %v5674_v5  ;;  %8769 = vmatpush3.bf16.msra.mxu0 %v5613_v21  ;;  %v5672_v59 = vld [vmem:[%s10960_s2 + $0x300] sm:$0xff]  ;;  %v5614_v31 = vpack.c.bf16 %v5610_v26, %v5609_v36 }
0x2f91   : > { %8764 = vmatprep.mubr.msk.bf16.mxu1 %vm354_vm2, %v5469_v55  ;;  %8770 = vmatprep.subr.bf16.mxu0 %v5614_v31 }
0x2f92   : > { %8765 = vmatmul.mubr.msk.bf16.vlgmr.msra.gmra.mrb[120].mxu1 %vm354_vm2, %v5470_v50  ;;  %v5673_v50 = vld [vmem:[%s10960_s2 + $0x308] sm:$0xff] }
0x2f93   : > { %8777 = vmatpush3.bf16.msra.mxu1 %v5674_v5  ;;  %v5675_v55 = vpack.c.bf16 %v5673_v50, %v5672_v59  ;;  %8771 = vmatpush3.bf16.msra.mxu0 %v5614_v31 }
0x2f95   : > { %8778 = vmatprep.subr.bf16.mxu1 %v5675_v55 }
0x2f97   : > { %8779 = vmatpush3.bf16.msra.mxu1 %v5675_v55 }
0x2f98   : > { %8792 = vmatprep.subr.mxu1 %v9303_v63 }
0x3065   : > { %v8766_v11 = vpop.f32.mrb[120].mxu1 }
0x3066   : > { %v5527_v23 = vadd.f32 %v8766_v11, %v7989_v34  ;;  %v5518_v32 = vpop.f32.mrb[121].mxu1  ;;  %v5726_v11 = vld [vmem:[%s10960_s2 + $0x318] sm:$0xff] }
0x3067   : > { %v5519_v57 = vadd.f32 %v7989_v34, %v5518_v32  ;;  %v8767_v40 = vpop.f32.mrb[122].mxu1 }
0x3068   : > { %v5535_v35 = vadd.f32 %v5527_v23, %v5391_v10  ;;  %v5521_v19 = vpop.f32.mrb[123].mxu1  ;;  %v5530_v42 = vadd.f32 %v8767_v40, %v7989_v34 }
0x3069   : > { %v5533_v1 = vadd.f32 %v5519_v57, %v5389_v17  ;;  %v5522_v38 = vadd.f32 %v7989_v34, %v5521_v19  ;;  %v5725_v34 = vld [vmem:[%s10960_s2 + $0x310] sm:$0xff] }
0x306a   : > { %v5545_v2 = vsel %vm354_vm2, %v5535_v35, 0.0  ;;  %v5536_v33 = vadd.f32 %v5530_v42, %v5392_v4  ;;  %v5729_v23 = vpack.c.bf16 %v5726_v11, %v5725_v34 }
0x306b   : > { %5546 = vadd.xlane.f32.xlu0 %v5545_v2  ;;  %v5534_v37 = vadd.f32 %v5522_v38, %v5390_v39  ;;  %v5539_v30 = vsel %vm354_vm2, %v5533_v1, 0.0 }
0x306c   : > { %v5548_v60 = vsel %vm354_vm2, %v5536_v33, 0.0  ;;  %8784 = vmatprep.subr.bf16.mxu0 %v5729_v23 }
0x306d   : > { %v5542_v53 = vsel %vm354_vm2, %v5534_v37, 0.0 }
0x306f   : > { %5540 = vadd.xlane.f32.xlu0 %v5539_v30 }
0x3073   : > { %5543 = vadd.xlane.f32.xlu0 %v5542_v53 }
0x3077   : > { %5549 = vadd.xlane.f32.xlu0 %v5548_v60 }
0x30f8   : > { %v5547_v43 = vpop.xlane.xlu0 %5546 }
0x30f9   : > { %v5553_v22 = vmul.f32 0.03125, %v5547_v43 }
0x30fb   : > { %v10414_v54 = vsub.f32 %v5535_v35, %v5553_v22 }
0x30fc   : > { %v5541_v13 = vpop.xlane.xlu0 %5540 }
0x30fd   : > { %v5551_v17 = vmul.f32 0.03125, %v5541_v13  ;;  %v5561_v44 = vmul.f32 %v10414_v54, %v10414_v54  ;;  %v7992_v13 = vld [vmem:[%s10960_s2 + $0x2c0] ss:$0 sm:$0xff] }
0x30ff   : > { %v5555_v39 = vsub.f32 %v5533_v1, %v5551_v17  ;;  %v5569_v46 = vsel %vm354_vm2, %v5561_v44, 0.0 }
0x3100   : > { %5570 = vadd.xlane.f32.xlu1 %v5569_v46  ;;  %v5544_v10 = vpop.xlane.xlu0 %5543 }
0x3101   : > { %v5552_v4 = vmul.f32 0.03125, %v5544_v10  ;;  %v5559_v47 = vmul.f32 %v5555_v39, %v5555_v39 }
0x3103   : > { %v5556_v18 = vsub.f32 %v5534_v37, %v5552_v4  ;;  %v5563_v49 = vsel %vm354_vm2, %v5559_v47, 0.0  ;;  %v7993_v47 = vld [vmem:[%s10960_s2 + $0x2c8] ss:$0 sm:$0xff] }
0x3104   : > { %5564 = vadd.xlane.f32.xlu0 %v5563_v49  ;;  %v5550_v61 = vpop.xlane.xlu0 %5549 }
0x3105   : > { %v5554_v51 = vmul.f32 0.03125, %v5550_v61  ;;  %v5560_v52 = vmul.f32 %v5556_v18, %v5556_v18 }
0x3107   : > { %v5558_v7 = vsub.f32 %v5536_v33, %v5554_v51  ;;  %v5566_v62 = vsel %vm354_vm2, %v5560_v52, 0.0 }
0x3108   : > { %5567 = vadd.xlane.f32.xlu0 %v5566_v62 }
0x3109   : > { %v5562_v8 = vmul.f32 %v5558_v7, %v5558_v7 }
0x310b   : > { %v5572_v12 = vsel %vm354_vm2, %v5562_v8, 0.0 }
0x310c   : > { %5573 = vadd.xlane.f32.xlu0 %v5572_v12 }
0x318d   : > { %v5571_v32 = vpop.xlane.xlu1 %5570 }
0x318e   : > { %v5577_v57 = vmul.f32 0.03125, %v5571_v32 }
0x3190   : > { %v5581_v19 = vadd.f32 1e-05, %v5577_v57 }
0x3191   : > { %v5565_v40 = vpop.xlane.xlu0 %5564 }
0x3192   : > { %v5575_v35 = vmul.f32 0.03125, %v5565_v40 }
0x3194   : > { %v5579_v1 = vadd.f32 1e-05, %v5575_v35 }
0x3195   : > { %v5568_v38 = vpop.xlane.xlu0 %5567 }
0x3196   : > { %9155 = vrsqrt.f32 %v5579_v1  ;;  %v5576_v2 = vmul.f32 0.03125, %v5568_v38 }
0x3197   : > { %9157 = vrsqrt.f32 %v5581_v19 }
0x3198   : > { %v5580_v42 = vadd.f32 1e-05, %v5576_v2 }
0x3199   : > { %v5574_v37 = vpop.xlane.xlu0 %5573 }
0x319a   : > { %9159 = vrsqrt.f32 %v5580_v42  ;;  %v5578_v30 = vmul.f32 0.03125, %v5574_v37 }
0x319c   : > { %v5582_v33 = vadd.f32 1e-05, %v5578_v30 }
0x319e   : > { %9161 = vrsqrt.f32 %v5582_v33 }
0x31a0   : > { %v9156_v53 = vpop.eup %9155 }
0x31a1   : > { %v5587_v60 = vmul.f32 %v9156_v53, %v5555_v39  ;;  %v9158_v43 = vpop.eup %9157 }
0x31a2   : > { %v5589_v17 = vmul.f32 %v9158_v43, %v10414_v54  ;;  %v5727_v54 = vld [vmem:[%s10960_s2 + $0x320] sm:$0xff] }
0x31a3   : > { %v5595_v46 = vmul.f32 %v7992_v13, %v5587_v60 }
0x31a4   : > { %v9160_v22 = vpop.eup %9159  ;;  %v5597_v49 = vmul.f32 %v7992_v13, %v5589_v17 }
0x31a5   : > { %v5588_v44 = vmul.f32 %v9160_v22, %v5556_v18  ;;  %v10460_v51 = vadd.f32 %v7993_v47, %v5595_v46  ;;  %v5728_v18 = vld [vmem:[%s10960_s2 + $0x328] sm:$0xff] }
0x31a6   : > { %v5730_v16 = vpack.c.bf16 %v5728_v18, %v5727_v54 }
0x31a7   : > { %v5596_v10 = vmul.f32 %v7992_v13, %v5588_v44 }
0x31a8   : > { %v9162_v4 = vpop.eup %9161 }
0x31a9   : > { %v5590_v61 = vmul.f32 %v9162_v4, %v5558_v7  ;;  %v10462_v39 = vadd.f32 %v7993_v47, %v5596_v10  ;;  %v10474_v7 = vadd.f32 %v7993_v47, %v5597_v49 }
0x31ab   : > { %v5598_v52 = vmul.f32 %v7992_v13, %v5590_v61  ;;  %v5611_v62 = vpack.c.bf16 %v10462_v39, %v10460_v51 }
0x31ad   : > { %8772 = vmatprep.mubr.msk.bf16.mxu0 %vm354_vm2, %v5611_v62  ;;  %8780 = vmatprep.mubr.msk.bf16.mxu1 %vm354_vm2, %v5611_v62  ;;  %v10476_v8 = vadd.f32 %v7993_v47, %v5598_v52 }
0x31af   : > { %v5612_v12 = vpack.c.bf16 %v10476_v8, %v10474_v7 }
0x31b1   : > { %8773 = vmatmul.mubr.msk.bf16.vlgmr.msra.gmra.mrb[108].mxu0 %vm354_vm2, %v5612_v12  ;;  %8781 = vmatmul.mubr.msk.bf16.vlgmr.msra.gmra.mrb[124].mxu1 %vm354_vm2, %v5612_v12 }
0x31b2   : > { %8785 = vmatpush3.bf16.msra.mxu0 %v5729_v23  ;;  %8788 = vmatprep.mubr.msk.bf16.mxu0 %vm354_vm2, %v5611_v62 }
0x31b3   : > { %8786 = vmatprep.subr.bf16.mxu0 %v5730_v16  ;;  %8794 = vmatprep.mubr.msk.f32.mxu1 %vm9304_vm3, %v9303_v63 }
0x31b6   : > { %8787 = vmatpush3.bf16.msra.mxu0 %v5730_v16 }
0x31b7   : > { %8797 = vmatprep.subr.bf16.mxu0 %v9303_v63 }
0x31b9   : > { %8789 = vmatmul.mubr.msk.bf16.vlgmr.msra.gmra.mrb[112].mxu0 %vm354_vm2, %v5612_v12 }
0x31ba   : > { %8799 = vmatprep.mubr.msk.bf16.mxu0 %vm9304_vm3, %v9303_v63 }
0x3284   : > { %v10489_v20 = vpop.f32.mrb[108].mxu0  ;;  %v10491_v41 = vpop.f32.mrb[124].mxu1 }
0x3285   : > { %v5655_v21 = vpop.f32.mrb[109].mxu0  ;;  %v5710_v28 = vpop.f32.mrb[125].mxu1 }
0x3286   : > { %v5780_v5 = vmul.f32 0.25, %v5655_v21  ;;  %5918 = vrot.lane.b32.xlu1 %v5710_v28, %s9305_s11  ;;  %v10494_v36 = vpop.f32.mrb[110].mxu0  ;;  %v10496_v26 = vpop.f32.mrb[126].mxu1  ;;  %8793 = vmatpush3.xpose.msk.msra.mxu1 %vm521_vm5, %v5710_v28 }
0x3287   : > { %v5658_v59 = vpop.f32.mrb[111].mxu0  ;;  %v5713_v31 = vpop.f32.mrb[127].mxu1  ;;  %8803 = vmatprep.subr.mxu1 %v9303_v63 }
0x3288   : > { %5916 = vrot.lane.b32.xlu0 %v5780_v5, %s9305_s11  ;;  %v6055_v46 = vmul.f32 0.25, %v5658_v59 }
0x3289   : > { %8795 = vmatmul.mubr.msk.f32.vlgmr.msra.gmra.mrb[128].mxu1 %vm521_vm5, %v5780_v5 }
0x328a   : > { %8805 = vmatprep.mubr.msk.f32.mxu1 %vm9304_vm3, %v9303_v63 }
0x328c   : > { %v10504_v50 = vpop.f32.mrb[112].mxu0 }
0x328d   : > { %v5765_v55 = vpop.f32.mrb[113].mxu0 }
0x328e   : > { %v5869_v34 = vpack.c.bf16 %v5765_v55, %v5765_v55  ;;  %v10506_v11 = vpop.f32.mrb[114].mxu0 }
0x328f   : > { %v5768_v23 = vpop.f32.mrb[115].mxu0 }
0x3290   : > { %v5874_v32 = vsel %vm615_vm4, %v5869_v34, 0  ;;  %v6144_v61 = vpack.c.bf16 %v5768_v23, %v5768_v23 }
0x3291   : > { %8798 = vmatpush3.bf16.msra.mxu0 %v5874_v32 }
0x3292   : > { %8814 = vmatprep.subr.mxu0 %v9303_v63  ;;  %v6149_v52 = vsel %vm615_vm4, %v6144_v61, 0 }
0x32f8   : > { %v5919_v57 = vpop.permute.xlu1 %5918 }
0x32f9   : > { %8804 = vmatpush3.xpose.msk.msra.mxu1 %vm521_vm5, %v5919_v57 }
0x32fa   : > { %v5917_v40 = vpop.permute.xlu0 %5916  ;;  %8808 = vmatprep.subr.bf16.mxu1 %v9303_v63 }
0x32fc   : > { %8806 = vmatmul.mubr.msk.f32.vlgmr.msra.gmra.mrb[130].mxu1 %vm521_vm5, %v5917_v40 }
0x32fd   : > { %8810 = vmatprep.mubr.msk.bf16.mxu1 %vm9304_vm3, %v9303_v63 }
0x335c   : > { %v5853_v35 = vpop.f32.mrb[128].mxu1 }
0x335d   : > { %v8796_v19 = vpop.f32.mrb[129].mxu1  ;;  %v5857_v1 = vsel %vm598_vm6, %v5853_v35, -inf }
0x335e   : > { %5858 = vmax.xlane.f32.xlu0 %v5857_v1 }
0x33cf   : > { %v5990_v38 = vpop.f32.mrb[130].mxu1 }
0x33d0   : > { %v8807_v2 = vpop.f32.mrb[131].mxu1  ;;  %v5994_v42 = vsel %vm598_vm6, %v5990_v38, -inf }
0x33d1   : > { %5995 = vmax.xlane.f32.xlu1 %v5994_v42 }
0x33eb   : > { %v5859_v37 = vpop.xlane.xlu0 %5858 }
0x33ec   : > { %v5860_v30 = vsub.f32 %v5853_v35, %v5859_v37 }
0x33ee   : > { %v5861_v33 = vmul.f32 1.442695, %v5860_v30 }
0x33f0   : > { %9163 = vpow2.f32 %v5861_v33 }
0x33fa   : > { %v9164_v53 = vpop.eup %9163 }
0x33fb   : > { %v5863_v60 = vsel %vm598_vm6, %v9164_v53, 0.0 }
0x33fc   : > { %5864 = vadd.xlane.f32.xlu0 %v5863_v60 }
0x3412   : > { %6193 = vrot.lane.b32.xlu0 %v5713_v31, %s9305_s11 }
0x345e   : > { %v5996_v43 = vpop.xlane.xlu1 %5995 }
0x345f   : > { %v5997_v22 = vsub.f32 %v5990_v38, %v5996_v43  ;;  %v6330_v43 = vmul.f32 0.25, %v10489_v20 }
0x3461   : > { %v5998_v13 = vmul.f32 1.442695, %v5997_v22 }
0x3463   : > { %9165 = vpow2.f32 %v5998_v13 }
0x346d   : > { %v9166_v17 = vpop.eup %9165 }
0x346e   : > { %v6000_v44 = vsel %vm598_vm6, %v9166_v17, 0.0 }
0x346f   : > { %6001 = vadd.xlane.f32.xlu1 %v6000_v44 }
0x3480   : > { %6007 = vrot.lane.b32.xlu1 %v5869_v34, %s9305_s11 }
0x3484   : > { %6191 = vrot.lane.b32.xlu1 %v6055_v46, %s9305_s11 }
0x3489   : > { %v5865_v10 = vpop.xlane.xlu0 %5864 }
0x348a   : > { %9167 = vrcp.f32 %v5865_v10 }
0x348d   : > { %v6194_v28 = vpop.permute.xlu0 %6193 }
0x3494   : > { %v9168_v4 = vpop.eup %9167 }
0x3495   : > { %v10522_v47 = vmul.f32 %v9168_v4, %v9164_v53 }
0x3497   : > { %v5868_v49 = vpack.c.bf16 %v10522_v47, %v10522_v47 }
0x3499   : > { %8800 = vmatmul.mubr.msk.bf16.vlgmr.msra.gmra.mrb[116].mxu0 %vm598_vm6, %v5868_v49 }
0x349a   : > { %8815 = vmatpush3.xpose.msk.msra.mxu0 %vm521_vm5, %v5713_v31  ;;  %8816 = vmatprep.mubr.msk.f32.mxu0 %vm9304_vm3, %v9303_v63 }
0x349b   : > { %8819 = vmatprep.subr.bf16.mxu0 %v9303_v63 }
0x34a1   : > { %8817 = vmatmul.mubr.msk.f32.vlgmr.msra.gmra.mrb[120].mxu0 %vm521_vm5, %v6055_v46 }
0x34a2   : > { %8820 = vmatpush3.bf16.msra.mxu0 %v6149_v52  ;;  %8821 = vmatprep.mubr.msk.bf16.mxu0 %vm9304_vm3, %v9303_v63 }
0x34a3   : > { %8836 = vmatprep.subr.mxu0 %v9303_v63 }
0x34fc   : > { %v6002_v62 = vpop.xlane.xlu1 %6001 }
0x34fd   : > { %9169 = vrcp.f32 %v6002_v62 }
0x3500   : > { %v6008_v54 = vpop.permute.xlu1 %6007 }
0x3501   : > { %v6013_v18 = vsel %vm615_vm4, %v6008_v54, 0 }
0x3502   : > { %8809 = vmatpush3.bf16.msra.mxu1 %v6013_v18 }
0x3503   : > { %8825 = vmatprep.subr.mxu1 %v9303_v63 }
0x3504   : > { %v6192_v5 = vpop.permute.xlu1 %6191 }
0x3507   : > { %v9170_v12 = vpop.eup %9169 }
0x3508   : > { %v10538_v16 = vmul.f32 %v9170_v12, %v9166_v17 }
0x350a   : > { %v6005_v21 = vpack.c.bf16 %v10538_v16, %v10538_v16 }
0x350c   : > { %8811 = vmatmul.mubr.msk.bf16.vlgmr.msra.gmra.mrb[132].mxu1 %vm598_vm6, %v6005_v21 }
0x350d   : > { %8826 = vmatpush3.xpose.msk.msra.mxu1 %vm521_vm5, %v6194_v28  ;;  %8827 = vmatprep.mubr.msk.f32.mxu1 %vm9304_vm3, %v9303_v63 }
0x350e   : > { %8830 = vmatprep.subr.bf16.mxu1 %v9303_v63 }
0x3514   : > { %8828 = vmatmul.mubr.msk.f32.vlgmr.msra.gmra.mrb[136].mxu1 %vm521_vm5, %v6192_v5 }
0x3515   : > { %8832 = vmatprep.mubr.msk.bf16.mxu1 %vm9304_vm3, %v9303_v63 }
0x356c   : > { %v10550_v59 = vpop.f32.mrb[116].mxu0 }
0x356d   : > { %v8801_v31 = vpop.f32.mrb[117].mxu0 }
0x356e   : > { %v5913_v55 = vpop.f32.mrb[118].mxu0 }
0x356f   : > { %v8802_v34 = vpop.f32.mrb[119].mxu0 }
0x3574   : > { %v6128_v23 = vpop.f32.mrb[120].mxu0 }
0x3575   : > { %v8818_v32 = vpop.f32.mrb[121].mxu0  ;;  %v6132_v57 = vsel %vm598_vm6, %v6128_v23, -inf }
0x3576   : > { %6133 = vmax.xlane.f32.xlu0 %v6132_v57 }
0x35df   : > { %v10553_v40 = vpop.f32.mrb[132].mxu1 }
0x35e0   : > { %v8812_v35 = vpop.f32.mrb[133].mxu1 }
0x35e1   : > { %v6052_v19 = vpop.f32.mrb[134].mxu1 }
0x35e2   : > { %v8813_v1 = vpop.f32.mrb[135].mxu1  ;;  %v6605_v19 = vmul.f32 0.25, %v10494_v36 }
0x35e7   : > { %v6265_v38 = vpop.f32.mrb[136].mxu1 }
0x35e8   : > { %v8829_v2 = vpop.f32.mrb[137].mxu1  ;;  %v6269_v42 = vsel %vm598_vm6, %v6265_v38, -inf }
0x35e9   : > { %6270 = vmax.xlane.f32.xlu1 %v6269_v42 }
0x3603   : > { %v6134_v37 = vpop.xlane.xlu0 %6133 }
0x3604   : > { %v6135_v30 = vsub.f32 %v6128_v23, %v6134_v37 }
0x3606   : > { %v6136_v33 = vmul.f32 1.442695, %v6135_v30 }
0x3608   : > { %9171 = vpow2.f32 %v6136_v33 }
0x3612   : > { %v9172_v53 = vpop.eup %9171 }
0x3613   : > { %v6138_v60 = vsel %vm598_vm6, %v9172_v53, 0.0 }
0x3614   : > { %6139 = vadd.xlane.f32.xlu1 %v6138_v60 }
0x3625   : > { %6468 = vrot.lane.b32.xlu1 %v10491_v41, %s9305_s11 }
0x3629   : > { %6466 = vrot.lane.b32.xlu1 %v6330_v43, %s9305_s11 }
0x3676   : > { %v6271_v22 = vpop.xlane.xlu1 %6270 }
0x3677   : > { %v6272_v13 = vsub.f32 %v6265_v38, %v6271_v22 }
0x3679   : > { %v6273_v17 = vmul.f32 1.442695, %v6272_v13 }
0x367b   : > { %9173 = vpow2.f32 %v6273_v17 }
0x3685   : > { %v9174_v44 = vpop.eup %9173 }
0x3686   : > { %v6275_v46 = vsel %vm598_vm6, %v9174_v44, 0.0 }
0x3687   : > { %6276 = vadd.xlane.f32.xlu0 %v6275_v46 }
0x369d   : > { %6282 = vrot.lane.b32.xlu0 %v6144_v61, %s9305_s11  ;;  %v6419_v61 = vpack.c.bf16 %v10504_v50, %v10504_v50 }
0x369f   : > { %v6424_v52 = vsel %vm615_vm4, %v6419_v61, 0 }
0x36a1   : > { %v6140_v10 = vpop.xlane.xlu1 %6139 }
0x36a2   : > { %9175 = vrcp.f32 %v6140_v10 }
0x36a5   : > { %v6469_v21 = vpop.permute.xlu1 %6468 }
0x36a9   : > { %v6467_v28 = vpop.permute.xlu1 %6466 }
0x36ac   : > { %v9176_v4 = vpop.eup %9175 }
0x36ad   : > { %v10563_v49 = vmul.f32 %v9176_v4, %v9172_v53 }
0x36af   : > { %v6143_v20 = vpack.c.bf16 %v10563_v49, %v10563_v49 }
0x36b1   : > { %8822 = vmatmul.mubr.msk.bf16.vlgmr.msra.gmra.mrb[124].mxu0 %vm598_vm6, %v6143_v20 }
0x36b2   : > { %8837 = vmatpush3.xpose.msk.msra.mxu0 %vm521_vm5, %v10491_v41  ;;  %8838 = vmatprep.mubr.msk.f32.mxu0 %vm9304_vm3, %v9303_v63 }
0x36b3   : > { %8841 = vmatprep.subr.bf16.mxu0 %v9303_v63 }
0x36b9   : > { %8839 = vmatmul.mubr.msk.f32.vlgmr.msra.gmra.mrb[122].mxu0 %vm521_vm5, %v6330_v43 }
0x36ba   : > { %8842 = vmatpush3.bf16.msra.mxu0 %v6424_v52  ;;  %8843 = vmatprep.mubr.msk.bf16.mxu0 %vm9304_vm3, %v9303_v63 }
0x36bb   : > { %8858 = vmatprep.subr.mxu0 %v9303_v63 }
0x3714   : > { %v6277_v62 = vpop.xlane.xlu0 %6276 }
0x3715   : > { %9177 = vrcp.f32 %v6277_v62 }
0x3718   : > { %v6283_v41 = vpop.permute.xlu0 %6282 }
0x3719   : > { %v6288_v54 = vsel %vm615_vm4, %v6283_v41, 0 }
0x371a   : > { %8831 = vmatpush3.bf16.msra.mxu1 %v6288_v54 }
0x371b   : > { %8847 = vmatprep.subr.mxu1 %v9303_v63 }
0x371f   : > { %v9178_v18 = vpop.eup %9177 }
0x3720   : > { %v10582_v50 = vmul.f32 %v9178_v18, %v9174_v44 }
0x3722   : > { %v6280_v12 = vpack.c.bf16 %v10582_v50, %v10582_v50 }
0x3724   : > { %8833 = vmatmul.mubr.msk.bf16.vlgmr.msra.gmra.mrb[140].mxu1 %vm598_vm6, %v6280_v12 }
0x3725   : > { %8848 = vmatpush3.xpose.msk.msra.mxu1 %vm521_vm5, %v6469_v21  ;;  %8849 = vmatprep.mubr.msk.f32.mxu1 %vm9304_vm3, %v9303_v63 }
0x3726   : > { %8852 = vmatprep.subr.bf16.mxu1 %v9303_v63 }
0x372c   : > { %8850 = vmatmul.mubr.msk.f32.vlgmr.msra.gmra.mrb[138].mxu1 %vm521_vm5, %v6467_v28 }
0x372d   : > { %8854 = vmatprep.mubr.msk.bf16.mxu1 %vm9304_vm3, %v9303_v63 }
0x3784   : > { %v10594_v5 = vpop.f32.mrb[124].mxu0 }
0x3785   : > { %v6884_v31 = vpack.c.bf16 %v10594_v5, %v10550_v59  ;;  %v8823_v55 = vpop.f32.mrb[125].mxu0 }
0x3786   : > { %v6188_v34 = vpop.f32.mrb[126].mxu0 }
0x3787   : > { %v8824_v23 = vpop.f32.mrb[127].mxu0 }
0x3788   : > { %v6694_v23 = vpack.c.bf16 %v10506_v11, %v10506_v11 }
0x378c   : > { %v6403_v32 = vpop.f32.mrb[122].mxu0 }
0x378d   : > { %v8840_v57 = vpop.f32.mrb[123].mxu0  ;;  %v6407_v35 = vsel %vm598_vm6, %v6403_v32, -inf }
0x378e   : > { %6408 = vmax.xlane.f32.xlu1 %v6407_v35 }
0x379f   : > { %6557 = vrot.lane.b32.xlu1 %v6419_v61, %s9305_s11 }
0x37a3   : > { %6741 = vrot.lane.b32.xlu1 %v6605_v19, %s9305_s11 }
0x37f7   : > { %v10602_v1 = vpop.f32.mrb[140].mxu1 }
0x37f8   : > { %v6887_v38 = vpack.c.bf16 %v10602_v1, %v10553_v40  ;;  %v8834_v2 = vpop.f32.mrb[141].mxu1 }
0x37f9   : > { %v6327_v42 = vpop.f32.mrb[142].mxu1 }
0x37fa   : > { %v8835_v37 = vpop.f32.mrb[143].mxu1 }
0x37ff   : > { %v6540_v30 = vpop.f32.mrb[138].mxu1 }
0x3800   : > { %v8851_v33 = vpop.f32.mrb[139].mxu1  ;;  %v6544_v53 = vsel %vm598_vm6, %v6540_v30, -inf }
0x3801   : > { %6545 = vmax.xlane.f32.xlu0 %v6544_v53 }
0x381b   : > { %v6409_v60 = vpop.xlane.xlu1 %6408 }
0x381c   : > { %v6410_v43 = vsub.f32 %v6403_v32, %v6409_v60  ;;  %v6699_v32 = vsel %vm615_vm4, %v6694_v23, 0 }
0x381e   : > { %v6411_v44 = vmul.f32 1.442695, %v6410_v43 }
0x381f   : > { %v6558_v22 = vpop.permute.xlu1 %6557 }
0x3820   : > { %v6563_v36 = vsel %vm615_vm4, %v6558_v22, 0 }
0x3821   : > { %8853 = vmatpush3.bf16.msra.mxu1 %v6563_v36 }
0x3822   : > { %8869 = vmatprep.subr.mxu1 %v9303_v63 }
0x3823   : > { %v6742_v34 = vpop.permute.xlu1 %6741 }
0x388e   : > { %v6546_v13 = vpop.xlane.xlu0 %6545 }
0x388f   : > { %v6547_v17 = vsub.f32 %v6540_v30, %v6546_v13 }
0x3891   : > { %v6548_v46 = vmul.f32 1.442695, %v6547_v17 }
0x3893   : > { %9179 = vpow2.f32 %v6548_v46 }
0x3894   : > { %9181 = vpow2.f32 %v6411_v44 }
0x389d   : > { %v9180_v10 = vpop.eup %9179 }
0x389e   : > { %v6550_v4 = vsel %vm598_vm6, %v9180_v10, 0.0  ;;  %v9182_v20 = vpop.eup %9181 }
0x389f   : > { %6551 = vadd.xlane.f32.xlu0 %v6550_v4  ;;  %v6413_v61 = vsel %vm598_vm6, %v9182_v20, 0.0 }
0x38a3   : > { %6414 = vadd.xlane.f32.xlu0 %v6413_v61 }
0x38b9   : > { %6743 = vrot.lane.b32.xlu0 %v10496_v26, %s9305_s11 }
0x392c   : > { %v6552_v52 = vpop.xlane.xlu0 %6551 }
0x392d   : > { %9183 = vrcp.f32 %v6552_v52 }
0x3930   : > { %v6415_v62 = vpop.xlane.xlu0 %6414 }
0x3931   : > { %9185 = vrcp.f32 %v6415_v62  ;;  %v6882_v62 = vld [vmem:[%s10960_s2 + $0x340] sm:$0xff] }
0x3934   : > { %v6744_v28 = vpop.permute.xlu0 %6743 }
0x3937   : > { %v9184_v41 = vpop.eup %9183 }
0x3938   : > { %v10613_v54 = vmul.f32 %v9184_v41, %v9180_v10  ;;  %v6883_v41 = vld [vmem:[%s10960_s2 + $0x348] sm:$0xff] }
0x393a   : > { %v6555_v18 = vpack.c.bf16 %v10613_v54, %v10613_v54 }
0x393b   : > { %v9186_v12 = vpop.eup %9185 }
0x393c   : > { %v10617_v21 = vmul.f32 %v9186_v12, %v9182_v20  ;;  %8855 = vmatmul.mubr.msk.bf16.vlgmr.msra.gmra.mrb[144].mxu1 %vm598_vm6, %v6555_v18  ;;  %v6889_v18 = vpack.c.bf16 %v6883_v41, %v6882_v62 }
0x393d   : > { %8870 = vmatpush3.xpose.msk.msra.mxu1 %vm521_vm5, %v6744_v28  ;;  %8871 = vmatprep.mubr.msk.f32.mxu1 %vm9304_vm3, %v9303_v63 }
0x393e   : > { %v6418_v55 = vpack.c.bf16 %v10617_v21, %v10617_v21  ;;  %8874 = vmatprep.subr.bf16.mxu1 %v9303_v63 }
0x3940   : > { %8844 = vmatmul.mubr.msk.bf16.vlgmr.msra.gmra.mrb[128].mxu0 %vm598_vm6, %v6418_v55 }
0x3941   : > { %8859 = vmatpush3.xpose.msk.msra.mxu0 %vm521_vm5, %v10496_v26  ;;  %8860 = vmatprep.mubr.msk.f32.mxu0 %vm9304_vm3, %v9303_v63 }
0x3942   : > { %8863 = vmatprep.subr.bf16.mxu0 %v9303_v63 }
0x3944   : > { %8872 = vmatmul.mubr.msk.f32.vlgmr.msra.gmra.mrb[148].mxu1 %vm521_vm5, %v6742_v34 }
0x3945   : > { %8876 = vmatprep.mubr.msk.bf16.mxu1 %vm9304_vm3, %v9303_v63 }
0x3948   : > { %8861 = vmatmul.mubr.msk.f32.vlgmr.msra.gmra.mrb[132].mxu0 %vm521_vm5, %v6605_v19 }
0x3949   : > { %8864 = vmatpush3.bf16.msra.mxu0 %v6699_v32  ;;  %8865 = vmatprep.mubr.msk.bf16.mxu0 %vm9304_vm3, %v9303_v63 }
0x394a   : > { %8880 = vmatprep.subr.bf16.mxu0 %v6889_v18 }
0x3a0f   : > { %v6599_v26 = vpop.f32.mrb[144].mxu1 }
0x3a10   : > { %v8856_v57 = vpop.f32.mrb[145].mxu1 }
0x3a11   : > { %v6602_v35 = vpop.f32.mrb[146].mxu1 }
0x3a12   : > { %v8857_v2 = vpop.f32.mrb[147].mxu1 }
0x3a13   : > { %v10641_v42 = vpop.f32.mrb[128].mxu0 }
0x3a14   : > { %v8845_v11 = vpop.f32.mrb[129].mxu0 }
0x3a15   : > { %v6463_v37 = vpop.f32.mrb[130].mxu0 }
0x3a16   : > { %v8846_v30 = vpop.f32.mrb[131].mxu0  ;;  %v6880_v37 = vld [vmem:[%s10960_s2 + $0x330] sm:$0xff] }
0x3a17   : > { %v6815_v33 = vpop.f32.mrb[148].mxu1  ;;  %v6881_v30 = vld [vmem:[%s10960_s2 + $0x338] sm:$0xff] }
0x3a18   : > { %v8873_v53 = vpop.f32.mrb[149].mxu1  ;;  %v6819_v60 = vsel %vm598_vm6, %v6815_v33, -inf }
0x3a19   : > { %6820 = vmax.xlane.f32.xlu1 %v6819_v60 }
0x3a1b   : > { %v6678_v43 = vpop.f32.mrb[132].mxu0 }
0x3a1c   : > { %v8862_v19 = vpop.f32.mrb[133].mxu0  ;;  %v6682_v22 = vsel %vm598_vm6, %v6678_v43, -inf }
0x3a1d   : > { %6683 = vmax.xlane.f32.xlu0 %v6682_v22 }
0x3aa6   : > { %v6821_v36 = vpop.xlane.xlu1 %6820 }
0x3aa7   : > { %v6822_v13 = vsub.f32 %v6815_v33, %v6821_v36  ;;  %v6886_v33 = vpack.c.bf16 %v6881_v30, %v6880_v37 }
0x3aa9   : > { %v6823_v17 = vmul.f32 1.442695, %v6822_v13 }
0x3aaa   : > { %v6684_v44 = vpop.xlane.xlu0 %6683 }
0x3aab   : > { %9187 = vpow2.f32 %v6823_v17  ;;  %v6685_v46 = vsub.f32 %v6678_v43, %v6684_v44 }
0x3aad   : > { %v6686_v10 = vmul.f32 1.442695, %v6685_v46 }
0x3aaf   : > { %9189 = vpow2.f32 %v6686_v10 }
0x3ab5   : > { %v9188_v4 = vpop.eup %9187 }
0x3ab6   : > { %v6825_v20 = vsel %vm598_vm6, %v9188_v4, 0.0 }
0x3ab7   : > { %6826 = vadd.xlane.f32.xlu0 %v6825_v20 }
0x3ab9   : > { %v9190_v61 = vpop.eup %9189 }
0x3aba   : > { %v6688_v52 = vsel %vm598_vm6, %v9190_v61, 0.0 }
0x3abb   : > { %6689 = vadd.xlane.f32.xlu1 %v6688_v52 }
0x3acd   : > { %6832 = vrot.lane.b32.xlu0 %v6694_v23, %s9305_s11 }
0x3b44   : > { %v6827_v12 = vpop.xlane.xlu0 %6826 }
0x3b45   : > { %9191 = vrcp.f32 %v6827_v12 }
0x3b48   : > { %v6690_v28 = vpop.xlane.xlu1 %6689  ;;  %v6833_v55 = vpop.permute.xlu0 %6832 }
0x3b49   : > { %9193 = vrcp.f32 %v6690_v28  ;;  %v6838_v34 = vsel %vm615_vm4, %v6833_v55, 0 }
0x3b4a   : > { %8875 = vmatpush3.bf16.msra.mxu1 %v6838_v34 }
0x3b4f   : > { %v9192_v32 = vpop.eup %9191 }
0x3b50   : > { %v10655_v23 = vmul.f32 %v9192_v32, %v9188_v4 }
0x3b52   : > { %v6830_v57 = vpack.c.bf16 %v10655_v23, %v10655_v23 }
0x3b53   : > { %v9194_v35 = vpop.eup %9193 }
0x3b54   : > { %v10659_v2 = vmul.f32 %v9194_v35, %v9190_v61  ;;  %8877 = vmatmul.mubr.msk.bf16.vlgmr.msra.gmra.mrb[152].mxu1 %vm598_vm6, %v6830_v57 }
0x3b56   : > { %v6693_v11 = vpack.c.bf16 %v10659_v2, %v10659_v2 }
0x3b58   : > { %8866 = vmatmul.mubr.msk.bf16.vlgmr.msra.gmra.mrb[136].mxu0 %vm598_vm6, %v6693_v11 }
0x3b59   : > { %8882 = vmatprep.mubr.msk.bf16.mxu0 %vm521_vm5, %v6887_v38  ;;  %8881 = vmatpush3.bf16.msra.mxu0 %v6889_v18 }
0x3b5a   : > { %8886 = vmatprep.subr.bf16.mxu0 %v6886_v33 }
0x3c27   : > { %v6874_v53 = vpop.f32.mrb[152].mxu1 }
0x3c28   : > { %v6888_v60 = vpack.c.bf16 %v6874_v53, %v6599_v26  ;;  %v8878_v43 = vpop.f32.mrb[153].mxu1 }
0x3c29   : > { %v6877_v19 = vpop.f32.mrb[154].mxu1  ;;  %v7075_v43 = vld [vmem:[%s10960_s2 + $0x368] sm:$0xff] }
0x3c2a   : > { %v8879_v22 = vpop.f32.mrb[155].mxu1  ;;  %8883 = vmatmul.mubr.msk.bf16.vlgmr.msra.gmra.mrb[140].mxu0 %vm521_vm5, %v6888_v60  ;;  %v7074_v60 = vld [vmem:[%s10960_s2 + $0x360] sm:$0xff] }
0x3c2b   : > { %v6735_v40 = vpop.f32.mrb[136].mxu0  ;;  %8888 = vmatprep.mubr.msk.bf16.mxu0 %vm521_vm5, %v6884_v31  ;;  %8887 = vmatpush3.bf16.msra.mxu0 %v6886_v33  ;;  %v7080_v19 = vpack.c.bf16 %v7075_v43, %v7074_v60  ;;  %v7076_v22 = vld [vmem:[%s10960_s2 + $0x370] sm:$0xff]  ;;  %v7148_v60 = vld [vmem:[%s10960_s2 + $0x398] sm:$0xff]  ;;  %v7149_v43 = vld [vmem:[%s10960_s2 + $0x3a0] sm:$0xff] }
0x3c2c   : > { %v6885_v1 = vpack.c.bf16 %v6735_v40, %v10641_v42  ;;  %v8867_v38 = vpop.f32.mrb[137].mxu0  ;;  %v7077_v40 = vld [vmem:[%s10960_s2 + $0x378] sm:$0xff] }
0x3c2d   : > { %v6738_v36 = vpop.f32.mrb[138].mxu0  ;;  %8892 = vmatprep.subr.bf16.mxu1 %v7080_v19 }
0x3c2e   : > { %v8868_v13 = vpop.f32.mrb[139].mxu0  ;;  %8893 = vmatpush3.bf16.msra.mxu1 %v7080_v19  ;;  %v7153_v19 = vpack.c.bf16 %v7149_v43, %v7148_v60 }
0x3c36   : > { %8889 = vmatmul.mubr.msk.bf16.vlgmr.msra.gmra.mrb[140].mxu0 %vm521_vm5, %v6885_v1  ;;  %v7081_v1 = vpack.c.bf16 %v7077_v40, %v7076_v22  ;;  %v8030_v22 = vld [vmem:[%s10960_s2 + $0x380] ss:$0 sm:$0xff] }
0x3c38   : > { %8894 = vmatprep.subr.bf16.mxu1 %v7081_v1 }
0x3c39   : > { %8895 = vmatpush3.bf16.msra.mxu1 %v7081_v1 }
0x3d09   : > { %v8890_v26 = vpop.f32.mrb[140].mxu0 }
0x3d0a   : > { %v7002_v17 = vadd.f32 %v8890_v26, %v10474_v7  ;;  %v6985_v44 = vpop.f32.mrb[141].mxu0 }
0x3d0b   : > { %v8891_v46 = vpop.f32.mrb[142].mxu0  ;;  %v7000_v10 = vadd.f32 %v6985_v44, %v10460_v51 }
0x3d0c   : > { %v6988_v4 = vpop.f32.mrb[143].mxu0  ;;  %v7012_v59 = vsel %vm354_vm2, %v7002_v17, 0.0  ;;  %v7003_v42 = vadd.f32 %v8891_v46, %v10476_v8 }
0x3d0d   : > { %7013 = vadd.xlane.f32.xlu1 %v7012_v59  ;;  %v7001_v5 = vadd.f32 %v6988_v4, %v10462_v39  ;;  %v7006_v31 = vsel %vm354_vm2, %v7000_v10, 0.0 }
0x3d0e   : > { %v7015_v7 = vsel %vm354_vm2, %v7003_v42, 0.0 }
0x3d0f   : > { %v7009_v20 = vsel %vm354_vm2, %v7001_v5, 0.0 }
0x3d11   : > { %7007 = vadd.xlane.f32.xlu1 %v7006_v31 }
0x3d15   : > { %7010 = vadd.xlane.f32.xlu1 %v7009_v20 }
0x3d19   : > { %7016 = vadd.xlane.f32.xlu1 %v7015_v7  ;;  %v8028_v7 = vld [vmem:[%s10960_s2 + $0x350] ss:$0 sm:$0xff] }
0x3d9a   : > { %v7014_v61 = vpop.xlane.xlu1 %7013 }
0x3d9b   : > { %v7020_v52 = vmul.f32 0.03125, %v7014_v61 }
0x3d9d   : > { %v7024_v41 = vsub.f32 %v7002_v17, %v7020_v52 }
0x3d9e   : > { %v7008_v51 = vpop.xlane.xlu1 %7007 }
0x3d9f   : > { %v7018_v62 = vmul.f32 0.03125, %v7008_v51  ;;  %v7028_v32 = vmul.f32 %v7024_v41, %v7024_v41 }
0x3da1   : > { %v7022_v18 = vsub.f32 %v7000_v10, %v7018_v62  ;;  %v7036_v37 = vsel %vm354_vm2, %v7028_v32, 0.0 }
0x3da2   : > { %v7011_v12 = vpop.xlane.xlu1 %7010 }
0x3da3   : > { %v7019_v28 = vmul.f32 0.03125, %v7011_v12  ;;  %v7026_v39 = vmul.f32 %v7022_v18, %v7022_v18 }
0x3da5   : > { %v7023_v55 = vsub.f32 %v7001_v5, %v7019_v28  ;;  %v7030_v34 = vsel %vm354_vm2, %v7026_v39, 0.0  ;;  %v8029_v28 = vld [vmem:[%s10960_s2 + $0x358] ss:$0 sm:$0xff] }
0x3da6   : > { %7031 = vadd.xlane.f32.xlu1 %v7030_v34  ;;  %v7017_v8 = vpop.xlane.xlu1 %7016 }
0x3da7   : > { %v7021_v57 = vmul.f32 0.03125, %v7017_v8  ;;  %v7027_v35 = vmul.f32 %v7023_v55, %v7023_v55 }
0x3da9   : > { %v7025_v11 = vsub.f32 %v7003_v42, %v7021_v57  ;;  %v7033_v30 = vsel %vm354_vm2, %v7027_v35, 0.0 }
0x3daa   : > { %7037 = vadd.xlane.f32.xlu1 %v7036_v37  ;;  %7034 = vadd.xlane.f32.xlu0 %v7033_v30 }
0x3dab   : > { %v7029_v33 = vmul.f32 %v7025_v11, %v7025_v11 }
0x3dad   : > { %v7039_v53 = vsel %vm354_vm2, %v7029_v33, 0.0 }
0x3dae   : > { %7040 = vadd.xlane.f32.xlu1 %v7039_v53 }
0x3e33   : > { %v7032_v38 = vpop.xlane.xlu1 %7031 }
0x3e34   : > { %v7042_v36 = vmul.f32 0.03125, %v7032_v38 }
0x3e36   : > { %v7046_v13 = vadd.f32 1e-05, %v7042_v36 }
0x3e37   : > { %v7035_v26 = vpop.xlane.xlu0 %7034  ;;  %v7038_v17 = vpop.xlane.xlu1 %7037 }
0x3e38   : > { %9195 = vrsqrt.f32 %v7046_v13  ;;  %v7043_v44 = vmul.f32 0.03125, %v7035_v26  ;;  %v7044_v46 = vmul.f32 0.03125, %v7038_v17 }
0x3e3a   : > { %v7047_v10 = vadd.f32 1e-05, %v7043_v44  ;;  %v7048_v4 = vadd.f32 1e-05, %v7044_v46 }
0x3e3b   : > { %v7041_v59 = vpop.xlane.xlu1 %7040 }
0x3e3c   : > { %9197 = vrsqrt.f32 %v7047_v10  ;;  %v7045_v5 = vmul.f32 0.03125, %v7041_v59 }
0x3e3d   : > { %9199 = vrsqrt.f32 %v7048_v4 }
0x3e3e   : > { %v7049_v31 = vadd.f32 1e-05, %v7045_v5 }
0x3e40   : > { %9201 = vrsqrt.f32 %v7049_v31 }
0x3e42   : > { %v9196_v42 = vpop.eup %9195 }
0x3e43   : > { %v7054_v20 = vmul.f32 %v9196_v42, %v7022_v18  ;;  %v8033_v42 = vld [vmem:[%s10960_s2 + $0x3a8] ss:$0 sm:$0xff] }
0x3e45   : > { %v7062_v62 = vmul.f32 %v8028_v7, %v7054_v20 }
0x3e46   : > { %v9198_v61 = vpop.eup %9197 }
0x3e47   : > { %v9200_v52 = vpop.eup %9199  ;;  %v7055_v51 = vmul.f32 %v9198_v61, %v7023_v55  ;;  %v7070_v57 = vadd.f32 %v8029_v28, %v7062_v62  ;;  %v7147_v55 = vld [vmem:[%s10960_s2 + $0x390] sm:$0xff] }
0x3e48   : > { %v7056_v12 = vmul.f32 %v9200_v52, %v7024_v41  ;;  %v7146_v41 = vld [vmem:[%s10960_s2 + $0x388] sm:$0xff] }
0x3e49   : > { %v7063_v39 = vmul.f32 %v8028_v7, %v7055_v51 }
0x3e4a   : > { %v9202_v34 = vpop.eup %9201  ;;  %v7064_v32 = vmul.f32 %v8028_v7, %v7056_v12 }
0x3e4b   : > { %v7057_v8 = vmul.f32 %v9202_v34, %v7025_v11  ;;  %v7071_v35 = vadd.f32 %v8029_v28, %v7063_v39  ;;  %v7152_v11 = vpack.c.bf16 %v7147_v55, %v7146_v41 }
0x3e4c   : > { %v7072_v30 = vadd.f32 %v8029_v28, %v7064_v32 }
0x3e4d   : > { %v7065_v18 = vmul.f32 %v8028_v7, %v7057_v8  ;;  %v7078_v37 = vpack.c.bf16 %v7071_v35, %v7070_v57  ;;  %8900 = vmatprep.subr.bf16.mxu1 %v7152_v11 }
0x3e4f   : > { %8896 = vmatprep.mubr.msk.bf16.mxu1 %vm354_vm2, %v7078_v37  ;;  %v7073_v33 = vadd.f32 %v8029_v28, %v7065_v18 }
0x3e51   : > { %v7079_v53 = vpack.c.bf16 %v7073_v33, %v7072_v30 }
0x3e53   : > { %8897 = vmatmul.mubr.msk.bf16.vlgmr.msra.gmra.mrb[156].mxu1 %vm354_vm2, %v7079_v53 }
0x3e54   : > { %8901 = vmatpush3.bf16.msra.mxu1 %v7152_v11 }
0x3e55   : > { %8902 = vmatprep.subr.bf16.mxu1 %v7153_v19 }
0x3e58   : > { %8903 = vmatpush3.bf16.msra.mxu1 %v7153_v19 }
0x3f26   : > { %v8898_v40 = vpop.f32.mrb[156].mxu1 }
0x3f27   : > { %v7136_v1 = vadd.f32 %v8898_v40, %v8030_v22  ;;  %v7127_v38 = vpop.f32.mrb[157].mxu1 }
0x3f28   : > { %v7128_v36 = vadd.f32 %v8030_v22, %v7127_v38  ;;  %v8899_v13 = vpop.f32.mrb[158].mxu1 }
0x3f29   : > { %v7139_v26 = vadd.f32 %v8899_v13, %v8030_v22  ;;  %v7130_v17 = vpop.f32.mrb[159].mxu1  ;;  %v7144_v46 = vmax.f32 %v7136_v1, 0.0 }
0x3f2a   : > { %v7131_v44 = vadd.f32 %v8030_v22, %v7130_v17  ;;  %v7142_v4 = vmax.f32 %v7128_v36, 0.0 }
0x3f2b   : > { %v7145_v10 = vmax.f32 %v7139_v26, 0.0 }
0x3f2c   : > { %v7143_v59 = vmax.f32 %v7131_v44, 0.0 }
0x3f2d   : > { %v7151_v5 = vpack.c.bf16 %v7145_v10, %v7144_v46 }
0x3f2e   : > { %v7150_v31 = vpack.c.bf16 %v7143_v59, %v7142_v4 }
0x3f30   : > { %8904 = vmatprep.mubr.msk.bf16.mxu1 %vm354_vm2, %v7150_v31 }
0x3f31   : > { %8905 = vmatmul.mubr.msk.bf16.vlgmr.msra.gmra.mrb[160].mxu1 %vm354_vm2, %v7151_v5 }
0x4004   : > { %v8906_v20 = vpop.f32.mrb[160].mxu1 }
0x4005   : > { %v7208_v7 = vadd.f32 %v8906_v20, %v8033_v42  ;;  %v7199_v61 = vpop.f32.mrb[161].mxu1 }
0x4006   : > { %v7200_v52 = vadd.f32 %v8033_v42, %v7199_v61  ;;  %v8907_v51 = vpop.f32.mrb[162].mxu1 }
0x4007   : > { %v7216_v62 = vadd.f32 %v7208_v7, %v7072_v30  ;;  %v7202_v12 = vpop.f32.mrb[163].mxu1  ;;  %v7211_v32 = vadd.f32 %v8907_v51, %v8033_v42 }
0x4008   : > { %v7214_v28 = vadd.f32 %v7200_v52, %v7070_v57  ;;  %v7203_v39 = vadd.f32 %v8033_v42, %v7202_v12 }
0x4009   : > { %v7226_v34 = vsel %vm354_vm2, %v7216_v62, 0.0  ;;  %v7217_v37 = vadd.f32 %v7211_v32, %v7073_v33 }
0x400a   : > { %7227 = vadd.xlane.f32.xlu1 %v7226_v34  ;;  %v7215_v8 = vadd.f32 %v7203_v39, %v7071_v35  ;;  %v7220_v18 = vsel %vm354_vm2, %v7214_v28, 0.0 }
0x400b   : > { %v7229_v41 = vsel %vm354_vm2, %v7217_v37, 0.0 }
0x400c   : > { %v7223_v53 = vsel %vm354_vm2, %v7215_v8, 0.0 }
0x400e   : > { %7221 = vadd.xlane.f32.xlu1 %v7220_v18 }
0x4012   : > { %7224 = vadd.xlane.f32.xlu1 %v7223_v53 }
0x4016   : > { %7230 = vadd.xlane.f32.xlu1 %v7229_v41 }
0x4097   : > { %v7228_v55 = vpop.xlane.xlu1 %7227 }
0x4098   : > { %v7234_v30 = vmul.f32 0.03125, %v7228_v55 }
0x409a   : > { %v10738_v11 = vsub.f32 %v7216_v62, %v7234_v30  ;;  %v8037_v30 = vld [vmem:[%s10960_s2 + $0x3b8] ss:$0 sm:$0xff] }
0x409b   : > { %v7222_v57 = vpop.xlane.xlu1 %7221 }
0x409c   : > { %v7232_v60 = vmul.f32 0.03125, %v7222_v57  ;;  %v7242_v43 = vmul.f32 %v10738_v11, %v10738_v11  ;;  %v7428_v57 = vadd.f32 %v10582_v50, %v10563_v49 }
0x409e   : > { %v10742_v35 = vsub.f32 %v7214_v28, %v7232_v60  ;;  %v7250_v19 = vsel %vm354_vm2, %v7242_v43, 0.0 }
0x409f   : > { %7251 = vadd.xlane.f32.xlu0 %v7250_v19  ;;  %v7225_v33 = vpop.xlane.xlu1 %7224 }
0x40a0   : > { %v7233_v22 = vmul.f32 0.03125, %v7225_v33  ;;  %v7240_v40 = vmul.f32 %v10742_v35, %v10742_v35  ;;  %v7427_v33 = vadd.f32 %v10538_v16, %v10522_v47 }
0x40a2   : > { %v7237_v1 = vsub.f32 %v7215_v8, %v7233_v22  ;;  %v7244_v38 = vsel %vm354_vm2, %v7240_v40, 0.0  ;;  %v8036_v8 = vld [vmem:[%s10960_s2 + $0x3b0] ss:$0 sm:$0xff]  ;;  %v7432_v40 = vmul.f32 0.5, %v7428_v57 }
0x40a3   : > { %7245 = vadd.xlane.f32.xlu1 %v7244_v38  ;;  %v7231_v36 = vpop.xlane.xlu1 %7230 }
0x40a4   : > { %v7235_v13 = vmul.f32 0.03125, %v7231_v36  ;;  %v7241_v26 = vmul.f32 %v7237_v1, %v7237_v1 }
0x40a6   : > { %v10748_v17 = vsub.f32 %v7217_v37, %v7235_v13  ;;  %v7247_v44 = vsel %vm354_vm2, %v7241_v26, 0.0 }
0x40a7   : > { %7248 = vadd.xlane.f32.xlu1 %v7247_v44 }
0x40a8   : > { %v7243_v46 = vmul.f32 %v10748_v17, %v10748_v17 }
0x40aa   : > { %v7253_v10 = vsel %vm354_vm2, %v7243_v46, 0.0  ;;  %v7429_v46 = vadd.f32 %v10613_v54, %v10617_v21 }
0x40ab   : > { %7254 = vadd.xlane.f32.xlu1 %v7253_v10 }
0x40b5   : > { %7669 = vrot.lane.b32.xlu0 %v9867_v56, %s9306_s4  ;;  %v7288_v56 = vld [vmem:[%s10960_s2 + $0x418] sm:$0xff] }
0x40b9   : > { %7673 = vrot.lane.b32.xlu0 %v9963_v6, %s9306_s4 }
0x40bc   : > { %7667 = vrot.lane.b32.xlu1 %v9826_v45, %s9306_s4  ;;  %v7289_v45 = vld [vmem:[%s10960_s2 + $0x420] sm:$0xff] }
0x40bd   : > { %7690 = vrot.lane.b32.xlu0 %v10563_v49, %s9307_s6  ;;  %v7294_v6 = vpack.c.bf16 %v7289_v45, %v7288_v56  ;;  %v7431_v49 = vmul.f32 0.5, %v7427_v33  ;;  %v7433_v56 = vmul.f32 0.5, %v7429_v46 }
0x40bf   : > { %8908 = vmatprep.subr.bf16.mxu0 %v7294_v6 }
0x40c0   : > { %7671 = vrot.lane.b32.xlu1 %v9921_v29, %s9306_s4  ;;  %8909 = vmatpush3.bf16.msra.mxu0 %v7294_v6  ;;  %v7290_v29 = vld [vmem:[%s10960_s2 + $0x428] sm:$0xff]  ;;  %s7766_s4 = sshll.u32 %s10094_s28, 4  ;;  %s10904_s4 = int_to_ptr.vmem [resolvable:$true] %s7766_s4 }
0x40c1   : > { %7694 = vrot.lane.b32.xlu0 %v10659_v2, %s9307_s6  ;;  %s9239_s11 = scalar_lea.vmem %s10904_s4, 512  ;;  %p9246_p0 = scmp.lt.s32.totalorder %s10904_s4, %s9244_s17 }
0x40c2   : > { %p9240_p11 = scmp.ne.s32.totalorder %s10904_s4, %s9239_s11  ;;  %p9247_p1 = scmp.lt.s32.totalorder %s9245_s19, %s9239_s11 }
0x40c4   : > { %7688 = vrot.lane.b32.xlu1 %v10522_v47, %s9307_s6  ;;  %v7438_v47 = vpack.c.bf16 %v7432_v40, %v7431_v49  ;;  %p9241_p12 = pnand %p9240_p11, %p9373_p5  ;;  %p9248_p2 = por %p9247_p1, %p9246_p0 }
0x40c5   : > { %7711 = vrot.lane.b32.xlu0 %v9886_v24, %s9308_s7  ;;  %v7291_v24 = vld [vmem:[%s10960_s2 + $0x430] sm:$0xff] }
0x40c6   : > { %v7295_v4 = vpack.c.bf16 %v7291_v24, %v7290_v29  ;;  %v8038_v24 = vld [vmem:[%s10960_s2 + $0x438] ss:$0 sm:$0xff]  ;;  %p9242_p13 = pneg %p9241_p12 }
0x40c8   : > { %7692 = vrot.lane.b32.xlu1 %v10617_v21, %s9307_s6  ;;  %8910 = vmatprep.subr.bf16.mxu0 %v7295_v4  ;;  %v7360_v21 = vld [vmem:[%s10960_s2 + $0x440] sm:$0xf]  ;;  %p9249_p3 = pnand %p9248_p2, %p9242_p13 }
0x40c9   : > { %7715 = vrot.lane.b32.xlu0 %v9959_v25, %s9308_s7  ;;  %8911 = vmatpush3.bf16.msra.mxu0 %v7295_v4  ;;  %v7437_v25 = vld [vmem:[%s10960_s2 + $0x458] sm:$0xff] }
0x40ca   : > { %v7440_v59 = vpack.c.bf16 %v7437_v25, %v7437_v25 }
0x40cc   : > { %7709 = vrot.lane.b32.xlu1 %v9842_v58, %s9308_s7  ;;  %8967 = vmatprep.subr.msk.bf16.mxu0 %vm615_vm4, %v7440_v59  ;;  %v7448_v26 = vsel %vm615_vm4, %v7440_v59, 0 }
0x40d0   : > { %7713 = vrot.lane.b32.xlu1 %v9917_v27, %s9308_s7 }
0x412c   : > { %v7252_v5 = vpop.xlane.xlu0 %7251 }
0x412d   : > { %v7258_v31 = vmul.f32 0.03125, %v7252_v5 }
0x412f   : > { %v7262_v7 = vadd.f32 1e-05, %v7258_v31 }
0x4130   : > { %v7246_v42 = vpop.xlane.xlu1 %7245 }
0x4131   : > { %v7256_v20 = vmul.f32 0.03125, %v7246_v42 }
0x4133   : > { %v7260_v61 = vadd.f32 1e-05, %v7256_v20 }
0x4134   : > { %v7249_v52 = vpop.xlane.xlu1 %7248 }
0x4135   : > { %9203 = vrsqrt.f32 %v7260_v61  ;;  %v7257_v58 = vmul.f32 0.03125, %v7249_v52 }
0x4136   : > { %9205 = vrsqrt.f32 %v7262_v7 }
0x4137   : > { %v7261_v51 = vadd.f32 1e-05, %v7257_v58 }
0x4138   : > { %v7255_v62 = vpop.xlane.xlu1 %7254 }
0x4139   : > { %9207 = vrsqrt.f32 %v7261_v51  ;;  %v7259_v27 = vmul.f32 0.03125, %v7255_v62  ;;  %v8048_v62 = vld [vmem:[%s10960_s2 + $0x460] ss:$0 sm:$0xff] }
0x413b   : > { %v7263_v12 = vadd.f32 1e-05, %v7259_v27 }
0x413d   : > { %9209 = vrsqrt.f32 %v7263_v12 }
0x413f   : > { %v9204_v28 = vpop.eup %9203 }
0x4140   : > { %v7268_v39 = vmul.f32 %v9204_v28, %v10742_v35  ;;  %v9206_v34 = vpop.eup %9205 }
0x4141   : > { %v7270_v18 = vmul.f32 %v9206_v34, %v10738_v11 }
0x4142   : > { %v7276_v53 = vmul.f32 %v8036_v8, %v7268_v39 }
0x4143   : > { %v9208_v32 = vpop.eup %9207  ;;  %v7278_v60 = vmul.f32 %v8036_v8, %v7270_v18 }
0x4144   : > { %v7269_v37 = vmul.f32 %v9208_v32, %v7237_v1  ;;  %v7284_v35 = vadd.f32 %v8037_v30, %v7276_v53  ;;  %v7435_v1 = vld [vmem:[%s10960_s2 + $0x450] sm:$0xf] }
0x4145   : > { %v7286_v38 = vadd.f32 %v8037_v30, %v7278_v60  ;;  %v7436_v44 = vpack.c.bf16 %v7435_v1, %v7435_v1 }
0x4146   : > { %v7277_v41 = vmul.f32 %v8036_v8, %v7269_v37 }
0x4147   : > { %v9210_v55 = vpop.eup %9209  ;;  %v7500_v6 = vsel %vm222_vm0, %v7436_v44, 0 }
0x4148   : > { %v7271_v43 = vmul.f32 %v9210_v55, %v10748_v17  ;;  %v7285_v19 = vadd.f32 %v8037_v30, %v7277_v41  ;;  %v7430_v17 = vadd.f32 %v10655_v23, %v10659_v2  ;;  %v7363_v2 = vpack.c.bf16 %v7360_v21, %v7360_v21 }
0x414a   : > { %v7279_v11 = vmul.f32 %v8036_v8, %v7271_v43  ;;  %v7292_v22 = vpack.c.bf16 %v7285_v19, %v7284_v35  ;;  %v7434_v10 = vmul.f32 0.5, %v7430_v17  ;;  %8966 = vmatprep.subr.msk.bf16.mxu1 %vm222_vm0, %v7363_v2  ;;  %v7376_v29 = vsel %vm222_vm0, %v7363_v2, 0  ;;  %v8041_v17 = vld [vmem:[%s10960_s2 + $0x448] ss:$0 sm:$0xff] }
0x414b   : > { %8917 = vmatpush3.bf16.msra.mxu1 %v7376_v29 }
0x414c   : > { %8912 = vmatprep.mubr.msk.bf16.mxu0 %vm354_vm2, %v7292_v22  ;;  %v7287_v36 = vadd.f32 %v8037_v30, %v7279_v11  ;;  %v7439_v45 = vpack.c.bf16 %v7434_v10, %v7433_v56 }
0x414e   : > { %v7293_v13 = vpack.c.bf16 %v7287_v36, %v7286_v38 }
0x4150   : > { %8913 = vmatmul.mubr.msk.bf16.vlgmr.msra.gmra.mrb[144].mxu0 %vm354_vm2, %v7293_v13 }
0x4151   : > { %8924 = vmatprep.mubr.msk.bf16.mxu0 %vm598_vm6, %v7438_v47  ;;  %8923 = vmatpush3.bf16.msra.mxu0 %v7448_v26 }
0x4152   : > { %8968 = vmatprep.subr.msk.bf16.mxu0 %vm222_vm0, %v7436_v44 }
0x4158   : > { %8925 = vmatmul.mubr.msk.bf16.vlgmr.msra.gmra.mrb[148].mxu0 %vm598_vm6, %v7439_v45 }
0x4159   : > { %8929 = vmatpush3.bf16.msra.mxu0 %v7500_v6  ;;  %8930 = vmatprep.mubr.msk.bf16.mxu0 %vm215_vm1, %v9407_v9 }
0x4164   : > { %8931 = vmatmul.mubr.msk.bf16.vlgmr.msra.gmra.mrb[148].mxu0 %vm215_vm1, %v9412_v14 }
0x4223   : > { %v8914_v4 = vpop.f32.mrb[144].mxu0 }
0x4224   : > { %v7350_v25 = vadd.f32 %v8914_v4, %v8038_v24  ;;  %v7341_v9 = vpop.f32.mrb[145].mxu0 }
0x4225   : > { %v7342_v59 = vadd.f32 %v8038_v24, %v7341_v9  ;;  %v8915_v5 = vpop.f32.mrb[146].mxu0 }
0x4226   : > { %v7353_v14 = vadd.f32 %v8915_v5, %v8038_v24  ;;  %v7344_v31 = vpop.f32.mrb[147].mxu0  ;;  %v7358_v20 = vmax.f32 %v7350_v25, 0.0 }
0x4227   : > { %v7345_v42 = vadd.f32 %v8038_v24, %v7344_v31  ;;  %v7356_v61 = vmax.f32 %v7342_v59, 0.0 }
0x4228   : > { %v7359_v7 = vmax.f32 %v7353_v14, 0.0 }
0x4229   : > { %v7357_v52 = vmax.f32 %v7345_v42, 0.0 }
0x422a   : > { %v7362_v58 = vpack.c.bf16 %v7359_v7, %v7358_v20 }
0x422b   : > { %v7361_v51 = vpack.c.bf16 %v7357_v52, %v7356_v61 }
0x422d   : > { %8918 = vmatprep.mubr.msk.bf16.mxu1 %vm215_vm1, %v7361_v51 }
0x422e   : > { %8919 = vmatmul.mubr.msk.bf16.vlgmr.msra.gmra.mrb[164].mxu1 %vm215_vm1, %v7362_v58 }
0x4237   : > { %v8932_v27 = vpop.f32.mrb[148].mxu0 }
0x4238   : > { %v7558_v12 = vadd.f32 %v8932_v27, %v8048_v62  ;;  %v7536_v28 = vpop.f32.mrb[149].mxu0 }
0x4239   : > { %v7556_v39 = vadd.f32 %v8048_v62, %v7536_v28  ;;  %v8933_v34 = vpop.f32.mrb[150].mxu0 }
0x423a   : > { %v7562_v32 = vsub.f32 0.0, %v7558_v12  ;;  %v7559_v8 = vadd.f32 %v8933_v34, %v8048_v62  ;;  %v7539_v18 = vpop.f32.mrb[151].mxu0 }
0x423b   : > { %v7560_v37 = vsub.f32 0.0, %v7556_v39  ;;  %v7557_v53 = vadd.f32 %v8048_v62, %v7539_v18 }
0x423c   : > { %v7568_v41 = vmul.f32 1.442695, %v7562_v32  ;;  %v7563_v55 = vsub.f32 0.0, %v7559_v8 }
0x423d   : > { %v7564_v30 = vmul.f32 1.442695, %v7560_v37  ;;  %v7561_v57 = vsub.f32 0.0, %v7557_v53 }
0x423e   : > { %9211 = vpow2.f32 %v7568_v41  ;;  %v7570_v60 = vmul.f32 1.442695, %v7563_v55 }
0x423f   : > { %9213 = vpow2.f32 %v7564_v30  ;;  %v7566_v43 = vmul.f32 1.442695, %v7561_v57 }
0x4240   : > { %9215 = vpow2.f32 %v7570_v60 }
0x4241   : > { %9217 = vpow2.f32 %v7566_v43 }
0x4248   : > { %v9212_v35 = vpop.eup %9211 }
0x4249   : > { %v9214_v19 = vpop.eup %9213  ;;  %v7574_v33 = vadd.f32 1.0, %v9212_v35 }
0x424a   : > { %v9216_v11 = vpop.eup %9215  ;;  %v7572_v40 = vadd.f32 1.0, %v9214_v19 }
0x424b   : > { %v9218_v22 = vpop.eup %9217  ;;  %9219 = vrcp.f32 %v7574_v33  ;;  %v7575_v1 = vadd.f32 1.0, %v9216_v11 }
0x424c   : > { %v7573_v38 = vadd.f32 1.0, %v9218_v22 }
0x424d   : > { %9221 = vrcp.f32 %v7575_v1 }
0x424e   : > { %9223 = vrcp.f32 %v7572_v40 }
0x424f   : > { %9225 = vrcp.f32 %v7573_v38 }
0x4255   : > { %v9220_v36 = vpop.eup %9219 }
0x4256   : > { %7650 = vrot.lane.b32.xlu1 %v9220_v36, %s9309_s25  ;;  %v7582_v46 = vsub.f32 1.0, %v9220_v36  ;;  %v7590_v2 = vmul.f32 %v9220_v36, %v10087_v48 }
0x4257   : > { %v9222_v49 = vpop.eup %9221 }
0x4258   : > { %7652 = vrot.lane.b32.xlu0 %v9222_v49, %s9309_s25  ;;  %v9224_v13 = vpop.eup %9223  ;;  %v7583_v24 = vsub.f32 1.0, %v9222_v49  ;;  %v7591_v42 = vmul.f32 %v9222_v49, %v10099_v15  ;;  %v7670_v15 = vpop.permute.xlu0 %7669 }
0x4259   : > { %v9226_v26 = vpop.eup %9225  ;;  %v7580_v45 = vsub.f32 1.0, %v9224_v13  ;;  %v7588_v9 = vmul.f32 %v9224_v13, %v10091_v3  ;;  %v7668_v3 = vpop.permute.xlu1 %7667 }
0x425a   : > { %7646 = vrot.lane.b32.xlu1 %v9224_v13, %s9309_s25  ;;  %v7581_v5 = vsub.f32 1.0, %v9226_v26  ;;  %v7589_v61 = vmul.f32 %v9226_v26, %v10108_v0 }
0x425c   : > { %7648 = vrot.lane.b32.xlu0 %v9226_v26, %s9309_s25  ;;  %v7674_v58 = vpop.permute.xlu0 %7673 }
0x425d   : > { %v7672_v0 = vpop.permute.xlu1 %7671 }
0x4260   : > { %v7691_v62 = vpop.permute.xlu0 %7690 }
0x4261   : > { %v7689_v51 = vpop.permute.xlu1 %7688 }
0x4264   : > { %v7695_v12 = vpop.permute.xlu0 %7694 }
0x4265   : > { %v7693_v27 = vpop.permute.xlu1 %7692 }
0x4269   : > { %v7710_v28 = vpop.permute.xlu1 %7709 }
0x426d   : > { %v7714_v39 = vpop.permute.xlu1 %7713 }
0x42c8   : > { %v7651_v34 = vpop.permute.xlu1 %7650 }
0x4301   : > { %v8920_v44 = vpop.f32.mrb[164].mxu1 }
0x4302   : > { %v7421_v47 = vadd.f32 %v8920_v44, %v8041_v17  ;;  %v7412_v10 = vpop.f32.mrb[165].mxu1 }
0x4303   : > { %v7413_v56 = vadd.f32 %v8041_v17, %v7412_v10  ;;  %v8921_v6 = vpop.f32.mrb[166].mxu1 }
0x4304   : > { %v7586_v21 = vmul.f32 %v7582_v46, %v7421_v47  ;;  %v7424_v29 = vadd.f32 %v8921_v6, %v8041_v17  ;;  %7608 = vrot.lane.b32.xlu1 %v7421_v47, %s9310_s5  ;;  %v7415_v4 = vpop.f32.mrb[167].mxu1 }
0x4305   : > { %v7584_v25 = vmul.f32 %v7580_v45, %v7413_v56  ;;  %v7416_v59 = vadd.f32 %v8041_v17, %v7415_v4  ;;  %7604 = vrot.lane.b32.xlu0 %v7413_v56, %s9310_s5 }
0x4306   : > { %v7594_v14 = vadd.f32 %v7590_v2, %v7586_v21  ;;  %v7587_v31 = vmul.f32 %v7583_v24, %v7424_v29 }
0x4307   : > { %v7592_v20 = vadd.f32 %v7588_v9, %v7584_v25  ;;  %v7585_v7 = vmul.f32 %v7581_v5, %v7416_v59 }
0x4308   : > { %v7595_v48 = vadd.f32 %v7591_v42, %v7587_v31  ;;  %7606 = vrot.lane.b32.xlu1 %v7416_v59, %s9310_s5 }
0x4309   : > { %v7593_v52 = vadd.f32 %v7589_v61, %v7585_v7  ;;  %7610 = vrot.lane.b32.xlu0 %v7424_v29, %s9310_s5 }
0x430c   : > { %7629 = vrot.lane.b32.xlu1 %v7594_v14, %s9311_s8 }
0x430d   : > { %7631 = vrot.lane.b32.xlu0 %v7595_v48, %s9311_s8 }
0x4310   : > { %7625 = vrot.lane.b32.xlu1 %v7592_v20, %s9311_s8 }
0x4311   : > { %7627 = vrot.lane.b32.xlu0 %v7593_v52, %s9311_s8 }
0x4314   : > { %7730 = vrot.lane.b32.xlu1 %v10538_v16, %s9312_s29  ;;  %v7712_v16 = vpop.permute.xlu0 %7711 }
0x4315   : > { %7732 = vrot.lane.b32.xlu0 %v10582_v50, %s9312_s29 }
0x4318   : > { %7734 = vrot.lane.b32.xlu1 %v10613_v54, %s9312_s29  ;;  %v7716_v50 = vpop.permute.xlu0 %7715 }
0x4319   : > { %7736 = vrot.lane.b32.xlu0 %v10655_v23, %s9312_s29  ;;  %v7647_v23 = vpop.permute.xlu1 %7646 }
0x431c   : > { %v7653_v54 = vpop.permute.xlu0 %7652 }
0x4320   : > { %v7649_v32 = vpop.permute.xlu0 %7648 }
0x4376   : > { %v7609_v8 = vpop.permute.xlu1 %7608 }
0x4377   : > { %7619 = vst.msk [vmem:[%s10094_s28 + $0x10] sm:$0xff] %vm7616_vm7, %v7609_v8  ;;  %v7605_v18 = vpop.permute.xlu0 %7604 }
0x4378   : > { %7617 = vst.msk [vmem:[%s10094_s28] sm:$0xff] %vm7616_vm7, %v7605_v18 }
0x437a   : > { %v7607_v37 = vpop.permute.xlu1 %7606 }
0x437b   : > { %7618 = vst.msk [vmem:[%s10094_s28 + $0x8] sm:$0xff] %vm7616_vm7, %v7607_v37  ;;  %v7611_v53 = vpop.permute.xlu0 %7610 }
0x437c   : > { %7620 = vst.msk [vmem:[%s10094_s28 + $0x18] sm:$0xff] %vm7616_vm7, %v7611_v53 }
0x437e   : > { %v7630_v41 = vpop.permute.xlu1 %7629 }
0x437f   : > { %7640 = vst.msk [vmem:[%s10094_s28 + $0x10] sm:$0xff] %vm7637_vm8, %v7630_v41  ;;  %v7632_v55 = vpop.permute.xlu0 %7631 }
0x4380   : > { %7661 = vst.msk [vmem:[%s10094_s28 + $0x10] sm:$0xff] %vm7658_vm9, %v7651_v34 }
0x4381   : > { %7641 = vst.msk [vmem:[%s10094_s28 + $0x18] sm:$0xff] %vm7637_vm8, %v7632_v55 }
0x4382   : > { %7682 = vst.msk [vmem:[%s10094_s28 + $0x10] sm:$0xff] %vm7679_vm10, %v7672_v0  ;;  %v7626_v30 = vpop.permute.xlu1 %7625 }
0x4383   : > { %7662 = vst.msk [vmem:[%s10094_s28 + $0x18] sm:$0xff] %vm7658_vm9, %v7653_v54  ;;  %v7628_v57 = vpop.permute.xlu0 %7627 }
0x4384   : > { %7683 = vst.msk [vmem:[%s10094_s28 + $0x18] sm:$0xff] %vm7679_vm10, %v7674_v58 }
0x4385   : > { %7703 = vst.msk [vmem:[%s10094_s28 + $0x10] sm:$0xff] %vm7700_vm11, %v7693_v27  ;;  %7704 = vst.msk [vmem:[%s10094_s28 + $0x18] sm:$0xff] %vm7700_vm11, %v7695_v12 }
0x4386   : > { %7638 = vst.msk [vmem:[%s10094_s28] sm:$0xff] %vm7637_vm8, %v7626_v30  ;;  %7639 = vst.msk [vmem:[%s10094_s28 + $0x8] sm:$0xff] %vm7637_vm8, %v7628_v57  ;;  %v7731_v60 = vpop.permute.xlu1 %7730 }
0x4387   : > { %7724 = vst.msk [vmem:[%s10094_s28 + $0x10] sm:$0xff] %vm7721_vm12, %v7714_v39  ;;  %7725 = vst.msk [vmem:[%s10094_s28 + $0x18] sm:$0xff] %vm7721_vm12, %v7716_v50  ;;  %v7733_v43 = vpop.permute.xlu0 %7732 }
0x4388   : > { %7659 = vst.msk [vmem:[%s10094_s28] sm:$0xff] %vm7658_vm9, %v7647_v23  ;;  %7660 = vst.msk [vmem:[%s10094_s28 + $0x8] sm:$0xff] %vm7658_vm9, %v7649_v32 }
0x4389   : > { %7680 = vst.msk [vmem:[%s10094_s28] sm:$0xff] %vm7679_vm10, %v7668_v3  ;;  %7681 = vst.msk [vmem:[%s10094_s28 + $0x8] sm:$0xff] %vm7679_vm10, %v7670_v15 }
0x438a   : > { %7701 = vst.msk [vmem:[%s10094_s28] sm:$0xff] %vm7700_vm11, %v7689_v51  ;;  %7702 = vst.msk [vmem:[%s10094_s28 + $0x8] sm:$0xff] %vm7700_vm11, %v7691_v62  ;;  %v7735_v35 = vpop.permute.xlu1 %7734 }
0x438b   : > { %7722 = vst.msk [vmem:[%s10094_s28] sm:$0xff] %vm7721_vm12, %v7710_v28  ;;  %7723 = vst.msk [vmem:[%s10094_s28 + $0x8] sm:$0xff] %vm7721_vm12, %v7712_v16  ;;  %v7737_v19 = vpop.permute.xlu0 %7736 }
0x438c   : > { %7743 = vst.msk [vmem:[%s10094_s28] sm:$0xff] %vm7742_vm13, %v7731_v60  ;;  %7744 = vst.msk [vmem:[%s10094_s28 + $0x8] sm:$0xff] %vm7742_vm13, %v7733_v43 }
0x438d   : > { %7748 = vst.msk [vmem:[%s10094_s28] sm:$0xff] %vm7747_vm14, %v9303_v63  ;;  %7749 = vst.msk [vmem:[%s10094_s28 + $0x8] sm:$0xff] %vm7747_vm14, %v9303_v63 }
0x438e   : > { %7745 = vst.msk [vmem:[%s10094_s28 + $0x10] sm:$0xff] %vm7742_vm13, %v7735_v35  ;;  %7746 = vst.msk [vmem:[%s10094_s28 + $0x18] sm:$0xff] %vm7742_vm13, %v7737_v19 }
0x438f   : > { %7750 = vst.msk [vmem:[%s10094_s28 + $0x10] sm:$0xff] %vm7747_vm14, %v9303_v63  ;;  %7751 = vst.msk [vmem:[%s10094_s28 + $0x18] sm:$0xff] %vm7747_vm14, %v9303_v63 }
0x4390   : > { %9252 = shalt.err (!%p9249_p3)
}
0x4391   : > { %s9253_s24 = scalar_lea.hbm %s10900_s9, 512  ;;  %s9257_s25 = scalar_lea.hbm %s10961_s3, 1024 }
0x4392   : > { %p9254_p4 = scmp.ne.s32.totalorder %s10900_s9, %s9253_s24  ;;  %p9258_p9 = scmp.lt.u32.totalorder %s10900_s9, %s10961_s3 }
0x4393   : > { %p9259_p10 = scmp.lt.u32.totalorder %s9257_s25, %s9253_s24  ;;  %p9261_p12 = scmp.lt.u32.totalorder %s9253_s24, %s10900_s9 }
0x4394   : > { %p9255_p7 = pnand %p9254_p4, %p9373_p5 }
0x4395   : > { %p9260_p11 = por %p9259_p10, %p9258_p9 }
0x4396   : > { %p9256_p8 = pneg %p9255_p7 }
0x4397   : > { %p9262_p13 = por %p9261_p12, %p9260_p11 }
0x4399   : > { %p9263_p0 = pnand %p9262_p13, %p9256_p8 }
0x439b   : > { %9266 = shalt.err (!%p9263_p0)
}
0x439c   : > { %s9314_s5 = smov 128  }
0x439d   : > { %8969 = dma.vmem_to_hbm [thread:$0]  (%p9373_p5), %s10904_s4, 512, %s10900_s9, %s10916_s16, %s9314_s5, %s9314_s5, %s9311_s8  }
0x439e PF: > { %p8975_p1 = scmp.ge.s32.totalorder %s9301_s15, 2  ;;  %s7781_s29 = sand.u32 1, %s9289_s12  }
0x439f   : > { %s7782_s30 = scalar_lea.sflag [#allocation3], %s7781_s29 }
0x43a0   : > { %p8972_p2 = pnand %p8975_p1, %p9377_p6 }
0x43a2   : > { %9284 = dma.done.wait (!%p8972_p2), %s7782_s30, 512  }
0x43a3   : > { %9286 = vsyncadd (!%p8972_p2), %s7782_s30, 4294966784  ;;  %p13_p3 = scmp.ge.s32.totalorder %s9360_s18, 4   ;;  %s10964_s12 = smov %s9293_s13 }
0x43a4   : > { %s10965_s13 = smov %s9297_s14  ;;  %s10966_s14 = smov %s9371_s21 }
0x43a5   : > { %s10967_s15 = smov %s9360_s18  ;;  %15 = sbr.rel (!%p13_p3) target bundleno = 3 (0x3), region = 70 }
0x43ac   :  { %7787 = vsyncpa [#allocation3], 1 }
0x43ad   :  { %7789 = vsyncpa [#allocation3 + $0x1], 1 }

</bundles_post_ra>
